<compile_context>
chip_gen: v7x
topology: tpu7x:2x2x1
jax: 0.10.0
libtpu: 0.0.40
codegen_flags: <defaults>
</compile_context>

<pallas_src>
import functools

import jax
import jax.numpy as jnp
from jax.experimental import pallas as pl
from jax.experimental.pallas import tpu as pltpu

_VMEM_LIMIT = 32 * 1024 * 1024  # conservative: fits v7x's 64 MiB/TC with headroom


# ----------------------------------------------------------------------------
# Pallas kernels
# ----------------------------------------------------------------------------
def _gn_silu_kernel(x_ref, gamma_ref, beta_ref, avg_ref, o_ref, *, eps, group_size):
    """Fused GroupNorm + SiLU for one batch image.

    x_ref:     (1, H*W, C)  activation slab (channels on lanes)
    gamma_ref: (1, C)       GroupNorm scale   (resident across the grid)
    beta_ref:  (1, C)       GroupNorm shift
    avg_ref:   (C, C)       0/1 group-membership matrix A[c,c'] = 1 iff same group
    o_ref:     (1, H*W, C)
    """
    x = x_ref[0].astype(jnp.float32)                      # (HW, C)
    n = jnp.float32(x.shape[0] * group_size)              # elements per group

    # One-pass statistics: per-channel sum / sum-of-squares (sublane reduction),
    # then one tiny dot with the membership matrix both sums within each group
    # and broadcasts the group value back to every channel of that group.
    s = jnp.sum(x, axis=0, keepdims=True)                 # (1, C)
    ss = jnp.sum(x * x, axis=0, keepdims=True)            # (1, C)
    a = avg_ref[...]                                      # (C, C)
    mean_c = jnp.dot(s, a, preferred_element_type=jnp.float32) / n
    ex2_c = jnp.dot(ss, a, preferred_element_type=jnp.float32) / n
    var_c = jnp.maximum(ex2_c - mean_c * mean_c, 0.0)     # biased var, clamp >= 0
    inv_c = jax.lax.rsqrt(var_c + eps)

    # Fold gamma / beta / mean / inv into a per-channel FMA: y = x*scale + shift.
    scale = inv_c * gamma_ref[...].astype(jnp.float32)    # (1, C)
    shift = beta_ref[...].astype(jnp.float32) - mean_c * scale
    y = x * scale + shift
    o_ref[0] = (y * jax.nn.sigmoid(y)).astype(o_ref.dtype)  # SiLU (sigmoid on EUP)


def _conv_tap_kernel(*refs, kw, has_residual):
    """One (batch, output-row, kh-tap) GEMM step of a stride-1 conv.

    Grid = (B, H_out, kh); last axis (kh row taps) is the reduction axis.
      a_ref: (1, 1, Wp, C)   one padded input row, shifted by the tap (index_map)
      w_ref: (1, kw, C, O)   weights of this row tap, split per column tap
      b_ref: (1, O)          bias
      r_ref: (1, 1, Wo, O)   [optional] residual fused into the epilogue
      o_ref: (1, 1, Wo, O)
      acc  : (Wo, O) f32 VMEM scratch accumulator
    """
    if has_residual:
        a_ref, w_ref, b_ref, r_ref, o_ref, acc_ref = refs
    else:
        a_ref, w_ref, b_ref, o_ref, acc_ref = refs
        r_ref = None

    d = pl.program_id(2)

    @pl.when(d == 0)
    def _():
        acc_ref[...] = jnp.zeros_like(acc_ref)

    wo = acc_ref.shape[0]
    row = a_ref[0, 0].astype(jnp.bfloat16)                # (Wp, C) bf16 MXU operand
    w = w_ref[0].astype(jnp.bfloat16)                     # (kw, C, O)

    # Static unroll over the kw column taps: each tap is a sublane-shifted view of
    # the same row (no im2col / no lane-axis concat), each its own MXU dot; f32 acc.
    acc = acc_ref[...]
    for j in range(kw):
        acc = acc + jnp.dot(row[j:j + wo, :], w[j],
                            preferred_element_type=jnp.float32)
    acc_ref[...] = acc

    @pl.when(d == pl.num_programs(2) - 1)
    def _():
        y = acc_ref[...] + b_ref[...].astype(jnp.float32)
        if has_residual:
            y = y + r_ref[0, 0].astype(jnp.float32)
        o_ref[0, 0] = y.astype(o_ref.dtype)


# ----------------------------------------------------------------------------
# Wrappers
# ----------------------------------------------------------------------------
def group_norm_silu(x_nhwc, gamma, beta, num_groups, eps=1e-5):
    B, H, W, C = x_nhwc.shape
    G = num_groups
    assert C % G == 0
    Cg = C // G
    HW = H * W

    xr = x_nhwc.reshape(B, HW, C)  # adjacent-dim merge: no HBM copy
    gids = jnp.arange(C, dtype=jnp.int32) // Cg
    avg = (gids[:, None] == gids[None, :]).astype(jnp.float32)  # (C, C)

    out = pl.pallas_call(
        functools.partial(_gn_silu_kernel, eps=eps, group_size=Cg),
        out_shape=jax.ShapeDtypeStruct((B, HW, C), x_nhwc.dtype),
        grid=(B,),
        in_specs=[
            pl.BlockSpec((1, HW, C), lambda b: (b, 0, 0)),
            pl.BlockSpec((1, C), lambda b: (0, 0)),   # constant block -> stays resident
            pl.BlockSpec((1, C), lambda b: (0, 0)),
            pl.BlockSpec((C, C), lambda b: (0, 0)),
        ],
        out_specs=pl.BlockSpec((1, HW, C), lambda b: (b, 0, 0)),
        compiler_params=pltpu.CompilerParams(
            dimension_semantics=("parallel",),
            vmem_limit_bytes=_VMEM_LIMIT),
        cost_estimate=pl.CostEstimate(
            flops=10 * B * HW * C,
            transcendentals=B * HW * C,
            bytes_accessed=2 * B * HW * C * 4),
    )(xr, gamma.reshape(1, C), beta.reshape(1, C), avg)
    return out.reshape(B, H, W, C)


def conv2d(x_nhwc, w_oihw, bias, padding, residual=None):
    """Stride-1 Conv2d (PyTorch semantics), optional fused residual add."""
    B, H, W, C = x_nhwc.shape
    O, Ci, kh, kw = w_oihw.shape
    assert Ci == C
    P = padding
    # Cast to bf16 fused into the pad copy (same rounding point as the in-kernel
    # cast it replaces; halves the per-tap HBM read).
    if P:
        xp = jnp.pad(x_nhwc, ((0, 0), (P, P), (P, P), (0, 0))).astype(jnp.bfloat16)
    elif kh > 1 or kw > 1:
        xp = x_nhwc.astype(jnp.bfloat16)
    else:
        xp = x_nhwc  # 1x1 / no-pad: single read, cast inside the kernel
    Hp, Wp = H + 2 * P, W + 2 * P
    Ho, Wo = Hp - kh + 1, Wp - kw + 1

    # OIHW -> (kh, kw, C, O), bf16, laid out once per call (tiny).
    wk = jnp.transpose(w_oihw, (2, 3, 1, 0)).astype(jnp.bfloat16)

    in_specs = [
        pl.BlockSpec((1, 1, Wp, C), lambda b, h, d: (b, h + d, 0, 0)),
        pl.BlockSpec((1, kw, C, O), lambda b, h, d: (d, 0, 0, 0)),
        pl.BlockSpec((1, O), lambda b, h, d: (0, 0)),
    ]
    args = [xp, wk, bias.reshape(1, O)]
    if residual is not None:
        in_specs.append(pl.BlockSpec((1, 1, Wo, O), lambda b, h, d: (b, h, 0, 0)))
        args.append(residual)

    flops = 2 * B * Ho * kh * kw * Wo * C * O
    bytes_accessed = int(
        B * Ho * kh * Wp * C * xp.dtype.itemsize       # input row re-reads (one per tap)
        + kh * kw * C * O * 2                          # weights (bf16)
        + B * Ho * Wo * O * 4                          # output write
        + (residual.size * residual.dtype.itemsize if residual is not None else 0))

    return pl.pallas_call(
        functools.partial(_conv_tap_kernel, kw=kw, has_residual=residual is not None),
        out_shape=jax.ShapeDtypeStruct((B, Ho, Wo, O), x_nhwc.dtype),
        grid=(B, Ho, kh),
        in_specs=in_specs,
        out_specs=pl.BlockSpec((1, 1, Wo, O), lambda b, h, d: (b, h, 0, 0)),
        scratch_shapes=[pltpu.VMEM((Wo, O), jnp.float32)],
        compiler_params=pltpu.CompilerParams(
            dimension_semantics=("parallel", "parallel", "arbitrary"),
            vmem_limit_bytes=_VMEM_LIMIT),
        cost_estimate=pl.CostEstimate(
            flops=flops, transcendentals=0, bytes_accessed=bytes_accessed),
    )(*args)


# ----------------------------------------------------------------------------
# Module: parameters + forward (Upsample = NN-upsample x2, conv3x3, RB, RB)
# ----------------------------------------------------------------------------
def _conv_params(key, out_ch, in_ch, k):
    kw_, kb_ = jax.random.split(key)
    w = jax.random.normal(kw_, (out_ch, in_ch, k, k), jnp.float32) * 0.1
    b = jax.random.normal(kb_, (out_ch,), jnp.float32) * 0.01
    return {"w": w, "b": b}


def _gsc_params(key, in_ch, out_ch, k):
    kg, kb, kc = jax.random.split(key, 3)
    return {
        "gn_gamma": 1.0 + 0.1 * jax.random.normal(kg, (in_ch,), jnp.float32),
        "gn_beta": 0.1 * jax.random.normal(kb, (in_ch,), jnp.float32),
        "conv": _conv_params(kc, out_ch, in_ch, k),
    }


def _resblock_params(key, in_ch, out_ch):
    k1, k2, k3 = jax.random.split(key, 3)
    p = {"gsc1": _gsc_params(k1, in_ch, out_ch, 3),
         "gsc2": _gsc_params(k2, out_ch, out_ch, 3)}
    if in_ch != out_ch:
        p["res"] = _conv_params(k3, out_ch, in_ch, 1)
    return p


def make_upsample_params(key, in_ch, out_ch):
    k0, k1, k2 = jax.random.split(key, 3)
    return {"conv0": _conv_params(k0, in_ch, in_ch, 3),
            "rb1": _resblock_params(k1, in_ch, out_ch),
            "rb2": _resblock_params(k2, out_ch, out_ch)}


def gsc_forward(p, x_nhwc, num_groups, padding, residual=None):
    h = group_norm_silu(x_nhwc, p["gn_gamma"], p["gn_beta"], num_groups)
    return conv2d(h, p["conv"]["w"], p["conv"]["b"], padding, residual=residual)


def resblock_forward(p, x_nhwc, num_groups):
    if "res" in p:
        r = conv2d(x_nhwc, p["res"]["w"], p["res"]["b"], padding=0)  # 1x1 conv
    else:
        r = x_nhwc
    h = gsc_forward(p["gsc1"], x_nhwc, num_groups, padding=1)
    # residual add fused into the last conv's epilogue
    return gsc_forward(p["gsc2"], h, num_groups, padding=1, residual=r)


def upsample_forward(params, x_nchw, num_groups):
    x = jnp.transpose(x_nchw, (0, 2, 3, 1))               # NCHW -> NHWC
    x = jnp.repeat(jnp.repeat(x, 2, axis=1), 2, axis=2)   # nearest-neighbor x2 (glue)
    x = conv2d(x, params["conv0"]["w"], params["conv0"]["b"], padding=1)
    x = resblock_forward(params["rb1"], x, num_groups)
    x = resblock_forward(params["rb2"], x, num_groups)
    return jnp.transpose(x, (0, 3, 1, 2))                 # back to NCHW


# ----------------------------------------------------------------------------
# Pure-JAX (XLA) reference for correctness checking
# ----------------------------------------------------------------------------
def _conv_ref(x_nhwc, w_oihw, b, padding):
    out = jax.lax.conv_general_dilated(
        x_nhwc, w_oihw, window_strides=(1, 1),
        padding=[(padding, padding), (padding, padding)],
        dimension_numbers=("NHWC", "OIHW", "NHWC"))
    return out + b.reshape(1, 1, 1, -1)


def _gn_silu_ref(x_nhwc, gamma, beta, num_groups, eps=1e-5):
    B, H, W, C = x_nhwc.shape
    xg = x_nhwc.reshape(B, H * W, num_groups, C // num_groups)
    mean = xg.mean(axis=(1, 3), keepdims=True)
    var = xg.var(axis=(1, 3), keepdims=True)
    xn = ((xg - mean) * jax.lax.rsqrt(var + eps)).reshape(B, H, W, C)
    y = xn * gamma.reshape(1, 1, 1, C) + beta.reshape(1, 1, 1, C)
    return y * jax.nn.sigmoid(y)


def upsample_forward_ref(params, x_nchw, num_groups):
    x = jnp.transpose(x_nchw, (0, 2, 3, 1))
    x = jnp.repeat(jnp.repeat(x, 2, axis=1), 2, axis=2)
    x = _conv_ref(x, params["conv0"]["w"], params["conv0"]["b"], 1)
    for name in ("rb1", "rb2"):
        p = params[name]
        r = _conv_ref(x, p["res"]["w"], p["res"]["b"], 0) if "res" in p else x
        h = _conv_ref(_gn_silu_ref(x, p["gsc1"]["gn_gamma"], p["gsc1"]["gn_beta"], num_groups),
                      p["gsc1"]["conv"]["w"], p["gsc1"]["conv"]["b"], 1)
        h = _conv_ref(_gn_silu_ref(h, p["gsc2"]["gn_gamma"], p["gsc2"]["gn_beta"], num_groups),
                      p["gsc2"]["conv"]["w"], p["gsc2"]["conv"]["b"], 1)
        x = h + r
    return jnp.transpose(x, (0, 3, 1, 2))


# ----------------------------------------------------------------------------
if __name__ == "__main__":
    B, in_ch, out_ch, num_groups = 2, 4, 8, 2
    H = W = 16

    key = jax.random.PRNGKey(0)
    kx, kp = jax.random.split(key)
    x = jax.random.normal(kx, (B, in_ch, H, W), jnp.float32)   # NCHW, like PyTorch
    params = make_upsample_params(kp, in_ch, out_ch)

    fwd = jax.jit(functools.partial(upsample_forward, num_groups=num_groups))
    y = jax.block_until_ready(fwd(params, x))

    expected_shape = (B, out_ch, 2 * H, 2 * W)
    assert y.shape == expected_shape, (y.shape, expected_shape)
    assert bool(jnp.all(jnp.isfinite(y)))

    # Reference check; tolerance sized for the in-kernel bf16 GEMM operands.
    y_ref = jax.jit(functools.partial(upsample_forward_ref, num_groups=num_groups))(params, x)
    max_err = float(jnp.max(jnp.abs(y - y_ref)))
    assert bool(jnp.allclose(y, y_ref, rtol=5e-2, atol=5e-2)), max_err

    print("KERNEL_OK")
</pallas_src>

<mosaic_0001>
module attributes {stable_mosaic.version = 11 : i64} {
  func.func @_conv_tap_kernel(%arg0: i32, %arg1: i32, %arg2: i32, %arg3: memref<1x1x34x4xbf16, #tpu.memory_space<vmem>>, %arg4: memref<1x3x4x4xbf16, #tpu.memory_space<vmem>>, %arg5: memref<1x4xf32, #tpu.memory_space<vmem>>, %arg6: memref<1x1x32x4xf32, #tpu.memory_space<vmem>>, %arg7: memref<32x4xf32, #tpu.memory_space<vmem>>) attributes {dimension_semantics = [#tpu.dimension_semantics<parallel>, #tpu.dimension_semantics<parallel>, #tpu.dimension_semantics<arbitrary>], iteration_bounds = array<i64: 2, 32, 3>, scalar_prefetch = 0 : i64, scratch_operands = 1 : i64, tpu.core_type = #tpu.core_type<tc>, window_params = [{transform_indices = @transform_0, window_bounds = array<i64: 1, 1, 34, 4>}, {transform_indices = @transform_1, window_bounds = array<i64: 1, 3, 4, 4>}, {pipeline_mode = #tpu.pipeline_mode<synchronous>, transform_indices = @transform_2, window_bounds = array<i64: 1, 4>}, {transform_indices = @transform_3, window_bounds = array<i64: 1, 1, 32, 4>}]} {
    %c0_i32 = arith.constant 0 : i32
    %0 = arith.cmpi eq, %arg2, %c0_i32 : i32
    %1 = arith.extui %0 : i1 to i32
    %c0_i32_0 = arith.constant 0 : i32
    %2 = arith.cmpi ne, %1, %c0_i32_0 : i32
    scf.if %2 {
      %cst_15 = arith.constant 0.000000e+00 : f32
      %27 = vector.broadcast %cst_15 : f32 to vector<32x4xf32>
      %c0_16 = arith.constant 0 : index
      %c0_17 = arith.constant 0 : index
      %28 = vector.load %arg7[%c0_16, %c0_17] : memref<32x4xf32, #tpu.memory_space<vmem>>, vector<32x4xf32>
      tpu.vector_store %arg7[%c0_16, %c0_17], %27 {strides = array<i32>} : memref<32x4xf32, #tpu.memory_space<vmem>>, vector<32x4xf32>,
    } else {
    }
    %c0 = arith.constant 0 : index
    %c0_1 = arith.constant 0 : index
    %c0_2 = arith.constant 0 : index
    %c0_3 = arith.constant 0 : index
    %3 = vector.load %arg3[%c0, %c0_1, %c0_2, %c0_3] : memref<1x1x34x4xbf16, #tpu.memory_space<vmem>>, vector<1x1x34x4xbf16>
    %4 = vector.shape_cast %3 : vector<1x1x34x4xbf16> to vector<34x4xbf16>
    %c0_4 = arith.constant 0 : index
    %c0_5 = arith.constant 0 : index
    %c0_6 = arith.constant 0 : index
    %c0_7 = arith.constant 0 : index
    %5 = vector.load %arg4[%c0_4, %c0_5, %c0_6, %c0_7] : memref<1x3x4x4xbf16, #tpu.memory_space<vmem>>, vector<1x3x4x4xbf16>
    %6 = vector.shape_cast %5 : vector<1x3x4x4xbf16> to vector<3x4x4xbf16>
    %c0_8 = arith.constant 0 : index
    %c0_9 = arith.constant 0 : index
    %7 = vector.load %arg7[%c0_8, %c0_9] : memref<32x4xf32, #tpu.memory_space<vmem>>, vector<32x4xf32>
    %8 = vector.extract_strided_slice %4 {offsets = [0, 0], sizes = [32, 4], strides = [1, 1]} : vector<34x4xbf16> to vector<32x4xbf16>
    %9 = vector.extract_strided_slice %6 {offsets = [0, 0, 0], sizes = [1, 4, 4], strides = [1, 1, 1]} : vector<3x4x4xbf16> to vector<1x4x4xbf16>
    %10 = vector.shape_cast %9 : vector<1x4x4xbf16> to vector<4x4xbf16>
    %cst = arith.constant dense<0.000000e+00> : vector<32x4xf32>
    %11 = tpu.matmul %8, %10, %cst {dimension_numbers = #tpu.dot_dimension_numbers<[1], [0], [0], [1], [0, 0, 1, 1], [], []>} : vector<32x4xbf16>, vector<4x4xbf16>, vector<32x4xf32> -> vector<32x4xf32>
    %12 = arith.addf %7, %11 : vector<32x4xf32>
    %13 = vector.extract_strided_slice %4 {offsets = [1, 0], sizes = [32, 4], strides = [1, 1]} : vector<34x4xbf16> to vector<32x4xbf16>
    %14 = vector.extract_strided_slice %6 {offsets = [1, 0, 0], sizes = [1, 4, 4], strides = [1, 1, 1]} : vector<3x4x4xbf16> to vector<1x4x4xbf16>
    %15 = vector.shape_cast %14 : vector<1x4x4xbf16> to vector<4x4xbf16>
    %cst_10 = arith.constant dense<0.000000e+00> : vector<32x4xf32>
    %16 = tpu.matmul %13, %15, %cst_10 {dimension_numbers = #tpu.dot_dimension_numbers<[1], [0], [0], [1], [0, 0, 1, 1], [], []>} : vector<32x4xbf16>, vector<4x4xbf16>, vector<32x4xf32> -> vector<32x4xf32>
    %17 = arith.addf %12, %16 : vector<32x4xf32>
    %18 = vector.extract_strided_slice %4 {offsets = [2, 0], sizes = [32, 4], strides = [1, 1]} : vector<34x4xbf16> to vector<32x4xbf16>
    %19 = vector.extract_strided_slice %6 {offsets = [2, 0, 0], sizes = [1, 4, 4], strides = [1, 1, 1]} : vector<3x4x4xbf16> to vector<1x4x4xbf16>
    %20 = vector.shape_cast %19 : vector<1x4x4xbf16> to vector<4x4xbf16>
    %cst_11 = arith.constant dense<0.000000e+00> : vector<32x4xf32>
    %21 = tpu.matmul %18, %20, %cst_11 {dimension_numbers = #tpu.dot_dimension_numbers<[1], [0], [0], [1], [0, 0, 1, 1], [], []>} : vector<32x4xbf16>, vector<4x4xbf16>, vector<32x4xf32> -> vector<32x4xf32>
    %22 = arith.addf %17, %21 : vector<32x4xf32>
    %c0_12 = arith.constant 0 : index
    %c0_13 = arith.constant 0 : index
    %23 = vector.load %arg7[%c0_12, %c0_13] : memref<32x4xf32, #tpu.memory_space<vmem>>, vector<32x4xf32>
    tpu.vector_store %arg7[%c0_12, %c0_13], %22 {strides = array<i32>} : memref<32x4xf32, #tpu.memory_space<vmem>>, vector<32x4xf32>,
    %c2_i32 = arith.constant 2 : i32
    %24 = arith.cmpi eq, %arg2, %c2_i32 : i32
    %25 = arith.extui %24 : i1 to i32
    %c0_i32_14 = arith.constant 0 : i32
    %26 = arith.cmpi ne, %25, %c0_i32_14 : i32
    scf.if %26 {
      %c0_15 = arith.constant 0 : index
      %c0_16 = arith.constant 0 : index
      %27 = vector.load %arg7[%c0_15, %c0_16] : memref<32x4xf32, #tpu.memory_space<vmem>>, vector<32x4xf32>
      %c0_17 = arith.constant 0 : index
      %c0_18 = arith.constant 0 : index
      %28 = vector.load %arg5[%c0_17, %c0_18] : memref<1x4xf32, #tpu.memory_space<vmem>>, vector<1x4xf32>
      %29 = vector.broadcast %28 : vector<1x4xf32> to vector<32x4xf32>
      %30 = arith.addf %27, %29 : vector<32x4xf32>
      %c0_19 = arith.constant 0 : index
      %c0_20 = arith.constant 0 : index
      %c0_21 = arith.constant 0 : index
      %c0_22 = arith.constant 0 : index
      %31 = vector.load %arg6[%c0_19, %c0_20, %c0_21, %c0_22] : memref<1x1x32x4xf32, #tpu.memory_space<vmem>>, vector<1x1x32x4xf32>
      %32 = vector.shape_cast %31 : vector<1x1x32x4xf32> to vector<32x4xf32>
      %33 = vector.shape_cast %30 : vector<32x4xf32> to vector<1x1x32x4xf32>
      tpu.vector_store %arg6[%c0_19, %c0_20, %c0_21, %c0_22], %33 {strides = array<i32>} : memref<1x1x32x4xf32, #tpu.memory_space<vmem>>, vector<1x1x32x4xf32>,
    } else {
    }
    return
  }
  func.func @transform_0(%arg0: i32, %arg1: i32, %arg2: i32) -> (i32, i32, i32, i32) {
    %0 = arith.addi %arg1, %arg2 : i32
    %c0_i32 = arith.constant 0 : i32
    %c0_i32_0 = arith.constant 0 : i32
    %c0_i32_1 = arith.constant 0 : i32
    return %arg0, %0, %c0_i32, %c0_i32_0 : i32, i32, i32, i32
  }
  func.func @transform_1(%arg0: i32, %arg1: i32, %arg2: i32) -> (i32, i32, i32, i32) {
    %c0_i32 = arith.constant 0 : i32
    %c0_i32_0 = arith.constant 0 : i32
    %c0_i32_1 = arith.constant 0 : i32
    %c0_i32_2 = arith.constant 0 : i32
    return %arg2, %c0_i32, %c0_i32_0, %c0_i32_1 : i32, i32, i32, i32
  }
  func.func @transform_2(%arg0: i32, %arg1: i32, %arg2: i32) -> (i32, i32) {
    %c0_i32 = arith.constant 0 : i32
    %c0_i32_0 = arith.constant 0 : i32
    %c0_i32_1 = arith.constant 0 : i32
    return %c0_i32, %c0_i32_0 : i32, i32
  }
  func.func @transform_3(%arg0: i32, %arg1: i32, %arg2: i32) -> (i32, i32, i32, i32) {
    %c0_i32 = arith.constant 0 : i32
    %c0_i32_0 = arith.constant 0 : i32
    %c0_i32_1 = arith.constant 0 : i32
    return %arg0, %arg1, %c0_i32, %c0_i32_0 : i32, i32, i32, i32
  }
}

module attributes {stable_mosaic.version = 11 : i64} {
  func.func @_gn_silu_kernel(%arg0: i32, %arg1: memref<1x1024x4xf32, #tpu.memory_space<vmem>>, %arg2: memref<1x4xf32, #tpu.memory_space<vmem>>, %arg3: memref<1x4xf32, #tpu.memory_space<vmem>>, %arg4: memref<4x4xf32, #tpu.memory_space<vmem>>, %arg5: memref<1x1024x4xf32, #tpu.memory_space<vmem>>) attributes {dimension_semantics = [#tpu.dimension_semantics<parallel>], iteration_bounds = array<i64: 2>, scalar_prefetch = 0 : i64, scratch_operands = 0 : i64, tpu.core_type = #tpu.core_type<tc>, window_params = [{transform_indices = @transform_0, window_bounds = array<i64: 1, 1024, 4>}, {pipeline_mode = #tpu.pipeline_mode<synchronous>, transform_indices = @transform_1, window_bounds = array<i64: 1, 4>}, {pipeline_mode = #tpu.pipeline_mode<synchronous>, transform_indices = @transform_2, window_bounds = array<i64: 1, 4>}, {pipeline_mode = #tpu.pipeline_mode<synchronous>, transform_indices = @transform_3, window_bounds = array<i64: 4, 4>}, {transform_indices = @transform_4, window_bounds = array<i64: 1, 1024, 4>}]} {
    %c0 = arith.constant 0 : index
    %c0_0 = arith.constant 0 : index
    %c0_1 = arith.constant 0 : index
    %0 = vector.load %arg1[%c0, %c0_0, %c0_1] : memref<1x1024x4xf32, #tpu.memory_space<vmem>>, vector<1x1024x4xf32>
    %1 = vector.shape_cast %0 : vector<1x1024x4xf32> to vector<1024x4xf32>
    %cst = arith.constant dense<0.000000e+00> : vector<4xf32>
    %2 = vector.multi_reduction <add>, %1, %cst [0] : vector<1024x4xf32> to vector<4xf32>
    %3 = vector.shape_cast %2 : vector<4xf32> to vector<1x4xf32>
    %4 = arith.mulf %1, %1 : vector<1024x4xf32>
    %cst_2 = arith.constant dense<0.000000e+00> : vector<4xf32>
    %5 = vector.multi_reduction <add>, %4, %cst_2 [0] : vector<1024x4xf32> to vector<4xf32>
    %6 = vector.shape_cast %5 : vector<4xf32> to vector<1x4xf32>
    %c0_3 = arith.constant 0 : index
    %c0_4 = arith.constant 0 : index
    %7 = vector.load %arg4[%c0_3, %c0_4] : memref<4x4xf32, #tpu.memory_space<vmem>>, vector<4x4xf32>
    %cst_5 = arith.constant dense<0.000000e+00> : vector<1x4xf32>
    %8 = tpu.matmul %3, %7, %cst_5 {dimension_numbers = #tpu.dot_dimension_numbers<[1], [0], [0], [1], [0, 0, 1, 1], [], []>} : vector<1x4xf32>, vector<4x4xf32>, vector<1x4xf32> -> vector<1x4xf32>
    %cst_6 = arith.constant 2.048000e+03 : f32
    %9 = vector.broadcast %cst_6 : f32 to vector<1x4xf32>
    %10 = arith.divf %8, %9 : vector<1x4xf32>
    %cst_7 = arith.constant dense<0.000000e+00> : vector<1x4xf32>
    %11 = tpu.matmul %6, %7, %cst_7 {dimension_numbers = #tpu.dot_dimension_numbers<[1], [0], [0], [1], [0, 0, 1, 1], [], []>} : vector<1x4xf32>, vector<4x4xf32>, vector<1x4xf32> -> vector<1x4xf32>
    %cst_8 = arith.constant 2.048000e+03 : f32
    %12 = vector.broadcast %cst_8 : f32 to vector<1x4xf32>
    %13 = arith.divf %11, %12 : vector<1x4xf32>
    %14 = arith.mulf %10, %10 : vector<1x4xf32>
    %15 = arith.subf %13, %14 : vector<1x4xf32>
    %cst_9 = arith.constant 0.000000e+00 : f32
    %16 = vector.broadcast %cst_9 : f32 to vector<1x4xf32>
    %17 = arith.maximumf %15, %16 : vector<1x4xf32>
    %cst_10 = arith.constant 9.99999974E-6 : f32
    %18 = vector.broadcast %cst_10 : f32 to vector<1x4xf32>
    %19 = arith.addf %17, %18 : vector<1x4xf32>
    %20 = math.rsqrt %19 : vector<1x4xf32>
    %c0_11 = arith.constant 0 : index
    %c0_12 = arith.constant 0 : index
    %21 = vector.load %arg2[%c0_11, %c0_12] : memref<1x4xf32, #tpu.memory_space<vmem>>, vector<1x4xf32>
    %22 = arith.mulf %20, %21 : vector<1x4xf32>
    %c0_13 = arith.constant 0 : index
    %c0_14 = arith.constant 0 : index
    %23 = vector.load %arg3[%c0_13, %c0_14] : memref<1x4xf32, #tpu.memory_space<vmem>>, vector<1x4xf32>
    %24 = arith.mulf %10, %22 : vector<1x4xf32>
    %25 = arith.subf %23, %24 : vector<1x4xf32>
    %26 = vector.broadcast %22 : vector<1x4xf32> to vector<1024x4xf32>
    %27 = arith.mulf %1, %26 : vector<1024x4xf32>
    %28 = vector.broadcast %25 : vector<1x4xf32> to vector<1024x4xf32>
    %29 = arith.addf %27, %28 : vector<1024x4xf32>
    %30 = arith.negf %29 : vector<1024x4xf32>
    %31 = math.exp %30 : vector<1024x4xf32>
    %cst_15 = arith.constant 1.000000e+00 : f32
    %32 = vector.broadcast %cst_15 : f32 to vector<1024x4xf32>
    %33 = arith.addf %32, %31 : vector<1024x4xf32>
    %34 = arith.divf %32, %33 : vector<1024x4xf32>
    %35 = arith.mulf %29, %34 : vector<1024x4xf32>
    %c0_16 = arith.constant 0 : index
    %c0_17 = arith.constant 0 : index
    %c0_18 = arith.constant 0 : index
    %36 = vector.load %arg5[%c0_16, %c0_17, %c0_18] : memref<1x1024x4xf32, #tpu.memory_space<vmem>>, vector<1x1024x4xf32>
    %37 = vector.shape_cast %36 : vector<1x1024x4xf32> to vector<1024x4xf32>
    %38 = vector.shape_cast %35 : vector<1024x4xf32> to vector<1x1024x4xf32>
    tpu.vector_store %arg5[%c0_16, %c0_17, %c0_18], %38 {strides = array<i32>} : memref<1x1024x4xf32, #tpu.memory_space<vmem>>, vector<1x1024x4xf32>,
    return
  }
  func.func @transform_0(%arg0: i32) -> (i32, i32, i32) {
    %c0_i32 = arith.constant 0 : i32
    %c0_i32_0 = arith.constant 0 : i32
    %c0_i32_1 = arith.constant 0 : i32
    return %arg0, %c0_i32, %c0_i32_0 : i32, i32, i32
  }
  func.func @transform_1(%arg0: i32) -> (i32, i32) {
    %c0_i32 = arith.constant 0 : i32
    %c0_i32_0 = arith.constant 0 : i32
    %c0_i32_1 = arith.constant 0 : i32
    return %c0_i32, %c0_i32_0 : i32, i32
  }
  func.func @transform_2(%arg0: i32) -> (i32, i32) {
    %c0_i32 = arith.constant 0 : i32
    %c0_i32_0 = arith.constant 0 : i32
    %c0_i32_1 = arith.constant 0 : i32
    return %c0_i32, %c0_i32_0 : i32, i32
  }
  func.func @transform_3(%arg0: i32) -> (i32, i32) {
    %c0_i32 = arith.constant 0 : i32
    %c0_i32_0 = arith.constant 0 : i32
    %c0_i32_1 = arith.constant 0 : i32
    return %c0_i32, %c0_i32_0 : i32, i32
  }
  func.func @transform_4(%arg0: i32) -> (i32, i32, i32) {
    %c0_i32 = arith.constant 0 : i32
    %c0_i32_0 = arith.constant 0 : i32
    %c0_i32_1 = arith.constant 0 : i32
    return %arg0, %c0_i32, %c0_i32_0 : i32, i32, i32
  }
}

module attributes {stable_mosaic.version = 11 : i64} {
  func.func @_gn_silu_kernel(%arg0: i32, %arg1: memref<1x1024x8xf32, #tpu.memory_space<vmem>>, %arg2: memref<1x8xf32, #tpu.memory_space<vmem>>, %arg3: memref<1x8xf32, #tpu.memory_space<vmem>>, %arg4: memref<8x8xf32, #tpu.memory_space<vmem>>, %arg5: memref<1x1024x8xf32, #tpu.memory_space<vmem>>) attributes {dimension_semantics = [#tpu.dimension_semantics<parallel>], iteration_bounds = array<i64: 2>, scalar_prefetch = 0 : i64, scratch_operands = 0 : i64, tpu.core_type = #tpu.core_type<tc>, window_params = [{transform_indices = @transform_0, window_bounds = array<i64: 1, 1024, 8>}, {pipeline_mode = #tpu.pipeline_mode<synchronous>, transform_indices = @transform_1, window_bounds = array<i64: 1, 8>}, {pipeline_mode = #tpu.pipeline_mode<synchronous>, transform_indices = @transform_2, window_bounds = array<i64: 1, 8>}, {pipeline_mode = #tpu.pipeline_mode<synchronous>, transform_indices = @transform_3, window_bounds = array<i64: 8, 8>}, {transform_indices = @transform_4, window_bounds = array<i64: 1, 1024, 8>}]} {
    %c0 = arith.constant 0 : index
    %c0_0 = arith.constant 0 : index
    %c0_1 = arith.constant 0 : index
    %0 = vector.load %arg1[%c0, %c0_0, %c0_1] : memref<1x1024x8xf32, #tpu.memory_space<vmem>>, vector<1x1024x8xf32>
    %1 = vector.shape_cast %0 : vector<1x1024x8xf32> to vector<1024x8xf32>
    %cst = arith.constant dense<0.000000e+00> : vector<8xf32>
    %2 = vector.multi_reduction <add>, %1, %cst [0] : vector<1024x8xf32> to vector<8xf32>
    %3 = vector.shape_cast %2 : vector<8xf32> to vector<1x8xf32>
    %4 = arith.mulf %1, %1 : vector<1024x8xf32>
    %cst_2 = arith.constant dense<0.000000e+00> : vector<8xf32>
    %5 = vector.multi_reduction <add>, %4, %cst_2 [0] : vector<1024x8xf32> to vector<8xf32>
    %6 = vector.shape_cast %5 : vector<8xf32> to vector<1x8xf32>
    %c0_3 = arith.constant 0 : index
    %c0_4 = arith.constant 0 : index
    %7 = vector.load %arg4[%c0_3, %c0_4] : memref<8x8xf32, #tpu.memory_space<vmem>>, vector<8x8xf32>
    %cst_5 = arith.constant dense<0.000000e+00> : vector<1x8xf32>
    %8 = tpu.matmul %3, %7, %cst_5 {dimension_numbers = #tpu.dot_dimension_numbers<[1], [0], [0], [1], [0, 0, 1, 1], [], []>} : vector<1x8xf32>, vector<8x8xf32>, vector<1x8xf32> -> vector<1x8xf32>
    %cst_6 = arith.constant 4.096000e+03 : f32
    %9 = vector.broadcast %cst_6 : f32 to vector<1x8xf32>
    %10 = arith.divf %8, %9 : vector<1x8xf32>
    %cst_7 = arith.constant dense<0.000000e+00> : vector<1x8xf32>
    %11 = tpu.matmul %6, %7, %cst_7 {dimension_numbers = #tpu.dot_dimension_numbers<[1], [0], [0], [1], [0, 0, 1, 1], [], []>} : vector<1x8xf32>, vector<8x8xf32>, vector<1x8xf32> -> vector<1x8xf32>
    %cst_8 = arith.constant 4.096000e+03 : f32
    %12 = vector.broadcast %cst_8 : f32 to vector<1x8xf32>
    %13 = arith.divf %11, %12 : vector<1x8xf32>
    %14 = arith.mulf %10, %10 : vector<1x8xf32>
    %15 = arith.subf %13, %14 : vector<1x8xf32>
    %cst_9 = arith.constant 0.000000e+00 : f32
    %16 = vector.broadcast %cst_9 : f32 to vector<1x8xf32>
    %17 = arith.maximumf %15, %16 : vector<1x8xf32>
    %cst_10 = arith.constant 9.99999974E-6 : f32
    %18 = vector.broadcast %cst_10 : f32 to vector<1x8xf32>
    %19 = arith.addf %17, %18 : vector<1x8xf32>
    %20 = math.rsqrt %19 : vector<1x8xf32>
    %c0_11 = arith.constant 0 : index
    %c0_12 = arith.constant 0 : index
    %21 = vector.load %arg2[%c0_11, %c0_12] : memref<1x8xf32, #tpu.memory_space<vmem>>, vector<1x8xf32>
    %22 = arith.mulf %20, %21 : vector<1x8xf32>
    %c0_13 = arith.constant 0 : index
    %c0_14 = arith.constant 0 : index
    %23 = vector.load %arg3[%c0_13, %c0_14] : memref<1x8xf32, #tpu.memory_space<vmem>>, vector<1x8xf32>
    %24 = arith.mulf %10, %22 : vector<1x8xf32>
    %25 = arith.subf %23, %24 : vector<1x8xf32>
    %26 = vector.broadcast %22 : vector<1x8xf32> to vector<1024x8xf32>
    %27 = arith.mulf %1, %26 : vector<1024x8xf32>
    %28 = vector.broadcast %25 : vector<1x8xf32> to vector<1024x8xf32>
    %29 = arith.addf %27, %28 : vector<1024x8xf32>
    %30 = arith.negf %29 : vector<1024x8xf32>
    %31 = math.exp %30 : vector<1024x8xf32>
    %cst_15 = arith.constant 1.000000e+00 : f32
    %32 = vector.broadcast %cst_15 : f32 to vector<1024x8xf32>
    %33 = arith.addf %32, %31 : vector<1024x8xf32>
    %34 = arith.divf %32, %33 : vector<1024x8xf32>
    %35 = arith.mulf %29, %34 : vector<1024x8xf32>
    %c0_16 = arith.constant 0 : index
    %c0_17 = arith.constant 0 : index
    %c0_18 = arith.constant 0 : index
    %36 = vector.load %arg5[%c0_16, %c0_17, %c0_18] : memref<1x1024x8xf32, #tpu.memory_space<vmem>>, vector<1x1024x8xf32>
    %37 = vector.shape_cast %36 : vector<1x1024x8xf32> to vector<1024x8xf32>
    %38 = vector.shape_cast %35 : vector<1024x8xf32> to vector<1x1024x8xf32>
    tpu.vector_store %arg5[%c0_16, %c0_17, %c0_18], %38 {strides = array<i32>} : memref<1x1024x8xf32, #tpu.memory_space<vmem>>, vector<1x1024x8xf32>,
    return
  }
  func.func @transform_0(%arg0: i32) -> (i32, i32, i32) {
    %c0_i32 = arith.constant 0 : i32
    %c0_i32_0 = arith.constant 0 : i32
    %c0_i32_1 = arith.constant 0 : i32
    return %arg0, %c0_i32, %c0_i32_0 : i32, i32, i32
  }
  func.func @transform_1(%arg0: i32) -> (i32, i32) {
    %c0_i32 = arith.constant 0 : i32
    %c0_i32_0 = arith.constant 0 : i32
    %c0_i32_1 = arith.constant 0 : i32
    return %c0_i32, %c0_i32_0 : i32, i32
  }
  func.func @transform_2(%arg0: i32) -> (i32, i32) {
    %c0_i32 = arith.constant 0 : i32
    %c0_i32_0 = arith.constant 0 : i32
    %c0_i32_1 = arith.constant 0 : i32
    return %c0_i32, %c0_i32_0 : i32, i32
  }
  func.func @transform_3(%arg0: i32) -> (i32, i32) {
    %c0_i32 = arith.constant 0 : i32
    %c0_i32_0 = arith.constant 0 : i32
    %c0_i32_1 = arith.constant 0 : i32
    return %c0_i32, %c0_i32_0 : i32, i32
  }
  func.func @transform_4(%arg0: i32) -> (i32, i32, i32) {
    %c0_i32 = arith.constant 0 : i32
    %c0_i32_0 = arith.constant 0 : i32
    %c0_i32_1 = arith.constant 0 : i32
    return %arg0, %c0_i32, %c0_i32_0 : i32, i32, i32
  }
}

module attributes {stable_mosaic.version = 11 : i64} {
  func.func @_conv_tap_kernel(%arg0: i32, %arg1: i32, %arg2: i32, %arg3: memref<1x1x34x4xbf16, #tpu.memory_space<vmem>>, %arg4: memref<1x3x4x8xbf16, #tpu.memory_space<vmem>>, %arg5: memref<1x8xf32, #tpu.memory_space<vmem>>, %arg6: memref<1x1x32x8xf32, #tpu.memory_space<vmem>>, %arg7: memref<32x8xf32, #tpu.memory_space<vmem>>) attributes {dimension_semantics = [#tpu.dimension_semantics<parallel>, #tpu.dimension_semantics<parallel>, #tpu.dimension_semantics<arbitrary>], iteration_bounds = array<i64: 2, 32, 3>, scalar_prefetch = 0 : i64, scratch_operands = 1 : i64, tpu.core_type = #tpu.core_type<tc>, window_params = [{transform_indices = @transform_0, window_bounds = array<i64: 1, 1, 34, 4>}, {transform_indices = @transform_1, window_bounds = array<i64: 1, 3, 4, 8>}, {pipeline_mode = #tpu.pipeline_mode<synchronous>, transform_indices = @transform_2, window_bounds = array<i64: 1, 8>}, {transform_indices = @transform_3, window_bounds = array<i64: 1, 1, 32, 8>}]} {
    %c0_i32 = arith.constant 0 : i32
    %0 = arith.cmpi eq, %arg2, %c0_i32 : i32
    %1 = arith.extui %0 : i1 to i32
    %c0_i32_0 = arith.constant 0 : i32
    %2 = arith.cmpi ne, %1, %c0_i32_0 : i32
    scf.if %2 {
      %cst_15 = arith.constant 0.000000e+00 : f32
      %27 = vector.broadcast %cst_15 : f32 to vector<32x8xf32>
      %c0_16 = arith.constant 0 : index
      %c0_17 = arith.constant 0 : index
      %28 = vector.load %arg7[%c0_16, %c0_17] : memref<32x8xf32, #tpu.memory_space<vmem>>, vector<32x8xf32>
      tpu.vector_store %arg7[%c0_16, %c0_17], %27 {strides = array<i32>} : memref<32x8xf32, #tpu.memory_space<vmem>>, vector<32x8xf32>,
    } else {
    }
    %c0 = arith.constant 0 : index
    %c0_1 = arith.constant 0 : index
    %c0_2 = arith.constant 0 : index
    %c0_3 = arith.constant 0 : index
    %3 = vector.load %arg3[%c0, %c0_1, %c0_2, %c0_3] : memref<1x1x34x4xbf16, #tpu.memory_space<vmem>>, vector<1x1x34x4xbf16>
    %4 = vector.shape_cast %3 : vector<1x1x34x4xbf16> to vector<34x4xbf16>
    %c0_4 = arith.constant 0 : index
    %c0_5 = arith.constant 0 : index
    %c0_6 = arith.constant 0 : index
    %c0_7 = arith.constant 0 : index
    %5 = vector.load %arg4[%c0_4, %c0_5, %c0_6, %c0_7] : memref<1x3x4x8xbf16, #tpu.memory_space<vmem>>, vector<1x3x4x8xbf16>
    %6 = vector.shape_cast %5 : vector<1x3x4x8xbf16> to vector<3x4x8xbf16>
    %c0_8 = arith.constant 0 : index
    %c0_9 = arith.constant 0 : index
    %7 = vector.load %arg7[%c0_8, %c0_9] : memref<32x8xf32, #tpu.memory_space<vmem>>, vector<32x8xf32>
    %8 = vector.extract_strided_slice %4 {offsets = [0, 0], sizes = [32, 4], strides = [1, 1]} : vector<34x4xbf16> to vector<32x4xbf16>
    %9 = vector.extract_strided_slice %6 {offsets = [0, 0, 0], sizes = [1, 4, 8], strides = [1, 1, 1]} : vector<3x4x8xbf16> to vector<1x4x8xbf16>
    %10 = vector.shape_cast %9 : vector<1x4x8xbf16> to vector<4x8xbf16>
    %cst = arith.constant dense<0.000000e+00> : vector<32x8xf32>
    %11 = tpu.matmul %8, %10, %cst {dimension_numbers = #tpu.dot_dimension_numbers<[1], [0], [0], [1], [0, 0, 1, 1], [], []>} : vector<32x4xbf16>, vector<4x8xbf16>, vector<32x8xf32> -> vector<32x8xf32>
    %12 = arith.addf %7, %11 : vector<32x8xf32>
    %13 = vector.extract_strided_slice %4 {offsets = [1, 0], sizes = [32, 4], strides = [1, 1]} : vector<34x4xbf16> to vector<32x4xbf16>
    %14 = vector.extract_strided_slice %6 {offsets = [1, 0, 0], sizes = [1, 4, 8], strides = [1, 1, 1]} : vector<3x4x8xbf16> to vector<1x4x8xbf16>
    %15 = vector.shape_cast %14 : vector<1x4x8xbf16> to vector<4x8xbf16>
    %cst_10 = arith.constant dense<0.000000e+00> : vector<32x8xf32>
    %16 = tpu.matmul %13, %15, %cst_10 {dimension_numbers = #tpu.dot_dimension_numbers<[1], [0], [0], [1], [0, 0, 1, 1], [], []>} : vector<32x4xbf16>, vector<4x8xbf16>, vector<32x8xf32> -> vector<32x8xf32>
    %17 = arith.addf %12, %16 : vector<32x8xf32>
    %18 = vector.extract_strided_slice %4 {offsets = [2, 0], sizes = [32, 4], strides = [1, 1]} : vector<34x4xbf16> to vector<32x4xbf16>
    %19 = vector.extract_strided_slice %6 {offsets = [2, 0, 0], sizes = [1, 4, 8], strides = [1, 1, 1]} : vector<3x4x8xbf16> to vector<1x4x8xbf16>
    %20 = vector.shape_cast %19 : vector<1x4x8xbf16> to vector<4x8xbf16>
    %cst_11 = arith.constant dense<0.000000e+00> : vector<32x8xf32>
    %21 = tpu.matmul %18, %20, %cst_11 {dimension_numbers = #tpu.dot_dimension_numbers<[1], [0], [0], [1], [0, 0, 1, 1], [], []>} : vector<32x4xbf16>, vector<4x8xbf16>, vector<32x8xf32> -> vector<32x8xf32>
    %22 = arith.addf %17, %21 : vector<32x8xf32>
    %c0_12 = arith.constant 0 : index
    %c0_13 = arith.constant 0 : index
    %23 = vector.load %arg7[%c0_12, %c0_13] : memref<32x8xf32, #tpu.memory_space<vmem>>, vector<32x8xf32>
    tpu.vector_store %arg7[%c0_12, %c0_13], %22 {strides = array<i32>} : memref<32x8xf32, #tpu.memory_space<vmem>>, vector<32x8xf32>,
    %c2_i32 = arith.constant 2 : i32
    %24 = arith.cmpi eq, %arg2, %c2_i32 : i32
    %25 = arith.extui %24 : i1 to i32
    %c0_i32_14 = arith.constant 0 : i32
    %26 = arith.cmpi ne, %25, %c0_i32_14 : i32
    scf.if %26 {
      %c0_15 = arith.constant 0 : index
      %c0_16 = arith.constant 0 : index
      %27 = vector.load %arg7[%c0_15, %c0_16] : memref<32x8xf32, #tpu.memory_space<vmem>>, vector<32x8xf32>
      %c0_17 = arith.constant 0 : index
      %c0_18 = arith.constant 0 : index
      %28 = vector.load %arg5[%c0_17, %c0_18] : memref<1x8xf32, #tpu.memory_space<vmem>>, vector<1x8xf32>
      %29 = vector.broadcast %28 : vector<1x8xf32> to vector<32x8xf32>
      %30 = arith.addf %27, %29 : vector<32x8xf32>
      %c0_19 = arith.constant 0 : index
      %c0_20 = arith.constant 0 : index
      %c0_21 = arith.constant 0 : index
      %c0_22 = arith.constant 0 : index
      %31 = vector.load %arg6[%c0_19, %c0_20, %c0_21, %c0_22] : memref<1x1x32x8xf32, #tpu.memory_space<vmem>>, vector<1x1x32x8xf32>
      %32 = vector.shape_cast %31 : vector<1x1x32x8xf32> to vector<32x8xf32>
      %33 = vector.shape_cast %30 : vector<32x8xf32> to vector<1x1x32x8xf32>
      tpu.vector_store %arg6[%c0_19, %c0_20, %c0_21, %c0_22], %33 {strides = array<i32>} : memref<1x1x32x8xf32, #tpu.memory_space<vmem>>, vector<1x1x32x8xf32>,
    } else {
    }
    return
  }
  func.func @transform_0(%arg0: i32, %arg1: i32, %arg2: i32) -> (i32, i32, i32, i32) {
    %0 = arith.addi %arg1, %arg2 : i32
    %c0_i32 = arith.constant 0 : i32
    %c0_i32_0 = arith.constant 0 : i32
    %c0_i32_1 = arith.constant 0 : i32
    return %arg0, %0, %c0_i32, %c0_i32_0 : i32, i32, i32, i32
  }
  func.func @transform_1(%arg0: i32, %arg1: i32, %arg2: i32) -> (i32, i32, i32, i32) {
    %c0_i32 = arith.constant 0 : i32
    %c0_i32_0 = arith.constant 0 : i32
    %c0_i32_1 = arith.constant 0 : i32
    %c0_i32_2 = arith.constant 0 : i32
    return %arg2, %c0_i32, %c0_i32_0, %c0_i32_1 : i32, i32, i32, i32
  }
  func.func @transform_2(%arg0: i32, %arg1: i32, %arg2: i32) -> (i32, i32) {
    %c0_i32 = arith.constant 0 : i32
    %c0_i32_0 = arith.constant 0 : i32
    %c0_i32_1 = arith.constant 0 : i32
    return %c0_i32, %c0_i32_0 : i32, i32
  }
  func.func @transform_3(%arg0: i32, %arg1: i32, %arg2: i32) -> (i32, i32, i32, i32) {
    %c0_i32 = arith.constant 0 : i32
    %c0_i32_0 = arith.constant 0 : i32
    %c0_i32_1 = arith.constant 0 : i32
    return %arg0, %arg1, %c0_i32, %c0_i32_0 : i32, i32, i32, i32
  }
}

module attributes {stable_mosaic.version = 11 : i64} {
  func.func @_conv_tap_kernel(%arg0: i32, %arg1: i32, %arg2: i32, %arg3: memref<1x1x32x4xf32, #tpu.memory_space<vmem>>, %arg4: memref<1x1x4x8xbf16, #tpu.memory_space<vmem>>, %arg5: memref<1x8xf32, #tpu.memory_space<vmem>>, %arg6: memref<1x1x32x8xf32, #tpu.memory_space<vmem>>, %arg7: memref<32x8xf32, #tpu.memory_space<vmem>>) attributes {dimension_semantics = [#tpu.dimension_semantics<parallel>, #tpu.dimension_semantics<parallel>, #tpu.dimension_semantics<arbitrary>], iteration_bounds = array<i64: 2, 32, 1>, scalar_prefetch = 0 : i64, scratch_operands = 1 : i64, tpu.core_type = #tpu.core_type<tc>, window_params = [{transform_indices = @transform_0, window_bounds = array<i64: 1, 1, 32, 4>}, {transform_indices = @transform_1, window_bounds = array<i64: 1, 1, 4, 8>}, {pipeline_mode = #tpu.pipeline_mode<synchronous>, transform_indices = @transform_2, window_bounds = array<i64: 1, 8>}, {transform_indices = @transform_3, window_bounds = array<i64: 1, 1, 32, 8>}]} {
    %c0_i32 = arith.constant 0 : i32
    %0 = arith.cmpi eq, %arg2, %c0_i32 : i32
    %1 = arith.extui %0 : i1 to i32
    %c0_i32_0 = arith.constant 0 : i32
    %2 = arith.cmpi ne, %1, %c0_i32_0 : i32
    scf.if %2 {
      %cst_14 = arith.constant 0.000000e+00 : f32
      %16 = vector.broadcast %cst_14 : f32 to vector<32x8xf32>
      %c0_15 = arith.constant 0 : index
      %c0_16 = arith.constant 0 : index
      %17 = vector.load %arg7[%c0_15, %c0_16] : memref<32x8xf32, #tpu.memory_space<vmem>>, vector<32x8xf32>
      tpu.vector_store %arg7[%c0_15, %c0_16], %16 {strides = array<i32>} : memref<32x8xf32, #tpu.memory_space<vmem>>, vector<32x8xf32>,
    } else {
    }
    %c0 = arith.constant 0 : index
    %c0_1 = arith.constant 0 : index
    %c0_2 = arith.constant 0 : index
    %c0_3 = arith.constant 0 : index
    %3 = vector.load %arg3[%c0, %c0_1, %c0_2, %c0_3] : memref<1x1x32x4xf32, #tpu.memory_space<vmem>>, vector<1x1x32x4xf32>
    %4 = vector.shape_cast %3 : vector<1x1x32x4xf32> to vector<32x4xf32>
    %5 = arith.truncf %4 : vector<32x4xf32> to vector<32x4xbf16>
    %c0_4 = arith.constant 0 : index
    %c0_5 = arith.constant 0 : index
    %c0_6 = arith.constant 0 : index
    %c0_7 = arith.constant 0 : index
    %6 = vector.load %arg4[%c0_4, %c0_5, %c0_6, %c0_7] : memref<1x1x4x8xbf16, #tpu.memory_space<vmem>>, vector<1x1x4x8xbf16>
    %7 = vector.shape_cast %6 : vector<1x1x4x8xbf16> to vector<1x4x8xbf16>
    %c0_8 = arith.constant 0 : index
    %c0_9 = arith.constant 0 : index
    %8 = vector.load %arg7[%c0_8, %c0_9] : memref<32x8xf32, #tpu.memory_space<vmem>>, vector<32x8xf32>
    %9 = vector.shape_cast %7 : vector<1x4x8xbf16> to vector<4x8xbf16>
    %cst = arith.constant dense<0.000000e+00> : vector<32x8xf32>
    %10 = tpu.matmul %5, %9, %cst {dimension_numbers = #tpu.dot_dimension_numbers<[1], [0], [0], [1], [0, 0, 1, 1], [], []>} : vector<32x4xbf16>, vector<4x8xbf16>, vector<32x8xf32> -> vector<32x8xf32>
    %11 = arith.addf %8, %10 : vector<32x8xf32>
    %c0_10 = arith.constant 0 : index
    %c0_11 = arith.constant 0 : index
    %12 = vector.load %arg7[%c0_10, %c0_11] : memref<32x8xf32, #tpu.memory_space<vmem>>, vector<32x8xf32>
    tpu.vector_store %arg7[%c0_10, %c0_11], %11 {strides = array<i32>} : memref<32x8xf32, #tpu.memory_space<vmem>>, vector<32x8xf32>,
    %c0_i32_12 = arith.constant 0 : i32
    %13 = arith.cmpi eq, %arg2, %c0_i32_12 : i32
    %14 = arith.extui %13 : i1 to i32
    %c0_i32_13 = arith.constant 0 : i32
    %15 = arith.cmpi ne, %14, %c0_i32_13 : i32
    scf.if %15 {
      %c0_14 = arith.constant 0 : index
      %c0_15 = arith.constant 0 : index
      %16 = vector.load %arg7[%c0_14, %c0_15] : memref<32x8xf32, #tpu.memory_space<vmem>>, vector<32x8xf32>
      %c0_16 = arith.constant 0 : index
      %c0_17 = arith.constant 0 : index
      %17 = vector.load %arg5[%c0_16, %c0_17] : memref<1x8xf32, #tpu.memory_space<vmem>>, vector<1x8xf32>
      %18 = vector.broadcast %17 : vector<1x8xf32> to vector<32x8xf32>
      %19 = arith.addf %16, %18 : vector<32x8xf32>
      %c0_18 = arith.constant 0 : index
      %c0_19 = arith.constant 0 : index
      %c0_20 = arith.constant 0 : index
      %c0_21 = arith.constant 0 : index
      %20 = vector.load %arg6[%c0_18, %c0_19, %c0_20, %c0_21] : memref<1x1x32x8xf32, #tpu.memory_space<vmem>>, vector<1x1x32x8xf32>
      %21 = vector.shape_cast %20 : vector<1x1x32x8xf32> to vector<32x8xf32>
      %22 = vector.shape_cast %19 : vector<32x8xf32> to vector<1x1x32x8xf32>
      tpu.vector_store %arg6[%c0_18, %c0_19, %c0_20, %c0_21], %22 {strides = array<i32>} : memref<1x1x32x8xf32, #tpu.memory_space<vmem>>, vector<1x1x32x8xf32>,
    } else {
    }
    return
  }
  func.func @transform_0(%arg0: i32, %arg1: i32, %arg2: i32) -> (i32, i32, i32, i32) {
    %0 = arith.addi %arg1, %arg2 : i32
    %c0_i32 = arith.constant 0 : i32
    %c0_i32_0 = arith.constant 0 : i32
    %c0_i32_1 = arith.constant 0 : i32
    return %arg0, %0, %c0_i32, %c0_i32_0 : i32, i32, i32, i32
  }
  func.func @transform_1(%arg0: i32, %arg1: i32, %arg2: i32) -> (i32, i32, i32, i32) {
    %c0_i32 = arith.constant 0 : i32
    %c0_i32_0 = arith.constant 0 : i32
    %c0_i32_1 = arith.constant 0 : i32
    %c0_i32_2 = arith.constant 0 : i32
    return %arg2, %c0_i32, %c0_i32_0, %c0_i32_1 : i32, i32, i32, i32
  }
  func.func @transform_2(%arg0: i32, %arg1: i32, %arg2: i32) -> (i32, i32) {
    %c0_i32 = arith.constant 0 : i32
    %c0_i32_0 = arith.constant 0 : i32
    %c0_i32_1 = arith.constant 0 : i32
    return %c0_i32, %c0_i32_0 : i32, i32
  }
  func.func @transform_3(%arg0: i32, %arg1: i32, %arg2: i32) -> (i32, i32, i32, i32) {
    %c0_i32 = arith.constant 0 : i32
    %c0_i32_0 = arith.constant 0 : i32
    %c0_i32_1 = arith.constant 0 : i32
    return %arg0, %arg1, %c0_i32, %c0_i32_0 : i32, i32, i32, i32
  }
}

module attributes {stable_mosaic.version = 11 : i64} {
  func.func @_conv_tap_kernel(%arg0: i32, %arg1: i32, %arg2: i32, %arg3: memref<1x1x34x8xbf16, #tpu.memory_space<vmem>>, %arg4: memref<1x3x8x8xbf16, #tpu.memory_space<vmem>>, %arg5: memref<1x8xf32, #tpu.memory_space<vmem>>, %arg6: memref<1x1x32x8xf32, #tpu.memory_space<vmem>>, %arg7: memref<1x1x32x8xf32, #tpu.memory_space<vmem>>, %arg8: memref<32x8xf32, #tpu.memory_space<vmem>>) attributes {dimension_semantics = [#tpu.dimension_semantics<parallel>, #tpu.dimension_semantics<parallel>, #tpu.dimension_semantics<arbitrary>], iteration_bounds = array<i64: 2, 32, 3>, scalar_prefetch = 0 : i64, scratch_operands = 1 : i64, tpu.core_type = #tpu.core_type<tc>, window_params = [{transform_indices = @transform_0, window_bounds = array<i64: 1, 1, 34, 8>}, {transform_indices = @transform_1, window_bounds = array<i64: 1, 3, 8, 8>}, {pipeline_mode = #tpu.pipeline_mode<synchronous>, transform_indices = @transform_2, window_bounds = array<i64: 1, 8>}, {transform_indices = @transform_3, window_bounds = array<i64: 1, 1, 32, 8>}, {transform_indices = @transform_4, window_bounds = array<i64: 1, 1, 32, 8>}]} {
    %c0_i32 = arith.constant 0 : i32
    %0 = arith.cmpi eq, %arg2, %c0_i32 : i32
    %1 = arith.extui %0 : i1 to i32
    %c0_i32_0 = arith.constant 0 : i32
    %2 = arith.cmpi ne, %1, %c0_i32_0 : i32
    scf.if %2 {
      %cst_15 = arith.constant 0.000000e+00 : f32
      %27 = vector.broadcast %cst_15 : f32 to vector<32x8xf32>
      %c0_16 = arith.constant 0 : index
      %c0_17 = arith.constant 0 : index
      %28 = vector.load %arg8[%c0_16, %c0_17] : memref<32x8xf32, #tpu.memory_space<vmem>>, vector<32x8xf32>
      tpu.vector_store %arg8[%c0_16, %c0_17], %27 {strides = array<i32>} : memref<32x8xf32, #tpu.memory_space<vmem>>, vector<32x8xf32>,
    } else {
    }
    %c0 = arith.constant 0 : index
    %c0_1 = arith.constant 0 : index
    %c0_2 = arith.constant 0 : index
    %c0_3 = arith.constant 0 : index
    %3 = vector.load %arg3[%c0, %c0_1, %c0_2, %c0_3] : memref<1x1x34x8xbf16, #tpu.memory_space<vmem>>, vector<1x1x34x8xbf16>
    %4 = vector.shape_cast %3 : vector<1x1x34x8xbf16> to vector<34x8xbf16>
    %c0_4 = arith.constant 0 : index
    %c0_5 = arith.constant 0 : index
    %c0_6 = arith.constant 0 : index
    %c0_7 = arith.constant 0 : index
    %5 = vector.load %arg4[%c0_4, %c0_5, %c0_6, %c0_7] : memref<1x3x8x8xbf16, #tpu.memory_space<vmem>>, vector<1x3x8x8xbf16>
    %6 = vector.shape_cast %5 : vector<1x3x8x8xbf16> to vector<3x8x8xbf16>
    %c0_8 = arith.constant 0 : index
    %c0_9 = arith.constant 0 : index
    %7 = vector.load %arg8[%c0_8, %c0_9] : memref<32x8xf32, #tpu.memory_space<vmem>>, vector<32x8xf32>
    %8 = vector.extract_strided_slice %4 {offsets = [0, 0], sizes = [32, 8], strides = [1, 1]} : vector<34x8xbf16> to vector<32x8xbf16>
    %9 = vector.extract_strided_slice %6 {offsets = [0, 0, 0], sizes = [1, 8, 8], strides = [1, 1, 1]} : vector<3x8x8xbf16> to vector<1x8x8xbf16>
    %10 = vector.shape_cast %9 : vector<1x8x8xbf16> to vector<8x8xbf16>
    %cst = arith.constant dense<0.000000e+00> : vector<32x8xf32>
    %11 = tpu.matmul %8, %10, %cst {dimension_numbers = #tpu.dot_dimension_numbers<[1], [0], [0], [1], [0, 0, 1, 1], [], []>} : vector<32x8xbf16>, vector<8x8xbf16>, vector<32x8xf32> -> vector<32x8xf32>
    %12 = arith.addf %7, %11 : vector<32x8xf32>
    %13 = vector.extract_strided_slice %4 {offsets = [1, 0], sizes = [32, 8], strides = [1, 1]} : vector<34x8xbf16> to vector<32x8xbf16>
    %14 = vector.extract_strided_slice %6 {offsets = [1, 0, 0], sizes = [1, 8, 8], strides = [1, 1, 1]} : vector<3x8x8xbf16> to vector<1x8x8xbf16>
    %15 = vector.shape_cast %14 : vector<1x8x8xbf16> to vector<8x8xbf16>
    %cst_10 = arith.constant dense<0.000000e+00> : vector<32x8xf32>
    %16 = tpu.matmul %13, %15, %cst_10 {dimension_numbers = #tpu.dot_dimension_numbers<[1], [0], [0], [1], [0, 0, 1, 1], [], []>} : vector<32x8xbf16>, vector<8x8xbf16>, vector<32x8xf32> -> vector<32x8xf32>
    %17 = arith.addf %12, %16 : vector<32x8xf32>
    %18 = vector.extract_strided_slice %4 {offsets = [2, 0], sizes = [32, 8], strides = [1, 1]} : vector<34x8xbf16> to vector<32x8xbf16>
    %19 = vector.extract_strided_slice %6 {offsets = [2, 0, 0], sizes = [1, 8, 8], strides = [1, 1, 1]} : vector<3x8x8xbf16> to vector<1x8x8xbf16>
    %20 = vector.shape_cast %19 : vector<1x8x8xbf16> to vector<8x8xbf16>
    %cst_11 = arith.constant dense<0.000000e+00> : vector<32x8xf32>
    %21 = tpu.matmul %18, %20, %cst_11 {dimension_numbers = #tpu.dot_dimension_numbers<[1], [0], [0], [1], [0, 0, 1, 1], [], []>} : vector<32x8xbf16>, vector<8x8xbf16>, vector<32x8xf32> -> vector<32x8xf32>
    %22 = arith.addf %17, %21 : vector<32x8xf32>
    %c0_12 = arith.constant 0 : index
    %c0_13 = arith.constant 0 : index
    %23 = vector.load %arg8[%c0_12, %c0_13] : memref<32x8xf32, #tpu.memory_space<vmem>>, vector<32x8xf32>
    tpu.vector_store %arg8[%c0_12, %c0_13], %22 {strides = array<i32>} : memref<32x8xf32, #tpu.memory_space<vmem>>, vector<32x8xf32>,
    %c2_i32 = arith.constant 2 : i32
    %24 = arith.cmpi eq, %arg2, %c2_i32 : i32
    %25 = arith.extui %24 : i1 to i32
    %c0_i32_14 = arith.constant 0 : i32
    %26 = arith.cmpi ne, %25, %c0_i32_14 : i32
    scf.if %26 {
      %c0_15 = arith.constant 0 : index
      %c0_16 = arith.constant 0 : index
      %27 = vector.load %arg8[%c0_15, %c0_16] : memref<32x8xf32, #tpu.memory_space<vmem>>, vector<32x8xf32>
      %c0_17 = arith.constant 0 : index
      %c0_18 = arith.constant 0 : index
      %28 = vector.load %arg5[%c0_17, %c0_18] : memref<1x8xf32, #tpu.memory_space<vmem>>, vector<1x8xf32>
      %29 = vector.broadcast %28 : vector<1x8xf32> to vector<32x8xf32>
      %30 = arith.addf %27, %29 : vector<32x8xf32>
      %c0_19 = arith.constant 0 : index
      %c0_20 = arith.constant 0 : index
      %c0_21 = arith.constant 0 : index
      %c0_22 = arith.constant 0 : index
      %31 = vector.load %arg6[%c0_19, %c0_20, %c0_21, %c0_22] : memref<1x1x32x8xf32, #tpu.memory_space<vmem>>, vector<1x1x32x8xf32>
      %32 = vector.shape_cast %31 : vector<1x1x32x8xf32> to vector<32x8xf32>
      %33 = arith.addf %30, %32 : vector<32x8xf32>
      %c0_23 = arith.constant 0 : index
      %c0_24 = arith.constant 0 : index
      %c0_25 = arith.constant 0 : index
      %c0_26 = arith.constant 0 : index
      %34 = vector.load %arg7[%c0_23, %c0_24, %c0_25, %c0_26] : memref<1x1x32x8xf32, #tpu.memory_space<vmem>>, vector<1x1x32x8xf32>
      %35 = vector.shape_cast %34 : vector<1x1x32x8xf32> to vector<32x8xf32>
      %36 = vector.shape_cast %33 : vector<32x8xf32> to vector<1x1x32x8xf32>
      tpu.vector_store %arg7[%c0_23, %c0_24, %c0_25, %c0_26], %36 {strides = array<i32>} : memref<1x1x32x8xf32, #tpu.memory_space<vmem>>, vector<1x1x32x8xf32>,
    } else {
    }
    return
  }
  func.func @transform_0(%arg0: i32, %arg1: i32, %arg2: i32) -> (i32, i32, i32, i32) {
    %0 = arith.addi %arg1, %arg2 : i32
    %c0_i32 = arith.constant 0 : i32
    %c0_i32_0 = arith.constant 0 : i32
    %c0_i32_1 = arith.constant 0 : i32
    return %arg0, %0, %c0_i32, %c0_i32_0 : i32, i32, i32, i32
  }
  func.func @transform_1(%arg0: i32, %arg1: i32, %arg2: i32) -> (i32, i32, i32, i32) {
    %c0_i32 = arith.constant 0 : i32
    %c0_i32_0 = arith.constant 0 : i32
    %c0_i32_1 = arith.constant 0 : i32
    %c0_i32_2 = arith.constant 0 : i32
    return %arg2, %c0_i32, %c0_i32_0, %c0_i32_1 : i32, i32, i32, i32
  }
  func.func @transform_2(%arg0: i32, %arg1: i32, %arg2: i32) -> (i32, i32) {
    %c0_i32 = arith.constant 0 : i32
    %c0_i32_0 = arith.constant 0 : i32
    %c0_i32_1 = arith.constant 0 : i32
    return %c0_i32, %c0_i32_0 : i32, i32
  }
  func.func @transform_3(%arg0: i32, %arg1: i32, %arg2: i32) -> (i32, i32, i32, i32) {
    %c0_i32 = arith.constant 0 : i32
    %c0_i32_0 = arith.constant 0 : i32
    %c0_i32_1 = arith.constant 0 : i32
    return %arg0, %arg1, %c0_i32, %c0_i32_0 : i32, i32, i32, i32
  }
  func.func @transform_4(%arg0: i32, %arg1: i32, %arg2: i32) -> (i32, i32, i32, i32) {
    %c0_i32 = arith.constant 0 : i32
    %c0_i32_0 = arith.constant 0 : i32
    %c0_i32_1 = arith.constant 0 : i32
    return %arg0, %arg1, %c0_i32, %c0_i32_0 : i32, i32, i32, i32
  }
}

module attributes {stable_mosaic.version = 11 : i64} {
  func.func @_conv_tap_kernel(%arg0: i32, %arg1: i32, %arg2: i32, %arg3: memref<1x1x34x8xbf16, #tpu.memory_space<vmem>>, %arg4: memref<1x3x8x8xbf16, #tpu.memory_space<vmem>>, %arg5: memref<1x8xf32, #tpu.memory_space<vmem>>, %arg6: memref<1x1x32x8xf32, #tpu.memory_space<vmem>>, %arg7: memref<32x8xf32, #tpu.memory_space<vmem>>) attributes {dimension_semantics = [#tpu.dimension_semantics<parallel>, #tpu.dimension_semantics<parallel>, #tpu.dimension_semantics<arbitrary>], iteration_bounds = array<i64: 2, 32, 3>, scalar_prefetch = 0 : i64, scratch_operands = 1 : i64, tpu.core_type = #tpu.core_type<tc>, window_params = [{transform_indices = @transform_0, window_bounds = array<i64: 1, 1, 34, 8>}, {transform_indices = @transform_1, window_bounds = array<i64: 1, 3, 8, 8>}, {pipeline_mode = #tpu.pipeline_mode<synchronous>, transform_indices = @transform_2, window_bounds = array<i64: 1, 8>}, {transform_indices = @transform_3, window_bounds = array<i64: 1, 1, 32, 8>}]} {
    %c0_i32 = arith.constant 0 : i32
    %0 = arith.cmpi eq, %arg2, %c0_i32 : i32
    %1 = arith.extui %0 : i1 to i32
    %c0_i32_0 = arith.constant 0 : i32
    %2 = arith.cmpi ne, %1, %c0_i32_0 : i32
    scf.if %2 {
      %cst_15 = arith.constant 0.000000e+00 : f32
      %27 = vector.broadcast %cst_15 : f32 to vector<32x8xf32>
      %c0_16 = arith.constant 0 : index
      %c0_17 = arith.constant 0 : index
      %28 = vector.load %arg7[%c0_16, %c0_17] : memref<32x8xf32, #tpu.memory_space<vmem>>, vector<32x8xf32>
      tpu.vector_store %arg7[%c0_16, %c0_17], %27 {strides = array<i32>} : memref<32x8xf32, #tpu.memory_space<vmem>>, vector<32x8xf32>,
    } else {
    }
    %c0 = arith.constant 0 : index
    %c0_1 = arith.constant 0 : index
    %c0_2 = arith.constant 0 : index
    %c0_3 = arith.constant 0 : index
    %3 = vector.load %arg3[%c0, %c0_1, %c0_2, %c0_3] : memref<1x1x34x8xbf16, #tpu.memory_space<vmem>>, vector<1x1x34x8xbf16>
    %4 = vector.shape_cast %3 : vector<1x1x34x8xbf16> to vector<34x8xbf16>
    %c0_4 = arith.constant 0 : index
    %c0_5 = arith.constant 0 : index
    %c0_6 = arith.constant 0 : index
    %c0_7 = arith.constant 0 : index
    %5 = vector.load %arg4[%c0_4, %c0_5, %c0_6, %c0_7] : memref<1x3x8x8xbf16, #tpu.memory_space<vmem>>, vector<1x3x8x8xbf16>
    %6 = vector.shape_cast %5 : vector<1x3x8x8xbf16> to vector<3x8x8xbf16>
    %c0_8 = arith.constant 0 : index
    %c0_9 = arith.constant 0 : index
    %7 = vector.load %arg7[%c0_8, %c0_9] : memref<32x8xf32, #tpu.memory_space<vmem>>, vector<32x8xf32>
    %8 = vector.extract_strided_slice %4 {offsets = [0, 0], sizes = [32, 8], strides = [1, 1]} : vector<34x8xbf16> to vector<32x8xbf16>
    %9 = vector.extract_strided_slice %6 {offsets = [0, 0, 0], sizes = [1, 8, 8], strides = [1, 1, 1]} : vector<3x8x8xbf16> to vector<1x8x8xbf16>
    %10 = vector.shape_cast %9 : vector<1x8x8xbf16> to vector<8x8xbf16>
    %cst = arith.constant dense<0.000000e+00> : vector<32x8xf32>
    %11 = tpu.matmul %8, %10, %cst {dimension_numbers = #tpu.dot_dimension_numbers<[1], [0], [0], [1], [0, 0, 1, 1], [], []>} : vector<32x8xbf16>, vector<8x8xbf16>, vector<32x8xf32> -> vector<32x8xf32>
    %12 = arith.addf %7, %11 : vector<32x8xf32>
    %13 = vector.extract_strided_slice %4 {offsets = [1, 0], sizes = [32, 8], strides = [1, 1]} : vector<34x8xbf16> to vector<32x8xbf16>
    %14 = vector.extract_strided_slice %6 {offsets = [1, 0, 0], sizes = [1, 8, 8], strides = [1, 1, 1]} : vector<3x8x8xbf16> to vector<1x8x8xbf16>
    %15 = vector.shape_cast %14 : vector<1x8x8xbf16> to vector<8x8xbf16>
    %cst_10 = arith.constant dense<0.000000e+00> : vector<32x8xf32>
    %16 = tpu.matmul %13, %15, %cst_10 {dimension_numbers = #tpu.dot_dimension_numbers<[1], [0], [0], [1], [0, 0, 1, 1], [], []>} : vector<32x8xbf16>, vector<8x8xbf16>, vector<32x8xf32> -> vector<32x8xf32>
    %17 = arith.addf %12, %16 : vector<32x8xf32>
    %18 = vector.extract_strided_slice %4 {offsets = [2, 0], sizes = [32, 8], strides = [1, 1]} : vector<34x8xbf16> to vector<32x8xbf16>
    %19 = vector.extract_strided_slice %6 {offsets = [2, 0, 0], sizes = [1, 8, 8], strides = [1, 1, 1]} : vector<3x8x8xbf16> to vector<1x8x8xbf16>
    %20 = vector.shape_cast %19 : vector<1x8x8xbf16> to vector<8x8xbf16>
    %cst_11 = arith.constant dense<0.000000e+00> : vector<32x8xf32>
    %21 = tpu.matmul %18, %20, %cst_11 {dimension_numbers = #tpu.dot_dimension_numbers<[1], [0], [0], [1], [0, 0, 1, 1], [], []>} : vector<32x8xbf16>, vector<8x8xbf16>, vector<32x8xf32> -> vector<32x8xf32>
    %22 = arith.addf %17, %21 : vector<32x8xf32>
    %c0_12 = arith.constant 0 : index
    %c0_13 = arith.constant 0 : index
    %23 = vector.load %arg7[%c0_12, %c0_13] : memref<32x8xf32, #tpu.memory_space<vmem>>, vector<32x8xf32>
    tpu.vector_store %arg7[%c0_12, %c0_13], %22 {strides = array<i32>} : memref<32x8xf32, #tpu.memory_space<vmem>>, vector<32x8xf32>,
    %c2_i32 = arith.constant 2 : i32
    %24 = arith.cmpi eq, %arg2, %c2_i32 : i32
    %25 = arith.extui %24 : i1 to i32
    %c0_i32_14 = arith.constant 0 : i32
    %26 = arith.cmpi ne, %25, %c0_i32_14 : i32
    scf.if %26 {
      %c0_15 = arith.constant 0 : index
      %c0_16 = arith.constant 0 : index
      %27 = vector.load %arg7[%c0_15, %c0_16] : memref<32x8xf32, #tpu.memory_space<vmem>>, vector<32x8xf32>
      %c0_17 = arith.constant 0 : index
      %c0_18 = arith.constant 0 : index
      %28 = vector.load %arg5[%c0_17, %c0_18] : memref<1x8xf32, #tpu.memory_space<vmem>>, vector<1x8xf32>
      %29 = vector.broadcast %28 : vector<1x8xf32> to vector<32x8xf32>
      %30 = arith.addf %27, %29 : vector<32x8xf32>
      %c0_19 = arith.constant 0 : index
      %c0_20 = arith.constant 0 : index
      %c0_21 = arith.constant 0 : index
      %c0_22 = arith.constant 0 : index
      %31 = vector.load %arg6[%c0_19, %c0_20, %c0_21, %c0_22] : memref<1x1x32x8xf32, #tpu.memory_space<vmem>>, vector<1x1x32x8xf32>
      %32 = vector.shape_cast %31 : vector<1x1x32x8xf32> to vector<32x8xf32>
      %33 = vector.shape_cast %30 : vector<32x8xf32> to vector<1x1x32x8xf32>
      tpu.vector_store %arg6[%c0_19, %c0_20, %c0_21, %c0_22], %33 {strides = array<i32>} : memref<1x1x32x8xf32, #tpu.memory_space<vmem>>, vector<1x1x32x8xf32>,
    } else {
    }
    return
  }
  func.func @transform_0(%arg0: i32, %arg1: i32, %arg2: i32) -> (i32, i32, i32, i32) {
    %0 = arith.addi %arg1, %arg2 : i32
    %c0_i32 = arith.constant 0 : i32
    %c0_i32_0 = arith.constant 0 : i32
    %c0_i32_1 = arith.constant 0 : i32
    return %arg0, %0, %c0_i32, %c0_i32_0 : i32, i32, i32, i32
  }
  func.func @transform_1(%arg0: i32, %arg1: i32, %arg2: i32) -> (i32, i32, i32, i32) {
    %c0_i32 = arith.constant 0 : i32
    %c0_i32_0 = arith.constant 0 : i32
    %c0_i32_1 = arith.constant 0 : i32
    %c0_i32_2 = arith.constant 0 : i32
    return %arg2, %c0_i32, %c0_i32_0, %c0_i32_1 : i32, i32, i32, i32
  }
  func.func @transform_2(%arg0: i32, %arg1: i32, %arg2: i32) -> (i32, i32) {
    %c0_i32 = arith.constant 0 : i32
    %c0_i32_0 = arith.constant 0 : i32
    %c0_i32_1 = arith.constant 0 : i32
    return %c0_i32, %c0_i32_0 : i32, i32
  }
  func.func @transform_3(%arg0: i32, %arg1: i32, %arg2: i32) -> (i32, i32, i32, i32) {
    %c0_i32 = arith.constant 0 : i32
    %c0_i32_0 = arith.constant 0 : i32
    %c0_i32_1 = arith.constant 0 : i32
    return %arg0, %arg1, %c0_i32, %c0_i32_0 : i32, i32, i32, i32
  }
}

</mosaic_0001>

<bundles_post_ra>
// kernel: upsample_forward.10
= control target key start
LH: loop header
LB: loop body
LE: loop exit
PB: predicated region body
PF: predicated region fallthrough
CT: control target
= control target key end

     0   :  { %s835_s12 = smov 0   ;;  %s837_s13 = smov 0   ;;  %s958_s0 = inlined_call_operand.vmem [shape: bf16[2,34,34,4], index: 0, kind: input, shape index: {}]   ;;  %s959_s1 = inlined_call_operand.vmem [shape: bf16[3,3,4,4], index: 1, kind: input, shape index: {}]   ;;  %s960_s2 = inlined_call_operand.vmem [shape: f32[1,4], index: 2, kind: input, shape index: {}]   ;;  %s961_s3 = inlined_call_operand.vmem [shape: f32[2,32,32,4], index: 3, kind: output, shape index: {}]  }
   0x1   :  { %s839_s14 = smov 0   ;;  %s841_s15 = smov 0  }
   0x2   :  { %s843_s16 = smov 0   ;;  %s845_s17 = smov 0  }
   0x3   :  { %s847_s18 = smov 0  }
   0x4 LB: > { %s25_s19 = sadd.s32 1, %s800_s15  ;;  %s28_s20 = sadd.s32 1, %s804_s16  ;;  %s812_s18 = sphi %s847_s18, %s13_s18   ;;  %s808_s17 = sphi %s845_s17, %s967_s17   ;;  %s804_s16 = sphi %s843_s16, %s966_s16   ;;  %s800_s15 = sphi %s841_s15, %s965_s15   ;;  %s796_s14 = sphi %s839_s14, %s964_s14   ;;  %s792_s13 = sphi %s837_s13, %s963_s13   ;;  %s788_s12 = sphi %s835_s12, %s962_s12  }
   0x5   : > { %p26_p0 = scmp.ge.s32.totalorder %s25_s19, 3  ;;  %p633_p1 = scmp.ge.s32.totalorder %s812_s18, 1 }
   0x6   : > { %p178_p2 = scmp.lt.s32.totalorder %s812_s18, 193  ;;  %s32_s21 = sadd.s32 1, %s808_s17 }
   0x7   : > { %s969_s19 = smov (%p26_p0, %s25_s19), 0  ;;  %s971_s20 = smov (!%p26_p0, %s28_s20), %s804_s16 }
   0x8   : > { %p179_p3 = pnand %p633_p1, %p178_p2  ;;  %p30_p4 = scmp.ge.s32.totalorder %s971_s20, 32 }
   0x9   : > { %s216_s22 = sadd.s32 (!%p179_p3), %s788_s12, %s792_s13  ;;  %p217_p6 = scmp.lt.s32.totalorder (!%p179_p3), %s796_s14, 1 }
   0xa   : > { %s973_s20 = smov (%p30_p4, %s971_s20), 0  ;;  %s975_s21 = smov (!%p30_p4, %s32_s21), %s808_s17 }
   0xb   : > { %p34_p5 = scmp.ge.s32.totalorder %s975_s21, 2  ;;  %182 = sbr.rel (%p179_p3) target bundleno = 283 (0x11b), region = 32 }
   0xc   : > { %p219_p7 = scmp.lt.s32.totalorder (!%p179_p3), %s216_s22, 33  ;;  %p227_p8 = scmp.lt.s32.totalorder (!%p179_p3), %s788_s12, 2 }
   0xd   : > { %s977_s21 = smov (%p34_p5, %s975_s21), 0  ;;  %p234_p9 = scmp.lt.s32.totalorder (!%p179_p3), %s792_s13, 31 }
   0xe   : > { %p639_p10 = scmp.ne.s32.totalorder (!%p179_p3), %s788_s12, 0 }
  0x12   : > { %s979_s14 = smov (!%p217_p6, %s796_s14), 1  ;;  %s981_s22 = smov (!%p219_p7, %s216_s22), 33 }
  0x13   : > { %s696_s23 = smul.u32 170, %s979_s14  ;;  %s637_s8 = sshll.u32 %s979_s14, 7  ;;  %vm246_vm0 = vcmask (!%p639_p10), 31744   ;;  %v814_v0 = vmov (!%p639_p10), 0.0  }
  0x14   : > { %s695_s24 = smul.u32 5, %s981_s22  ;;  %s983_s13 = smov (!%p234_p9, %s792_s13), 31  ;;  %247 = vst.msk [vmem:[#allocation2] sm:$0xff] (!%p639_p10), %vm246_vm0, %v814_v0  ;;  %248 = vst.msk [vmem:[#allocation2 + $0x8] sm:$0xff] (!%p639_p10), %vm246_vm0, %v814_v0 }
  0x15   : > { %s228_s25 = scalar_select %p227_p8, %s788_s12, 2 }
  0x16   : > { %s223_s26 = sadd.s32 %s696_s23, %s695_s24  ;;  %s636_s9 = sshll.u32 %s983_s13, 2  ;;  %249 = vst.msk [vmem:[#allocation2 + $0x10] sm:$0xff] (!%p639_p10), %vm246_vm0, %v814_v0  ;;  %250 = vst.msk [vmem:[#allocation2 + $0x18] sm:$0xff] (!%p639_p10), %vm246_vm0, %v814_v0 }
  0x17   : > { %s634_s27 = sshll.u32 %s223_s26, 2  ;;  %s697_s28 = smul.u32 6, %s228_s25 }
  0x18   : > { %s889_s4 = scalar_lea.vmem %s958_s0, %s634_s27  ;;  %s238_s10 = sadd.s32 %s637_s8, %s636_s9 }
  0x19   : > { %s894_s7 = scalar_lea.vmem %s959_s1, %s697_s28  ;;  %s638_s11 = sshll.u32 %s238_s10, 3 }
  0x1a   : > { %s900_s24 = scalar_lea.vmem %s961_s3, %s638_s11  ;;  %245 = sbr.rel (%p639_p10) target bundleno = 33 (0x21), region = 36 }
  0x21 PF: > { %v257_v1 = vld [vmem:[%s894_s7 + $0x2] sm:$0x3]  ;;  %vm280_vm1 = vcmask 1041408   ;;  %v756_v4 = vld [vmem:[%s889_s4 + $0x8] sm:$0xff]   ;;  %vm273_vm2 = vcmask 31744   ;;  %vm421_vm4 = vcmask 1046528  }
  0x22   : > { %v755_v2 = vld [vmem:[%s889_s4] sm:$0xff]   ;;  %693 = vmatprep.subr.msk.bf16.mxu0 %vm280_vm1, %v257_v1  ;;  %v366_v3 = vsel %vm280_vm1, %v257_v1, 0  ;;  %v347_v7 = vshll.u32 %v756_v4, 16  ;;  %v351_v8 = vshrl.u32 %v756_v4, 16  ;;  %v423_v15 = vrot.slane %v756_v4, 1  ;;  %v261_v31 = vld [vmem:[#allocation2 + $0x10] sm:$0xff] }
  0x23   : > { %669 = vmatpush3.bf16.msra.mxu0 %v366_v3  ;;  %v341_v5 = vshrl.u32 %v755_v2, 16  ;;  %v343_v6 = vshll.u32 %v755_v2, 16  ;;  %v258_v9 = vld [vmem:[%s894_s7 + $0x4] sm:$0x3]  ;;  %664 = vmatprep.mubr.msk.bf16.mxu1 %vm273_vm2, %v755_v2  ;;  %v256_v13 = vld [vmem:[%s894_s7] sm:$0x3] }
  0x24   : > { %694 = vmatprep.subr.msk.bf16.mxu0 %vm280_vm1, %v258_v9  ;;  %v757_v10 = vld [vmem:[%s889_s4 + $0x10] ss:$0 sps:$4 sm:$0x11]   ;;  %v349_v12 = vrot.slane %v347_v7, 1  ;;  %v422_v14 = vrot.slane %v755_v2, 1  ;;  %692 = vmatprep.subr.msk.bf16.mxu1 %vm280_vm1, %v256_v13  ;;  %v282_v17 = vsel %vm280_vm1, %v256_v13, 0 }
  0x25   : > { %v345_v11 = vrot.slane %v343_v6, 1  ;;  %vm340_vm3 = vsmask.f32 7424  ;;  %v355_v16 = vshll.u32 %v757_v10, 16  ;;  %663 = vmatpush3.bf16.msra.mxu1 %v282_v17  ;;  %v434_v22 = vsel %vm280_vm1, %v258_v9, 0  ;;  %v259_v32 = vld [vmem:[#allocation2] sm:$0xff] }
  0x26   : > { %v353_v19 = vor.u32 %v351_v8, %v349_v12  ;;  %v424_v23 = vsel %vm421_vm4, %v422_v14, %v423_v15  ;;  %v425_v25 = vrot.slane %v757_v10, 1  ;;  %v262_v35 = vld [vmem:[#allocation2 + $0x18] sm:$0xff]  ;;  %v260_v36 = vld [vmem:[#allocation2 + $0x8] sm:$0xff]  ;;  %p649_p11 = scmp.ne.s32.totalorder %s788_s12, 2 }
  0x27   : > { %v346_v18 = vor.u32 %v345_v11, %v341_v5  ;;  %v357_v20 = vrot.slane %v355_v16, 1  ;;  %v650_v48 = vld [vmem:[%s960_s2] ss:$0 sm:$0xff] (!%p649_p11) }
  0x28   : > { %665 = vmatmul.mubr.msk.bf16.vlgmr.msra.gmra.mrb[0].mxu1 %vm273_vm2, %v756_v4  ;;  %v426_v26 = vsel %vm421_vm4, %v423_v15, %v425_v25 }
  0x29   : > { %v350_v21 = vsel %vm340_vm3, %v346_v18, %v349_v12  ;;  %v358_v24 = vsel %vm340_vm3, %v353_v19, %v357_v20 }
  0x2a   : > { %670 = vmatprep.mubr.msk.bf16.mxu0 %vm273_vm2, %v350_v21 }
  0x2b   : > { %671 = vmatmul.mubr.msk.bf16.vlgmr.msra.gmra.mrb[0].mxu0 %vm273_vm2, %v358_v24 }
  0x2c   : > { %675 = vmatpush3.bf16.msra.mxu0 %v434_v22  ;;  %676 = vmatprep.mubr.msk.bf16.mxu0 %vm273_vm2, %v424_v23 }
  0x37   : > { %677 = vmatmul.mubr.msk.bf16.vlgmr.msra.gmra.mrb[0].mxu0 %vm273_vm2, %v426_v26 }
  0xfb   : > { %v666_v27 = vpop.f32.mrb[0].mxu1 }
  0xfc   : > { %v318_v28 = vpop.f32.mrb[1].mxu1  ;;  %v335_v33 = vadd.f32 %v666_v27, %v261_v31 }
  0xfd   : > { %v667_v29 = vpop.f32.mrb[2].mxu1  ;;  %v333_v34 = vadd.f32 %v318_v28, %v259_v32 }
  0xfe   : > { %v321_v30 = vpop.f32.mrb[3].mxu1  ;;  %v336_v38 = vadd.f32 %v667_v29, %v262_v35 }
  0xff   : > { %v334_v41 = vadd.f32 %v321_v30, %v260_v36 }
 0x10a   : > { %v678_v37 = vpop.f32.mrb[0].mxu0  ;;  %496 = sbr.rel (%p649_p11) target bundleno = 283 (0x11b), region = 40 }
 0x10b   : > { %v681_v39 = vadd.f32 %v678_v37, %v335_v33  ;;  %v470_v40 = vpop.f32.mrb[1].mxu0 }
 0x10c   : > { %v683_v42 = vadd.f32 %v470_v40, %v333_v34  ;;  %v679_v43 = vpop.f32.mrb[2].mxu0 }
 0x10d   : > { %491 = vst.msk [vmem:[#allocation2 + $0x10] sm:$0xff] %vm273_vm2, %v681_v39  ;;  %v685_v44 = vadd.f32 %v679_v43, %v336_v38  ;;  %v473_v45 = vpop.f32.mrb[3].mxu0 }
 0x10e   : > { %489 = vst.msk [vmem:[#allocation2] sm:$0xff] %vm273_vm2, %v683_v42  ;;  %v687_v46 = vadd.f32 %v473_v45, %v334_v41 }
 0x10f   : > { %492 = vst.msk [vmem:[#allocation2 + $0x18] sm:$0xff] %vm273_vm2, %v685_v44 }
 0x110   : > { %490 = vst.msk [vmem:[#allocation2 + $0x8] sm:$0xff] %vm273_vm2, %v687_v46 }
 0x114   : > { %v499_v52 = vld [vmem:[#allocation2 + $0x10] sm:$0xff] }
 0x115   : > { %v497_v47 = vld [vmem:[#allocation2] sm:$0xff]  ;;  %v510_v54 = vadd.f32 %v650_v48, %v499_v52 }
 0x116   : > { %v508_v50 = vadd.f32 %v650_v48, %v497_v47  ;;  %v500_v53 = vld [vmem:[#allocation2 + $0x18] sm:$0xff] }
 0x117   : > { %v498_v49 = vld [vmem:[#allocation2 + $0x8] sm:$0xff]  ;;  %v511_v55 = vadd.f32 %v650_v48, %v500_v53  ;;  %514 = vst.msk [vmem:[%s900_s24 + $0x10] sm:$0xff] %vm273_vm2, %v510_v54 }
 0x118   : > { %v509_v51 = vadd.f32 %v650_v48, %v498_v49  ;;  %512 = vst.msk [vmem:[%s900_s24] sm:$0xff] %vm273_vm2, %v508_v50 }
 0x119   : > { %515 = vst.msk [vmem:[%s900_s24 + $0x18] sm:$0xff] %vm273_vm2, %v511_v55 }
 0x11a   : > { %513 = vst.msk [vmem:[%s900_s24 + $0x8] sm:$0xff] %vm273_vm2, %v509_v51 }
 0x11b PF: > { %s13_s18 = sadd.s32 1, %s812_s18   ;;  %s962_s12 = smov %s800_s15 }
 0x11c   : > { %p10_p12 = scmp.ge.s32.totalorder %s13_s18, 194   ;;  %s963_s13 = smov %s804_s16 }
 0x11d   : > { %s964_s14 = smov %s808_s17  ;;  %s965_s15 = smov %s969_s19 }
 0x11e   : > { %s966_s16 = smov %s973_s20  ;;  %s967_s17 = smov %s977_s21 }
 0x11f   :  { %12 = sbr.rel (!%p10_p12) target bundleno = 4 (0x4), region = 73 }

// kernel: upsample_forward.12
= control target key start
LH: loop header
LB: loop body
LE: loop exit
PB: predicated region body
PF: predicated region fallthrough
CT: control target
= control target key end

     0   :  { %s3282_s15 = smov 0   ;;  %s6285_s0 = inlined_call_operand.vmem [shape: f32[2,1024,4], index: 0, kind: input, shape index: {}]   ;;  %s6286_s1 = inlined_call_operand.vmem [shape: f32[1,4], index: 1, kind: input, shape index: {}]   ;;  %s6287_s2 = inlined_call_operand.vmem [shape: f32[1,4], index: 2, kind: input, shape index: {}]   ;;  %s6288_s3 = inlined_call_operand.vmem [shape: f32[4,4], index: 3, kind: input, shape index: {}]   ;;  %s6289_s4 = inlined_call_operand.vmem [shape: f32[2,1024,4], index: 4, kind: output, shape index: {}]  }
   0x1 LB: > { %s2486_s16 = sadd.s32 4294967295, %s3253_s15   ;;  %p2490_p0 = scmp.ge.s32.totalorder %s3253_s15, 1  ;;  %s3253_s15 = sphi %s3282_s15, %s14_s15  }
   0x2   : > { %p162_p1 = scmp.lt.s32.totalorder %s3253_s15, 3 }
   0x4   : > { %p163_p2 = pnand %p2490_p0, %p162_p1 }
   0x6   : > { %166 = sbr.rel (%p163_p2) target bundleno = 961 (0x3c1), region = 36 }
   0xd   : > { %p188_p3 = scmp.lt.s32.totalorder %s2486_s16, 1  ;;  %vm326_vm0 = vcmask 31744   ;;  %vm981_vm1 = vcmask 1043456   ;;  %vm3256_vm2 = vmmov 0  }
   0xf   : > { %s7093_s16 = smov (!%p188_p3, %s2486_s16), 1 }
  0x10   : > { %s2629_s17 = sshll.u32 %s7093_s16, 10 }
  0x11   : > { %s3298_s20 = scalar_lea.vmem %s6285_s0, %s2629_s17  ;;  %s5782_s29 = scalar_lea.vmem %s6289_s4, %s2629_s17 }
  0x12   : > { %v3301_v0 = vld [vmem:[%s3298_s20] sm:$0xff]  ;;  %v3304_v1 = vld [vmem:[%s3298_s20 + $0x8] sm:$0xff]  ;;  %v3307_v2 = vld [vmem:[%s3298_s20 + $0x10] sm:$0xff] }
  0x13   : > { %v3310_v3 = vld [vmem:[%s3298_s20 + $0x18] sm:$0xff]  ;;  %v327_v4 = vsel %vm326_vm0, %v3301_v0, 0.0  ;;  %v328_v5 = vsel %vm326_vm0, %v3304_v1, 0.0  ;;  %v330_v6 = vsel %vm326_vm0, %v3307_v2, 0.0  ;;  %v3319_v7 = vld [vmem:[%s3298_s20 + $0x20] sm:$0xff]  ;;  %v3324_v10 = vld [vmem:[%s3298_s20 + $0x28] sm:$0xff] }
  0x14   : > { %v329_v8 = vadd.f32 %v328_v5, %v327_v4  ;;  %v332_v9 = vsel %vm326_vm0, %v3310_v3, 0.0  ;;  %v334_v12 = vsel %vm326_vm0, %v3319_v7, 0.0  ;;  %v3329_v13 = vld [vmem:[%s3298_s20 + $0x30] sm:$0xff]  ;;  %v336_v15 = vsel %vm326_vm0, %v3324_v10, 0.0  ;;  %v3334_v16 = vld [vmem:[%s3298_s20 + $0x38] sm:$0xff]  ;;  %v3339_v19 = vld [vmem:[%s3298_s20 + $0x40] sm:$0xff] }
  0x15   : > { %v338_v18 = vsel %vm326_vm0, %v3329_v13, 0.0  ;;  %v340_v21 = vsel %vm326_vm0, %v3334_v16, 0.0  ;;  %v3344_v22 = vld [vmem:[%s3298_s20 + $0x48] sm:$0xff]  ;;  %v342_v24 = vsel %vm326_vm0, %v3339_v19, 0.0  ;;  %v3349_v25 = vld [vmem:[%s3298_s20 + $0x50] sm:$0xff]  ;;  %v3354_v28 = vld [vmem:[%s3298_s20 + $0x58] sm:$0xff] }
  0x16   : > { %v331_v11 = vadd.f32 %v330_v6, %v329_v8  ;;  %v344_v27 = vsel %vm326_vm0, %v3344_v22, 0.0  ;;  %v346_v30 = vsel %vm326_vm0, %v3349_v25, 0.0  ;;  %v3359_v31 = vld [vmem:[%s3298_s20 + $0x60] sm:$0xff]  ;;  %v348_v33 = vsel %vm326_vm0, %v3354_v28, 0.0  ;;  %v3364_v34 = vld [vmem:[%s3298_s20 + $0x68] sm:$0xff]  ;;  %v3369_v37 = vld [vmem:[%s3298_s20 + $0x70] sm:$0xff] }
  0x17   : > { %v350_v36 = vsel %vm326_vm0, %v3359_v31, 0.0  ;;  %v352_v39 = vsel %vm326_vm0, %v3364_v34, 0.0  ;;  %v3374_v40 = vld [vmem:[%s3298_s20 + $0x78] sm:$0xff]  ;;  %v354_v42 = vsel %vm326_vm0, %v3369_v37, 0.0  ;;  %v3379_v43 = vld [vmem:[%s3298_s20 + $0x80] sm:$0xff]  ;;  %v3384_v46 = vld [vmem:[%s3298_s20 + $0x88] sm:$0xff] }
  0x18   : > { %v333_v14 = vadd.f32 %v332_v9, %v331_v11  ;;  %v356_v45 = vsel %vm326_vm0, %v3374_v40, 0.0  ;;  %v358_v48 = vsel %vm326_vm0, %v3379_v43, 0.0  ;;  %v3389_v49 = vld [vmem:[%s3298_s20 + $0x90] sm:$0xff]  ;;  %v360_v51 = vsel %vm326_vm0, %v3384_v46, 0.0  ;;  %v3394_v52 = vld [vmem:[%s3298_s20 + $0x98] sm:$0xff]  ;;  %v3399_v55 = vld [vmem:[%s3298_s20 + $0xa0] sm:$0xff] }
  0x19   : > { %v362_v54 = vsel %vm326_vm0, %v3389_v49, 0.0  ;;  %v364_v57 = vsel %vm326_vm0, %v3394_v52, 0.0  ;;  %v3404_v58 = vld [vmem:[%s3298_s20 + $0xa8] sm:$0xff]  ;;  %v366_v60 = vsel %vm326_vm0, %v3399_v55, 0.0  ;;  %v3409_v61 = vld [vmem:[%s3298_s20 + $0xb0] sm:$0xff]  ;;  %v3414_v4 = vld [vmem:[%s3298_s20 + $0xb8] sm:$0xff] }
  0x1a   : > { %v335_v17 = vadd.f32 %v334_v12, %v333_v14  ;;  %v368_v63 = vsel %vm326_vm0, %v3404_v58, 0.0  ;;  %v370_v6 = vsel %vm326_vm0, %v3409_v61, 0.0  ;;  %v3419_v8 = vld [vmem:[%s3298_s20 + $0xc0] sm:$0xff]  ;;  %v372_v11 = vsel %vm326_vm0, %v3414_v4, 0.0  ;;  %v3424_v12 = vld [vmem:[%s3298_s20 + $0xc8] sm:$0xff] }
  0x1c   : > { %v337_v20 = vadd.f32 %v336_v15, %v335_v17  ;;  %v374_v15 = vsel %vm326_vm0, %v3419_v8, 0.0  ;;  %v3429_v17 = vld [vmem:[%s3298_s20 + $0xd0] sm:$0xff] }
  0x1e   : > { %v339_v23 = vadd.f32 %v338_v18, %v337_v20  ;;  %v376_v20 = vsel %vm326_vm0, %v3424_v12, 0.0 }
  0x20   : > { %v341_v26 = vadd.f32 %v340_v21, %v339_v23  ;;  %v3434_v21 = vld [vmem:[%s3298_s20 + $0xd8] sm:$0xff] }
  0x22   : > { %v343_v29 = vadd.f32 %v342_v24, %v341_v26  ;;  %v378_v24 = vsel %vm326_vm0, %v3429_v17, 0.0  ;;  %v588_v26 = vmul.f32 %v3301_v0, %v3301_v0  ;;  %v592_v0 = vmul.f32 %v3319_v7, %v3319_v7 }
  0x23   : > { %v593_v7 = vmul.f32 %v3324_v10, %v3324_v10 }
  0x24   : > { %v345_v32 = vadd.f32 %v344_v27, %v343_v29  ;;  %v589_v27 = vmul.f32 %v3304_v1, %v3304_v1  ;;  %v590_v29 = vmul.f32 %v3307_v2, %v3307_v2  ;;  %v716_v2 = vsel %vm326_vm0, %v588_v26, 0.0  ;;  %v3502_v26 = vld [vmem:[%s3298_s20 + $0x118] sm:$0xff] }
  0x26   : > { %v347_v35 = vadd.f32 %v346_v30, %v345_v32  ;;  %v3445_v30 = vld [vmem:[%s3298_s20 + $0xe0] sm:$0xff] }
  0x27   : > { %v382_v1 = vsel %vm326_vm0, %v3445_v30, 0.0 }
  0x28   : > { %v349_v38 = vadd.f32 %v348_v33, %v347_v35  ;;  %v380_v33 = vsel %vm326_vm0, %v3434_v21, 0.0  ;;  %v591_v35 = vmul.f32 %v3310_v3, %v3310_v3 }
  0x2a   : > { %v351_v41 = vadd.f32 %v350_v36, %v349_v38  ;;  %v3452_v36 = vld [vmem:[%s3298_s20 + $0xe8] sm:$0xff] }
  0x2c   : > { %v353_v44 = vadd.f32 %v352_v39, %v351_v41  ;;  %v717_v39 = vsel %vm326_vm0, %v589_v27, 0.0  ;;  %v719_v41 = vsel %vm326_vm0, %v590_v29, 0.0 }
  0x2d   : > { %v718_v3 = vadd.f32 %v717_v39, %v716_v2  ;;  %v3518_v39 = vld [vmem:[%s3298_s20 + $0x128] sm:$0xff] }
  0x2e   : > { %v355_v47 = vadd.f32 %v354_v42, %v353_v44  ;;  %v3462_v42 = vld [vmem:[%s3298_s20 + $0xf0] sm:$0xff] }
  0x30   : > { %v357_v50 = vadd.f32 %v356_v45, %v355_v47  ;;  %v384_v45 = vsel %vm326_vm0, %v3452_v36, 0.0  ;;  %v721_v47 = vsel %vm326_vm0, %v591_v35, 0.0  ;;  %v3510_v35 = vld [vmem:[%s3298_s20 + $0x120] sm:$0xff] }
  0x32   : > { %v359_v53 = vadd.f32 %v358_v48, %v357_v50  ;;  %v3470_v48 = vld [vmem:[%s3298_s20 + $0xf8] sm:$0xff] }
  0x33   : > { %v388_v10 = vsel %vm326_vm0, %v3470_v48, 0.0 }
  0x34   : > { %v361_v56 = vadd.f32 %v360_v51, %v359_v53  ;;  %v720_v51 = vadd.f32 %v719_v41, %v718_v3  ;;  %v386_v53 = vsel %vm326_vm0, %v3462_v42, 0.0  ;;  %v600_v3 = vmul.f32 %v3359_v31, %v3359_v31 }
  0x36   : > { %v363_v59 = vadd.f32 %v362_v54, %v361_v56  ;;  %v594_v54 = vmul.f32 %v3329_v13, %v3329_v13  ;;  %v723_v56 = vsel %vm326_vm0, %v592_v0, 0.0 }
  0x38   : > { %v365_v62 = vadd.f32 %v364_v57, %v363_v59  ;;  %v3478_v57 = vld [vmem:[%s3298_s20 + $0x100] sm:$0xff] }
  0x39   : > { %v390_v13 = vsel %vm326_vm0, %v3478_v57, 0.0 }
  0x3a   : > { %v367_v5 = vadd.f32 %v366_v60, %v365_v62  ;;  %v722_v60 = vadd.f32 %v721_v47, %v720_v51  ;;  %v595_v62 = vmul.f32 %v3334_v16, %v3334_v16  ;;  %v601_v51 = vmul.f32 %v3364_v34, %v3364_v34 }
  0x3c   : > { %v369_v9 = vadd.f32 %v368_v63, %v367_v5  ;;  %v725_v63 = vsel %vm326_vm0, %v593_v7, 0.0  ;;  %v3486_v5 = vld [vmem:[%s3298_s20 + $0x108] sm:$0xff]  ;;  %v3526_v7 = vld [vmem:[%s3298_s20 + $0x130] sm:$0xff] }
  0x3d   : > { %v392_v16 = vsel %vm326_vm0, %v3486_v5, 0.0  ;;  %v402_v31 = vsel %vm326_vm0, %v3526_v7, 0.0 }
  0x3e   : > { %v371_v14 = vadd.f32 %v370_v6, %v369_v9  ;;  %v724_v9 = vadd.f32 %v723_v56, %v722_v60  ;;  %v602_v60 = vmul.f32 %v3369_v37, %v3369_v37 }
  0x40   : > { %v373_v18 = vadd.f32 %v372_v11, %v371_v14  ;;  %v596_v11 = vmul.f32 %v3339_v19, %v3339_v19  ;;  %v727_v14 = vsel %vm326_vm0, %v594_v54, 0.0  ;;  %v3534_v54 = vld [vmem:[%s3298_s20 + $0x138] sm:$0xff] }
  0x41   : > { %v404_v34 = vsel %vm326_vm0, %v3534_v54, 0.0 }
  0x42   : > { %v375_v23 = vadd.f32 %v374_v15, %v373_v18  ;;  %v3494_v15 = vld [vmem:[%s3298_s20 + $0x110] sm:$0xff] }
  0x43   : > { %v394_v19 = vsel %vm326_vm0, %v3494_v15, 0.0 }
  0x44   : > { %v377_v32 = vadd.f32 %v376_v20, %v375_v23  ;;  %v726_v20 = vadd.f32 %v725_v63, %v724_v9  ;;  %v597_v23 = vmul.f32 %v3344_v22, %v3344_v22  ;;  %v396_v22 = vsel %vm326_vm0, %v3502_v26, 0.0 }
  0x45   : > { %v603_v9 = vmul.f32 %v3374_v40, %v3374_v40 }
  0x46   : > { %v379_v38 = vadd.f32 %v378_v24, %v377_v32  ;;  %v729_v24 = vsel %vm326_vm0, %v595_v62, 0.0  ;;  %v728_v29 = vadd.f32 %v727_v14, %v726_v20  ;;  %v598_v32 = vmul.f32 %v3349_v25, %v3349_v25  ;;  %v3542_v62 = vld [vmem:[%s3298_s20 + $0x140] sm:$0xff] }
  0x47   : > { %v733_v2 = vsel %vm326_vm0, %v597_v23, 0.0  ;;  %v398_v25 = vsel %vm326_vm0, %v3510_v35, 0.0  ;;  %v406_v37 = vsel %vm326_vm0, %v3542_v62, 0.0  ;;  %v604_v20 = vmul.f32 %v3379_v43, %v3379_v43  ;;  %v3558_v23 = vld [vmem:[%s3298_s20 + $0x150] sm:$0xff] }
  0x48   : > { %v381_v44 = vadd.f32 %v380_v33, %v379_v38  ;;  %v731_v33 = vsel %vm326_vm0, %v596_v11, 0.0  ;;  %v730_v0 = vadd.f32 %v729_v24, %v728_v29  ;;  %v3550_v11 = vld [vmem:[%s3298_s20 + $0x148] sm:$0xff]  ;;  %v605_v29 = vmul.f32 %v3384_v46, %v3384_v46 }
  0x49   : > { %v408_v40 = vsel %vm326_vm0, %v3550_v11, 0.0  ;;  %v410_v43 = vsel %vm326_vm0, %v3558_v23, 0.0 }
  0x4a   : > { %v383_v50 = vadd.f32 %v382_v1, %v381_v44  ;;  %v599_v1 = vmul.f32 %v3354_v28, %v3354_v28  ;;  %v732_v44 = vadd.f32 %v731_v33, %v730_v0  ;;  %v400_v28 = vsel %vm326_vm0, %v3518_v39, 0.0 }
  0x4b   : > { %v606_v0 = vmul.f32 %v3389_v49, %v3389_v49 }
  0x4c   : > { %v385_v59 = vadd.f32 %v384_v45, %v383_v50  ;;  %v735_v45 = vsel %vm326_vm0, %v598_v32, 0.0  ;;  %v734_v50 = vadd.f32 %v733_v2, %v732_v44  ;;  %v3566_v32 = vld [vmem:[%s3298_s20 + $0x158] sm:$0xff]  ;;  %v607_v44 = vmul.f32 %v3394_v52, %v3394_v52 }
  0x4d   : > { %v412_v46 = vsel %vm326_vm0, %v3566_v32, 0.0 }
  0x4e   : > { %v387_v6 = vadd.f32 %v386_v53, %v385_v59  ;;  %v737_v53 = vsel %vm326_vm0, %v599_v1, 0.0  ;;  %v736_v59 = vadd.f32 %v735_v45, %v734_v50  ;;  %v3574_v1 = vld [vmem:[%s3298_s20 + $0x160] sm:$0xff]  ;;  %v608_v50 = vmul.f32 %v3399_v55, %v3399_v55 }
  0x4f   : > { %v414_v49 = vsel %vm326_vm0, %v3574_v1, 0.0 }
  0x50   : > { %v389_v18 = vadd.f32 %v388_v10, %v387_v6  ;;  %v739_v10 = vsel %vm326_vm0, %v600_v3, 0.0  ;;  %v738_v6 = vadd.f32 %v737_v53, %v736_v59  ;;  %v3582_v3 = vld [vmem:[%s3298_s20 + $0x168] sm:$0xff]  ;;  %v609_v59 = vmul.f32 %v3404_v58, %v3404_v58 }
  0x51   : > { %v416_v52 = vsel %vm326_vm0, %v3582_v3, 0.0 }
  0x52   : > { %v391_v27 = vadd.f32 %v390_v13, %v389_v18  ;;  %v741_v13 = vsel %vm326_vm0, %v601_v51, 0.0  ;;  %v740_v18 = vadd.f32 %v739_v10, %v738_v6  ;;  %v3590_v51 = vld [vmem:[%s3298_s20 + $0x170] sm:$0xff]  ;;  %v610_v6 = vmul.f32 %v3409_v61, %v3409_v61 }
  0x53   : > { %v418_v55 = vsel %vm326_vm0, %v3590_v51, 0.0 }
  0x54   : > { %v393_v38 = vadd.f32 %v392_v16, %v391_v27  ;;  %v743_v16 = vsel %vm326_vm0, %v602_v60, 0.0  ;;  %v742_v27 = vadd.f32 %v741_v13, %v740_v18  ;;  %v3598_v60 = vld [vmem:[%s3298_s20 + $0x178] sm:$0xff]  ;;  %v611_v18 = vmul.f32 %v3414_v4, %v3414_v4 }
  0x55   : > { %v420_v58 = vsel %vm326_vm0, %v3598_v60, 0.0 }
  0x56   : > { %v395_v41 = vadd.f32 %v394_v19, %v393_v38  ;;  %v745_v19 = vsel %vm326_vm0, %v603_v9, 0.0  ;;  %v744_v38 = vadd.f32 %v743_v16, %v742_v27  ;;  %v3606_v9 = vld [vmem:[%s3298_s20 + $0x180] sm:$0xff]  ;;  %v612_v27 = vmul.f32 %v3419_v8, %v3419_v8 }
  0x57   : > { %v422_v61 = vsel %vm326_vm0, %v3606_v9, 0.0 }
  0x58   : > { %v397_v47 = vadd.f32 %v396_v22, %v395_v41  ;;  %v747_v22 = vsel %vm326_vm0, %v604_v20, 0.0  ;;  %v746_v41 = vadd.f32 %v745_v19, %v744_v38  ;;  %v3614_v20 = vld [vmem:[%s3298_s20 + $0x188] sm:$0xff]  ;;  %v613_v38 = vmul.f32 %v3424_v12, %v3424_v12 }
  0x59   : > { %v424_v4 = vsel %vm326_vm0, %v3614_v20, 0.0 }
  0x5a   : > { %v399_v56 = vadd.f32 %v398_v25, %v397_v47  ;;  %v749_v25 = vsel %vm326_vm0, %v605_v29, 0.0  ;;  %v748_v47 = vadd.f32 %v747_v22, %v746_v41  ;;  %v3622_v29 = vld [vmem:[%s3298_s20 + $0x190] sm:$0xff]  ;;  %v614_v41 = vmul.f32 %v3429_v17, %v3429_v17 }
  0x5b   : > { %v426_v8 = vsel %vm326_vm0, %v3622_v29, 0.0 }
  0x5c   : > { %v401_v63 = vadd.f32 %v400_v28, %v399_v56  ;;  %v751_v28 = vsel %vm326_vm0, %v606_v0, 0.0  ;;  %v750_v56 = vadd.f32 %v749_v25, %v748_v47  ;;  %v3630_v0 = vld [vmem:[%s3298_s20 + $0x198] sm:$0xff]  ;;  %v615_v47 = vmul.f32 %v3434_v21, %v3434_v21 }
  0x5d   : > { %v428_v12 = vsel %vm326_vm0, %v3630_v0, 0.0 }
  0x5e   : > { %v403_v14 = vadd.f32 %v402_v31, %v401_v63  ;;  %v753_v31 = vsel %vm326_vm0, %v607_v44, 0.0  ;;  %v752_v63 = vadd.f32 %v751_v28, %v750_v56  ;;  %v3638_v44 = vld [vmem:[%s3298_s20 + $0x1a0] sm:$0xff]  ;;  %v616_v56 = vmul.f32 %v3445_v30, %v3445_v30 }
  0x5f   : > { %v430_v17 = vsel %vm326_vm0, %v3638_v44, 0.0 }
  0x60   : > { %v405_v24 = vadd.f32 %v404_v34, %v403_v14  ;;  %v755_v34 = vsel %vm326_vm0, %v608_v50, 0.0  ;;  %v754_v14 = vadd.f32 %v753_v31, %v752_v63  ;;  %v3646_v50 = vld [vmem:[%s3298_s20 + $0x1a8] sm:$0xff]  ;;  %v617_v63 = vmul.f32 %v3452_v36, %v3452_v36 }
  0x61   : > { %v432_v21 = vsel %vm326_vm0, %v3646_v50, 0.0 }
  0x62   : > { %v407_v33 = vadd.f32 %v406_v37, %v405_v24  ;;  %v757_v37 = vsel %vm326_vm0, %v609_v59, 0.0  ;;  %v756_v24 = vadd.f32 %v755_v34, %v754_v14  ;;  %v3654_v59 = vld [vmem:[%s3298_s20 + $0x1b0] sm:$0xff]  ;;  %v618_v14 = vmul.f32 %v3462_v42, %v3462_v42 }
  0x63   : > { %v434_v30 = vsel %vm326_vm0, %v3654_v59, 0.0 }
  0x64   : > { %v409_v2 = vadd.f32 %v408_v40, %v407_v33  ;;  %v759_v40 = vsel %vm326_vm0, %v610_v6, 0.0  ;;  %v758_v33 = vadd.f32 %v757_v37, %v756_v24  ;;  %v3662_v6 = vld [vmem:[%s3298_s20 + $0x1b8] sm:$0xff]  ;;  %v619_v24 = vmul.f32 %v3470_v48, %v3470_v48 }
  0x65   : > { %v436_v36 = vsel %vm326_vm0, %v3662_v6, 0.0 }
  0x66   : > { %v411_v45 = vadd.f32 %v410_v43, %v409_v2  ;;  %v761_v43 = vsel %vm326_vm0, %v611_v18, 0.0  ;;  %v760_v2 = vadd.f32 %v759_v40, %v758_v33  ;;  %v3670_v18 = vld [vmem:[%s3298_s20 + $0x1c0] sm:$0xff]  ;;  %v620_v33 = vmul.f32 %v3478_v57, %v3478_v57 }
  0x67   : > { %v438_v42 = vsel %vm326_vm0, %v3670_v18, 0.0 }
  0x68   : > { %v413_v53 = vadd.f32 %v412_v46, %v411_v45  ;;  %v763_v46 = vsel %vm326_vm0, %v612_v27, 0.0  ;;  %v762_v45 = vadd.f32 %v761_v43, %v760_v2  ;;  %v3678_v27 = vld [vmem:[%s3298_s20 + $0x1c8] sm:$0xff]  ;;  %v621_v2 = vmul.f32 %v3486_v5, %v3486_v5 }
  0x69   : > { %v440_v48 = vsel %vm326_vm0, %v3678_v27, 0.0 }
  0x6a   : > { %v415_v10 = vadd.f32 %v414_v49, %v413_v53  ;;  %v765_v49 = vsel %vm326_vm0, %v613_v38, 0.0  ;;  %v764_v53 = vadd.f32 %v763_v46, %v762_v45  ;;  %v3686_v38 = vld [vmem:[%s3298_s20 + $0x1d0] sm:$0xff]  ;;  %v622_v45 = vmul.f32 %v3494_v15, %v3494_v15 }
  0x6b   : > { %v442_v57 = vsel %vm326_vm0, %v3686_v38, 0.0 }
  0x6c   : > { %v417_v13 = vadd.f32 %v416_v52, %v415_v10  ;;  %v767_v52 = vsel %vm326_vm0, %v614_v41, 0.0  ;;  %v766_v10 = vadd.f32 %v765_v49, %v764_v53  ;;  %v3694_v41 = vld [vmem:[%s3298_s20 + $0x1d8] sm:$0xff]  ;;  %v623_v53 = vmul.f32 %v3502_v26, %v3502_v26 }
  0x6d   : > { %v444_v5 = vsel %vm326_vm0, %v3694_v41, 0.0 }
  0x6e   : > { %v419_v16 = vadd.f32 %v418_v55, %v417_v13  ;;  %v769_v55 = vsel %vm326_vm0, %v615_v47, 0.0  ;;  %v768_v13 = vadd.f32 %v767_v52, %v766_v10  ;;  %v3702_v47 = vld [vmem:[%s3298_s20 + $0x1e0] sm:$0xff]  ;;  %v624_v10 = vmul.f32 %v3510_v35, %v3510_v35 }
  0x6f   : > { %v446_v15 = vsel %vm326_vm0, %v3702_v47, 0.0 }
  0x70   : > { %v421_v19 = vadd.f32 %v420_v58, %v419_v16  ;;  %v771_v58 = vsel %vm326_vm0, %v616_v56, 0.0  ;;  %v770_v16 = vadd.f32 %v769_v55, %v768_v13  ;;  %v3710_v56 = vld [vmem:[%s3298_s20 + $0x1e8] sm:$0xff]  ;;  %v625_v13 = vmul.f32 %v3518_v39, %v3518_v39 }
  0x71   : > { %v448_v26 = vsel %vm326_vm0, %v3710_v56, 0.0 }
  0x72   : > { %v423_v22 = vadd.f32 %v422_v61, %v421_v19  ;;  %v773_v61 = vsel %vm326_vm0, %v617_v63, 0.0  ;;  %v772_v19 = vadd.f32 %v771_v58, %v770_v16  ;;  %v3718_v63 = vld [vmem:[%s3298_s20 + $0x1f0] sm:$0xff]  ;;  %v626_v16 = vmul.f32 %v3526_v7, %v3526_v7 }
  0x73   : > { %v450_v35 = vsel %vm326_vm0, %v3718_v63, 0.0 }
  0x74   : > { %v425_v25 = vadd.f32 %v424_v4, %v423_v22  ;;  %v775_v4 = vsel %vm326_vm0, %v618_v14, 0.0  ;;  %v774_v22 = vadd.f32 %v773_v61, %v772_v19  ;;  %v3726_v14 = vld [vmem:[%s3298_s20 + $0x1f8] sm:$0xff]  ;;  %v627_v19 = vmul.f32 %v3534_v54, %v3534_v54 }
  0x75   : > { %v452_v39 = vsel %vm326_vm0, %v3726_v14, 0.0 }
  0x76   : > { %v427_v28 = vadd.f32 %v426_v8, %v425_v25  ;;  %v777_v8 = vsel %vm326_vm0, %v619_v24, 0.0  ;;  %v776_v25 = vadd.f32 %v775_v4, %v774_v22  ;;  %v3734_v24 = vld [vmem:[%s3298_s20 + $0x200] sm:$0xff]  ;;  %v628_v22 = vmul.f32 %v3542_v62, %v3542_v62 }
  0x77   : > { %v454_v7 = vsel %vm326_vm0, %v3734_v24, 0.0 }
  0x78   : > { %v429_v31 = vadd.f32 %v428_v12, %v427_v28  ;;  %v779_v12 = vsel %vm326_vm0, %v620_v33, 0.0  ;;  %v778_v28 = vadd.f32 %v777_v8, %v776_v25  ;;  %v3742_v33 = vld [vmem:[%s3298_s20 + $0x208] sm:$0xff]  ;;  %v629_v25 = vmul.f32 %v3550_v11, %v3550_v11 }
  0x79   : > { %v456_v54 = vsel %vm326_vm0, %v3742_v33, 0.0 }
  0x7a   : > { %v431_v34 = vadd.f32 %v430_v17, %v429_v31  ;;  %v781_v17 = vsel %vm326_vm0, %v621_v2, 0.0  ;;  %v780_v31 = vadd.f32 %v779_v12, %v778_v28  ;;  %v3750_v2 = vld [vmem:[%s3298_s20 + $0x210] sm:$0xff]  ;;  %v630_v28 = vmul.f32 %v3558_v23, %v3558_v23 }
  0x7b   : > { %v458_v62 = vsel %vm326_vm0, %v3750_v2, 0.0 }
  0x7c   : > { %v433_v37 = vadd.f32 %v432_v21, %v431_v34  ;;  %v783_v21 = vsel %vm326_vm0, %v622_v45, 0.0  ;;  %v782_v34 = vadd.f32 %v781_v17, %v780_v31  ;;  %v3758_v45 = vld [vmem:[%s3298_s20 + $0x218] sm:$0xff]  ;;  %v631_v31 = vmul.f32 %v3566_v32, %v3566_v32 }
  0x7d   : > { %v460_v11 = vsel %vm326_vm0, %v3758_v45, 0.0 }
  0x7e   : > { %v435_v40 = vadd.f32 %v434_v30, %v433_v37  ;;  %v785_v30 = vsel %vm326_vm0, %v623_v53, 0.0  ;;  %v784_v37 = vadd.f32 %v783_v21, %v782_v34  ;;  %v3766_v53 = vld [vmem:[%s3298_s20 + $0x220] sm:$0xff]  ;;  %v632_v34 = vmul.f32 %v3574_v1, %v3574_v1 }
  0x7f   : > { %v462_v23 = vsel %vm326_vm0, %v3766_v53, 0.0 }
  0x80   : > { %v437_v43 = vadd.f32 %v436_v36, %v435_v40  ;;  %v787_v36 = vsel %vm326_vm0, %v624_v10, 0.0  ;;  %v786_v40 = vadd.f32 %v785_v30, %v784_v37  ;;  %v3774_v10 = vld [vmem:[%s3298_s20 + $0x228] sm:$0xff]  ;;  %v633_v37 = vmul.f32 %v3582_v3, %v3582_v3 }
  0x81   : > { %v464_v32 = vsel %vm326_vm0, %v3774_v10, 0.0 }
  0x82   : > { %v439_v46 = vadd.f32 %v438_v42, %v437_v43  ;;  %v789_v42 = vsel %vm326_vm0, %v625_v13, 0.0  ;;  %v788_v43 = vadd.f32 %v787_v36, %v786_v40  ;;  %v3782_v13 = vld [vmem:[%s3298_s20 + $0x230] sm:$0xff]  ;;  %v634_v40 = vmul.f32 %v3590_v51, %v3590_v51 }
  0x83   : > { %v466_v1 = vsel %vm326_vm0, %v3782_v13, 0.0 }
  0x84   : > { %v441_v49 = vadd.f32 %v440_v48, %v439_v46  ;;  %v791_v48 = vsel %vm326_vm0, %v626_v16, 0.0  ;;  %v790_v46 = vadd.f32 %v789_v42, %v788_v43  ;;  %v3790_v16 = vld [vmem:[%s3298_s20 + $0x238] sm:$0xff]  ;;  %v635_v43 = vmul.f32 %v3598_v60, %v3598_v60 }
  0x85   : > { %v468_v3 = vsel %vm326_vm0, %v3790_v16, 0.0 }
  0x86   : > { %v443_v52 = vadd.f32 %v442_v57, %v441_v49  ;;  %v793_v57 = vsel %vm326_vm0, %v627_v19, 0.0  ;;  %v792_v49 = vadd.f32 %v791_v48, %v790_v46  ;;  %v3798_v19 = vld [vmem:[%s3298_s20 + $0x240] sm:$0xff]  ;;  %v636_v46 = vmul.f32 %v3606_v9, %v3606_v9 }
  0x87   : > { %v470_v51 = vsel %vm326_vm0, %v3798_v19, 0.0 }
  0x88   : > { %v445_v55 = vadd.f32 %v444_v5, %v443_v52  ;;  %v795_v5 = vsel %vm326_vm0, %v628_v22, 0.0  ;;  %v794_v52 = vadd.f32 %v793_v57, %v792_v49  ;;  %v3806_v22 = vld [vmem:[%s3298_s20 + $0x248] sm:$0xff]  ;;  %v637_v49 = vmul.f32 %v3614_v20, %v3614_v20 }
  0x89   : > { %v472_v60 = vsel %vm326_vm0, %v3806_v22, 0.0 }
  0x8a   : > { %v447_v58 = vadd.f32 %v446_v15, %v445_v55  ;;  %v797_v15 = vsel %vm326_vm0, %v629_v25, 0.0  ;;  %v796_v55 = vadd.f32 %v795_v5, %v794_v52  ;;  %v3814_v25 = vld [vmem:[%s3298_s20 + $0x250] sm:$0xff]  ;;  %v638_v52 = vmul.f32 %v3622_v29, %v3622_v29 }
  0x8b   : > { %v474_v9 = vsel %vm326_vm0, %v3814_v25, 0.0 }
  0x8c   : > { %v449_v61 = vadd.f32 %v448_v26, %v447_v58  ;;  %v799_v26 = vsel %vm326_vm0, %v630_v28, 0.0  ;;  %v798_v58 = vadd.f32 %v797_v15, %v796_v55  ;;  %v3822_v28 = vld [vmem:[%s3298_s20 + $0x258] sm:$0xff]  ;;  %v639_v55 = vmul.f32 %v3630_v0, %v3630_v0 }
  0x8d   : > { %v476_v20 = vsel %vm326_vm0, %v3822_v28, 0.0 }
  0x8e   : > { %v451_v4 = vadd.f32 %v450_v35, %v449_v61  ;;  %v801_v35 = vsel %vm326_vm0, %v631_v31, 0.0  ;;  %v800_v61 = vadd.f32 %v799_v26, %v798_v58  ;;  %v3830_v31 = vld [vmem:[%s3298_s20 + $0x260] sm:$0xff]  ;;  %v640_v58 = vmul.f32 %v3638_v44, %v3638_v44 }
  0x8f   : > { %v478_v29 = vsel %vm326_vm0, %v3830_v31, 0.0 }
  0x90   : > { %v453_v8 = vadd.f32 %v452_v39, %v451_v4  ;;  %v803_v39 = vsel %vm326_vm0, %v632_v34, 0.0  ;;  %v802_v4 = vadd.f32 %v801_v35, %v800_v61  ;;  %v3838_v34 = vld [vmem:[%s3298_s20 + $0x268] sm:$0xff]  ;;  %v641_v61 = vmul.f32 %v3646_v50, %v3646_v50 }
  0x91   : > { %v480_v0 = vsel %vm326_vm0, %v3838_v34, 0.0 }
  0x92   : > { %v455_v12 = vadd.f32 %v454_v7, %v453_v8  ;;  %v805_v7 = vsel %vm326_vm0, %v633_v37, 0.0  ;;  %v804_v8 = vadd.f32 %v803_v39, %v802_v4  ;;  %v3846_v37 = vld [vmem:[%s3298_s20 + $0x270] sm:$0xff]  ;;  %v642_v4 = vmul.f32 %v3654_v59, %v3654_v59 }
  0x93   : > { %v482_v44 = vsel %vm326_vm0, %v3846_v37, 0.0 }
  0x94   : > { %v457_v17 = vadd.f32 %v456_v54, %v455_v12  ;;  %v807_v54 = vsel %vm326_vm0, %v634_v40, 0.0  ;;  %v806_v12 = vadd.f32 %v805_v7, %v804_v8  ;;  %v3854_v40 = vld [vmem:[%s3298_s20 + $0x278] sm:$0xff]  ;;  %v643_v8 = vmul.f32 %v3662_v6, %v3662_v6 }
  0x95   : > { %v484_v50 = vsel %vm326_vm0, %v3854_v40, 0.0 }
  0x96   : > { %v459_v21 = vadd.f32 %v458_v62, %v457_v17  ;;  %v809_v62 = vsel %vm326_vm0, %v635_v43, 0.0  ;;  %v808_v17 = vadd.f32 %v807_v54, %v806_v12  ;;  %v3862_v43 = vld [vmem:[%s3298_s20 + $0x280] sm:$0xff]  ;;  %v644_v12 = vmul.f32 %v3670_v18, %v3670_v18 }
  0x97   : > { %v486_v59 = vsel %vm326_vm0, %v3862_v43, 0.0 }
  0x98   : > { %v461_v30 = vadd.f32 %v460_v11, %v459_v21  ;;  %v811_v11 = vsel %vm326_vm0, %v636_v46, 0.0  ;;  %v810_v21 = vadd.f32 %v809_v62, %v808_v17  ;;  %v3870_v46 = vld [vmem:[%s3298_s20 + $0x288] sm:$0xff]  ;;  %v645_v17 = vmul.f32 %v3678_v27, %v3678_v27 }
  0x99   : > { %v488_v6 = vsel %vm326_vm0, %v3870_v46, 0.0 }
  0x9a   : > { %v463_v36 = vadd.f32 %v462_v23, %v461_v30  ;;  %v813_v23 = vsel %vm326_vm0, %v637_v49, 0.0  ;;  %v812_v30 = vadd.f32 %v811_v11, %v810_v21  ;;  %v3878_v49 = vld [vmem:[%s3298_s20 + $0x290] sm:$0xff]  ;;  %v646_v21 = vmul.f32 %v3686_v38, %v3686_v38 }
  0x9b   : > { %v490_v18 = vsel %vm326_vm0, %v3878_v49, 0.0 }
  0x9c   : > { %v465_v42 = vadd.f32 %v464_v32, %v463_v36  ;;  %v815_v32 = vsel %vm326_vm0, %v638_v52, 0.0  ;;  %v814_v36 = vadd.f32 %v813_v23, %v812_v30  ;;  %v3886_v52 = vld [vmem:[%s3298_s20 + $0x298] sm:$0xff]  ;;  %v647_v30 = vmul.f32 %v3694_v41, %v3694_v41 }
  0x9d   : > { %v492_v27 = vsel %vm326_vm0, %v3886_v52, 0.0 }
  0x9e   : > { %v467_v48 = vadd.f32 %v466_v1, %v465_v42  ;;  %v817_v1 = vsel %vm326_vm0, %v639_v55, 0.0  ;;  %v816_v42 = vadd.f32 %v815_v32, %v814_v36  ;;  %v3894_v55 = vld [vmem:[%s3298_s20 + $0x2a0] sm:$0xff]  ;;  %v648_v36 = vmul.f32 %v3702_v47, %v3702_v47 }
  0x9f   : > { %v494_v38 = vsel %vm326_vm0, %v3894_v55, 0.0 }
  0xa0   : > { %v469_v57 = vadd.f32 %v468_v3, %v467_v48  ;;  %v819_v3 = vsel %vm326_vm0, %v640_v58, 0.0  ;;  %v818_v48 = vadd.f32 %v817_v1, %v816_v42  ;;  %v3902_v58 = vld [vmem:[%s3298_s20 + $0x2a8] sm:$0xff]  ;;  %v649_v42 = vmul.f32 %v3710_v56, %v3710_v56 }
  0xa1   : > { %v496_v41 = vsel %vm326_vm0, %v3902_v58, 0.0 }
  0xa2   : > { %v471_v5 = vadd.f32 %v470_v51, %v469_v57  ;;  %v821_v51 = vsel %vm326_vm0, %v641_v61, 0.0  ;;  %v820_v57 = vadd.f32 %v819_v3, %v818_v48  ;;  %v3910_v61 = vld [vmem:[%s3298_s20 + $0x2b0] sm:$0xff]  ;;  %v650_v48 = vmul.f32 %v3718_v63, %v3718_v63 }
  0xa3   : > { %v498_v47 = vsel %vm326_vm0, %v3910_v61, 0.0 }
  0xa4   : > { %v473_v15 = vadd.f32 %v472_v60, %v471_v5  ;;  %v823_v60 = vsel %vm326_vm0, %v642_v4, 0.0  ;;  %v822_v5 = vadd.f32 %v821_v51, %v820_v57  ;;  %v3918_v4 = vld [vmem:[%s3298_s20 + $0x2b8] sm:$0xff]  ;;  %v651_v57 = vmul.f32 %v3726_v14, %v3726_v14 }
  0xa5   : > { %v500_v56 = vsel %vm326_vm0, %v3918_v4, 0.0 }
  0xa6   : > { %v475_v26 = vadd.f32 %v474_v9, %v473_v15  ;;  %v825_v9 = vsel %vm326_vm0, %v643_v8, 0.0  ;;  %v824_v15 = vadd.f32 %v823_v60, %v822_v5  ;;  %v3926_v8 = vld [vmem:[%s3298_s20 + $0x2c0] sm:$0xff]  ;;  %v652_v5 = vmul.f32 %v3734_v24, %v3734_v24 }
  0xa7   : > { %v502_v63 = vsel %vm326_vm0, %v3926_v8, 0.0 }
  0xa8   : > { %v477_v35 = vadd.f32 %v476_v20, %v475_v26  ;;  %v827_v20 = vsel %vm326_vm0, %v644_v12, 0.0  ;;  %v826_v26 = vadd.f32 %v825_v9, %v824_v15  ;;  %v3934_v12 = vld [vmem:[%s3298_s20 + $0x2c8] sm:$0xff]  ;;  %v653_v15 = vmul.f32 %v3742_v33, %v3742_v33 }
  0xa9   : > { %v504_v14 = vsel %vm326_vm0, %v3934_v12, 0.0 }
  0xaa   : > { %v479_v39 = vadd.f32 %v478_v29, %v477_v35  ;;  %v829_v29 = vsel %vm326_vm0, %v645_v17, 0.0  ;;  %v828_v35 = vadd.f32 %v827_v20, %v826_v26  ;;  %v3942_v17 = vld [vmem:[%s3298_s20 + $0x2d0] sm:$0xff]  ;;  %v654_v26 = vmul.f32 %v3750_v2, %v3750_v2 }
  0xab   : > { %v506_v24 = vsel %vm326_vm0, %v3942_v17, 0.0 }
  0xac   : > { %v481_v7 = vadd.f32 %v480_v0, %v479_v39  ;;  %v831_v0 = vsel %vm326_vm0, %v646_v21, 0.0  ;;  %v830_v39 = vadd.f32 %v829_v29, %v828_v35  ;;  %v3950_v21 = vld [vmem:[%s3298_s20 + $0x2d8] sm:$0xff]  ;;  %v655_v35 = vmul.f32 %v3758_v45, %v3758_v45 }
  0xad   : > { %v508_v33 = vsel %vm326_vm0, %v3950_v21, 0.0 }
  0xae   : > { %v483_v54 = vadd.f32 %v482_v44, %v481_v7  ;;  %v833_v44 = vsel %vm326_vm0, %v647_v30, 0.0  ;;  %v832_v7 = vadd.f32 %v831_v0, %v830_v39  ;;  %v3958_v30 = vld [vmem:[%s3298_s20 + $0x2e0] sm:$0xff]  ;;  %v656_v39 = vmul.f32 %v3766_v53, %v3766_v53 }
  0xaf   : > { %v510_v2 = vsel %vm326_vm0, %v3958_v30, 0.0 }
  0xb0   : > { %v485_v62 = vadd.f32 %v484_v50, %v483_v54  ;;  %v835_v50 = vsel %vm326_vm0, %v648_v36, 0.0  ;;  %v834_v54 = vadd.f32 %v833_v44, %v832_v7  ;;  %v3966_v36 = vld [vmem:[%s3298_s20 + $0x2e8] sm:$0xff]  ;;  %v657_v7 = vmul.f32 %v3774_v10, %v3774_v10 }
  0xb1   : > { %v512_v45 = vsel %vm326_vm0, %v3966_v36, 0.0 }
  0xb2   : > { %v487_v11 = vadd.f32 %v486_v59, %v485_v62  ;;  %v837_v59 = vsel %vm326_vm0, %v649_v42, 0.0  ;;  %v836_v62 = vadd.f32 %v835_v50, %v834_v54  ;;  %v3974_v42 = vld [vmem:[%s3298_s20 + $0x2f0] sm:$0xff]  ;;  %v658_v54 = vmul.f32 %v3782_v13, %v3782_v13  ;;  %v977_v13 = vld [vmem:[%s6288_s3] sm:$0xf] }
  0xb3   : > { %v514_v53 = vsel %vm326_vm0, %v3974_v42, 0.0 }
  0xb4   : > { %v489_v23 = vadd.f32 %v488_v6, %v487_v11  ;;  %v839_v6 = vsel %vm326_vm0, %v650_v48, 0.0  ;;  %v838_v11 = vadd.f32 %v837_v59, %v836_v62  ;;  %v3982_v48 = vld [vmem:[%s3298_s20 + $0x2f8] sm:$0xff]  ;;  %v659_v62 = vmul.f32 %v3790_v16, %v3790_v16 }
  0xb5   : > { %v516_v10 = vsel %vm326_vm0, %v3982_v48, 0.0  ;;  %v660_v16 = vmul.f32 %v3798_v19, %v3798_v19 }
  0xb6   : > { %v491_v32 = vadd.f32 %v490_v18, %v489_v23  ;;  %v841_v18 = vsel %vm326_vm0, %v651_v57, 0.0  ;;  %v840_v23 = vadd.f32 %v839_v6, %v838_v11  ;;  %v3990_v57 = vld [vmem:[%s3298_s20 + $0x300] sm:$0xff]  ;;  %v3255_v11 = vmov 0.0  }
  0xb7   : > { %2635 = vmatprep.subr.mxu0 %v3255_v11  ;;  %2640 = vmatprep.subr.mxu1 %v3255_v11  ;;  %v857_v19 = vsel %vm326_vm0, %v659_v62, 0.0  ;;  %v666_v62 = vmul.f32 %v3846_v37, %v3846_v37 }
  0xb8   : > { %v493_v1 = vadd.f32 %v492_v27, %v491_v32  ;;  %v843_v27 = vsel %vm326_vm0, %v652_v5, 0.0  ;;  %v842_v32 = vadd.f32 %v841_v18, %v840_v23  ;;  %v3998_v5 = vld [vmem:[%s3298_s20 + $0x308] sm:$0xff]  ;;  %2636 = vmatpush3.msk.msra.mxu0 %vm981_vm1, %v977_v13  ;;  %2637 = vmatprep.mubr.msk.f32.mxu0 %vm3256_vm2, %v3255_v11  ;;  %v4009_v18 = vld [vmem:[%s3298_s20 + $0x310] sm:$0xff] }
  0xb9   : > { %6426 = vst [vmem:[#allocation2_spill] sm:$0xff] %v3998_v5  ;;  %6427 = vst [vmem:[#allocation3_spill] sm:$0xff] %v4009_v18  ;;  %2641 = vmatpush3.msk.msra.mxu1 %vm981_vm1, %v977_v13  ;;  %2642 = vmatprep.mubr.msk.f32.mxu1 %vm3256_vm2, %v3255_v11  ;;  %v667_v11 = vmul.f32 %v3854_v40, %v3854_v40 }
  0xba   : > { %v495_v3 = vadd.f32 %v494_v38, %v493_v1  ;;  %v845_v38 = vsel %vm326_vm0, %v653_v15, 0.0  ;;  %v844_v1 = vadd.f32 %v843_v27, %v842_v32  ;;  %v855_v15 = vsel %vm326_vm0, %v658_v54, 0.0  ;;  %v4017_v27 = vld [vmem:[%s3298_s20 + $0x318] sm:$0xff] }
  0xbb   : > { %6428 = vst [vmem:[#allocation4_spill] sm:$0xff] %v4017_v27  ;;  %v665_v54 = vmul.f32 %v3838_v34, %v3838_v34 }
  0xbc   : > { %v497_v51 = vadd.f32 %v496_v41, %v495_v3  ;;  %v847_v41 = vsel %vm326_vm0, %v654_v26, 0.0  ;;  %v846_v3 = vadd.f32 %v845_v38, %v844_v1  ;;  %v661_v26 = vmul.f32 %v3806_v22, %v3806_v22 }
  0xbd   : > { %v859_v38 = vsel %vm326_vm0, %v660_v16, 0.0  ;;  %v524_v22 = vsel %vm326_vm0, %v4017_v27, 0.0  ;;  %v4065_v16 = vld [vmem:[%s3298_s20 + $0x348] sm:$0xff] }
  0xbe   : > { %v499_v60 = vadd.f32 %v498_v47, %v497_v51  ;;  %v849_v47 = vsel %vm326_vm0, %v655_v35, 0.0  ;;  %v848_v51 = vadd.f32 %v847_v41, %v846_v3  ;;  %v662_v35 = vmul.f32 %v3814_v25, %v3814_v25 }
  0xbf   : > { %v861_v41 = vsel %vm326_vm0, %v661_v26, 0.0  ;;  %v871_v26 = vsel %vm326_vm0, %v666_v62, 0.0  ;;  %v4105_v62 = vld [vmem:[%s3298_s20 + $0x370] sm:$0xff] }
  0xc0   : > { %v501_v9 = vadd.f32 %v500_v56, %v499_v60  ;;  %v851_v56 = vsel %vm326_vm0, %v656_v39, 0.0  ;;  %v850_v60 = vadd.f32 %v849_v47, %v848_v51  ;;  %v663_v39 = vmul.f32 %v3822_v28, %v3822_v28 }
  0xc1   : > { %v863_v47 = vsel %vm326_vm0, %v662_v35, 0.0  ;;  %v669_v35 = vmul.f32 %v3870_v46, %v3870_v46 }
  0xc2   : > { %v503_v20 = vadd.f32 %v502_v63, %v501_v9  ;;  %v853_v63 = vsel %vm326_vm0, %v657_v7, 0.0  ;;  %v852_v9 = vadd.f32 %v851_v56, %v850_v60  ;;  %v664_v7 = vmul.f32 %v3830_v31, %v3830_v31 }
  0xc3   : > { %v865_v56 = vsel %vm326_vm0, %v663_v39, 0.0 }
  0xc4   : > { %v505_v29 = vadd.f32 %v504_v14, %v503_v20  ;;  %v518_v14 = vsel %vm326_vm0, %v3990_v57, 0.0  ;;  %v854_v23 = vadd.f32 %v853_v63, %v852_v9  ;;  %v867_v63 = vsel %vm326_vm0, %v664_v7, 0.0 }
  0xc6   : > { %v507_v0 = vadd.f32 %v506_v24, %v505_v29  ;;  %v520_v24 = vsel %vm326_vm0, %v3998_v5, 0.0  ;;  %v856_v32 = vadd.f32 %v855_v15, %v854_v23 }
  0xc8   : > { %v509_v44 = vadd.f32 %v508_v33, %v507_v0  ;;  %v522_v33 = vsel %vm326_vm0, %v4009_v18, 0.0  ;;  %v4025_v0 = vld [vmem:[%s3298_s20 + $0x320] sm:$0xff] }
  0xc9   : > { %6429 = vst [vmem:[#allocation5_spill] sm:$0xff] %v4025_v0  ;;  %v526_v25 = vsel %vm326_vm0, %v4025_v0, 0.0 }
  0xca   : > { %v511_v50 = vadd.f32 %v510_v2, %v509_v44  ;;  %v858_v2 = vadd.f32 %v857_v19, %v856_v32  ;;  %v4033_v44 = vld [vmem:[%s3298_s20 + $0x328] sm:$0xff]  ;;  %v4073_v19 = vld [vmem:[%s3298_s20 + $0x350] sm:$0xff] }
  0xcb   : > { %6430 = vst [vmem:[#allocation6_spill] sm:$0xff] %v4033_v44  ;;  %v528_v28 = vsel %vm326_vm0, %v4033_v44, 0.0  ;;  %v538_v39 = vsel %vm326_vm0, %v4073_v19, 0.0 }
  0xcc   : > { %v513_v59 = vadd.f32 %v512_v45, %v511_v50  ;;  %v860_v45 = vadd.f32 %v859_v38, %v858_v2  ;;  %v4041_v50 = vld [vmem:[%s3298_s20 + $0x330] sm:$0xff]  ;;  %v873_v38 = vsel %vm326_vm0, %v667_v11, 0.0 }
  0xcd   : > { %6431 = vst [vmem:[#allocation7_spill] sm:$0xff] %v4041_v50  ;;  %v530_v31 = vsel %vm326_vm0, %v4041_v50, 0.0 }
  0xce   : > { %v515_v6 = vadd.f32 %v514_v53, %v513_v59  ;;  %v862_v53 = vadd.f32 %v861_v41, %v860_v45  ;;  %v4049_v59 = vld [vmem:[%s3298_s20 + $0x338] sm:$0xff]  ;;  %v670_v41 = vmul.f32 %v3878_v49, %v3878_v49  ;;  %v4089_v45 = vld [vmem:[%s3298_s20 + $0x360] sm:$0xff] }
  0xcf   : > { %v532_v34 = vsel %vm326_vm0, %v4049_v59, 0.0 }
  0xd0   : > { %v517_v20 = vadd.f32 %v516_v10, %v515_v6  ;;  %v864_v10 = vadd.f32 %v863_v47, %v862_v53  ;;  %v4057_v6 = vld [vmem:[%s3298_s20 + $0x340] sm:$0xff]  ;;  %v877_v53 = vsel %vm326_vm0, %v669_v35, 0.0 }
  0xd1   : > { %v534_v23 = vsel %vm326_vm0, %v4057_v6, 0.0 }
  0xd2   : > { %v519_v29 = vadd.f32 %v518_v14, %v517_v20  ;;  %v866_v13 = vadd.f32 %v865_v56, %v864_v10  ;;  %v869_v14 = vsel %vm326_vm0, %v665_v54, 0.0  ;;  %v672_v10 = vmul.f32 %v3894_v55, %v3894_v55 }
  0xd4   : > { %v521_v1 = vadd.f32 %v520_v24, %v519_v29  ;;  %v868_v20 = vadd.f32 %v867_v63, %v866_v13  ;;  %v668_v24 = vmul.f32 %v3862_v43, %v3862_v43 }
  0xd6   : > { %v523_v3 = vadd.f32 %v522_v33, %v521_v1  ;;  %v870_v32 = vadd.f32 %v869_v14, %v868_v20  ;;  %v536_v33 = vsel %vm326_vm0, %v4065_v16, 0.0  ;;  %v4081_v1 = vld [vmem:[%s3298_s20 + $0x358] sm:$0xff] }
  0xd7   : > { %v540_v47 = vsel %vm326_vm0, %v4081_v1, 0.0  ;;  %v4113_v14 = vld [vmem:[%s3298_s20 + $0x378] sm:$0xff] }
  0xd8   : > { %v525_v51 = vadd.f32 %v524_v22, %v523_v3  ;;  %v872_v22 = vadd.f32 %v871_v26, %v870_v32  ;;  %v875_v3 = vsel %vm326_vm0, %v668_v24, 0.0  ;;  %v674_v24 = vmul.f32 %v3910_v61, %v3910_v61 }
  0xd9   : > { %v883_v26 = vsel %vm326_vm0, %v672_v10, 0.0  ;;  %v548_v35 = vsel %vm326_vm0, %v4113_v14, 0.0  ;;  %v4145_v10 = vld [vmem:[%s3298_s20 + $0x398] sm:$0xff] }
  0xda   : > { %v527_v60 = vadd.f32 %v526_v25, %v525_v51  ;;  %v874_v7 = vadd.f32 %v873_v38, %v872_v22  ;;  %v671_v51 = vmul.f32 %v3886_v52, %v3886_v52  ;;  %v675_v38 = vmul.f32 %v3918_v4, %v3918_v4  ;;  %v4129_v22 = vld [vmem:[%s3298_s20 + $0x388] sm:$0xff] }
  0xdc   : > { %v529_v9 = vadd.f32 %v528_v28, %v527_v60  ;;  %v4097_v28 = vld [vmem:[%s3298_s20 + $0x368] sm:$0xff]  ;;  %v876_v56 = vadd.f32 %v875_v3, %v874_v7  ;;  %v542_v60 = vsel %vm326_vm0, %v4089_v45, 0.0  ;;  %v881_v11 = vsel %vm326_vm0, %v671_v51, 0.0 }
  0xdd   : > { %v544_v13 = vsel %vm326_vm0, %v4097_v28, 0.0  ;;  %v887_v7 = vsel %vm326_vm0, %v674_v24, 0.0  ;;  %v679_v24 = vmul.f32 %v3950_v21, %v3950_v21 }
  0xde   : > { %v531_v15 = vadd.f32 %v530_v31, %v529_v9  ;;  %v879_v31 = vsel %vm326_vm0, %v670_v41, 0.0  ;;  %v878_v9 = vadd.f32 %v877_v53, %v876_v56  ;;  %v677_v56 = vmul.f32 %v3934_v12, %v3934_v12 }
  0xe0   : > { %v533_v29 = vadd.f32 %v532_v34, %v531_v15  ;;  %v673_v34 = vmul.f32 %v3902_v58, %v3902_v58  ;;  %v880_v20 = vadd.f32 %v879_v31, %v878_v9 }
  0xe2   : > { %v535_v2 = vadd.f32 %v534_v23, %v533_v29  ;;  %v546_v23 = vsel %vm326_vm0, %v4105_v62, 0.0  ;;  %v4121_v29 = vld [vmem:[%s3298_s20 + $0x380] sm:$0xff] }
  0xe3   : > { %v550_v3 = vsel %vm326_vm0, %v4121_v29, 0.0 }
  0xe4   : > { %v537_v25 = vadd.f32 %v536_v33, %v535_v2  ;;  %v882_v33 = vadd.f32 %v881_v11, %v880_v20  ;;  %v885_v2 = vsel %vm326_vm0, %v673_v34, 0.0  ;;  %v4153_v11 = vld [vmem:[%s3298_s20 + $0x3a0] sm:$0xff] }
  0xe6   : > { %v539_v54 = vadd.f32 %v538_v39, %v537_v25  ;;  %v884_v41 = vadd.f32 %v883_v26, %v882_v33  ;;  %v676_v25 = vmul.f32 %v3926_v8, %v3926_v8  ;;  %v893_v26 = vsel %vm326_vm0, %v677_v56, 0.0 }
  0xe8   : > { %v541_v63 = vadd.f32 %v540_v47, %v539_v54  ;;  %v4137_v47 = vld [vmem:[%s3298_s20 + $0x390] sm:$0xff]  ;;  %v886_v53 = vadd.f32 %v885_v2, %v884_v41  ;;  %v552_v54 = vsel %vm326_vm0, %v4129_v22, 0.0  ;;  %v891_v34 = vsel %vm326_vm0, %v676_v25, 0.0 }
  0xe9   : > { %v554_v9 = vsel %vm326_vm0, %v4137_v47, 0.0  ;;  %v680_v2 = vmul.f32 %v3958_v30, %v3958_v30  ;;  %v4169_v41 = vld [vmem:[%s3298_s20 + $0x3b0] sm:$0xff] }
  0xea   : > { %v543_v15 = vadd.f32 %v542_v60, %v541_v63  ;;  %v889_v60 = vsel %vm326_vm0, %v675_v38, 0.0  ;;  %v888_v63 = vadd.f32 %v887_v7, %v886_v53  ;;  %v558_v38 = vsel %vm326_vm0, %v4153_v11, 0.0 }
  0xeb   : > { %v897_v53 = vsel %vm326_vm0, %v679_v24, 0.0 }
  0xec   : > { %v545_v32 = vadd.f32 %v544_v13, %v543_v15  ;;  %v678_v13 = vmul.f32 %v3942_v17, %v3942_v17  ;;  %v890_v20 = vadd.f32 %v889_v60, %v888_v63  ;;  %v682_v63 = vmul.f32 %v3974_v42, %v3974_v42 }
  0xee   : > { %v547_v39 = vadd.f32 %v546_v23, %v545_v32  ;;  %v556_v23 = vsel %vm326_vm0, %v4145_v10, 0.0  ;;  %v4161_v32 = vld [vmem:[%s3298_s20 + $0x3a8] sm:$0xff] }
  0xef   : > { %v560_v7 = vsel %vm326_vm0, %v4161_v32, 0.0 }
  0xf0   : > { %v549_v51 = vadd.f32 %v548_v35, %v547_v39  ;;  %v892_v35 = vadd.f32 %v891_v34, %v890_v20  ;;  %v895_v39 = vsel %vm326_vm0, %v678_v13, 0.0  ;;  %v4185_v13 = vld [vmem:[%s3298_s20 + $0x3c0] sm:$0xff] }
  0xf2   : > { %v551_v31 = vadd.f32 %v550_v3, %v549_v51  ;;  %v894_v25 = vadd.f32 %v893_v26, %v892_v35  ;;  %v681_v51 = vmul.f32 %v3966_v36, %v3966_v36  ;;  %v4193_v26 = vld [vmem:[%s3298_s20 + $0x3c8] sm:$0xff] }
  0xf4   : > { %v553_v15 = vadd.f32 %v552_v54, %v551_v31  ;;  %v4177_v54 = vld [vmem:[%s3298_s20 + $0x3b8] sm:$0xff]  ;;  %v896_v60 = vadd.f32 %v895_v39, %v894_v25  ;;  %v562_v31 = vsel %vm326_vm0, %v4169_v41, 0.0  ;;  %v901_v24 = vsel %vm326_vm0, %v681_v51, 0.0 }
  0xf5   : > { %v564_v20 = vsel %vm326_vm0, %v4177_v54, 0.0  ;;  %v903_v39 = vsel %vm326_vm0, %v682_v63, 0.0  ;;  %v568_v51 = vsel %vm326_vm0, %v4193_v26, 0.0 }
  0xf6   : > { %v555_v33 = vadd.f32 %v554_v9, %v553_v15  ;;  %v899_v9 = vsel %vm326_vm0, %v680_v2, 0.0  ;;  %v898_v15 = vadd.f32 %v897_v53, %v896_v60  ;;  %v684_v2 = vmul.f32 %v3990_v57, %v3990_v57  ;;  %v4209_v60 = vld [vmem:[%s3298_s20 + $0x3d8] sm:$0xff] }
  0xf7   : > { %v685_v53 = vmul.f32 %v3998_v5, %v3998_v5 }
  0xf8   : > { %v557_v3 = vadd.f32 %v556_v23, %v555_v33  ;;  %v683_v23 = vmul.f32 %v3982_v48, %v3982_v48  ;;  %v900_v35 = vadd.f32 %v899_v9, %v898_v15  ;;  %v907_v15 = vsel %vm326_vm0, %v684_v2, 0.0 }
  0xfa   : > { %v559_v56 = vadd.f32 %v558_v38, %v557_v3  ;;  %v566_v38 = vsel %vm326_vm0, %v4185_v13, 0.0  ;;  %v4201_v3 = vld [vmem:[%s3298_s20 + $0x3d0] sm:$0xff] }
  0xfb   : > { %v570_v63 = vsel %vm326_vm0, %v4201_v3, 0.0 }
  0xfc   : > { %v561_v34 = vadd.f32 %v560_v7, %v559_v56  ;;  %v902_v7 = vadd.f32 %v901_v24, %v900_v35  ;;  %v905_v56 = vsel %vm326_vm0, %v683_v23, 0.0  ;;  %v572_v23 = vsel %vm326_vm0, %v4209_v60, 0.0 }
  0xfd   : > { %v687_v35 = vmul.f32 %v4017_v27, %v4017_v27 }
  0xfe   : > { %v563_v33 = vadd.f32 %v562_v31, %v561_v34  ;;  %v904_v9 = vadd.f32 %v903_v39, %v902_v7  ;;  %v686_v34 = vmul.f32 %v4009_v18, %v4009_v18  ;;  %v4225_v39 = vld [vmem:[%s3298_s20 + $0x3e8] sm:$0xff] }
  0xff   : > { %v576_v27 = vsel %vm326_vm0, %v4225_v39, 0.0 }
 0x100   : > { %v565_v25 = vadd.f32 %v564_v20, %v563_v33  ;;  %v4217_v20 = vld [vmem:[%s3298_s20 + $0x3e0] sm:$0xff]  ;;  %v906_v33 = vadd.f32 %v905_v56, %v904_v9  ;;  %v911_v56 = vsel %vm326_vm0, %v686_v34, 0.0  ;;  %v690_v34 = vmul.f32 %v4041_v50, %v4041_v50 }
 0x101   : > { %v574_v2 = vsel %vm326_vm0, %v4217_v20, 0.0 }
 0x102   : > { %v567_v31 = vadd.f32 %v566_v38, %v565_v25  ;;  %v909_v38 = vsel %vm326_vm0, %v685_v53, 0.0  ;;  %v908_v7 = vadd.f32 %v907_v15, %v906_v33  ;;  %v689_v53 = vmul.f32 %v4033_v44, %v4033_v44  ;;  %v4241_v15 = vld [vmem:[%s3298_s20 + $0x3f8] sm:$0xff] }
 0x103   : > { %6432 = vst [vmem:[#allocation8_spill] sm:$0xff] %v4241_v15 }
 0x104   : > { %v569_v24 = vadd.f32 %v568_v51, %v567_v31  ;;  %v688_v51 = vmul.f32 %v4025_v0, %v4025_v0  ;;  %v4233_v31 = vld [vmem:[%s3298_s20 + $0x3f0] sm:$0xff]  ;;  %v910_v18 = vadd.f32 %v909_v38, %v908_v7  ;;  %v580_v7 = vsel %vm326_vm0, %v4241_v15, 0.0 }
 0x105   : > { %v578_v0 = vsel %vm326_vm0, %v4233_v31, 0.0  ;;  %v917_v44 = vsel %vm326_vm0, %v689_v53, 0.0 }
 0x106   : > { %v571_v25 = vadd.f32 %v570_v63, %v569_v24  ;;  %v913_v63 = vsel %vm326_vm0, %v687_v35, 0.0  ;;  %v912_v33 = vadd.f32 %v911_v56, %v910_v18  ;;  %v691_v35 = vmul.f32 %v4049_v59, %v4049_v59 }
 0x107   : > { %v692_v56 = vmul.f32 %v4057_v6, %v4057_v6 }
 0x108   : > { %v573_v9 = vadd.f32 %v572_v23, %v571_v25  ;;  %v915_v23 = vsel %vm326_vm0, %v688_v51, 0.0  ;;  %v914_v25 = vadd.f32 %v913_v63, %v912_v33  ;;  %v921_v51 = vsel %vm326_vm0, %v691_v35, 0.0 }
 0x109   : > { %v694_v33 = vmul.f32 %v4073_v19, %v4073_v19 }
 0x10a   : > { %v575_v24 = vadd.f32 %v574_v2, %v573_v9  ;;  %v916_v18 = vadd.f32 %v915_v23, %v914_v25  ;;  %v919_v9 = vsel %vm326_vm0, %v690_v34, 0.0 }
 0x10b   : > { %v927_v35 = vsel %vm326_vm0, %v694_v33, 0.0 }
 0x10c   : > { %v577_v38 = vadd.f32 %v576_v27, %v575_v24  ;;  %v918_v5 = vadd.f32 %v917_v44, %v916_v18  ;;  %v693_v27 = vmul.f32 %v4065_v16, %v4065_v16  ;;  %v697_v18 = vmul.f32 %v4097_v28, %v4097_v28 }
 0x10e   : > { %v579_v2 = vadd.f32 %v578_v0, %v577_v38  ;;  %v920_v24 = vadd.f32 %v919_v9, %v918_v5  ;;  %v923_v0 = vsel %vm326_vm0, %v692_v56, 0.0  ;;  %v695_v38 = vmul.f32 %v4081_v1, %v4081_v1 }
 0x10f   : > { %v925_v34 = vsel %vm326_vm0, %v693_v27, 0.0  ;;  %v933_v33 = vsel %vm326_vm0, %v697_v18, 0.0  ;;  %v703_v18 = vmul.f32 %v4145_v10, %v4145_v10 }
 0x110   : > { %v581_v50 = vadd.f32 %v580_v7, %v579_v2  ;;  %v922_v23 = vadd.f32 %v921_v51, %v920_v24  ;;  %v696_v7 = vmul.f32 %v4089_v45, %v4089_v45  ;;  %v698_v51 = vmul.f32 %v4105_v62, %v4105_v62 }
 0x112   : > { %v582_v63 = vrot.slane %v581_v50, 4  ;;  %v924_v25 = vadd.f32 %v923_v0, %v922_v23  ;;  %v931_v27 = vsel %vm326_vm0, %v696_v7, 0.0  ;;  %v699_v0 = vmul.f32 %v4113_v14, %v4113_v14 }
 0x113   : > { %v700_v23 = vmul.f32 %v4121_v29, %v4121_v29 }
 0x114   : > { %v583_v53 = vadd.f32 %v582_v63, %v581_v50  ;;  %v926_v2 = vadd.f32 %v925_v34, %v924_v25  ;;  %v929_v50 = vsel %vm326_vm0, %v695_v38, 0.0  ;;  %v935_v38 = vsel %vm326_vm0, %v698_v51, 0.0 }
 0x115   : > { %v937_v25 = vsel %vm326_vm0, %v699_v0, 0.0 }
 0x116   : > { %v584_v44 = vrot.slane %v583_v53, 2  ;;  %v928_v9 = vadd.f32 %v927_v35, %v926_v2  ;;  %v702_v35 = vmul.f32 %v4137_v47, %v4137_v47 }
 0x118   : > { %v585_v5 = vadd.f32 %v584_v44, %v583_v53  ;;  %v930_v24 = vadd.f32 %v929_v50, %v928_v9  ;;  %v701_v44 = vmul.f32 %v4129_v22, %v4129_v22  ;;  %v704_v9 = vmul.f32 %v4153_v11, %v4153_v11 }
 0x119   : > { %v943_v51 = vsel %vm326_vm0, %v702_v35, 0.0 }
 0x11a   : > { %v586_v56 = vrot.slane %v585_v5, 1  ;;  %v932_v53 = vadd.f32 %v931_v27, %v930_v24  ;;  %v941_v50 = vsel %vm326_vm0, %v701_v44, 0.0  ;;  %v945_v24 = vsel %vm326_vm0, %v703_v18, 0.0 }
 0x11c   : > { %v587_v63 = vadd.f32 %v586_v56, %v585_v5  ;;  %v934_v34 = vadd.f32 %v933_v33, %v932_v53  ;;  %v939_v5 = vsel %vm326_vm0, %v700_v23, 0.0  ;;  %v706_v33 = vmul.f32 %v4169_v41, %v4169_v41 }
 0x11d   : > { %v947_v53 = vsel %vm326_vm0, %v704_v9, 0.0 }
 0x11e   : > { %2638 = vmatmul.mubr.msk.f32.vlgmr.msra.gmra.mrb[0].mxu0 %vm326_vm0, %v587_v63  ;;  %v936_v7 = vadd.f32 %v935_v38, %v934_v34  ;;  %v705_v63 = vmul.f32 %v4161_v32, %v4161_v32  ;;  %v707_v38 = vmul.f32 %v4177_v54, %v4177_v54 }
 0x120   : > { %v938_v2 = vadd.f32 %v937_v25, %v936_v7  ;;  %v949_v34 = vsel %vm326_vm0, %v705_v63, 0.0  ;;  %v708_v25 = vmul.f32 %v4185_v13, %v4185_v13  ;;  %v951_v7 = vsel %vm326_vm0, %v706_v33, 0.0 }
 0x122   : > { %v940_v56 = vadd.f32 %v939_v5, %v938_v2  ;;  %v709_v5 = vmul.f32 %v4193_v26, %v4193_v26  ;;  %v953_v2 = vsel %vm326_vm0, %v707_v38, 0.0 }
 0x124   : > { %v942_v27 = vadd.f32 %v941_v50, %v940_v56  ;;  %v710_v50 = vmul.f32 %v4201_v3, %v4201_v3  ;;  %v955_v56 = vsel %vm326_vm0, %v708_v25, 0.0 }
 0x126   : > { %v944_v0 = vadd.f32 %v943_v51, %v942_v27  ;;  %v711_v51 = vmul.f32 %v4209_v60, %v4209_v60  ;;  %v957_v27 = vsel %vm326_vm0, %v709_v5, 0.0 }
 0x128   : > { %v946_v23 = vadd.f32 %v945_v24, %v944_v0  ;;  %v712_v24 = vmul.f32 %v4217_v20, %v4217_v20  ;;  %v959_v0 = vsel %vm326_vm0, %v710_v50, 0.0 }
 0x12a   : > { %v948_v44 = vadd.f32 %v947_v53, %v946_v23  ;;  %v713_v53 = vmul.f32 %v4225_v39, %v4225_v39  ;;  %v961_v23 = vsel %vm326_vm0, %v711_v51, 0.0 }
 0x12c   : > { %v950_v35 = vadd.f32 %v949_v34, %v948_v44  ;;  %v714_v34 = vmul.f32 %v4233_v31, %v4233_v31  ;;  %v963_v44 = vsel %vm326_vm0, %v712_v24, 0.0 }
 0x12e   : > { %v952_v18 = vadd.f32 %v951_v7, %v950_v35  ;;  %v715_v7 = vmul.f32 %v4241_v15, %v4241_v15  ;;  %v965_v35 = vsel %vm326_vm0, %v713_v53, 0.0 }
 0x130   : > { %v954_v9 = vadd.f32 %v953_v2, %v952_v18  ;;  %v967_v2 = vsel %vm326_vm0, %v714_v34, 0.0  ;;  %v969_v50 = vsel %vm326_vm0, %v715_v7, 0.0 }
 0x132   : > { %v956_v63 = vadd.f32 %v955_v56, %v954_v9 }
 0x134   : > { %v958_v33 = vadd.f32 %v957_v27, %v956_v63 }
 0x136   : > { %v960_v38 = vadd.f32 %v959_v0, %v958_v33 }
 0x138   : > { %v962_v25 = vadd.f32 %v961_v23, %v960_v38 }
 0x13a   : > { %v964_v5 = vadd.f32 %v963_v44, %v962_v25 }
 0x13c   : > { %v966_v18 = vadd.f32 %v965_v35, %v964_v5 }
 0x13e   : > { %v968_v56 = vadd.f32 %v967_v2, %v966_v18  ;;  %v1141_v2 = vlaneseq }
 0x140   : > { %v970_v9 = vadd.f32 %v969_v50, %v968_v56  ;;  %v4329_v18 = vshrl.u32 %v1141_v2, 7  ;;  %v1136_v50 = vld [vmem:[%s6286_s1] sm:$0x1] }
 0x142   : > { %v971_v51 = vrot.slane %v970_v9, 4  ;;  %v6297_v56 = vsub.s32 0, %v4329_v18 }
 0x144   : > { %v972_v27 = vadd.f32 %v971_v51, %v970_v9 }
 0x146   : > { %v973_v63 = vrot.slane %v972_v27, 2 }
 0x148   : > { %v974_v0 = vadd.f32 %v973_v63, %v972_v27  ;;  %v4338_v27 = vld [vmem:[%s6287_s2] sm:$0x1] }
 0x14a   : > { %v975_v33 = vrot.slane %v974_v0, 1 }
 0x14c   : > { %v976_v24 = vadd.f32 %v975_v33, %v974_v0  ;;  %v3180_v33 = vld [vmem:[%s3298_s20 + $0x58] sm:$0xff] }
 0x14e   : > { %2643 = vmatmul.mubr.msk.f32.vlgmr.msra.gmra.mrb[0].mxu1 %vm326_vm0, %v976_v24  ;;  %v3169_v24 = vld [vmem:[%s3298_s20] sm:$0xff] }
 0x1f1   : > { %v1051_v23 = vpop.f32.mrb[0].mxu0 }
 0x1f2   : > { %v2639_v38 = vpop.f32.mrb[1].mxu0  ;;  %v1056_v15 = vmul.f32 0.00048828125, %v1051_v23 }
 0x1f3   : > { %v3170_v38 = vld [vmem:[%s3298_s20 + $0x8] sm:$0xff] }
 0x1f4   : > { %v1131_v53 = vmul.f32 %v1056_v15, %v1056_v15 }
 0x221   : > { %v1126_v44 = vpop.f32.mrb[0].mxu1 }
 0x222   : > { %v2644_v25 = vpop.f32.mrb[1].mxu1  ;;  %v1130_v34 = vmul.f32 0.00048828125, %v1126_v44 }
 0x223   : > { %v3172_v25 = vld [vmem:[%s3298_s20 + $0x18] sm:$0xff] }
 0x224   : > { %v1132_v35 = vsub.f32 %v1130_v34, %v1131_v53 }
 0x226   : > { %v1133_v7 = vmax.f32 %v1132_v35, 0.0  ;;  %v3173_v35 = vld [vmem:[%s3298_s20 + $0x20] sm:$0xff] }
 0x228   : > { %v1134_v5 = vadd.f32 1e-05, %v1133_v7 }
 0x22a   : > { %2655 = vrsqrt.f32 %v1134_v5  ;;  %v3174_v5 = vld [vmem:[%s3298_s20 + $0x28] sm:$0xff] }
 0x234   : > { %v2656_v9 = vpop.eup %2655 }
 0x235   : > { %v1137_v51 = vmul.f32 %v2656_v9, %v1136_v50  ;;  %v3175_v50 = vld [vmem:[%s3298_s20 + $0x30] sm:$0xff] }
 0x237   : > { %v4340_v63 = vmul.f32 %v1137_v51, %v1056_v15  ;;  %v4344_v0 = vrot.slane %v1137_v51, %v6297_v56  ;;  %v3171_v15 = vld [vmem:[%s3298_s20 + $0x10] sm:$0xff]  ;;  %v3176_v51 = vld [vmem:[%s3298_s20 + $0x38] sm:$0xff]  ;;  %v3181_v56 = vld [vmem:[%s3298_s20 + $0x60] sm:$0xff] }
 0x239   : > { %v4350_v23 = vmul.f32 %v3169_v24, %v4344_v0  ;;  %v4354_v53 = vmul.f32 %v3170_v38, %v4344_v0  ;;  %v4358_v44 = vmul.f32 %v3171_v15, %v4344_v0  ;;  %v4362_v34 = vmul.f32 %v3172_v25, %v4344_v0  ;;  %v3177_v38 = vld [vmem:[%s3298_s20 + $0x40] sm:$0xff]  ;;  %v3178_v25 = vld [vmem:[%s3298_s20 + $0x48] sm:$0xff] }
 0x23a   : > { %v4366_v7 = vmul.f32 %v3173_v35, %v4344_v0  ;;  %v4370_v2 = vmul.f32 %v3174_v5, %v4344_v0  ;;  %v4374_v9 = vmul.f32 %v3175_v50, %v4344_v0  ;;  %v4378_v24 = vmul.f32 %v3176_v51, %v4344_v0  ;;  %v3179_v5 = vld [vmem:[%s3298_s20 + $0x50] sm:$0xff] }
 0x23b   : > { %v4382_v15 = vmul.f32 %v3177_v38, %v4344_v0  ;;  %v4386_v35 = vmul.f32 %v3178_v25, %v4344_v0  ;;  %v4390_v50 = vmul.f32 %v3179_v5, %v4344_v0  ;;  %v4394_v51 = vmul.f32 %v3180_v33, %v4344_v0 }
 0x23c   : > { %6433 = vst [vmem:[#allocation9_spill] sm:$0xff] %v4374_v9  ;;  %6434 = vst [vmem:[#allocation10_spill] sm:$0xff] %v4378_v24  ;;  %v4398_v38 = vmul.f32 %v3181_v56, %v4344_v0  ;;  %v3242_v9 = vld [vmem:[%s3298_s20 + $0x248] sm:$0xff] }
 0x23d   : > { %6435 = vst [vmem:[#allocation11_spill] sm:$0xff] %v4382_v15  ;;  %6436 = vst [vmem:[#allocation12_spill] sm:$0xff] %v4386_v35  ;;  %v3182_v15 = vld [vmem:[%s3298_s20 + $0x68] sm:$0xff]  ;;  %v3183_v35 = vld [vmem:[%s3298_s20 + $0x70] sm:$0xff] }
 0x23e   : > { %6437 = vst [vmem:[#allocation13_spill] sm:$0xff] %v4390_v50  ;;  %6438 = vst [vmem:[#allocation14_spill] sm:$0xff] %v4394_v51  ;;  %v4402_v25 = vmul.f32 %v3182_v15, %v4344_v0  ;;  %v4406_v5 = vmul.f32 %v3183_v35, %v4344_v0  ;;  %v3184_v50 = vld [vmem:[%s3298_s20 + $0x78] sm:$0xff]  ;;  %v3185_v51 = vld [vmem:[%s3298_s20 + $0x80] sm:$0xff] }
 0x23f   : > { %6439 = vst [vmem:[#allocation15_spill] sm:$0xff] %v4398_v38  ;;  %v4410_v33 = vmul.f32 %v3184_v50, %v4344_v0  ;;  %v4414_v56 = vmul.f32 %v3185_v51, %v4344_v0  ;;  %v3186_v38 = vld [vmem:[%s3298_s20 + $0x88] sm:$0xff] }
 0x240   : > { %6440 = vst [vmem:[#allocation16_spill] sm:$0xff] %v4402_v25  ;;  %6441 = vst [vmem:[#allocation17_spill] sm:$0xff] %v4406_v5  ;;  %v4418_v15 = vmul.f32 %v3186_v38, %v4344_v0  ;;  %v3187_v25 = vld [vmem:[%s3298_s20 + $0x90] sm:$0xff]  ;;  %v3188_v5 = vld [vmem:[%s3298_s20 + $0x98] sm:$0xff] }
 0x241   : > { %6442 = vst [vmem:[#allocation18_spill] sm:$0xff] %v4410_v33  ;;  %6443 = vst [vmem:[#allocation19_spill] sm:$0xff] %v4414_v56  ;;  %v4422_v35 = vmul.f32 %v3187_v25, %v4344_v0  ;;  %v4426_v50 = vmul.f32 %v3188_v5, %v4344_v0  ;;  %v3189_v33 = vld [vmem:[%s3298_s20 + $0xa0] sm:$0xff]  ;;  %v3190_v56 = vld [vmem:[%s3298_s20 + $0xa8] sm:$0xff] }
 0x242   : > { %6444 = vst [vmem:[#allocation20_spill] sm:$0xff] %v4418_v15  ;;  %v4430_v51 = vmul.f32 %v3189_v33, %v4344_v0  ;;  %v4434_v38 = vmul.f32 %v3190_v56, %v4344_v0  ;;  %v3191_v15 = vld [vmem:[%s3298_s20 + $0xb0] sm:$0xff] }
 0x243   : > { %6445 = vst [vmem:[#allocation21_spill] sm:$0xff] %v4422_v35  ;;  %6446 = vst [vmem:[#allocation22_spill] sm:$0xff] %v4426_v50  ;;  %v4438_v25 = vmul.f32 %v3191_v15, %v4344_v0  ;;  %v3192_v35 = vld [vmem:[%s3298_s20 + $0xb8] sm:$0xff]  ;;  %v3193_v50 = vld [vmem:[%s3298_s20 + $0xc0] sm:$0xff] }
 0x244   : > { %6447 = vst [vmem:[#allocation23_spill] sm:$0xff] %v4430_v51  ;;  %6448 = vst [vmem:[#allocation24_spill] sm:$0xff] %v4434_v38  ;;  %v4442_v5 = vmul.f32 %v3192_v35, %v4344_v0  ;;  %v4446_v33 = vmul.f32 %v3193_v50, %v4344_v0  ;;  %v3194_v51 = vld [vmem:[%s3298_s20 + $0xc8] sm:$0xff]  ;;  %v3195_v38 = vld [vmem:[%s3298_s20 + $0xd0] sm:$0xff] }
 0x245   : > { %6449 = vst [vmem:[#allocation25_spill] sm:$0xff] %v4438_v25  ;;  %v4450_v56 = vmul.f32 %v3194_v51, %v4344_v0  ;;  %v4454_v15 = vmul.f32 %v3195_v38, %v4344_v0  ;;  %v3196_v25 = vld [vmem:[%s3298_s20 + $0xd8] sm:$0xff] }
 0x246   : > { %6450 = vst [vmem:[#allocation26_spill] sm:$0xff] %v4442_v5  ;;  %6451 = vst [vmem:[#allocation27_spill] sm:$0xff] %v4446_v33  ;;  %v4458_v35 = vmul.f32 %v3196_v25, %v4344_v0  ;;  %v3197_v5 = vld [vmem:[%s3298_s20 + $0xe0] sm:$0xff]  ;;  %v3198_v33 = vld [vmem:[%s3298_s20 + $0xe8] sm:$0xff] }
 0x247   : > { %6452 = vst [vmem:[#allocation28_spill] sm:$0xff] %v4450_v56  ;;  %6453 = vst [vmem:[#allocation29_spill] sm:$0xff] %v4454_v15  ;;  %v4462_v50 = vmul.f32 %v3197_v5, %v4344_v0  ;;  %v4466_v51 = vmul.f32 %v3198_v33, %v4344_v0  ;;  %v3199_v56 = vld [vmem:[%s3298_s20 + $0xf0] sm:$0xff]  ;;  %v3200_v15 = vld [vmem:[%s3298_s20 + $0xf8] sm:$0xff] }
 0x248   : > { %6454 = vst [vmem:[#allocation30_spill] sm:$0xff] %v4458_v35  ;;  %v4470_v38 = vmul.f32 %v3199_v56, %v4344_v0  ;;  %v4474_v25 = vmul.f32 %v3200_v15, %v4344_v0  ;;  %v3201_v35 = vld [vmem:[%s3298_s20 + $0x100] sm:$0xff] }
 0x249   : > { %6455 = vst [vmem:[#allocation31_spill] sm:$0xff] %v4462_v50  ;;  %6456 = vst [vmem:[#allocation32_spill] sm:$0xff] %v4466_v51  ;;  %v4478_v5 = vmul.f32 %v3201_v35, %v4344_v0  ;;  %v3202_v50 = vld [vmem:[%s3298_s20 + $0x108] sm:$0xff]  ;;  %v3203_v51 = vld [vmem:[%s3298_s20 + $0x110] sm:$0xff] }
 0x24a   : > { %6457 = vst [vmem:[#allocation33_spill] sm:$0xff] %v4470_v38  ;;  %6458 = vst [vmem:[#allocation34_spill] sm:$0xff] %v4474_v25  ;;  %v4482_v33 = vmul.f32 %v3202_v50, %v4344_v0  ;;  %v4486_v56 = vmul.f32 %v3203_v51, %v4344_v0  ;;  %v3204_v38 = vld [vmem:[%s3298_s20 + $0x118] sm:$0xff]  ;;  %v3205_v25 = vld [vmem:[%s3298_s20 + $0x120] sm:$0xff] }
 0x24b   : > { %6459 = vst [vmem:[#allocation35_spill] sm:$0xff] %v4478_v5  ;;  %v4490_v15 = vmul.f32 %v3204_v38, %v4344_v0  ;;  %v4494_v35 = vmul.f32 %v3205_v25, %v4344_v0  ;;  %v3206_v5 = vld [vmem:[%s3298_s20 + $0x128] sm:$0xff] }
 0x24c   : > { %6460 = vst [vmem:[#allocation36_spill] sm:$0xff] %v4482_v33  ;;  %6461 = vst [vmem:[#allocation37_spill] sm:$0xff] %v4486_v56  ;;  %v4498_v50 = vmul.f32 %v3206_v5, %v4344_v0  ;;  %v3207_v33 = vld [vmem:[%s3298_s20 + $0x130] sm:$0xff]  ;;  %v3208_v56 = vld [vmem:[%s3298_s20 + $0x138] sm:$0xff] }
 0x24d   : > { %6462 = vst [vmem:[#allocation38_spill] sm:$0xff] %v4490_v15  ;;  %6463 = vst [vmem:[#allocation39_spill] sm:$0xff] %v4494_v35  ;;  %v4502_v51 = vmul.f32 %v3207_v33, %v4344_v0  ;;  %v4506_v38 = vmul.f32 %v3208_v56, %v4344_v0  ;;  %v3209_v15 = vld [vmem:[%s3298_s20 + $0x140] sm:$0xff]  ;;  %v3210_v35 = vld [vmem:[%s3298_s20 + $0x148] sm:$0xff] }
 0x24e   : > { %6464 = vst [vmem:[#allocation40_spill] sm:$0xff] %v4498_v50  ;;  %v4510_v25 = vmul.f32 %v3209_v15, %v4344_v0  ;;  %v4514_v5 = vmul.f32 %v3210_v35, %v4344_v0  ;;  %v3211_v50 = vld [vmem:[%s3298_s20 + $0x150] sm:$0xff] }
 0x24f   : > { %6465 = vst [vmem:[#allocation41_spill] sm:$0xff] %v4502_v51  ;;  %6466 = vst [vmem:[#allocation42_spill] sm:$0xff] %v4506_v38  ;;  %v4518_v33 = vmul.f32 %v3211_v50, %v4344_v0  ;;  %v3212_v51 = vld [vmem:[%s3298_s20 + $0x158] sm:$0xff]  ;;  %v3213_v38 = vld [vmem:[%s3298_s20 + $0x160] sm:$0xff] }
 0x250   : > { %6467 = vst [vmem:[#allocation43_spill] sm:$0xff] %v4510_v25  ;;  %6468 = vst [vmem:[#allocation44_spill] sm:$0xff] %v4514_v5  ;;  %v4522_v56 = vmul.f32 %v3212_v51, %v4344_v0  ;;  %v4526_v15 = vmul.f32 %v3213_v38, %v4344_v0  ;;  %v3214_v25 = vld [vmem:[%s3298_s20 + $0x168] sm:$0xff]  ;;  %v3215_v5 = vld [vmem:[%s3298_s20 + $0x170] sm:$0xff] }
 0x251   : > { %6469 = vst [vmem:[#allocation45_spill] sm:$0xff] %v4518_v33  ;;  %v4530_v35 = vmul.f32 %v3214_v25, %v4344_v0  ;;  %v4534_v50 = vmul.f32 %v3215_v5, %v4344_v0  ;;  %v3216_v33 = vld [vmem:[%s3298_s20 + $0x178] sm:$0xff] }
 0x252   : > { %6470 = vst [vmem:[#allocation46_spill] sm:$0xff] %v4522_v56  ;;  %6471 = vst [vmem:[#allocation47_spill] sm:$0xff] %v4526_v15  ;;  %v4538_v51 = vmul.f32 %v3216_v33, %v4344_v0  ;;  %v3217_v56 = vld [vmem:[%s3298_s20 + $0x180] sm:$0xff]  ;;  %v3218_v15 = vld [vmem:[%s3298_s20 + $0x188] sm:$0xff] }
 0x253   : > { %6472 = vst [vmem:[#allocation48_spill] sm:$0xff] %v4530_v35  ;;  %6473 = vst [vmem:[#allocation49_spill] sm:$0xff] %v4534_v50  ;;  %v4542_v38 = vmul.f32 %v3217_v56, %v4344_v0  ;;  %v4546_v25 = vmul.f32 %v3218_v15, %v4344_v0  ;;  %v3219_v35 = vld [vmem:[%s3298_s20 + $0x190] sm:$0xff]  ;;  %v3220_v50 = vld [vmem:[%s3298_s20 + $0x198] sm:$0xff] }
 0x254   : > { %6474 = vst [vmem:[#allocation50_spill] sm:$0xff] %v4538_v51  ;;  %v4550_v5 = vmul.f32 %v3219_v35, %v4344_v0  ;;  %v4554_v33 = vmul.f32 %v3220_v50, %v4344_v0  ;;  %v3221_v51 = vld [vmem:[%s3298_s20 + $0x1a0] sm:$0xff] }
 0x255   : > { %6475 = vst [vmem:[#allocation51_spill] sm:$0xff] %v4542_v38  ;;  %6476 = vst [vmem:[#allocation52_spill] sm:$0xff] %v4546_v25  ;;  %v4558_v56 = vmul.f32 %v3221_v51, %v4344_v0  ;;  %v3222_v38 = vld [vmem:[%s3298_s20 + $0x1a8] sm:$0xff]  ;;  %v3223_v25 = vld [vmem:[%s3298_s20 + $0x1b0] sm:$0xff] }
 0x256   : > { %6477 = vst [vmem:[#allocation53_spill] sm:$0xff] %v4550_v5  ;;  %6478 = vst [vmem:[#allocation54_spill] sm:$0xff] %v4554_v33  ;;  %v4562_v15 = vmul.f32 %v3222_v38, %v4344_v0  ;;  %v4566_v35 = vmul.f32 %v3223_v25, %v4344_v0  ;;  %v3224_v5 = vld [vmem:[%s3298_s20 + $0x1b8] sm:$0xff]  ;;  %v3225_v33 = vld [vmem:[%s3298_s20 + $0x1c0] sm:$0xff] }
 0x257   : > { %6479 = vst [vmem:[#allocation55_spill] sm:$0xff] %v4558_v56  ;;  %v4570_v50 = vmul.f32 %v3224_v5, %v4344_v0  ;;  %v4574_v51 = vmul.f32 %v3225_v33, %v4344_v0  ;;  %v3226_v56 = vld [vmem:[%s3298_s20 + $0x1c8] sm:$0xff] }
 0x258   : > { %6480 = vst [vmem:[#allocation56_spill] sm:$0xff] %v4562_v15  ;;  %6481 = vst [vmem:[#allocation57_spill] sm:$0xff] %v4566_v35  ;;  %v4578_v38 = vmul.f32 %v3226_v56, %v4344_v0  ;;  %v3227_v15 = vld [vmem:[%s3298_s20 + $0x1d0] sm:$0xff]  ;;  %v3228_v35 = vld [vmem:[%s3298_s20 + $0x1d8] sm:$0xff] }
 0x259   : > { %6482 = vst [vmem:[#allocation58_spill] sm:$0xff] %v4570_v50  ;;  %6483 = vst [vmem:[#allocation59_spill] sm:$0xff] %v4574_v51  ;;  %v4582_v25 = vmul.f32 %v3227_v15, %v4344_v0  ;;  %v4586_v5 = vmul.f32 %v3228_v35, %v4344_v0  ;;  %v3229_v50 = vld [vmem:[%s3298_s20 + $0x1e0] sm:$0xff]  ;;  %v3230_v51 = vld [vmem:[%s3298_s20 + $0x1e8] sm:$0xff] }
 0x25a   : > { %6484 = vst [vmem:[#allocation60_spill] sm:$0xff] %v4578_v38  ;;  %v4590_v33 = vmul.f32 %v3229_v50, %v4344_v0  ;;  %v4594_v56 = vmul.f32 %v3230_v51, %v4344_v0  ;;  %v3231_v38 = vld [vmem:[%s3298_s20 + $0x1f0] sm:$0xff] }
 0x25b   : > { %6485 = vst [vmem:[#allocation61_spill] sm:$0xff] %v4582_v25  ;;  %6486 = vst [vmem:[#allocation62_spill] sm:$0xff] %v4586_v5  ;;  %v4598_v15 = vmul.f32 %v3231_v38, %v4344_v0  ;;  %v3232_v25 = vld [vmem:[%s3298_s20 + $0x1f8] sm:$0xff]  ;;  %v3233_v5 = vld [vmem:[%s3298_s20 + $0x200] sm:$0xff] }
 0x25c   : > { %6487 = vst [vmem:[#allocation63_spill] sm:$0xff] %v4590_v33  ;;  %6488 = vst [vmem:[#allocation64_spill] sm:$0xff] %v4594_v56  ;;  %v4602_v35 = vmul.f32 %v3232_v25, %v4344_v0  ;;  %v4606_v50 = vmul.f32 %v3233_v5, %v4344_v0  ;;  %v3234_v33 = vld [vmem:[%s3298_s20 + $0x208] sm:$0xff]  ;;  %v3235_v56 = vld [vmem:[%s3298_s20 + $0x210] sm:$0xff] }
 0x25d   : > { %6489 = vst [vmem:[#allocation65_spill] sm:$0xff] %v4598_v15  ;;  %v4610_v51 = vmul.f32 %v3234_v33, %v4344_v0  ;;  %v4614_v38 = vmul.f32 %v3235_v56, %v4344_v0  ;;  %v3236_v15 = vld [vmem:[%s3298_s20 + $0x218] sm:$0xff] }
 0x25e   : > { %6490 = vst [vmem:[#allocation66_spill] sm:$0xff] %v4602_v35  ;;  %6491 = vst [vmem:[#allocation67_spill] sm:$0xff] %v4606_v50  ;;  %v4618_v25 = vmul.f32 %v3236_v15, %v4344_v0  ;;  %v3237_v35 = vld [vmem:[%s3298_s20 + $0x220] sm:$0xff]  ;;  %v3238_v50 = vld [vmem:[%s3298_s20 + $0x228] sm:$0xff] }
 0x25f   : > { %6492 = vst [vmem:[#allocation68_spill] sm:$0xff] %v4610_v51  ;;  %6493 = vst [vmem:[#allocation69_spill] sm:$0xff] %v4614_v38  ;;  %v4622_v5 = vmul.f32 %v3237_v35, %v4344_v0  ;;  %v4626_v33 = vmul.f32 %v3238_v50, %v4344_v0  ;;  %v3239_v51 = vld [vmem:[%s3298_s20 + $0x230] sm:$0xff]  ;;  %v3240_v56 = vld [vmem:[%s3298_s20 + $0x238] sm:$0xff]  ;;  %v4642_v35 = vmul.f32 %v3242_v9, %v4344_v0 }
 0x260   : > { %6494 = vst [vmem:[#allocation70_spill] sm:$0xff] %v4618_v25  ;;  %v4630_v24 = vmul.f32 %v3239_v51, %v4344_v0  ;;  %v4634_v38 = vmul.f32 %v3240_v56, %v4344_v0  ;;  %v3241_v15 = vld [vmem:[%s3298_s20 + $0x240] sm:$0xff]  ;;  %v4662_v9 = vmul.f32 %v4344_v0, %v3846_v37  ;;  %v4682_v37 = vmul.f32 %v4344_v0, %v3886_v52 }
 0x261   : > { %6495 = vst [vmem:[#allocation71_spill] sm:$0xff] %v4622_v5  ;;  %6496 = vst [vmem:[#allocation72_spill] sm:$0xff] %v4626_v33  ;;  %v4638_v25 = vmul.f32 %v3241_v15, %v4344_v0  ;;  %v3243_v5 = vld [vmem:[%s3298_s20 + $0x250] sm:$0xff]  ;;  %v3244_v33 = vld [vmem:[%s3298_s20 + $0x258] sm:$0xff]  ;;  %v4702_v52 = vmul.f32 %v4344_v0, %v3926_v8  ;;  %v4722_v8 = vmul.f32 %v4344_v0, %v3966_v36 }
 0x262   : > { %6497 = vst [vmem:[#allocation73_spill] sm:$0xff] %v4630_v24  ;;  %6498 = vst [vmem:[#allocation74_spill] sm:$0xff] %v4634_v38  ;;  %v4646_v50 = vmul.f32 %v3243_v5, %v4344_v0  ;;  %v4650_v51 = vmul.f32 %v3244_v33, %v4344_v0  ;;  %v3245_v24 = vld [vmem:[%s3298_s20 + $0x260] sm:$0xff]  ;;  %v3246_v38 = vld [vmem:[%s3298_s20 + $0x268] sm:$0xff]  ;;  %v4666_v5 = vmul.f32 %v4344_v0, %v3854_v40 }
 0x263   : > { %v4654_v56 = vmul.f32 %v3245_v24, %v4344_v0  ;;  %v4658_v15 = vmul.f32 %v3246_v38, %v4344_v0  ;;  %v4670_v33 = vmul.f32 %v4344_v0, %v3862_v43  ;;  %v4674_v24 = vmul.f32 %v4344_v0, %v3870_v46  ;;  %6501 = vst [vmem:[#allocation77_spill] sm:$0xff] %v4722_v8  ;;  %v6507_v8 = vld [vmem:[#allocation4_spill] sm:$0xff] }
 0x264   : > { %v4678_v38 = vmul.f32 %v4344_v0, %v3878_v49  ;;  %v4686_v40 = vmul.f32 %v4344_v0, %v3894_v55  ;;  %v4690_v43 = vmul.f32 %v4344_v0, %v3902_v58  ;;  %v4694_v46 = vmul.f32 %v4344_v0, %v3910_v61 }
 0x265   : > { %v4698_v49 = vmul.f32 %v4344_v0, %v3918_v4  ;;  %v4706_v55 = vmul.f32 %v4344_v0, %v3934_v12  ;;  %v4710_v58 = vmul.f32 %v4344_v0, %v3942_v17  ;;  %v4714_v61 = vmul.f32 %v4344_v0, %v3950_v21 }
 0x266   : > { %v4718_v4 = vmul.f32 %v4344_v0, %v3958_v30  ;;  %v4726_v12 = vmul.f32 %v4344_v0, %v3974_v42  ;;  %v4730_v17 = vmul.f32 %v4344_v0, %v3982_v48  ;;  %v4734_v21 = vmul.f32 %v4344_v0, %v3990_v57 }
 0x267   : > { %6499 = vst [vmem:[#allocation75_spill] sm:$0xff] %v4714_v61  ;;  %v6505_v61 = vld [vmem:[#allocation2_spill] sm:$0xff]  ;;  %v4746_v42 = vmul.f32 %v4344_v0, %v6507_v8  ;;  %v4766_v8 = vmul.f32 %v4344_v0, %v4057_v6  ;;  %v4786_v6 = vmul.f32 %v4344_v0, %v4097_v28  ;;  %v4806_v28 = vmul.f32 %v4344_v0, %v4137_v47 }
 0x268   : > { %6500 = vst [vmem:[#allocation76_spill] sm:$0xff] %v4718_v4  ;;  %6502 = vst [vmem:[#allocation78_spill] sm:$0xff] %v4726_v12  ;;  %v4738_v30 = vmul.f32 %v4344_v0, %v6505_v61  ;;  %v6506_v4 = vld [vmem:[#allocation3_spill] sm:$0xff]  ;;  %v6508_v12 = vld [vmem:[#allocation5_spill] sm:$0xff]  ;;  %v4826_v47 = vmul.f32 %v4344_v0, %v4177_v54  ;;  %v6514_v54 = vsub.f32 %v4338_v27, %v4340_v63 }
 0x269   : > { %6503 = vst [vmem:[#allocation79_spill] sm:$0xff] %v4730_v17  ;;  %6504 = vst [vmem:[#allocation80_spill] sm:$0xff] %v4734_v21  ;;  %v4742_v36 = vmul.f32 %v4344_v0, %v6506_v4  ;;  %v4750_v48 = vmul.f32 %v4344_v0, %v6508_v12  ;;  %v6509_v17 = vld [vmem:[#allocation6_spill] sm:$0xff]  ;;  %v6510_v21 = vld [vmem:[#allocation7_spill] sm:$0xff]  ;;  %v4762_v4 = vmul.f32 %v4344_v0, %v4049_v59 }
 0x26a   : > { %v4754_v57 = vmul.f32 %v4344_v0, %v6509_v17  ;;  %v4758_v61 = vmul.f32 %v4344_v0, %v6510_v21  ;;  %v4770_v12 = vmul.f32 %v4344_v0, %v4065_v16  ;;  %v4774_v17 = vmul.f32 %v4344_v0, %v4073_v19  ;;  %6512 = vst [vmem:[#allocation3_spill] sm:$0xff] %v4826_v47 }
 0x26b   : > { %v4778_v21 = vmul.f32 %v4344_v0, %v4081_v1  ;;  %v4782_v59 = vmul.f32 %v4344_v0, %v4089_v45  ;;  %v4790_v16 = vmul.f32 %v4344_v0, %v4105_v62  ;;  %v4794_v19 = vmul.f32 %v4344_v0, %v4113_v14 }
 0x26c   : > { %v4798_v1 = vmul.f32 %v4344_v0, %v4121_v29  ;;  %v4802_v45 = vmul.f32 %v4344_v0, %v4129_v22  ;;  %v4810_v62 = vmul.f32 %v4344_v0, %v4145_v10  ;;  %v4814_v14 = vmul.f32 %v4344_v0, %v4153_v11 }
 0x26d   : > { %v4818_v29 = vmul.f32 %v4344_v0, %v4161_v32  ;;  %v4822_v22 = vmul.f32 %v4344_v0, %v4169_v41  ;;  %v4830_v10 = vmul.f32 %v4344_v0, %v4185_v13  ;;  %v4834_v11 = vmul.f32 %v4344_v0, %v4193_v26 }
 0x26e   : > { %v4838_v32 = vmul.f32 %v4344_v0, %v4201_v3  ;;  %v4842_v41 = vmul.f32 %v4344_v0, %v4209_v60  ;;  %v4853_v13 = vmul.f32 %v4344_v0, %v4217_v20  ;;  %v4857_v26 = vmul.f32 %v4344_v0, %v4225_v39  ;;  %v6515_v60 = vld [vmem:[#allocation8_spill] sm:$0xff] }
 0x26f   : > { %6511 = vst [vmem:[#allocation2_spill] sm:$0xff] %v4822_v22  ;;  %v6513_v22 = vsub.s32 0, %v4329_v18  ;;  %v4861_v3 = vmul.f32 %v4344_v0, %v4233_v31  ;;  %v4865_v18 = vmul.f32 %v4344_v0, %v6515_v60  ;;  %v6528_v60 = vld [vmem:[#allocation12_spill] sm:$0xff] }
 0x271   : > { %v4849_v47 = vrot.slane %v6514_v54, %v6513_v22  ;;  %v6524_v22 = vld [vmem:[#allocation10_spill] sm:$0xff]  ;;  %v6526_v54 = vld [vmem:[#allocation11_spill] sm:$0xff] }
 0x273   : > { %v4869_v27 = vadd.f32 %v4849_v47, %v4350_v23  ;;  %v4873_v20 = vadd.f32 %v4849_v47, %v4354_v53  ;;  %v4877_v39 = vadd.f32 %v4849_v47, %v4358_v44  ;;  %v4881_v31 = vadd.f32 %v4849_v47, %v4362_v34  ;;  %v6522_v23 = vld [vmem:[#allocation9_spill] sm:$0xff] }
 0x274   : > { %v4885_v63 = vadd.f32 %v4849_v47, %v4366_v7  ;;  %v4889_v0 = vadd.f32 %v4849_v47, %v4370_v2  ;;  %v4893_v53 = vadd.f32 %v4849_v47, %v6522_v23  ;;  %v4897_v44 = vadd.f32 %v4849_v47, %v6524_v22 }
 0x275   : > { %6516 = vst [vmem:[#allocation4_spill] sm:$0xff] %v4869_v27  ;;  %6517 = vst [vmem:[#allocation5_spill] sm:$0xff] %v4873_v20  ;;  %v4901_v34 = vadd.f32 %v4849_v47, %v6526_v54  ;;  %v4905_v7 = vadd.f32 %v4849_v47, %v6528_v60 }
 0x276   : > { %6518 = vst [vmem:[#allocation6_spill] sm:$0xff] %v4877_v39  ;;  %6519 = vst [vmem:[#allocation7_spill] sm:$0xff] %v4881_v31 }
 0x277   : > { %6520 = vst [vmem:[#allocation8_spill] sm:$0xff] %v4885_v63  ;;  %6521 = vst [vmem:[#allocation81_spill] sm:$0xff] %v4889_v0  ;;  %v6530_v63 = vld [vmem:[#allocation13_spill] sm:$0xff]  ;;  %v6532_v0 = vld [vmem:[#allocation14_spill] sm:$0xff] }
 0x278   : > { %6523 = vst [vmem:[#allocation9_spill] sm:$0xff] %v4893_v53  ;;  %6525 = vst [vmem:[#allocation10_spill] sm:$0xff] %v4897_v44  ;;  %v4909_v2 = vadd.f32 %v4849_v47, %v6530_v63  ;;  %v4913_v23 = vadd.f32 %v4849_v47, %v6532_v0  ;;  %v6534_v53 = vld [vmem:[#allocation15_spill] sm:$0xff]  ;;  %v6536_v44 = vld [vmem:[#allocation16_spill] sm:$0xff] }
 0x279   : > { %6527 = vst [vmem:[#allocation11_spill] sm:$0xff] %v4901_v34  ;;  %6529 = vst [vmem:[#allocation12_spill] sm:$0xff] %v4905_v7  ;;  %v4917_v22 = vadd.f32 %v4849_v47, %v6534_v53  ;;  %v4921_v54 = vadd.f32 %v4849_v47, %v6536_v44  ;;  %v6538_v34 = vld [vmem:[#allocation17_spill] sm:$0xff]  ;;  %v6540_v7 = vld [vmem:[#allocation18_spill] sm:$0xff] }
 0x27a   : > { %6531 = vst [vmem:[#allocation13_spill] sm:$0xff] %v4909_v2  ;;  %6533 = vst [vmem:[#allocation14_spill] sm:$0xff] %v4913_v23  ;;  %v4925_v60 = vadd.f32 %v4849_v47, %v6538_v34  ;;  %v4929_v63 = vadd.f32 %v4849_v47, %v6540_v7  ;;  %v6542_v2 = vld [vmem:[#allocation19_spill] sm:$0xff]  ;;  %v6544_v23 = vld [vmem:[#allocation20_spill] sm:$0xff] }
 0x27b   : > { %6535 = vst [vmem:[#allocation15_spill] sm:$0xff] %v4917_v22  ;;  %6537 = vst [vmem:[#allocation16_spill] sm:$0xff] %v4921_v54  ;;  %v4933_v0 = vadd.f32 %v4849_v47, %v6542_v2  ;;  %v4937_v53 = vadd.f32 %v4849_v47, %v6544_v23  ;;  %v6546_v22 = vld [vmem:[#allocation21_spill] sm:$0xff]  ;;  %v6548_v54 = vld [vmem:[#allocation22_spill] sm:$0xff] }
 0x27c   : > { %6539 = vst [vmem:[#allocation17_spill] sm:$0xff] %v4925_v60  ;;  %6541 = vst [vmem:[#allocation18_spill] sm:$0xff] %v4929_v63  ;;  %v4941_v44 = vadd.f32 %v4849_v47, %v6546_v22  ;;  %v4945_v34 = vadd.f32 %v4849_v47, %v6548_v54  ;;  %v6550_v60 = vld [vmem:[#allocation23_spill] sm:$0xff]  ;;  %v6552_v63 = vld [vmem:[#allocation24_spill] sm:$0xff] }
 0x27d   : > { %6543 = vst [vmem:[#allocation19_spill] sm:$0xff] %v4933_v0  ;;  %6545 = vst [vmem:[#allocation20_spill] sm:$0xff] %v4937_v53  ;;  %v4949_v7 = vadd.f32 %v4849_v47, %v6550_v60  ;;  %v4953_v2 = vadd.f32 %v4849_v47, %v6552_v63  ;;  %v6554_v0 = vld [vmem:[#allocation25_spill] sm:$0xff]  ;;  %v6556_v53 = vld [vmem:[#allocation26_spill] sm:$0xff] }
 0x27e   : > { %6547 = vst [vmem:[#allocation21_spill] sm:$0xff] %v4941_v44  ;;  %6549 = vst [vmem:[#allocation22_spill] sm:$0xff] %v4945_v34  ;;  %v4957_v23 = vadd.f32 %v4849_v47, %v6554_v0  ;;  %v4961_v22 = vadd.f32 %v4849_v47, %v6556_v53  ;;  %v6558_v44 = vld [vmem:[#allocation27_spill] sm:$0xff]  ;;  %v6560_v34 = vld [vmem:[#allocation28_spill] sm:$0xff] }
 0x27f   : > { %6551 = vst [vmem:[#allocation23_spill] sm:$0xff] %v4949_v7  ;;  %6553 = vst [vmem:[#allocation24_spill] sm:$0xff] %v4953_v2  ;;  %v4965_v54 = vadd.f32 %v4849_v47, %v6558_v44  ;;  %v4969_v60 = vadd.f32 %v4849_v47, %v6560_v34  ;;  %v6562_v7 = vld [vmem:[#allocation29_spill] sm:$0xff]  ;;  %v6564_v2 = vld [vmem:[#allocation30_spill] sm:$0xff] }
 0x280   : > { %6555 = vst [vmem:[#allocation25_spill] sm:$0xff] %v4957_v23  ;;  %6557 = vst [vmem:[#allocation26_spill] sm:$0xff] %v4961_v22  ;;  %v4973_v63 = vadd.f32 %v4849_v47, %v6562_v7  ;;  %v4977_v0 = vadd.f32 %v4849_v47, %v6564_v2  ;;  %v6566_v23 = vld [vmem:[#allocation31_spill] sm:$0xff]  ;;  %v6568_v22 = vld [vmem:[#allocation32_spill] sm:$0xff] }
 0x281   : > { %6559 = vst [vmem:[#allocation27_spill] sm:$0xff] %v4965_v54  ;;  %6561 = vst [vmem:[#allocation28_spill] sm:$0xff] %v4969_v60  ;;  %v4981_v53 = vadd.f32 %v4849_v47, %v6566_v23  ;;  %v4985_v44 = vadd.f32 %v4849_v47, %v6568_v22  ;;  %v6570_v54 = vld [vmem:[#allocation33_spill] sm:$0xff]  ;;  %v6572_v60 = vld [vmem:[#allocation34_spill] sm:$0xff] }
 0x282   : > { %6563 = vst [vmem:[#allocation29_spill] sm:$0xff] %v4973_v63  ;;  %6565 = vst [vmem:[#allocation30_spill] sm:$0xff] %v4977_v0  ;;  %v4989_v34 = vadd.f32 %v4849_v47, %v6570_v54  ;;  %v4993_v7 = vadd.f32 %v4849_v47, %v6572_v60  ;;  %v6574_v63 = vld [vmem:[#allocation35_spill] sm:$0xff]  ;;  %v6576_v0 = vld [vmem:[#allocation36_spill] sm:$0xff] }
 0x283   : > { %6567 = vst [vmem:[#allocation31_spill] sm:$0xff] %v4981_v53  ;;  %6569 = vst [vmem:[#allocation32_spill] sm:$0xff] %v4985_v44  ;;  %v4997_v2 = vadd.f32 %v4849_v47, %v6574_v63  ;;  %v5001_v23 = vadd.f32 %v4849_v47, %v6576_v0  ;;  %v6578_v53 = vld [vmem:[#allocation37_spill] sm:$0xff]  ;;  %v6580_v44 = vld [vmem:[#allocation38_spill] sm:$0xff] }
 0x284   : > { %6571 = vst [vmem:[#allocation33_spill] sm:$0xff] %v4989_v34  ;;  %6573 = vst [vmem:[#allocation34_spill] sm:$0xff] %v4993_v7  ;;  %v5005_v22 = vadd.f32 %v4849_v47, %v6578_v53  ;;  %v5009_v54 = vadd.f32 %v4849_v47, %v6580_v44  ;;  %v6582_v34 = vld [vmem:[#allocation39_spill] sm:$0xff]  ;;  %v6584_v7 = vld [vmem:[#allocation40_spill] sm:$0xff] }
 0x285   : > { %6575 = vst [vmem:[#allocation35_spill] sm:$0xff] %v4997_v2  ;;  %6577 = vst [vmem:[#allocation36_spill] sm:$0xff] %v5001_v23  ;;  %v5013_v60 = vadd.f32 %v4849_v47, %v6582_v34  ;;  %v5017_v63 = vadd.f32 %v4849_v47, %v6584_v7  ;;  %v6586_v2 = vld [vmem:[#allocation41_spill] sm:$0xff]  ;;  %v6588_v23 = vld [vmem:[#allocation42_spill] sm:$0xff] }
 0x286   : > { %6579 = vst [vmem:[#allocation37_spill] sm:$0xff] %v5005_v22  ;;  %6581 = vst [vmem:[#allocation38_spill] sm:$0xff] %v5009_v54  ;;  %v5021_v0 = vadd.f32 %v4849_v47, %v6586_v2  ;;  %v5025_v53 = vadd.f32 %v4849_v47, %v6588_v23  ;;  %v6590_v22 = vld [vmem:[#allocation43_spill] sm:$0xff]  ;;  %v6592_v54 = vld [vmem:[#allocation44_spill] sm:$0xff] }
 0x287   : > { %6583 = vst [vmem:[#allocation39_spill] sm:$0xff] %v5013_v60  ;;  %6585 = vst [vmem:[#allocation40_spill] sm:$0xff] %v5017_v63  ;;  %v5029_v44 = vadd.f32 %v4849_v47, %v6590_v22  ;;  %v5033_v34 = vadd.f32 %v4849_v47, %v6592_v54  ;;  %v6594_v60 = vld [vmem:[#allocation45_spill] sm:$0xff]  ;;  %v6596_v63 = vld [vmem:[#allocation46_spill] sm:$0xff] }
 0x288   : > { %6587 = vst [vmem:[#allocation41_spill] sm:$0xff] %v5021_v0  ;;  %6589 = vst [vmem:[#allocation42_spill] sm:$0xff] %v5025_v53  ;;  %v5037_v7 = vadd.f32 %v4849_v47, %v6594_v60  ;;  %v5041_v2 = vadd.f32 %v4849_v47, %v6596_v63  ;;  %v6598_v0 = vld [vmem:[#allocation47_spill] sm:$0xff]  ;;  %v6600_v53 = vld [vmem:[#allocation48_spill] sm:$0xff] }
 0x289   : > { %6591 = vst [vmem:[#allocation43_spill] sm:$0xff] %v5029_v44  ;;  %6593 = vst [vmem:[#allocation44_spill] sm:$0xff] %v5033_v34  ;;  %v5045_v23 = vadd.f32 %v4849_v47, %v6598_v0  ;;  %v5049_v22 = vadd.f32 %v4849_v47, %v6600_v53  ;;  %v6602_v44 = vld [vmem:[#allocation49_spill] sm:$0xff]  ;;  %v6604_v34 = vld [vmem:[#allocation50_spill] sm:$0xff] }
 0x28a   : > { %6595 = vst [vmem:[#allocation45_spill] sm:$0xff] %v5037_v7  ;;  %6597 = vst [vmem:[#allocation46_spill] sm:$0xff] %v5041_v2  ;;  %v5053_v54 = vadd.f32 %v4849_v47, %v6602_v44  ;;  %v5057_v60 = vadd.f32 %v4849_v47, %v6604_v34  ;;  %v6606_v7 = vld [vmem:[#allocation51_spill] sm:$0xff]  ;;  %v6608_v2 = vld [vmem:[#allocation52_spill] sm:$0xff] }
 0x28b   : > { %6599 = vst [vmem:[#allocation47_spill] sm:$0xff] %v5045_v23  ;;  %6601 = vst [vmem:[#allocation48_spill] sm:$0xff] %v5049_v22  ;;  %v5061_v63 = vadd.f32 %v4849_v47, %v6606_v7  ;;  %v5065_v0 = vadd.f32 %v4849_v47, %v6608_v2  ;;  %v6610_v23 = vld [vmem:[#allocation53_spill] sm:$0xff]  ;;  %v6612_v22 = vld [vmem:[#allocation54_spill] sm:$0xff] }
 0x28c   : > { %6603 = vst [vmem:[#allocation49_spill] sm:$0xff] %v5053_v54  ;;  %6605 = vst [vmem:[#allocation50_spill] sm:$0xff] %v5057_v60  ;;  %v5069_v53 = vadd.f32 %v4849_v47, %v6610_v23  ;;  %v5073_v44 = vadd.f32 %v4849_v47, %v6612_v22  ;;  %v6614_v54 = vld [vmem:[#allocation55_spill] sm:$0xff]  ;;  %v6616_v60 = vld [vmem:[#allocation56_spill] sm:$0xff] }
 0x28d   : > { %6607 = vst [vmem:[#allocation51_spill] sm:$0xff] %v5061_v63  ;;  %6609 = vst [vmem:[#allocation52_spill] sm:$0xff] %v5065_v0  ;;  %v5077_v34 = vadd.f32 %v4849_v47, %v6614_v54  ;;  %v5081_v7 = vadd.f32 %v4849_v47, %v6616_v60  ;;  %v6618_v63 = vld [vmem:[#allocation57_spill] sm:$0xff]  ;;  %v6620_v0 = vld [vmem:[#allocation58_spill] sm:$0xff] }
 0x28e   : > { %6611 = vst [vmem:[#allocation53_spill] sm:$0xff] %v5069_v53  ;;  %6613 = vst [vmem:[#allocation54_spill] sm:$0xff] %v5073_v44  ;;  %v5085_v2 = vadd.f32 %v4849_v47, %v6618_v63  ;;  %v5089_v23 = vadd.f32 %v4849_v47, %v6620_v0  ;;  %v6622_v53 = vld [vmem:[#allocation59_spill] sm:$0xff]  ;;  %v6624_v44 = vld [vmem:[#allocation60_spill] sm:$0xff] }
 0x28f   : > { %6615 = vst [vmem:[#allocation55_spill] sm:$0xff] %v5077_v34  ;;  %6617 = vst [vmem:[#allocation56_spill] sm:$0xff] %v5081_v7  ;;  %v5093_v22 = vadd.f32 %v4849_v47, %v6622_v53  ;;  %v5097_v54 = vadd.f32 %v4849_v47, %v6624_v44  ;;  %v6626_v34 = vld [vmem:[#allocation61_spill] sm:$0xff]  ;;  %v6628_v7 = vld [vmem:[#allocation62_spill] sm:$0xff] }
 0x290   : > { %6619 = vst [vmem:[#allocation57_spill] sm:$0xff] %v5085_v2  ;;  %6621 = vst [vmem:[#allocation58_spill] sm:$0xff] %v5089_v23  ;;  %v5101_v60 = vadd.f32 %v4849_v47, %v6626_v34  ;;  %v5105_v63 = vadd.f32 %v4849_v47, %v6628_v7  ;;  %v6630_v2 = vld [vmem:[#allocation63_spill] sm:$0xff]  ;;  %v6632_v23 = vld [vmem:[#allocation64_spill] sm:$0xff] }
 0x291   : > { %6623 = vst [vmem:[#allocation59_spill] sm:$0xff] %v5093_v22  ;;  %6625 = vst [vmem:[#allocation60_spill] sm:$0xff] %v5097_v54  ;;  %v5109_v0 = vadd.f32 %v4849_v47, %v6630_v2  ;;  %v5113_v53 = vadd.f32 %v4849_v47, %v6632_v23  ;;  %v6634_v22 = vld [vmem:[#allocation65_spill] sm:$0xff]  ;;  %v6636_v54 = vld [vmem:[#allocation66_spill] sm:$0xff] }
 0x292   : > { %6627 = vst [vmem:[#allocation61_spill] sm:$0xff] %v5101_v60  ;;  %6629 = vst [vmem:[#allocation62_spill] sm:$0xff] %v5105_v63  ;;  %v5117_v44 = vadd.f32 %v4849_v47, %v6634_v22  ;;  %v5121_v34 = vadd.f32 %v4849_v47, %v6636_v54  ;;  %v6638_v60 = vld [vmem:[#allocation67_spill] sm:$0xff]  ;;  %v6640_v63 = vld [vmem:[#allocation68_spill] sm:$0xff] }
 0x293   : > { %6631 = vst [vmem:[#allocation63_spill] sm:$0xff] %v5109_v0  ;;  %6633 = vst [vmem:[#allocation64_spill] sm:$0xff] %v5113_v53  ;;  %v5125_v7 = vadd.f32 %v4849_v47, %v6638_v60  ;;  %v5129_v2 = vadd.f32 %v4849_v47, %v6640_v63  ;;  %v6642_v0 = vld [vmem:[#allocation69_spill] sm:$0xff]  ;;  %v6644_v53 = vld [vmem:[#allocation70_spill] sm:$0xff] }
 0x294   : > { %6635 = vst [vmem:[#allocation65_spill] sm:$0xff] %v5117_v44  ;;  %6637 = vst [vmem:[#allocation66_spill] sm:$0xff] %v5121_v34  ;;  %v5133_v23 = vadd.f32 %v4849_v47, %v6642_v0  ;;  %v5137_v22 = vadd.f32 %v4849_v47, %v6644_v53  ;;  %v6646_v44 = vld [vmem:[#allocation71_spill] sm:$0xff]  ;;  %v6648_v34 = vld [vmem:[#allocation72_spill] sm:$0xff]  ;;  %v5157_v53 = vadd.f32 %v4849_v47, %v4638_v25 }
 0x295   : > { %6639 = vst [vmem:[#allocation67_spill] sm:$0xff] %v5125_v7  ;;  %6641 = vst [vmem:[#allocation68_spill] sm:$0xff] %v5129_v2  ;;  %v5141_v54 = vadd.f32 %v4849_v47, %v6646_v44  ;;  %v5145_v60 = vadd.f32 %v4849_v47, %v6648_v34  ;;  %v6650_v7 = vld [vmem:[#allocation73_spill] sm:$0xff]  ;;  %v6652_v2 = vld [vmem:[#allocation74_spill] sm:$0xff]  ;;  %v5161_v44 = vadd.f32 %v4849_v47, %v4642_v35 }
 0x296   : > { %6643 = vst [vmem:[#allocation69_spill] sm:$0xff] %v5133_v23  ;;  %6645 = vst [vmem:[#allocation70_spill] sm:$0xff] %v5137_v22  ;;  %v5149_v63 = vadd.f32 %v4849_v47, %v6650_v7  ;;  %v5153_v0 = vadd.f32 %v4849_v47, %v6652_v2  ;;  %v5165_v34 = vadd.f32 %v4849_v47, %v4646_v50 }
 0x297   : > { %6647 = vst [vmem:[#allocation71_spill] sm:$0xff] %v5141_v54  ;;  %6649 = vst [vmem:[#allocation72_spill] sm:$0xff] %v5145_v60  ;;  %v5169_v7 = vadd.f32 %v4849_v47, %v4650_v51  ;;  %v5173_v2 = vadd.f32 %v4849_v47, %v4654_v56  ;;  %v5177_v25 = vadd.f32 %v4849_v47, %v4658_v15 }
 0x298   : > { %6651 = vst [vmem:[#allocation73_spill] sm:$0xff] %v5149_v63  ;;  %6653 = vst [vmem:[#allocation74_spill] sm:$0xff] %v5153_v0  ;;  %v5181_v35 = vadd.f32 %v4849_v47, %v4662_v9  ;;  %v5185_v50 = vadd.f32 %v4849_v47, %v4666_v5  ;;  %v5189_v51 = vadd.f32 %v4849_v47, %v4670_v33 }
 0x299   : > { %6654 = vst [vmem:[#allocation82_spill] sm:$0xff] %v5157_v53  ;;  %6655 = vst [vmem:[#allocation83_spill] sm:$0xff] %v5161_v44  ;;  %v5193_v56 = vadd.f32 %v4849_v47, %v4674_v24  ;;  %v5197_v15 = vadd.f32 %v4849_v47, %v4678_v38  ;;  %v5201_v9 = vadd.f32 %v4849_v47, %v4682_v37 }
 0x29a   : > { %6656 = vst [vmem:[#allocation84_spill] sm:$0xff] %v5165_v34  ;;  %6657 = vst [vmem:[#allocation85_spill] sm:$0xff] %v5169_v7  ;;  %v5205_v5 = vadd.f32 %v4849_v47, %v4686_v40  ;;  %v5209_v33 = vadd.f32 %v4849_v47, %v4690_v43  ;;  %v5213_v24 = vadd.f32 %v4849_v47, %v4694_v46 }
 0x29b   : > { %6658 = vst [vmem:[#allocation86_spill] sm:$0xff] %v5173_v2  ;;  %6659 = vst [vmem:[#allocation87_spill] sm:$0xff] %v5177_v25  ;;  %v5217_v38 = vadd.f32 %v4849_v47, %v4698_v49  ;;  %v5221_v37 = vadd.f32 %v4849_v47, %v4702_v52  ;;  %v5225_v40 = vadd.f32 %v4849_v47, %v4706_v55 }
 0x29c   : > { %6660 = vst [vmem:[#allocation88_spill] sm:$0xff] %v5181_v35  ;;  %6661 = vst [vmem:[#allocation89_spill] sm:$0xff] %v5185_v50  ;;  %v5229_v43 = vadd.f32 %v4849_v47, %v4710_v58 }
 0x29d   : > { %6662 = vst [vmem:[#allocation90_spill] sm:$0xff] %v5189_v51  ;;  %6663 = vst [vmem:[#allocation91_spill] sm:$0xff] %v5193_v56 }
 0x29e   : > { %6664 = vst [vmem:[#allocation92_spill] sm:$0xff] %v5197_v15  ;;  %6665 = vst [vmem:[#allocation93_spill] sm:$0xff] %v5201_v9 }
 0x29f   : > { %6666 = vst [vmem:[#allocation94_spill] sm:$0xff] %v5205_v5  ;;  %6667 = vst [vmem:[#allocation95_spill] sm:$0xff] %v5209_v33  ;;  %v6673_v33 = vld [vmem:[#allocation75_spill] sm:$0xff] }
 0x2a0   : > { %6668 = vst [vmem:[#allocation96_spill] sm:$0xff] %v5213_v24  ;;  %6669 = vst [vmem:[#allocation97_spill] sm:$0xff] %v5217_v38  ;;  %v5233_v46 = vadd.f32 %v4849_v47, %v6673_v33  ;;  %v6675_v24 = vld [vmem:[#allocation76_spill] sm:$0xff]  ;;  %v6677_v38 = vld [vmem:[#allocation77_spill] sm:$0xff] }
 0x2a1   : > { %6670 = vst [vmem:[#allocation98_spill] sm:$0xff] %v5221_v37  ;;  %6671 = vst [vmem:[#allocation99_spill] sm:$0xff] %v5225_v40  ;;  %v5237_v49 = vadd.f32 %v4849_v47, %v6675_v24  ;;  %v5241_v52 = vadd.f32 %v4849_v47, %v6677_v38  ;;  %v6679_v37 = vld [vmem:[#allocation78_spill] sm:$0xff]  ;;  %v6681_v40 = vld [vmem:[#allocation79_spill] sm:$0xff]  ;;  %v5257_v24 = vadd.f32 %v4849_v47, %v4738_v30 }
 0x2a2   : > { %6672 = vst [vmem:[#allocation100_spill] sm:$0xff] %v5229_v43  ;;  %6674 = vst [vmem:[#allocation75_spill] sm:$0xff] %v5233_v46  ;;  %v5245_v55 = vadd.f32 %v4849_v47, %v6679_v37  ;;  %v5249_v58 = vadd.f32 %v4849_v47, %v6681_v40  ;;  %v6683_v43 = vld [vmem:[#allocation80_spill] sm:$0xff]  ;;  %v5261_v38 = vadd.f32 %v4849_v47, %v4742_v36 }
 0x2a3   : > { %6676 = vst [vmem:[#allocation76_spill] sm:$0xff] %v5237_v49  ;;  %6678 = vst [vmem:[#allocation77_spill] sm:$0xff] %v5241_v52  ;;  %v5253_v33 = vadd.f32 %v4849_v47, %v6683_v43  ;;  %v5265_v37 = vadd.f32 %v4849_v47, %v4746_v42  ;;  %v5269_v40 = vadd.f32 %v4849_v47, %v4750_v48 }
 0x2a4   : > { %6680 = vst [vmem:[#allocation78_spill] sm:$0xff] %v5245_v55  ;;  %6682 = vst [vmem:[#allocation79_spill] sm:$0xff] %v5249_v58  ;;  %v5273_v43 = vadd.f32 %v4849_v47, %v4754_v57  ;;  %v5277_v30 = vadd.f32 %v4849_v47, %v4758_v61  ;;  %v5281_v36 = vadd.f32 %v4849_v47, %v4762_v4 }
 0x2a5   : > { %6684 = vst [vmem:[#allocation80_spill] sm:$0xff] %v5253_v33  ;;  %6685 = vst [vmem:[#allocation101_spill] sm:$0xff] %v5257_v24  ;;  %v5285_v42 = vadd.f32 %v4849_v47, %v4766_v8  ;;  %v5289_v48 = vadd.f32 %v4849_v47, %v4770_v12  ;;  %v5293_v57 = vadd.f32 %v4849_v47, %v4774_v17 }
 0x2a6   : > { %6686 = vst [vmem:[#allocation102_spill] sm:$0xff] %v5261_v38  ;;  %6687 = vst [vmem:[#allocation103_spill] sm:$0xff] %v5265_v37  ;;  %v5297_v61 = vadd.f32 %v4849_v47, %v4778_v21  ;;  %v5301_v4 = vadd.f32 %v4849_v47, %v4782_v59  ;;  %v5305_v8 = vadd.f32 %v4849_v47, %v4786_v6 }
 0x2a7   : > { %6688 = vst [vmem:[#allocation104_spill] sm:$0xff] %v5269_v40  ;;  %6689 = vst [vmem:[#allocation105_spill] sm:$0xff] %v5273_v43  ;;  %v5309_v12 = vadd.f32 %v4849_v47, %v4790_v16  ;;  %v5313_v17 = vadd.f32 %v4849_v47, %v4794_v19  ;;  %v5317_v21 = vadd.f32 %v4849_v47, %v4798_v1 }
 0x2a8   : > { %6690 = vst [vmem:[#allocation106_spill] sm:$0xff] %v5277_v30  ;;  %6691 = vst [vmem:[#allocation107_spill] sm:$0xff] %v5281_v36  ;;  %v5321_v59 = vadd.f32 %v4849_v47, %v4802_v45  ;;  %v5325_v6 = vadd.f32 %v4849_v47, %v4806_v28  ;;  %v5329_v16 = vadd.f32 %v4849_v47, %v4810_v62 }
 0x2a9   : > { %6692 = vst [vmem:[#allocation108_spill] sm:$0xff] %v5285_v42  ;;  %6693 = vst [vmem:[#allocation109_spill] sm:$0xff] %v5289_v48  ;;  %v5333_v19 = vadd.f32 %v4849_v47, %v4814_v14  ;;  %v5337_v1 = vadd.f32 %v4849_v47, %v4818_v29  ;;  %v5349_v62 = vadd.f32 %v4849_v47, %v4830_v10 }
 0x2aa   : > { %6694 = vst [vmem:[#allocation110_spill] sm:$0xff] %v5293_v57  ;;  %6695 = vst [vmem:[#allocation111_spill] sm:$0xff] %v5297_v61  ;;  %v5353_v14 = vadd.f32 %v4849_v47, %v4834_v11  ;;  %v5357_v29 = vadd.f32 %v4849_v47, %v4838_v32  ;;  %v5369_v10 = vadd.f32 %v4849_v47, %v4857_v26 }
 0x2ab   : > { %6696 = vst [vmem:[#allocation112_spill] sm:$0xff] %v5301_v4  ;;  %6697 = vst [vmem:[#allocation113_spill] sm:$0xff] %v5305_v8  ;;  %v5373_v11 = vadd.f32 %v4849_v47, %v4861_v3  ;;  %v5377_v32 = vadd.f32 %v4849_v47, %v4865_v18  ;;  %v6720_v3 = vld [vmem:[#allocation9_spill] sm:$0xff] }
 0x2ac   : > { %6698 = vst [vmem:[#allocation114_spill] sm:$0xff] %v5309_v12  ;;  %6699 = vst [vmem:[#allocation115_spill] sm:$0xff] %v5313_v17 }
 0x2ad   : > { %6700 = vst [vmem:[#allocation116_spill] sm:$0xff] %v5317_v21  ;;  %6701 = vst [vmem:[#allocation117_spill] sm:$0xff] %v5321_v59  ;;  %v6706_v21 = vld [vmem:[#allocation2_spill] sm:$0xff]  ;;  %v6708_v59 = vld [vmem:[#allocation3_spill] sm:$0xff] }
 0x2ae   : > { %6702 = vst [vmem:[#allocation118_spill] sm:$0xff] %v5325_v6  ;;  %6703 = vst [vmem:[#allocation119_spill] sm:$0xff] %v5329_v16  ;;  %v5341_v45 = vadd.f32 %v4849_v47, %v6706_v21  ;;  %v5345_v28 = vadd.f32 %v4849_v47, %v6708_v59  ;;  %v5361_v21 = vadd.f32 %v4849_v47, %v4842_v41  ;;  %v2500_v41 = vmul.f32 -1.442695, %v4873_v20  ;;  %v6723_v20 = vld [vmem:[#allocation12_spill] sm:$0xff] }
 0x2af   : > { %6704 = vst [vmem:[#allocation120_spill] sm:$0xff] %v5333_v19  ;;  %6705 = vst [vmem:[#allocation121_spill] sm:$0xff] %v5337_v1  ;;  %v5365_v59 = vadd.f32 %v4849_v47, %v4853_v13  ;;  %v2502_v13 = vmul.f32 -1.442695, %v4881_v31  ;;  %v6721_v47 = vld [vmem:[#allocation10_spill] sm:$0xff]  ;;  %v6724_v31 = vld [vmem:[#allocation13_spill] sm:$0xff] }
 0x2b0   : > { %6707 = vst [vmem:[#allocation2_spill] sm:$0xff] %v5341_v45  ;;  %6709 = vst [vmem:[#allocation3_spill] sm:$0xff] %v5345_v28  ;;  %v2506_v18 = vmul.f32 -1.442695, %v6721_v47 }
 0x2b1   : > { %6710 = vst [vmem:[#allocation122_spill] sm:$0xff] %v5349_v62  ;;  %6711 = vst [vmem:[#allocation123_spill] sm:$0xff] %v5353_v14 }
 0x2b2   : > { %6712 = vst [vmem:[#allocation124_spill] sm:$0xff] %v5357_v29  ;;  %6713 = vst [vmem:[#allocation125_spill] sm:$0xff] %v5361_v21  ;;  %v2499_v29 = vmul.f32 -1.442695, %v4869_v27  ;;  %v2501_v21 = vmul.f32 -1.442695, %v4877_v39 }
 0x2b3   : > { %6714 = vst [vmem:[#allocation126_spill] sm:$0xff] %v5365_v59  ;;  %6715 = vst [vmem:[#allocation127_spill] sm:$0xff] %v5369_v10  ;;  %v6718_v59 = vld [vmem:[#allocation8_spill] sm:$0xff]  ;;  %v6719_v10 = vld [vmem:[#allocation81_spill] sm:$0xff]  ;;  %v2508_v39 = vmul.f32 -1.442695, %v6723_v20 }
 0x2b4   : > { %6716 = vst [vmem:[#allocation128_spill] sm:$0xff] %v5373_v11  ;;  %6717 = vst [vmem:[#allocation129_spill] sm:$0xff] %v5377_v32  ;;  %2657 = vpow2.f32 %v2499_v29  ;;  %v2503_v26 = vmul.f32 -1.442695, %v6718_v59  ;;  %v2504_v14 = vmul.f32 -1.442695, %v6719_v10 }
 0x2b5   : > { %2659 = vpow2.f32 %v2500_v41  ;;  %v2505_v11 = vmul.f32 -1.442695, %v6720_v3  ;;  %v6722_v27 = vld [vmem:[#allocation11_spill] sm:$0xff]  ;;  %v2509_v29 = vmul.f32 -1.442695, %v6724_v31  ;;  %v6725_v59 = vld [vmem:[#allocation14_spill] sm:$0xff] }
 0x2b6   : > { %2661 = vpow2.f32 %v2501_v21  ;;  %v2507_v32 = vmul.f32 -1.442695, %v6722_v27  ;;  %v2510_v41 = vmul.f32 -1.442695, %v6725_v59  ;;  %v6726_v10 = vld [vmem:[#allocation15_spill] sm:$0xff]  ;;  %v6727_v3 = vld [vmem:[#allocation16_spill] sm:$0xff] }
 0x2b7   : > { %2663 = vpow2.f32 %v2502_v13  ;;  %v2511_v21 = vmul.f32 -1.442695, %v6726_v10  ;;  %v2512_v13 = vmul.f32 -1.442695, %v6727_v3 }
 0x2b8   : > { %2665 = vpow2.f32 %v2503_v26  ;;  %v6728_v26 = vld [vmem:[#allocation17_spill] sm:$0xff] }
 0x2b9   : > { %2667 = vpow2.f32 %v2504_v14  ;;  %v2513_v27 = vmul.f32 -1.442695, %v6728_v26 }
 0x2ba   : > { %2669 = vpow2.f32 %v2505_v11  ;;  %v6730_v11 = vld [vmem:[#allocation18_spill] sm:$0xff] }
 0x2bb   : > { %2671 = vpow2.f32 %v2506_v18  ;;  %v2514_v20 = vmul.f32 -1.442695, %v6730_v11  ;;  %v6732_v18 = vld [vmem:[#allocation19_spill] sm:$0xff] }
 0x2bc   : > { %2673 = vpow2.f32 %v2507_v32  ;;  %v2515_v32 = vmul.f32 -1.442695, %v6732_v18 }
 0x2bd   : > { %2675 = vpow2.f32 %v2508_v39  ;;  %v6734_v39 = vld [vmem:[#allocation20_spill] sm:$0xff] }
 0x2be   : > { %v5393_v62 = vpop.eup %2657  ;;  %2677 = vpow2.f32 %v2509_v29  ;;  %v2516_v3 = vmul.f32 -1.442695, %v6734_v39  ;;  %v6736_v29 = vld [vmem:[#allocation21_spill] sm:$0xff] }
 0x2bf   : > { %v5396_v14 = vpop.eup %2659  ;;  %2679 = vpow2.f32 %v2510_v41  ;;  %v2517_v26 = vmul.f32 -1.442695, %v6736_v29  ;;  %v6738_v41 = vld [vmem:[#allocation22_spill] sm:$0xff] }
 0x2c0   : > { %6729 = vst [vmem:[#allocation130_spill] sm:$0xff] %v5396_v14  ;;  %v5399_v31 = vpop.eup %2661  ;;  %2681 = vpow2.f32 %v2511_v21  ;;  %v2518_v11 = vmul.f32 -1.442695, %v6738_v41  ;;  %v6740_v21 = vld [vmem:[#allocation23_spill] sm:$0xff] }
 0x2c1   : > { %6731 = vst [vmem:[#allocation131_spill] sm:$0xff] %v5399_v31  ;;  %v5402_v59 = vpop.eup %2663  ;;  %2683 = vpow2.f32 %v2512_v13  ;;  %v2519_v18 = vmul.f32 -1.442695, %v6740_v21  ;;  %v6742_v13 = vld [vmem:[#allocation24_spill] sm:$0xff] }
 0x2c2   : > { %6733 = vst [vmem:[#allocation132_spill] sm:$0xff] %v5402_v59  ;;  %v5405_v10 = vpop.eup %2665  ;;  %2685 = vpow2.f32 %v2513_v27  ;;  %v2520_v39 = vmul.f32 -1.442695, %v6742_v13  ;;  %v6744_v27 = vld [vmem:[#allocation25_spill] sm:$0xff] }
 0x2c3   : > { %6735 = vst [vmem:[#allocation133_spill] sm:$0xff] %v5405_v10  ;;  %v5408_v47 = vpop.eup %2667  ;;  %2687 = vpow2.f32 %v2514_v20  ;;  %v2521_v29 = vmul.f32 -1.442695, %v6744_v27  ;;  %v6746_v20 = vld [vmem:[#allocation26_spill] sm:$0xff] }
 0x2c4   : > { %6737 = vst [vmem:[#allocation134_spill] sm:$0xff] %v5408_v47  ;;  %v5411_v14 = vpop.eup %2669  ;;  %2689 = vpow2.f32 %v2515_v32  ;;  %v2522_v41 = vmul.f32 -1.442695, %v6746_v20  ;;  %v6748_v32 = vld [vmem:[#allocation27_spill] sm:$0xff] }
 0x2c5   : > { %6739 = vst [vmem:[#allocation135_spill] sm:$0xff] %v5411_v14  ;;  %v5414_v31 = vpop.eup %2671  ;;  %2691 = vpow2.f32 %v2516_v3  ;;  %v2523_v21 = vmul.f32 -1.442695, %v6748_v32  ;;  %v6750_v3 = vld [vmem:[#allocation28_spill] sm:$0xff] }
 0x2c6   : > { %6741 = vst [vmem:[#allocation136_spill] sm:$0xff] %v5414_v31  ;;  %v5417_v59 = vpop.eup %2673  ;;  %2693 = vpow2.f32 %v2517_v26  ;;  %v2524_v13 = vmul.f32 -1.442695, %v6750_v3  ;;  %v6752_v26 = vld [vmem:[#allocation29_spill] sm:$0xff] }
 0x2c7   : > { %6743 = vst [vmem:[#allocation137_spill] sm:$0xff] %v5417_v59  ;;  %v5420_v10 = vpop.eup %2675  ;;  %2695 = vpow2.f32 %v2518_v11  ;;  %v2525_v27 = vmul.f32 -1.442695, %v6752_v26  ;;  %v6754_v11 = vld [vmem:[#allocation30_spill] sm:$0xff] }
 0x2c8   : > { %6745 = vst [vmem:[#allocation138_spill] sm:$0xff] %v5420_v10  ;;  %v5423_v47 = vpop.eup %2677  ;;  %2697 = vpow2.f32 %v2519_v18  ;;  %v2526_v20 = vmul.f32 -1.442695, %v6754_v11  ;;  %v6756_v18 = vld [vmem:[#allocation31_spill] sm:$0xff] }
 0x2c9   : > { %6747 = vst [vmem:[#allocation139_spill] sm:$0xff] %v5423_v47  ;;  %v5426_v14 = vpop.eup %2679  ;;  %2699 = vpow2.f32 %v2520_v39  ;;  %v2527_v32 = vmul.f32 -1.442695, %v6756_v18  ;;  %v6758_v39 = vld [vmem:[#allocation32_spill] sm:$0xff] }
 0x2ca   : > { %6749 = vst [vmem:[#allocation140_spill] sm:$0xff] %v5426_v14  ;;  %v5429_v31 = vpop.eup %2681  ;;  %2701 = vpow2.f32 %v2521_v29  ;;  %v2528_v3 = vmul.f32 -1.442695, %v6758_v39  ;;  %v6760_v29 = vld [vmem:[#allocation33_spill] sm:$0xff] }
 0x2cb   : > { %6751 = vst [vmem:[#allocation141_spill] sm:$0xff] %v5429_v31  ;;  %v5432_v59 = vpop.eup %2683  ;;  %2703 = vpow2.f32 %v2522_v41  ;;  %v2529_v26 = vmul.f32 -1.442695, %v6760_v29  ;;  %v6762_v41 = vld [vmem:[#allocation34_spill] sm:$0xff] }
 0x2cc   : > { %6753 = vst [vmem:[#allocation142_spill] sm:$0xff] %v5432_v59  ;;  %v5435_v10 = vpop.eup %2685  ;;  %2705 = vpow2.f32 %v2523_v21  ;;  %v2530_v11 = vmul.f32 -1.442695, %v6762_v41  ;;  %v6764_v21 = vld [vmem:[#allocation35_spill] sm:$0xff] }
 0x2cd   : > { %6755 = vst [vmem:[#allocation143_spill] sm:$0xff] %v5435_v10  ;;  %v5438_v47 = vpop.eup %2687  ;;  %2707 = vpow2.f32 %v2524_v13  ;;  %v2531_v18 = vmul.f32 -1.442695, %v6764_v21  ;;  %v6766_v13 = vld [vmem:[#allocation36_spill] sm:$0xff] }
 0x2ce   : > { %6757 = vst [vmem:[#allocation144_spill] sm:$0xff] %v5438_v47  ;;  %v5441_v14 = vpop.eup %2689  ;;  %2709 = vpow2.f32 %v2525_v27  ;;  %v2532_v39 = vmul.f32 -1.442695, %v6766_v13  ;;  %v6768_v27 = vld [vmem:[#allocation37_spill] sm:$0xff] }
 0x2cf   : > { %6759 = vst [vmem:[#allocation145_spill] sm:$0xff] %v5441_v14  ;;  %v5444_v31 = vpop.eup %2691  ;;  %2711 = vpow2.f32 %v2526_v20  ;;  %v2533_v29 = vmul.f32 -1.442695, %v6768_v27  ;;  %v6770_v20 = vld [vmem:[#allocation38_spill] sm:$0xff] }
 0x2d0   : > { %6761 = vst [vmem:[#allocation146_spill] sm:$0xff] %v5444_v31  ;;  %v5447_v59 = vpop.eup %2693  ;;  %2713 = vpow2.f32 %v2527_v32  ;;  %v2534_v41 = vmul.f32 -1.442695, %v6770_v20  ;;  %v6772_v32 = vld [vmem:[#allocation39_spill] sm:$0xff] }
 0x2d1   : > { %6763 = vst [vmem:[#allocation147_spill] sm:$0xff] %v5447_v59  ;;  %v5450_v10 = vpop.eup %2695  ;;  %2715 = vpow2.f32 %v2528_v3  ;;  %v2535_v21 = vmul.f32 -1.442695, %v6772_v32  ;;  %v6774_v3 = vld [vmem:[#allocation40_spill] sm:$0xff] }
 0x2d2   : > { %6765 = vst [vmem:[#allocation148_spill] sm:$0xff] %v5450_v10  ;;  %v5453_v47 = vpop.eup %2697  ;;  %2717 = vpow2.f32 %v2529_v26  ;;  %v2536_v13 = vmul.f32 -1.442695, %v6774_v3  ;;  %v6776_v26 = vld [vmem:[#allocation41_spill] sm:$0xff] }
 0x2d3   : > { %6767 = vst [vmem:[#allocation149_spill] sm:$0xff] %v5453_v47  ;;  %v5456_v14 = vpop.eup %2699  ;;  %2719 = vpow2.f32 %v2530_v11  ;;  %v2537_v27 = vmul.f32 -1.442695, %v6776_v26  ;;  %v6778_v11 = vld [vmem:[#allocation42_spill] sm:$0xff] }
 0x2d4   : > { %6769 = vst [vmem:[#allocation150_spill] sm:$0xff] %v5456_v14  ;;  %v5459_v31 = vpop.eup %2701  ;;  %2721 = vpow2.f32 %v2531_v18  ;;  %v2538_v20 = vmul.f32 -1.442695, %v6778_v11  ;;  %v6780_v18 = vld [vmem:[#allocation43_spill] sm:$0xff] }
 0x2d5   : > { %6771 = vst [vmem:[#allocation151_spill] sm:$0xff] %v5459_v31  ;;  %v5462_v59 = vpop.eup %2703  ;;  %2723 = vpow2.f32 %v2532_v39  ;;  %v2539_v32 = vmul.f32 -1.442695, %v6780_v18  ;;  %v6782_v39 = vld [vmem:[#allocation44_spill] sm:$0xff] }
 0x2d6   : > { %6773 = vst [vmem:[#allocation152_spill] sm:$0xff] %v5462_v59  ;;  %v5465_v10 = vpop.eup %2705  ;;  %2725 = vpow2.f32 %v2533_v29  ;;  %v2540_v3 = vmul.f32 -1.442695, %v6782_v39  ;;  %v6784_v29 = vld [vmem:[#allocation45_spill] sm:$0xff] }
 0x2d7   : > { %6775 = vst [vmem:[#allocation153_spill] sm:$0xff] %v5465_v10  ;;  %v5468_v47 = vpop.eup %2707  ;;  %2727 = vpow2.f32 %v2534_v41  ;;  %v2541_v26 = vmul.f32 -1.442695, %v6784_v29  ;;  %v6786_v41 = vld [vmem:[#allocation46_spill] sm:$0xff] }
 0x2d8   : > { %6777 = vst [vmem:[#allocation154_spill] sm:$0xff] %v5468_v47  ;;  %v5471_v14 = vpop.eup %2709  ;;  %2729 = vpow2.f32 %v2535_v21  ;;  %v2542_v11 = vmul.f32 -1.442695, %v6786_v41  ;;  %v6788_v21 = vld [vmem:[#allocation47_spill] sm:$0xff] }
 0x2d9   : > { %6779 = vst [vmem:[#allocation155_spill] sm:$0xff] %v5471_v14  ;;  %v5474_v31 = vpop.eup %2711  ;;  %2731 = vpow2.f32 %v2536_v13  ;;  %v2543_v18 = vmul.f32 -1.442695, %v6788_v21  ;;  %v6790_v13 = vld [vmem:[#allocation48_spill] sm:$0xff] }
 0x2da   : > { %6781 = vst [vmem:[#allocation156_spill] sm:$0xff] %v5474_v31  ;;  %v5477_v59 = vpop.eup %2713  ;;  %2733 = vpow2.f32 %v2537_v27  ;;  %v2544_v39 = vmul.f32 -1.442695, %v6790_v13  ;;  %v6792_v27 = vld [vmem:[#allocation49_spill] sm:$0xff] }
 0x2db   : > { %6783 = vst [vmem:[#allocation157_spill] sm:$0xff] %v5477_v59  ;;  %v5480_v10 = vpop.eup %2715  ;;  %2735 = vpow2.f32 %v2538_v20  ;;  %v2545_v29 = vmul.f32 -1.442695, %v6792_v27  ;;  %v6794_v20 = vld [vmem:[#allocation50_spill] sm:$0xff] }
 0x2dc   : > { %6785 = vst [vmem:[#allocation158_spill] sm:$0xff] %v5480_v10  ;;  %v5483_v47 = vpop.eup %2717  ;;  %2737 = vpow2.f32 %v2539_v32  ;;  %v2546_v41 = vmul.f32 -1.442695, %v6794_v20  ;;  %v6796_v32 = vld [vmem:[#allocation51_spill] sm:$0xff] }
 0x2dd   : > { %6787 = vst [vmem:[#allocation159_spill] sm:$0xff] %v5483_v47  ;;  %v5486_v14 = vpop.eup %2719  ;;  %2739 = vpow2.f32 %v2540_v3  ;;  %v2547_v21 = vmul.f32 -1.442695, %v6796_v32  ;;  %v6798_v3 = vld [vmem:[#allocation52_spill] sm:$0xff] }
 0x2de   : > { %6789 = vst [vmem:[#allocation160_spill] sm:$0xff] %v5486_v14  ;;  %v5489_v31 = vpop.eup %2721  ;;  %2741 = vpow2.f32 %v2541_v26  ;;  %v2548_v13 = vmul.f32 -1.442695, %v6798_v3  ;;  %v6800_v26 = vld [vmem:[#allocation53_spill] sm:$0xff] }
 0x2df   : > { %6791 = vst [vmem:[#allocation161_spill] sm:$0xff] %v5489_v31  ;;  %v5492_v59 = vpop.eup %2723  ;;  %2743 = vpow2.f32 %v2542_v11  ;;  %v2549_v27 = vmul.f32 -1.442695, %v6800_v26  ;;  %v6802_v11 = vld [vmem:[#allocation54_spill] sm:$0xff] }
 0x2e0   : > { %6793 = vst [vmem:[#allocation162_spill] sm:$0xff] %v5492_v59  ;;  %v5495_v10 = vpop.eup %2725  ;;  %2745 = vpow2.f32 %v2543_v18  ;;  %v2550_v20 = vmul.f32 -1.442695, %v6802_v11  ;;  %v6804_v18 = vld [vmem:[#allocation55_spill] sm:$0xff] }
 0x2e1   : > { %6795 = vst [vmem:[#allocation163_spill] sm:$0xff] %v5495_v10  ;;  %v5498_v47 = vpop.eup %2727  ;;  %2747 = vpow2.f32 %v2544_v39  ;;  %v2551_v32 = vmul.f32 -1.442695, %v6804_v18  ;;  %v6806_v39 = vld [vmem:[#allocation56_spill] sm:$0xff] }
 0x2e2   : > { %6797 = vst [vmem:[#allocation164_spill] sm:$0xff] %v5498_v47  ;;  %v5501_v14 = vpop.eup %2729  ;;  %2749 = vpow2.f32 %v2545_v29  ;;  %v2552_v3 = vmul.f32 -1.442695, %v6806_v39  ;;  %v6808_v29 = vld [vmem:[#allocation57_spill] sm:$0xff] }
 0x2e3   : > { %6799 = vst [vmem:[#allocation165_spill] sm:$0xff] %v5501_v14  ;;  %v5504_v31 = vpop.eup %2731  ;;  %2751 = vpow2.f32 %v2546_v41  ;;  %v2553_v26 = vmul.f32 -1.442695, %v6808_v29  ;;  %v6810_v41 = vld [vmem:[#allocation58_spill] sm:$0xff] }
 0x2e4   : > { %6801 = vst [vmem:[#allocation166_spill] sm:$0xff] %v5504_v31  ;;  %v5507_v59 = vpop.eup %2733  ;;  %2753 = vpow2.f32 %v2547_v21  ;;  %v2554_v11 = vmul.f32 -1.442695, %v6810_v41  ;;  %v6812_v21 = vld [vmem:[#allocation59_spill] sm:$0xff] }
 0x2e5   : > { %6803 = vst [vmem:[#allocation167_spill] sm:$0xff] %v5507_v59  ;;  %v5510_v10 = vpop.eup %2735  ;;  %2755 = vpow2.f32 %v2548_v13  ;;  %v2555_v18 = vmul.f32 -1.442695, %v6812_v21  ;;  %v6814_v13 = vld [vmem:[#allocation60_spill] sm:$0xff] }
 0x2e6   : > { %6805 = vst [vmem:[#allocation168_spill] sm:$0xff] %v5510_v10  ;;  %v5513_v47 = vpop.eup %2737  ;;  %2757 = vpow2.f32 %v2549_v27  ;;  %v2556_v39 = vmul.f32 -1.442695, %v6814_v13  ;;  %v6816_v27 = vld [vmem:[#allocation61_spill] sm:$0xff] }
 0x2e7   : > { %6807 = vst [vmem:[#allocation169_spill] sm:$0xff] %v5513_v47  ;;  %v5516_v14 = vpop.eup %2739  ;;  %2759 = vpow2.f32 %v2550_v20  ;;  %v2557_v29 = vmul.f32 -1.442695, %v6816_v27  ;;  %v6818_v20 = vld [vmem:[#allocation62_spill] sm:$0xff] }
 0x2e8   : > { %6809 = vst [vmem:[#allocation170_spill] sm:$0xff] %v5516_v14  ;;  %v5519_v31 = vpop.eup %2741  ;;  %2761 = vpow2.f32 %v2551_v32  ;;  %v2558_v41 = vmul.f32 -1.442695, %v6818_v20  ;;  %v6820_v32 = vld [vmem:[#allocation63_spill] sm:$0xff] }
 0x2e9   : > { %6811 = vst [vmem:[#allocation171_spill] sm:$0xff] %v5519_v31  ;;  %v5522_v59 = vpop.eup %2743  ;;  %2763 = vpow2.f32 %v2552_v3  ;;  %v2559_v21 = vmul.f32 -1.442695, %v6820_v32  ;;  %v6822_v3 = vld [vmem:[#allocation64_spill] sm:$0xff] }
 0x2ea   : > { %6813 = vst [vmem:[#allocation172_spill] sm:$0xff] %v5522_v59  ;;  %v5525_v10 = vpop.eup %2745  ;;  %2765 = vpow2.f32 %v2553_v26  ;;  %v2560_v13 = vmul.f32 -1.442695, %v6822_v3  ;;  %v6823_v26 = vld [vmem:[#allocation65_spill] sm:$0xff] }
 0x2eb   : > { %6815 = vst [vmem:[#allocation173_spill] sm:$0xff] %v5525_v10  ;;  %v5528_v47 = vpop.eup %2747  ;;  %2767 = vpow2.f32 %v2554_v11  ;;  %v2561_v27 = vmul.f32 -1.442695, %v6823_v26  ;;  %v6824_v11 = vld [vmem:[#allocation66_spill] sm:$0xff] }
 0x2ec   : > { %6817 = vst [vmem:[#allocation174_spill] sm:$0xff] %v5528_v47  ;;  %v5531_v14 = vpop.eup %2749  ;;  %2769 = vpow2.f32 %v2555_v18  ;;  %v2562_v20 = vmul.f32 -1.442695, %v6824_v11  ;;  %v6825_v18 = vld [vmem:[#allocation67_spill] sm:$0xff] }
 0x2ed   : > { %6819 = vst [vmem:[#allocation175_spill] sm:$0xff] %v5531_v14  ;;  %v5534_v31 = vpop.eup %2751  ;;  %2771 = vpow2.f32 %v2556_v39  ;;  %v2563_v32 = vmul.f32 -1.442695, %v6825_v18  ;;  %v6826_v39 = vld [vmem:[#allocation68_spill] sm:$0xff] }
 0x2ee   : > { %6821 = vst [vmem:[#allocation176_spill] sm:$0xff] %v5534_v31  ;;  %v5537_v59 = vpop.eup %2753  ;;  %2773 = vpow2.f32 %v2557_v29  ;;  %v2564_v3 = vmul.f32 -1.442695, %v6826_v39  ;;  %v2565_v29 = vmul.f32 -1.442695, %v5133_v23 }
 0x2ef   : > { %v5540_v10 = vpop.eup %2755  ;;  %2775 = vpow2.f32 %v2558_v41  ;;  %v2566_v41 = vmul.f32 -1.442695, %v5137_v22 }
 0x2f0   : > { %v5543_v47 = vpop.eup %2757  ;;  %2777 = vpow2.f32 %v2559_v21  ;;  %v2567_v21 = vmul.f32 -1.442695, %v5141_v54 }
 0x2f1   : > { %v5546_v14 = vpop.eup %2759  ;;  %2779 = vpow2.f32 %v2560_v13  ;;  %v2568_v13 = vmul.f32 -1.442695, %v5145_v60 }
 0x2f2   : > { %v5549_v31 = vpop.eup %2761  ;;  %2781 = vpow2.f32 %v2561_v27  ;;  %v2569_v27 = vmul.f32 -1.442695, %v5149_v63 }
 0x2f3   : > { %v5552_v26 = vpop.eup %2763  ;;  %2783 = vpow2.f32 %v2562_v20  ;;  %v2570_v20 = vmul.f32 -1.442695, %v5153_v0 }
 0x2f4   : > { %v5555_v11 = vpop.eup %2765  ;;  %2785 = vpow2.f32 %v2563_v32  ;;  %v2571_v32 = vmul.f32 -1.442695, %v5157_v53 }
 0x2f5   : > { %v5558_v18 = vpop.eup %2767  ;;  %2787 = vpow2.f32 %v2564_v3  ;;  %v2572_v3 = vmul.f32 -1.442695, %v5161_v44 }
 0x2f6   : > { %v5561_v39 = vpop.eup %2769  ;;  %2789 = vpow2.f32 %v2565_v29  ;;  %v2573_v29 = vmul.f32 -1.442695, %v5165_v34 }
 0x2f7   : > { %v5564_v23 = vpop.eup %2771  ;;  %2791 = vpow2.f32 %v2566_v41  ;;  %v2574_v41 = vmul.f32 -1.442695, %v5169_v7 }
 0x2f8   : > { %v5567_v22 = vpop.eup %2773  ;;  %2793 = vpow2.f32 %v2567_v21  ;;  %v2575_v21 = vmul.f32 -1.442695, %v5173_v2 }
 0x2f9   : > { %v5570_v54 = vpop.eup %2775  ;;  %2795 = vpow2.f32 %v2568_v13  ;;  %v2576_v13 = vmul.f32 -1.442695, %v5177_v25 }
 0x2fa   : > { %v5573_v60 = vpop.eup %2777  ;;  %2797 = vpow2.f32 %v2569_v27  ;;  %v2577_v27 = vmul.f32 -1.442695, %v5181_v35 }
 0x2fb   : > { %v5576_v63 = vpop.eup %2779  ;;  %2799 = vpow2.f32 %v2570_v20  ;;  %v2578_v20 = vmul.f32 -1.442695, %v5185_v50 }
 0x2fc   : > { %v5579_v0 = vpop.eup %2781  ;;  %2801 = vpow2.f32 %v2571_v32  ;;  %v2579_v32 = vmul.f32 -1.442695, %v5189_v51 }
 0x2fd   : > { %v5582_v53 = vpop.eup %2783  ;;  %2803 = vpow2.f32 %v2572_v3  ;;  %v2580_v3 = vmul.f32 -1.442695, %v5193_v56 }
 0x2fe   : > { %v5585_v44 = vpop.eup %2785  ;;  %2805 = vpow2.f32 %v2573_v29  ;;  %v2581_v29 = vmul.f32 -1.442695, %v5197_v15 }
 0x2ff   : > { %v5588_v34 = vpop.eup %2787  ;;  %2807 = vpow2.f32 %v2574_v41  ;;  %v2582_v41 = vmul.f32 -1.442695, %v5201_v9 }
 0x300   : > { %v5591_v7 = vpop.eup %2789  ;;  %2809 = vpow2.f32 %v2575_v21  ;;  %v2583_v21 = vmul.f32 -1.442695, %v5205_v5 }
 0x301   : > { %v5594_v2 = vpop.eup %2791  ;;  %2811 = vpow2.f32 %v2576_v13  ;;  %v6832_v13 = vld [vmem:[#allocation95_spill] sm:$0xff] }
 0x302   : > { %6827 = vst [vmem:[#allocation177_spill] sm:$0xff] %v5594_v2  ;;  %v5597_v25 = vpop.eup %2793  ;;  %2813 = vpow2.f32 %v2577_v27  ;;  %v2584_v56 = vmul.f32 -1.442695, %v6832_v13  ;;  %v6834_v27 = vld [vmem:[#allocation96_spill] sm:$0xff] }
 0x303   : > { %6828 = vst [vmem:[#allocation178_spill] sm:$0xff] %v5597_v25  ;;  %v5600_v35 = vpop.eup %2795  ;;  %2815 = vpow2.f32 %v2578_v20  ;;  %v2585_v15 = vmul.f32 -1.442695, %v6834_v27  ;;  %v6835_v20 = vld [vmem:[#allocation97_spill] sm:$0xff] }
 0x304   : > { %6829 = vst [vmem:[#allocation179_spill] sm:$0xff] %v5600_v35  ;;  %v5603_v50 = vpop.eup %2797  ;;  %2817 = vpow2.f32 %v2579_v32  ;;  %v2586_v9 = vmul.f32 -1.442695, %v6835_v20  ;;  %v6836_v32 = vld [vmem:[#allocation98_spill] sm:$0xff] }
 0x305   : > { %6830 = vst [vmem:[#allocation180_spill] sm:$0xff] %v5603_v50  ;;  %v5606_v51 = vpop.eup %2799  ;;  %2819 = vpow2.f32 %v2580_v3  ;;  %v2587_v5 = vmul.f32 -1.442695, %v6836_v32  ;;  %v6837_v3 = vld [vmem:[#allocation99_spill] sm:$0xff] }
 0x306   : > { %6831 = vst [vmem:[#allocation181_spill] sm:$0xff] %v5606_v51  ;;  %v5609_v2 = vpop.eup %2801  ;;  %2821 = vpow2.f32 %v2581_v29  ;;  %v2588_v13 = vmul.f32 -1.442695, %v6837_v3  ;;  %v6838_v29 = vld [vmem:[#allocation100_spill] sm:$0xff] }
 0x307   : > { %6833 = vst [vmem:[#allocation182_spill] sm:$0xff] %v5609_v2  ;;  %v5612_v25 = vpop.eup %2803  ;;  %2823 = vpow2.f32 %v2582_v41  ;;  %v2589_v27 = vmul.f32 -1.442695, %v6838_v29  ;;  %v2590_v41 = vmul.f32 -1.442695, %v5233_v46 }
 0x308   : > { %v5615_v35 = vpop.eup %2805  ;;  %2825 = vpow2.f32 %v2583_v21  ;;  %v2591_v21 = vmul.f32 -1.442695, %v5237_v49 }
 0x309   : > { %v5618_v50 = vpop.eup %2807  ;;  %2827 = vpow2.f32 %v2584_v56  ;;  %v2592_v56 = vmul.f32 -1.442695, %v5241_v52 }
 0x30a   : > { %v5621_v51 = vpop.eup %2809  ;;  %2829 = vpow2.f32 %v2585_v15  ;;  %v2593_v15 = vmul.f32 -1.442695, %v5245_v55 }
 0x30b   : > { %v5624_v2 = vpop.eup %2811  ;;  %2831 = vpow2.f32 %v2586_v9  ;;  %v2594_v9 = vmul.f32 -1.442695, %v5249_v58 }
 0x30c   : > { %v5627_v20 = vpop.eup %2813  ;;  %2833 = vpow2.f32 %v2587_v5  ;;  %v2595_v5 = vmul.f32 -1.442695, %v5253_v33 }
 0x30d   : > { %v5630_v32 = vpop.eup %2815  ;;  %2835 = vpow2.f32 %v2588_v13  ;;  %v2596_v13 = vmul.f32 -1.442695, %v5257_v24 }
 0x30e   : > { %v5633_v3 = vpop.eup %2817  ;;  %2837 = vpow2.f32 %v2589_v27  ;;  %v2597_v27 = vmul.f32 -1.442695, %v5261_v38 }
 0x30f   : > { %v5636_v29 = vpop.eup %2819  ;;  %2839 = vpow2.f32 %v2590_v41  ;;  %v2598_v41 = vmul.f32 -1.442695, %v5265_v37 }
 0x310   : > { %v5639_v46 = vpop.eup %2821  ;;  %2841 = vpow2.f32 %v2591_v21  ;;  %v2599_v21 = vmul.f32 -1.442695, %v5269_v40 }
 0x311   : > { %v5642_v49 = vpop.eup %2823  ;;  %2843 = vpow2.f32 %v2592_v56  ;;  %v2600_v56 = vmul.f32 -1.442695, %v5273_v43 }
 0x312   : > { %v5645_v52 = vpop.eup %2825  ;;  %2845 = vpow2.f32 %v2593_v15  ;;  %v2601_v15 = vmul.f32 -1.442695, %v5277_v30 }
 0x313   : > { %v5648_v55 = vpop.eup %2827  ;;  %2847 = vpow2.f32 %v2594_v9  ;;  %v2602_v9 = vmul.f32 -1.442695, %v5281_v36 }
 0x314   : > { %v5651_v58 = vpop.eup %2829  ;;  %2849 = vpow2.f32 %v2595_v5  ;;  %v2603_v5 = vmul.f32 -1.442695, %v5285_v42 }
 0x315   : > { %v5654_v33 = vpop.eup %2831  ;;  %2851 = vpow2.f32 %v2596_v13  ;;  %v2604_v13 = vmul.f32 -1.442695, %v5289_v48 }
 0x316   : > { %v5657_v24 = vpop.eup %2833  ;;  %2853 = vpow2.f32 %v2597_v27  ;;  %v2605_v27 = vmul.f32 -1.442695, %v5293_v57 }
 0x317   : > { %v5660_v38 = vpop.eup %2835  ;;  %2855 = vpow2.f32 %v2598_v41  ;;  %v2606_v41 = vmul.f32 -1.442695, %v5297_v61 }
 0x318   : > { %v5663_v37 = vpop.eup %2837  ;;  %2857 = vpow2.f32 %v2599_v21  ;;  %v2607_v21 = vmul.f32 -1.442695, %v5301_v4 }
 0x319   : > { %v5666_v40 = vpop.eup %2839  ;;  %2859 = vpow2.f32 %v2600_v56  ;;  %v2608_v56 = vmul.f32 -1.442695, %v5305_v8 }
 0x31a   : > { %v5669_v43 = vpop.eup %2841  ;;  %2861 = vpow2.f32 %v2601_v15  ;;  %v2609_v15 = vmul.f32 -1.442695, %v5309_v12 }
 0x31b   : > { %v5672_v30 = vpop.eup %2843  ;;  %2863 = vpow2.f32 %v2602_v9  ;;  %v2610_v9 = vmul.f32 -1.442695, %v5313_v17 }
 0x31c   : > { %v5675_v36 = vpop.eup %2845  ;;  %2865 = vpow2.f32 %v2603_v5  ;;  %v6841_v5 = vld [vmem:[#allocation116_spill] sm:$0xff] }
 0x31d   : > { %6839 = vst [vmem:[#allocation183_spill] sm:$0xff] %v5675_v36  ;;  %v5678_v42 = vpop.eup %2847  ;;  %2867 = vpow2.f32 %v2604_v13  ;;  %v2611_v4 = vmul.f32 -1.442695, %v6841_v5  ;;  %v6843_v13 = vld [vmem:[#allocation117_spill] sm:$0xff] }
 0x31e   : > { %6840 = vst [vmem:[#allocation184_spill] sm:$0xff] %v5678_v42  ;;  %v5681_v48 = vpop.eup %2849  ;;  %2869 = vpow2.f32 %v2605_v27  ;;  %v2612_v8 = vmul.f32 -1.442695, %v6843_v13  ;;  %v2613_v27 = vmul.f32 -1.442695, %v5325_v6 }
 0x31f   : > { %v5684_v57 = vpop.eup %2851  ;;  %2871 = vpow2.f32 %v2606_v41  ;;  %v2614_v41 = vmul.f32 -1.442695, %v5329_v16 }
 0x320   : > { %v5687_v61 = vpop.eup %2853  ;;  %2873 = vpow2.f32 %v2607_v21  ;;  %v2615_v21 = vmul.f32 -1.442695, %v5333_v19 }
 0x321   : > { %v5690_v36 = vpop.eup %2855  ;;  %2875 = vpow2.f32 %v2608_v56  ;;  %v2616_v56 = vmul.f32 -1.442695, %v5337_v1 }
 0x322   : > { %6842 = vst [vmem:[#allocation185_spill] sm:$0xff] %v5690_v36  ;;  %v5693_v42 = vpop.eup %2857  ;;  %2877 = vpow2.f32 %v2609_v15  ;;  %v2617_v15 = vmul.f32 -1.442695, %v5341_v45 }
 0x323   : > { %6844 = vst [vmem:[#allocation186_spill] sm:$0xff] %v5693_v42  ;;  %v5696_v12 = vpop.eup %2859  ;;  %2879 = vpow2.f32 %v2610_v9  ;;  %v2618_v9 = vmul.f32 -1.442695, %v5345_v28 }
 0x324   : > { %6845 = vst [vmem:[#allocation187_spill] sm:$0xff] %v5696_v12  ;;  %v5699_v17 = vpop.eup %2861  ;;  %2881 = vpow2.f32 %v2611_v4  ;;  %v6851_v4 = vld [vmem:[#allocation122_spill] sm:$0xff] }
 0x325   : > { %6846 = vst [vmem:[#allocation188_spill] sm:$0xff] %v5699_v17  ;;  %v5702_v5 = vpop.eup %2863  ;;  %2883 = vpow2.f32 %v2612_v8  ;;  %v2619_v19 = vmul.f32 -1.442695, %v6851_v4  ;;  %v6853_v8 = vld [vmem:[#allocation123_spill] sm:$0xff]  ;;  %v6898_v12 = vld [vmem:[#allocation146_spill] sm:$0xff] }
 0x326   : > { %6847 = vst [vmem:[#allocation189_spill] sm:$0xff] %v5702_v5  ;;  %v5705_v13 = vpop.eup %2865  ;;  %2885 = vpow2.f32 %v2613_v27  ;;  %v2620_v1 = vmul.f32 -1.442695, %v6853_v8  ;;  %v6855_v27 = vld [vmem:[#allocation124_spill] sm:$0xff]  ;;  %v1808_v42 = vadd.f32 1.0, %v6898_v12 }
 0x327   : > { %6848 = vst [vmem:[#allocation190_spill] sm:$0xff] %v5705_v13  ;;  %v5708_v6 = vpop.eup %2867  ;;  %2887 = vpow2.f32 %v2614_v41  ;;  %v2621_v45 = vmul.f32 -1.442695, %v6855_v27  ;;  %v6857_v41 = vld [vmem:[#allocation125_spill] sm:$0xff]  ;;  %v6903_v12 = vld [vmem:[#allocation8_spill] sm:$0xff] }
 0x328   : > { %6849 = vst [vmem:[#allocation191_spill] sm:$0xff] %v5708_v6  ;;  %v5711_v16 = vpop.eup %2869  ;;  %2889 = vpow2.f32 %v2615_v21  ;;  %v2622_v28 = vmul.f32 -1.442695, %v6857_v41  ;;  %v6859_v21 = vld [vmem:[#allocation126_spill] sm:$0xff] }
 0x329   : > { %6850 = vst [vmem:[#allocation192_spill] sm:$0xff] %v5711_v16  ;;  %v5714_v17 = vpop.eup %2871  ;;  %2891 = vpow2.f32 %v2616_v56  ;;  %v2623_v4 = vmul.f32 -1.442695, %v6859_v21  ;;  %v6861_v56 = vld [vmem:[#allocation127_spill] sm:$0xff] }
 0x32a   : > { %6852 = vst [vmem:[#allocation193_spill] sm:$0xff] %v5714_v17  ;;  %v5717_v5 = vpop.eup %2873  ;;  %2893 = vpow2.f32 %v2617_v15  ;;  %v2624_v8 = vmul.f32 -1.442695, %v6861_v56  ;;  %v6863_v15 = vld [vmem:[#allocation128_spill] sm:$0xff] }
 0x32b   : > { %6854 = vst [vmem:[#allocation194_spill] sm:$0xff] %v5717_v5  ;;  %v5720_v13 = vpop.eup %2875  ;;  %2895 = vpow2.f32 %v2618_v9  ;;  %v2625_v27 = vmul.f32 -1.442695, %v6863_v15  ;;  %v6865_v9 = vld [vmem:[#allocation129_spill] sm:$0xff] }
 0x32c   : > { %6856 = vst [vmem:[#allocation195_spill] sm:$0xff] %v5720_v13  ;;  %v5723_v6 = vpop.eup %2877  ;;  %2897 = vpow2.f32 %v2619_v19  ;;  %v2626_v41 = vmul.f32 -1.442695, %v6865_v9  ;;  %v1791_v19 = vadd.f32 1.0, %v5393_v62 }
 0x32d   : > { %6858 = vst [vmem:[#allocation196_spill] sm:$0xff] %v5723_v6  ;;  %v5726_v16 = vpop.eup %2879  ;;  %2899 = vpow2.f32 %v2620_v1  ;;  %v6868_v1 = vld [vmem:[#allocation130_spill] sm:$0xff] }
 0x32e   : > { %6860 = vst [vmem:[#allocation197_spill] sm:$0xff] %v5726_v16  ;;  %v5729_v17 = vpop.eup %2881  ;;  %2901 = vpow2.f32 %v2621_v45  ;;  %v1792_v56 = vadd.f32 1.0, %v6868_v1  ;;  %v6870_v45 = vld [vmem:[#allocation131_spill] sm:$0xff] }
 0x32f   : > { %6862 = vst [vmem:[#allocation198_spill] sm:$0xff] %v5729_v17  ;;  %v5732_v5 = vpop.eup %2883  ;;  %2903 = vpow2.f32 %v2622_v28  ;;  %v1793_v15 = vadd.f32 1.0, %v6870_v45  ;;  %v6872_v28 = vld [vmem:[#allocation132_spill] sm:$0xff] }
 0x330   : > { %6864 = vst [vmem:[#allocation199_spill] sm:$0xff] %v5732_v5  ;;  %v5735_v13 = vpop.eup %2885  ;;  %2905 = vpow2.f32 %v2623_v4  ;;  %v1794_v9 = vadd.f32 1.0, %v6872_v28  ;;  %v6874_v4 = vld [vmem:[#allocation133_spill] sm:$0xff] }
 0x331   : > { %6866 = vst [vmem:[#allocation200_spill] sm:$0xff] %v5735_v13  ;;  %v5738_v21 = vpop.eup %2887  ;;  %2907 = vpow2.f32 %v2624_v8  ;;  %v1795_v13 = vadd.f32 1.0, %v6874_v4  ;;  %v6876_v8 = vld [vmem:[#allocation134_spill] sm:$0xff] }
 0x332   : > { %6867 = vst [vmem:[#allocation201_spill] sm:$0xff] %v5738_v21  ;;  %v5741_v16 = vpop.eup %2889  ;;  %2909 = vpow2.f32 %v2625_v27  ;;  %v1796_v21 = vadd.f32 1.0, %v6876_v8  ;;  %v6878_v27 = vld [vmem:[#allocation135_spill] sm:$0xff] }
 0x333   : > { %6869 = vst [vmem:[#allocation130_spill] sm:$0xff] %v5741_v16  ;;  %v5744_v17 = vpop.eup %2891  ;;  %2911 = vpow2.f32 %v2626_v41  ;;  %v1797_v16 = vadd.f32 1.0, %v6878_v27  ;;  %v6880_v41 = vld [vmem:[#allocation136_spill] sm:$0xff]  ;;  %v6886_v27 = vld [vmem:[#allocation139_spill] sm:$0xff] }
 0x334   : > { %6871 = vst [vmem:[#allocation131_spill] sm:$0xff] %v5744_v17  ;;  %v5747_v5 = vpop.eup %2893  ;;  %2913 = vrcp.f32 %v1791_v19  ;;  %v1798_v17 = vadd.f32 1.0, %v6880_v41  ;;  %v6888_v41 = vld [vmem:[#allocation140_spill] sm:$0xff] }
 0x335   : > { %6873 = vst [vmem:[#allocation132_spill] sm:$0xff] %v5747_v5  ;;  %v5750_v62 = vpop.eup %2895  ;;  %2915 = vrcp.f32 %v1792_v56  ;;  %v6882_v5 = vld [vmem:[#allocation137_spill] sm:$0xff] }
 0x336   : > { %6875 = vst [vmem:[#allocation133_spill] sm:$0xff] %v5750_v62  ;;  %v5753_v1 = vpop.eup %2897  ;;  %2917 = vrcp.f32 %v1793_v15  ;;  %v1799_v4 = vadd.f32 1.0, %v6882_v5  ;;  %v6884_v62 = vld [vmem:[#allocation138_spill] sm:$0xff]  ;;  %v1801_v15 = vadd.f32 1.0, %v6886_v27  ;;  %v6890_v5 = vld [vmem:[#allocation141_spill] sm:$0xff] }
 0x337   : > { %6877 = vst [vmem:[#allocation134_spill] sm:$0xff] %v5753_v1  ;;  %v5756_v45 = vpop.eup %2899  ;;  %2919 = vrcp.f32 %v1794_v9  ;;  %v1800_v56 = vadd.f32 1.0, %v6884_v62  ;;  %v1802_v9 = vadd.f32 1.0, %v6888_v41  ;;  %v6892_v1 = vld [vmem:[#allocation142_spill] sm:$0xff]  ;;  %v6894_v41 = vld [vmem:[#allocation144_spill] sm:$0xff] }
 0x338   : > { %6879 = vst [vmem:[#allocation135_spill] sm:$0xff] %v5756_v45  ;;  %v5759_v28 = vpop.eup %2901  ;;  %2921 = vrcp.f32 %v1795_v13  ;;  %v1803_v13 = vadd.f32 1.0, %v6890_v5  ;;  %v1804_v62 = vadd.f32 1.0, %v6892_v1  ;;  %v1806_v5 = vadd.f32 1.0, %v6894_v41 }
 0x339   : > { %6881 = vst [vmem:[#allocation136_spill] sm:$0xff] %v5759_v28  ;;  %v5762_v19 = vpop.eup %2903  ;;  %2923 = vrcp.f32 %v1796_v21 }
 0x33a   : > { %6883 = vst [vmem:[#allocation137_spill] sm:$0xff] %v5762_v19  ;;  %v5765_v8 = vpop.eup %2905  ;;  %2925 = vrcp.f32 %v1797_v16  ;;  %v6893_v16 = vld [vmem:[#allocation143_spill] sm:$0xff] }
 0x33b   : > { %6885 = vst [vmem:[#allocation138_spill] sm:$0xff] %v5765_v8  ;;  %v5768_v45 = vpop.eup %2907  ;;  %2927 = vrcp.f32 %v1798_v17  ;;  %v1805_v17 = vadd.f32 1.0, %v6893_v16  ;;  %v6899_v16 = vld [vmem:[#allocation6_spill] sm:$0xff] }
 0x33c   : > { %6887 = vst [vmem:[#allocation139_spill] sm:$0xff] %v5768_v45  ;;  %v5771_v28 = vpop.eup %2909  ;;  %2929 = vrcp.f32 %v1799_v4  ;;  %v6895_v4 = vld [vmem:[#allocation4_spill] sm:$0xff]  ;;  %v6897_v45 = vld [vmem:[#allocation5_spill] sm:$0xff] }
 0x33d   : > { %6889 = vst [vmem:[#allocation140_spill] sm:$0xff] %v5771_v28  ;;  %v5774_v19 = vpop.eup %2911  ;;  %2931 = vrcp.f32 %v1800_v56  ;;  %v6896_v56 = vld [vmem:[#allocation145_spill] sm:$0xff] }
 0x33e   : > { %6891 = vst [vmem:[#allocation141_spill] sm:$0xff] %v5774_v19  ;;  %v2914_v21 = vpop.eup %2913  ;;  %2933 = vrcp.f32 %v1801_v15  ;;  %v1807_v28 = vadd.f32 1.0, %v6896_v56 }
 0x33f   : > { %v2916_v27 = vpop.eup %2915  ;;  %2935 = vrcp.f32 %v1802_v9  ;;  %v2175_v19 = vmul.f32 %v2914_v21, %v6895_v4  ;;  %v6900_v9 = vld [vmem:[#allocation147_spill] sm:$0xff] }
 0x340   : > { %v2918_v1 = vpop.eup %2917  ;;  %2937 = vrcp.f32 %v1803_v13  ;;  %v2176_v8 = vmul.f32 %v2916_v27, %v6897_v45  ;;  %v1809_v36 = vadd.f32 1.0, %v6900_v9  ;;  %v6901_v21 = vld [vmem:[#allocation7_spill] sm:$0xff]  ;;  %v6902_v45 = vld [vmem:[#allocation148_spill] sm:$0xff] }
 0x341   : > { %v2920_v6 = vpop.eup %2919  ;;  %2939 = vrcp.f32 %v1804_v62  ;;  %v2177_v15 = vmul.f32 %v2918_v1, %v6899_v16  ;;  %2303 = vst.msk [vmem:[%s5782_s29] sm:$0xff] %vm326_vm0, %v2175_v19  ;;  %v1810_v27 = vadd.f32 1.0, %v6902_v45  ;;  %v6904_v19 = vld [vmem:[#allocation149_spill] sm:$0xff] }
 0x342   : > { %v2922_v41 = vpop.eup %2921  ;;  %2941 = vrcp.f32 %v1805_v17  ;;  %v2178_v4 = vmul.f32 %v2920_v6, %v6901_v21  ;;  %2304 = vst.msk [vmem:[%s5782_s29 + $0x8] sm:$0xff] %vm326_vm0, %v2176_v8  ;;  %v1811_v56 = vadd.f32 1.0, %v6904_v19  ;;  %v6905_v16 = vld [vmem:[#allocation81_spill] sm:$0xff]  ;;  %v6906_v8 = vld [vmem:[#allocation150_spill] sm:$0xff] }
 0x343   : > { %v2924_v13 = vpop.eup %2923  ;;  %2943 = vrcp.f32 %v1806_v5  ;;  %v2179_v62 = vmul.f32 %v2922_v41, %v6903_v12  ;;  %2305 = vst.msk [vmem:[%s5782_s29 + $0x10] sm:$0xff] %vm326_vm0, %v2177_v15  ;;  %v1812_v9 = vadd.f32 1.0, %v6906_v8  ;;  %v6907_v21 = vld [vmem:[#allocation9_spill] sm:$0xff]  ;;  %v6908_v15 = vld [vmem:[#allocation151_spill] sm:$0xff]  ;;  %v6909_v12 = vld [vmem:[#allocation10_spill] sm:$0xff] }
 0x344   : > { %v2926_v1 = vpop.eup %2925  ;;  %2945 = vrcp.f32 %v1807_v28  ;;  %v2180_v17 = vmul.f32 %v2924_v13, %v6905_v16  ;;  %2306 = vst.msk [vmem:[%s5782_s29 + $0x18] sm:$0xff] %vm326_vm0, %v2178_v4  ;;  %v1813_v45 = vadd.f32 1.0, %v6908_v15  ;;  %v6910_v4 = vld [vmem:[#allocation152_spill] sm:$0xff]  ;;  %v6911_v16 = vld [vmem:[#allocation11_spill] sm:$0xff] }
 0x345   : > { %v2928_v6 = vpop.eup %2927  ;;  %2947 = vrcp.f32 %v1808_v42  ;;  %v2181_v5 = vmul.f32 %v2926_v1, %v6907_v21  ;;  %2307 = vst.msk [vmem:[%s5782_s29 + $0x20] sm:$0xff] %vm326_vm0, %v2179_v62  ;;  %v1814_v19 = vadd.f32 1.0, %v6910_v4  ;;  %v6912_v62 = vld [vmem:[#allocation153_spill] sm:$0xff]  ;;  %v6913_v21 = vld [vmem:[#allocation12_spill] sm:$0xff] }
 0x346   : > { %v2930_v41 = vpop.eup %2929  ;;  %2949 = vrcp.f32 %v1809_v36  ;;  %v2182_v28 = vmul.f32 %v2928_v6, %v6909_v12  ;;  %2308 = vst.msk [vmem:[%s5782_s29 + $0x28] sm:$0xff] %vm326_vm0, %v2180_v17  ;;  %v1815_v8 = vadd.f32 1.0, %v6912_v62  ;;  %v6914_v17 = vld [vmem:[#allocation154_spill] sm:$0xff]  ;;  %v6915_v12 = vld [vmem:[#allocation13_spill] sm:$0xff] }
 0x347   : > { %v2932_v13 = vpop.eup %2931  ;;  %2951 = vrcp.f32 %v1810_v27  ;;  %v2183_v42 = vmul.f32 %v2930_v41, %v6911_v16  ;;  %2309 = vst.msk [vmem:[%s5782_s29 + $0x30] sm:$0xff] %vm326_vm0, %v2181_v5  ;;  %v1816_v15 = vadd.f32 1.0, %v6914_v17  ;;  %v6916_v5 = vld [vmem:[#allocation155_spill] sm:$0xff]  ;;  %v6917_v16 = vld [vmem:[#allocation14_spill] sm:$0xff] }
 0x348   : > { %v2934_v1 = vpop.eup %2933  ;;  %2953 = vrcp.f32 %v1811_v56  ;;  %v2184_v36 = vmul.f32 %v2932_v13, %v6913_v21  ;;  %2310 = vst.msk [vmem:[%s5782_s29 + $0x38] sm:$0xff] %vm326_vm0, %v2182_v28  ;;  %v1817_v4 = vadd.f32 1.0, %v6916_v5  ;;  %v6918_v28 = vld [vmem:[#allocation156_spill] sm:$0xff]  ;;  %v6919_v21 = vld [vmem:[#allocation15_spill] sm:$0xff] }
 0x349   : > { %v2936_v6 = vpop.eup %2935  ;;  %2955 = vrcp.f32 %v1812_v9  ;;  %v2185_v27 = vmul.f32 %v2934_v1, %v6915_v12  ;;  %2311 = vst.msk [vmem:[%s5782_s29 + $0x40] sm:$0xff] %vm326_vm0, %v2183_v42  ;;  %v1818_v62 = vadd.f32 1.0, %v6918_v28  ;;  %v6920_v42 = vld [vmem:[#allocation157_spill] sm:$0xff]  ;;  %v6921_v12 = vld [vmem:[#allocation16_spill] sm:$0xff] }
 0x34a   : > { %v2938_v41 = vpop.eup %2937  ;;  %2957 = vrcp.f32 %v1813_v45  ;;  %v2186_v56 = vmul.f32 %v2936_v6, %v6917_v16  ;;  %2312 = vst.msk [vmem:[%s5782_s29 + $0x48] sm:$0xff] %vm326_vm0, %v2184_v36  ;;  %v1819_v17 = vadd.f32 1.0, %v6920_v42  ;;  %v6922_v36 = vld [vmem:[#allocation158_spill] sm:$0xff]  ;;  %v6923_v16 = vld [vmem:[#allocation17_spill] sm:$0xff] }
 0x34b   : > { %v2940_v13 = vpop.eup %2939  ;;  %2959 = vrcp.f32 %v1814_v19  ;;  %v2187_v9 = vmul.f32 %v2938_v41, %v6919_v21  ;;  %2313 = vst.msk [vmem:[%s5782_s29 + $0x50] sm:$0xff] %vm326_vm0, %v2185_v27  ;;  %v1820_v5 = vadd.f32 1.0, %v6922_v36  ;;  %v6924_v27 = vld [vmem:[#allocation159_spill] sm:$0xff]  ;;  %v6925_v21 = vld [vmem:[#allocation18_spill] sm:$0xff] }
 0x34c   : > { %v2942_v1 = vpop.eup %2941  ;;  %2961 = vrcp.f32 %v1815_v8  ;;  %v2188_v45 = vmul.f32 %v2940_v13, %v6921_v12  ;;  %2314 = vst.msk [vmem:[%s5782_s29 + $0x58] sm:$0xff] %vm326_vm0, %v2186_v56  ;;  %v1821_v28 = vadd.f32 1.0, %v6924_v27  ;;  %v6926_v56 = vld [vmem:[#allocation160_spill] sm:$0xff]  ;;  %v6927_v12 = vld [vmem:[#allocation19_spill] sm:$0xff] }
 0x34d   : > { %v2944_v6 = vpop.eup %2943  ;;  %2963 = vrcp.f32 %v1816_v15  ;;  %v2189_v19 = vmul.f32 %v2942_v1, %v6923_v16  ;;  %2315 = vst.msk [vmem:[%s5782_s29 + $0x60] sm:$0xff] %vm326_vm0, %v2187_v9  ;;  %v1822_v42 = vadd.f32 1.0, %v6926_v56  ;;  %v6928_v9 = vld [vmem:[#allocation161_spill] sm:$0xff]  ;;  %v6929_v16 = vld [vmem:[#allocation20_spill] sm:$0xff] }
 0x34e   : > { %v2946_v41 = vpop.eup %2945  ;;  %2965 = vrcp.f32 %v1817_v4  ;;  %v2190_v8 = vmul.f32 %v2944_v6, %v6925_v21  ;;  %2316 = vst.msk [vmem:[%s5782_s29 + $0x68] sm:$0xff] %vm326_vm0, %v2188_v45  ;;  %v1823_v36 = vadd.f32 1.0, %v6928_v9  ;;  %v6930_v45 = vld [vmem:[#allocation162_spill] sm:$0xff]  ;;  %v6931_v21 = vld [vmem:[#allocation21_spill] sm:$0xff] }
 0x34f   : > { %v2948_v13 = vpop.eup %2947  ;;  %2967 = vrcp.f32 %v1818_v62  ;;  %v2191_v15 = vmul.f32 %v2946_v41, %v6927_v12  ;;  %2317 = vst.msk [vmem:[%s5782_s29 + $0x70] sm:$0xff] %vm326_vm0, %v2189_v19  ;;  %v1824_v27 = vadd.f32 1.0, %v6930_v45  ;;  %v6932_v19 = vld [vmem:[#allocation163_spill] sm:$0xff]  ;;  %v6933_v12 = vld [vmem:[#allocation22_spill] sm:$0xff] }
 0x350   : > { %v2950_v1 = vpop.eup %2949  ;;  %2969 = vrcp.f32 %v1819_v17  ;;  %v2192_v4 = vmul.f32 %v2948_v13, %v6929_v16  ;;  %2318 = vst.msk [vmem:[%s5782_s29 + $0x78] sm:$0xff] %vm326_vm0, %v2190_v8  ;;  %v1825_v56 = vadd.f32 1.0, %v6932_v19  ;;  %v6934_v8 = vld [vmem:[#allocation164_spill] sm:$0xff]  ;;  %v6935_v16 = vld [vmem:[#allocation23_spill] sm:$0xff] }
 0x351   : > { %v2952_v6 = vpop.eup %2951  ;;  %2971 = vrcp.f32 %v1820_v5  ;;  %v2193_v62 = vmul.f32 %v2950_v1, %v6931_v21  ;;  %2319 = vst.msk [vmem:[%s5782_s29 + $0x80] sm:$0xff] %vm326_vm0, %v2191_v15  ;;  %v1826_v9 = vadd.f32 1.0, %v6934_v8  ;;  %v6936_v15 = vld [vmem:[#allocation165_spill] sm:$0xff]  ;;  %v6937_v21 = vld [vmem:[#allocation24_spill] sm:$0xff] }
 0x352   : > { %v2954_v41 = vpop.eup %2953  ;;  %2973 = vrcp.f32 %v1821_v28  ;;  %v2194_v17 = vmul.f32 %v2952_v6, %v6933_v12  ;;  %2320 = vst.msk [vmem:[%s5782_s29 + $0x88] sm:$0xff] %vm326_vm0, %v2192_v4  ;;  %v1827_v45 = vadd.f32 1.0, %v6936_v15  ;;  %v6938_v4 = vld [vmem:[#allocation166_spill] sm:$0xff]  ;;  %v6939_v12 = vld [vmem:[#allocation25_spill] sm:$0xff] }
 0x353   : > { %v2956_v13 = vpop.eup %2955  ;;  %2975 = vrcp.f32 %v1822_v42  ;;  %v2195_v5 = vmul.f32 %v2954_v41, %v6935_v16  ;;  %2321 = vst.msk [vmem:[%s5782_s29 + $0x90] sm:$0xff] %vm326_vm0, %v2193_v62  ;;  %v1828_v19 = vadd.f32 1.0, %v6938_v4  ;;  %v6940_v62 = vld [vmem:[#allocation167_spill] sm:$0xff]  ;;  %v6941_v16 = vld [vmem:[#allocation26_spill] sm:$0xff] }
 0x354   : > { %v2958_v1 = vpop.eup %2957  ;;  %2977 = vrcp.f32 %v1823_v36  ;;  %v2196_v28 = vmul.f32 %v2956_v13, %v6937_v21  ;;  %2322 = vst.msk [vmem:[%s5782_s29 + $0x98] sm:$0xff] %vm326_vm0, %v2194_v17  ;;  %v1829_v8 = vadd.f32 1.0, %v6940_v62  ;;  %v6942_v17 = vld [vmem:[#allocation168_spill] sm:$0xff]  ;;  %v6943_v21 = vld [vmem:[#allocation27_spill] sm:$0xff] }
 0x355   : > { %v2960_v6 = vpop.eup %2959  ;;  %2979 = vrcp.f32 %v1824_v27  ;;  %v2197_v42 = vmul.f32 %v2958_v1, %v6939_v12  ;;  %2323 = vst.msk [vmem:[%s5782_s29 + $0xa0] sm:$0xff] %vm326_vm0, %v2195_v5  ;;  %v1830_v15 = vadd.f32 1.0, %v6942_v17  ;;  %v6944_v5 = vld [vmem:[#allocation169_spill] sm:$0xff]  ;;  %v6945_v12 = vld [vmem:[#allocation28_spill] sm:$0xff] }
 0x356   : > { %v2962_v41 = vpop.eup %2961  ;;  %2981 = vrcp.f32 %v1825_v56  ;;  %v2198_v36 = vmul.f32 %v2960_v6, %v6941_v16  ;;  %2324 = vst.msk [vmem:[%s5782_s29 + $0xa8] sm:$0xff] %vm326_vm0, %v2196_v28  ;;  %v1831_v4 = vadd.f32 1.0, %v6944_v5  ;;  %v6946_v28 = vld [vmem:[#allocation170_spill] sm:$0xff]  ;;  %v6947_v16 = vld [vmem:[#allocation29_spill] sm:$0xff] }
 0x357   : > { %v2964_v13 = vpop.eup %2963  ;;  %2983 = vrcp.f32 %v1826_v9  ;;  %v2199_v27 = vmul.f32 %v2962_v41, %v6943_v21  ;;  %2325 = vst.msk [vmem:[%s5782_s29 + $0xb0] sm:$0xff] %vm326_vm0, %v2197_v42  ;;  %v1832_v62 = vadd.f32 1.0, %v6946_v28  ;;  %v6948_v42 = vld [vmem:[#allocation171_spill] sm:$0xff]  ;;  %v6949_v21 = vld [vmem:[#allocation30_spill] sm:$0xff] }
 0x358   : > { %v2966_v1 = vpop.eup %2965  ;;  %2985 = vrcp.f32 %v1827_v45  ;;  %v2200_v56 = vmul.f32 %v2964_v13, %v6945_v12  ;;  %2326 = vst.msk [vmem:[%s5782_s29 + $0xb8] sm:$0xff] %vm326_vm0, %v2198_v36  ;;  %v1833_v17 = vadd.f32 1.0, %v6948_v42  ;;  %v6950_v36 = vld [vmem:[#allocation172_spill] sm:$0xff]  ;;  %v6951_v12 = vld [vmem:[#allocation31_spill] sm:$0xff] }
 0x359   : > { %v2968_v6 = vpop.eup %2967  ;;  %2987 = vrcp.f32 %v1828_v19  ;;  %v2201_v9 = vmul.f32 %v2966_v1, %v6947_v16  ;;  %2327 = vst.msk [vmem:[%s5782_s29 + $0xc0] sm:$0xff] %vm326_vm0, %v2199_v27  ;;  %v1834_v5 = vadd.f32 1.0, %v6950_v36  ;;  %v6952_v27 = vld [vmem:[#allocation173_spill] sm:$0xff]  ;;  %v6953_v16 = vld [vmem:[#allocation32_spill] sm:$0xff] }
 0x35a   : > { %v2970_v41 = vpop.eup %2969  ;;  %2989 = vrcp.f32 %v1829_v8  ;;  %v2202_v45 = vmul.f32 %v2968_v6, %v6949_v21  ;;  %2328 = vst.msk [vmem:[%s5782_s29 + $0xc8] sm:$0xff] %vm326_vm0, %v2200_v56  ;;  %v1835_v28 = vadd.f32 1.0, %v6952_v27  ;;  %v6954_v56 = vld [vmem:[#allocation174_spill] sm:$0xff]  ;;  %v6955_v21 = vld [vmem:[#allocation33_spill] sm:$0xff] }
 0x35b   : > { %v2972_v13 = vpop.eup %2971  ;;  %2991 = vrcp.f32 %v1830_v15  ;;  %v2203_v19 = vmul.f32 %v2970_v41, %v6951_v12  ;;  %2329 = vst.msk [vmem:[%s5782_s29 + $0xd0] sm:$0xff] %vm326_vm0, %v2201_v9  ;;  %v1836_v42 = vadd.f32 1.0, %v6954_v56  ;;  %v6956_v9 = vld [vmem:[#allocation175_spill] sm:$0xff]  ;;  %v6957_v12 = vld [vmem:[#allocation34_spill] sm:$0xff]  ;;  %v6960_v56 = vld [vmem:[#allocation36_spill] sm:$0xff] }
 0x35c   : > { %v2974_v1 = vpop.eup %2973  ;;  %2993 = vrcp.f32 %v1831_v4  ;;  %v2204_v8 = vmul.f32 %v2972_v13, %v6953_v16  ;;  %2330 = vst.msk [vmem:[%s5782_s29 + $0xd8] sm:$0xff] %vm326_vm0, %v2202_v45  ;;  %v1837_v36 = vadd.f32 1.0, %v6956_v9  ;;  %v6958_v45 = vld [vmem:[#allocation176_spill] sm:$0xff]  ;;  %v6959_v16 = vld [vmem:[#allocation35_spill] sm:$0xff] }
 0x35d   : > { %v2976_v6 = vpop.eup %2975  ;;  %2995 = vrcp.f32 %v1832_v62  ;;  %v2205_v15 = vmul.f32 %v2974_v1, %v6955_v21  ;;  %2331 = vst.msk [vmem:[%s5782_s29 + $0xe0] sm:$0xff] %vm326_vm0, %v2203_v19  ;;  %v1838_v27 = vadd.f32 1.0, %v6958_v45  ;;  %v1839_v19 = vadd.f32 1.0, %v5537_v59  ;;  %v6961_v21 = vld [vmem:[#allocation37_spill] sm:$0xff]  ;;  %v6962_v59 = vld [vmem:[#allocation38_spill] sm:$0xff] }
 0x35e   : > { %v2978_v41 = vpop.eup %2977  ;;  %2997 = vrcp.f32 %v1833_v17  ;;  %v2206_v4 = vmul.f32 %v2976_v6, %v6957_v12  ;;  %2332 = vst.msk [vmem:[%s5782_s29 + $0xe8] sm:$0xff] %vm326_vm0, %v2204_v8  ;;  %v1840_v8 = vadd.f32 1.0, %v5540_v10  ;;  %v1842_v12 = vadd.f32 1.0, %v5546_v14  ;;  %v6963_v10 = vld [vmem:[#allocation39_spill] sm:$0xff]  ;;  %v6965_v14 = vld [vmem:[#allocation41_spill] sm:$0xff] }
 0x35f   : > { %v2980_v13 = vpop.eup %2979  ;;  %2999 = vrcp.f32 %v1834_v5  ;;  %v2207_v62 = vmul.f32 %v2978_v41, %v6959_v16  ;;  %2333 = vst.msk [vmem:[%s5782_s29 + $0xf0] sm:$0xff] %vm326_vm0, %v2205_v15  ;;  %v1841_v15 = vadd.f32 1.0, %v5543_v47  ;;  %v6964_v47 = vld [vmem:[#allocation40_spill] sm:$0xff]  ;;  %v1844_v16 = vadd.f32 1.0, %v5552_v26  ;;  %v6967_v26 = vld [vmem:[#allocation43_spill] sm:$0xff] }
 0x360   : > { %v2982_v1 = vpop.eup %2981  ;;  %3001 = vrcp.f32 %v1835_v28  ;;  %v2208_v17 = vmul.f32 %v2980_v13, %v6960_v56  ;;  %2334 = vst.msk [vmem:[%s5782_s29 + $0xf8] sm:$0xff] %vm326_vm0, %v2206_v4  ;;  %v1843_v13 = vadd.f32 1.0, %v5549_v31  ;;  %v6966_v31 = vld [vmem:[#allocation42_spill] sm:$0xff] }
 0x361   : > { %v2984_v6 = vpop.eup %2983  ;;  %3003 = vrcp.f32 %v1836_v42  ;;  %v2209_v5 = vmul.f32 %v2982_v1, %v6961_v21  ;;  %2335 = vst.msk [vmem:[%s5782_s29 + $0x100] sm:$0xff] %vm326_vm0, %v2207_v62  ;;  %v1845_v1 = vadd.f32 1.0, %v5555_v11  ;;  %v1847_v21 = vadd.f32 1.0, %v5561_v39  ;;  %v6968_v11 = vld [vmem:[#allocation44_spill] sm:$0xff]  ;;  %v6970_v39 = vld [vmem:[#allocation46_spill] sm:$0xff] }
 0x362   : > { %v2986_v41 = vpop.eup %2985  ;;  %3005 = vrcp.f32 %v1837_v36  ;;  %v2210_v28 = vmul.f32 %v2984_v6, %v6962_v59  ;;  %2336 = vst.msk [vmem:[%s5782_s29 + $0x108] sm:$0xff] %vm326_vm0, %v2208_v17  ;;  %v1846_v17 = vadd.f32 1.0, %v5558_v18  ;;  %v6969_v18 = vld [vmem:[#allocation45_spill] sm:$0xff] }
 0x363   : > { %v2988_v9 = vpop.eup %2987  ;;  %3007 = vrcp.f32 %v1838_v27  ;;  %v2211_v42 = vmul.f32 %v2986_v41, %v6963_v10  ;;  %2337 = vst.msk [vmem:[%s5782_s29 + $0x110] sm:$0xff] %vm326_vm0, %v2209_v5 }
 0x364   : > { %v2990_v4 = vpop.eup %2989  ;;  %3009 = vrcp.f32 %v1839_v19  ;;  %v2212_v36 = vmul.f32 %v2988_v9, %v6964_v47  ;;  %2338 = vst.msk [vmem:[%s5782_s29 + $0x118] sm:$0xff] %vm326_vm0, %v2210_v28  ;;  %v1849_v9 = vadd.f32 1.0, %v5567_v22  ;;  %v1851_v47 = vadd.f32 1.0, %v5573_v60  ;;  %v6972_v22 = vld [vmem:[#allocation48_spill] sm:$0xff]  ;;  %v6974_v60 = vld [vmem:[#allocation50_spill] sm:$0xff] }
 0x365   : > { %v2992_v45 = vpop.eup %2991  ;;  %3011 = vrcp.f32 %v1840_v8  ;;  %v2213_v27 = vmul.f32 %v2990_v4, %v6965_v14  ;;  %2339 = vst.msk [vmem:[%s5782_s29 + $0x120] sm:$0xff] %vm326_vm0, %v2211_v42  ;;  %v1850_v42 = vadd.f32 1.0, %v5570_v54  ;;  %v6973_v54 = vld [vmem:[#allocation49_spill] sm:$0xff] }
 0x366   : > { %v2994_v62 = vpop.eup %2993  ;;  %3013 = vrcp.f32 %v1841_v15  ;;  %v2214_v19 = vmul.f32 %v2992_v45, %v6966_v31  ;;  %2340 = vst.msk [vmem:[%s5782_s29 + $0x128] sm:$0xff] %vm326_vm0, %v2212_v36  ;;  %v1848_v15 = vadd.f32 1.0, %v5564_v23  ;;  %v6971_v23 = vld [vmem:[#allocation47_spill] sm:$0xff] }
 0x367   : > { %v2996_v56 = vpop.eup %2995  ;;  %3015 = vrcp.f32 %v1842_v12  ;;  %v2215_v6 = vmul.f32 %v2994_v62, %v6967_v26  ;;  %2341 = vst.msk [vmem:[%s5782_s29 + $0x130] sm:$0xff] %vm326_vm0, %v2213_v27  ;;  %v1853_v62 = vadd.f32 1.0, %v5579_v0  ;;  %v1855_v26 = vadd.f32 1.0, %v5585_v44  ;;  %v6976_v0 = vld [vmem:[#allocation52_spill] sm:$0xff]  ;;  %v6978_v44 = vld [vmem:[#allocation54_spill] sm:$0xff] }
 0x368   : > { %v2998_v8 = vpop.eup %2997  ;;  %3017 = vrcp.f32 %v1843_v13  ;;  %v2216_v5 = vmul.f32 %v2996_v56, %v6968_v11  ;;  %2342 = vst.msk [vmem:[%s5782_s29 + $0x138] sm:$0xff] %vm326_vm0, %v2214_v19  ;;  %v1854_v19 = vadd.f32 1.0, %v5582_v53  ;;  %v6977_v53 = vld [vmem:[#allocation53_spill] sm:$0xff] }
 0x369   : > { %v3000_v41 = vpop.eup %2999  ;;  %3019 = vrcp.f32 %v1844_v16  ;;  %v2217_v59 = vmul.f32 %v2998_v8, %v6969_v18  ;;  %2343 = vst.msk [vmem:[%s5782_s29 + $0x140] sm:$0xff] %vm326_vm0, %v2215_v6  ;;  %v1852_v16 = vadd.f32 1.0, %v5576_v63  ;;  %v6975_v63 = vld [vmem:[#allocation51_spill] sm:$0xff] }
 0x36a   : > { %v3002_v28 = vpop.eup %3001  ;;  %3021 = vrcp.f32 %v1845_v1  ;;  %v2218_v12 = vmul.f32 %v3000_v41, %v6970_v39  ;;  %2344 = vst.msk [vmem:[%s5782_s29 + $0x148] sm:$0xff] %vm326_vm0, %v2216_v5  ;;  %v1857_v41 = vadd.f32 1.0, %v5591_v7  ;;  %v6982_v7 = vld [vmem:[#allocation56_spill] sm:$0xff] }
 0x36b   : > { %v3004_v10 = vpop.eup %3003  ;;  %3023 = vrcp.f32 %v1846_v17  ;;  %v2219_v4 = vmul.f32 %v3002_v28, %v6971_v23  ;;  %2345 = vst.msk [vmem:[%s5782_s29 + $0x150] sm:$0xff] %vm326_vm0, %v2217_v59  ;;  %v6979_v59 = vld [vmem:[#allocation177_spill] sm:$0xff] }
 0x36c   : > { %v3006_v13 = vpop.eup %3005  ;;  %3025 = vrcp.f32 %v1847_v21  ;;  %v2220_v36 = vmul.f32 %v3004_v10, %v6972_v22  ;;  %2346 = vst.msk [vmem:[%s5782_s29 + $0x158] sm:$0xff] %vm326_vm0, %v2218_v12  ;;  %v1856_v21 = vadd.f32 1.0, %v5588_v34  ;;  %v1858_v28 = vadd.f32 1.0, %v6979_v59  ;;  %v6980_v34 = vld [vmem:[#allocation55_spill] sm:$0xff]  ;;  %v6981_v12 = vld [vmem:[#allocation178_spill] sm:$0xff] }
 0x36d   : > { %v3008_v45 = vpop.eup %3007  ;;  %3027 = vrcp.f32 %v1848_v15  ;;  %v2221_v14 = vmul.f32 %v3006_v13, %v6973_v54  ;;  %2347 = vst.msk [vmem:[%s5782_s29 + $0x160] sm:$0xff] %vm326_vm0, %v2219_v4  ;;  %v1859_v10 = vadd.f32 1.0, %v6981_v12  ;;  %v6983_v4 = vld [vmem:[#allocation179_spill] sm:$0xff]  ;;  %v6986_v54 = vld [vmem:[#allocation58_spill] sm:$0xff] }
 0x36e   : > { %v3010_v27 = vpop.eup %3009  ;;  %3029 = vrcp.f32 %v1849_v9  ;;  %v2222_v1 = vmul.f32 %v3008_v45, %v6974_v60  ;;  %2348 = vst.msk [vmem:[%s5782_s29 + $0x168] sm:$0xff] %vm326_vm0, %v2220_v36  ;;  %v1860_v13 = vadd.f32 1.0, %v6983_v4  ;;  %v6985_v45 = vld [vmem:[#allocation180_spill] sm:$0xff]  ;;  %v1870_v4 = vadd.f32 1.0, %v5630_v32  ;;  %v6999_v32 = vld [vmem:[#allocation69_spill] sm:$0xff] }
 0x36f   : > { %v3012_v31 = vpop.eup %3011  ;;  %3031 = vrcp.f32 %v1850_v42  ;;  %v2223_v56 = vmul.f32 %v3010_v27, %v6975_v63  ;;  %2349 = vst.msk [vmem:[%s5782_s29 + $0x170] sm:$0xff] %vm326_vm0, %v2221_v14  ;;  %v6989_v63 = vld [vmem:[#allocation182_spill] sm:$0xff] }
 0x370   : > { %v3014_v17 = vpop.eup %3013  ;;  %3033 = vrcp.f32 %v1851_v47  ;;  %v2224_v6 = vmul.f32 %v3012_v31, %v6976_v0  ;;  %2350 = vst.msk [vmem:[%s5782_s29 + $0x178] sm:$0xff] %vm326_vm0, %v2222_v1  ;;  %v6984_v47 = vld [vmem:[#allocation57_spill] sm:$0xff]  ;;  %v6988_v1 = vld [vmem:[#allocation59_spill] sm:$0xff] }
 0x371   : > { %v3016_v8 = vpop.eup %3015  ;;  %3035 = vrcp.f32 %v1852_v16  ;;  %v2225_v11 = vmul.f32 %v3014_v17, %v6977_v53  ;;  %2351 = vst.msk [vmem:[%s5782_s29 + $0x180] sm:$0xff] %vm326_vm0, %v2223_v56  ;;  %v1861_v16 = vadd.f32 1.0, %v6985_v45  ;;  %v1863_v56 = vadd.f32 1.0, %v6989_v63  ;;  %v6990_v17 = vld [vmem:[#allocation60_spill] sm:$0xff] }
 0x372   : > { %v3018_v5 = vpop.eup %3017  ;;  %3037 = vrcp.f32 %v1853_v62  ;;  %v2226_v15 = vmul.f32 %v3016_v8, %v6978_v44  ;;  %2352 = vst.msk [vmem:[%s5782_s29 + $0x188] sm:$0xff] %vm326_vm0, %v2224_v6  ;;  %v6987_v62 = vld [vmem:[#allocation181_spill] sm:$0xff]  ;;  %v1864_v6 = vadd.f32 1.0, %v5612_v25  ;;  %v6993_v25 = vld [vmem:[#allocation63_spill] sm:$0xff]  ;;  %v1875_v63 = vadd.f32 1.0, %v5645_v52  ;;  %v7004_v52 = vld [vmem:[#allocation74_spill] sm:$0xff] }
 0x373   : > { %v3020_v18 = vpop.eup %3019  ;;  %3039 = vrcp.f32 %v1854_v19  ;;  %v2227_v9 = vmul.f32 %v3018_v5, %v6980_v34  ;;  %2353 = vst.msk [vmem:[%s5782_s29 + $0x190] sm:$0xff] %vm326_vm0, %v2225_v11  ;;  %v1862_v60 = vadd.f32 1.0, %v6987_v62  ;;  %v6991_v8 = vld [vmem:[#allocation61_spill] sm:$0xff]  ;;  %v1865_v11 = vadd.f32 1.0, %v5615_v35  ;;  %v6992_v5 = vld [vmem:[#allocation62_spill] sm:$0xff]  ;;  %v6994_v35 = vld [vmem:[#allocation64_spill] sm:$0xff] }
 0x374   : > { %v3022_v39 = vpop.eup %3021  ;;  %3041 = vrcp.f32 %v1855_v26  ;;  %v2228_v42 = vmul.f32 %v3020_v18, %v6982_v7  ;;  %2354 = vst.msk [vmem:[%s5782_s29 + $0x198] sm:$0xff] %vm326_vm0, %v2226_v15  ;;  %v1866_v15 = vadd.f32 1.0, %v5618_v50  ;;  %v6995_v50 = vld [vmem:[#allocation65_spill] sm:$0xff]  ;;  %v1869_v7 = vadd.f32 1.0, %v5627_v20  ;;  %v6998_v20 = vld [vmem:[#allocation68_spill] sm:$0xff] }
 0x375   : > { %v3024_v23 = vpop.eup %3023  ;;  %3043 = vrcp.f32 %v1856_v21  ;;  %v2229_v22 = vmul.f32 %v3022_v39, %v6984_v47  ;;  %2355 = vst.msk [vmem:[%s5782_s29 + $0x1a0] sm:$0xff] %vm326_vm0, %v2227_v9  ;;  %v1868_v39 = vadd.f32 1.0, %v5624_v2  ;;  %v6997_v2 = vld [vmem:[#allocation67_spill] sm:$0xff] }
 0x376   : > { %v3026_v36 = vpop.eup %3025  ;;  %3045 = vrcp.f32 %v1857_v41  ;;  %v2230_v14 = vmul.f32 %v3024_v23, %v6986_v54  ;;  %2356 = vst.msk [vmem:[%s5782_s29 + $0x1a8] sm:$0xff] %vm326_vm0, %v2228_v42 }
 0x377   : > { %v3028_v27 = vpop.eup %3027  ;;  %3047 = vrcp.f32 %v1858_v28  ;;  %v2231_v31 = vmul.f32 %v3026_v36, %v6988_v1  ;;  %2357 = vst.msk [vmem:[%s5782_s29 + $0x1b0] sm:$0xff] %vm326_vm0, %v2229_v22  ;;  %v1867_v28 = vadd.f32 1.0, %v5621_v51  ;;  %v6996_v51 = vld [vmem:[#allocation66_spill] sm:$0xff]  ;;  %v1871_v22 = vadd.f32 1.0, %v5633_v3 }
 0x378   : > { %v3030_v19 = vpop.eup %3029  ;;  %3049 = vrcp.f32 %v1859_v10  ;;  %v2232_v26 = vmul.f32 %v3028_v27, %v6990_v17  ;;  %2358 = vst.msk [vmem:[%s5782_s29 + $0x1b8] sm:$0xff] %vm326_vm0, %v2230_v14  ;;  %v1873_v27 = vadd.f32 1.0, %v5639_v46  ;;  %v7000_v3 = vld [vmem:[#allocation70_spill] sm:$0xff]  ;;  %v1874_v1 = vadd.f32 1.0, %v5642_v49  ;;  %v7002_v46 = vld [vmem:[#allocation72_spill] sm:$0xff]  ;;  %v7003_v49 = vld [vmem:[#allocation73_spill] sm:$0xff] }
 0x379   : > { %v3032_v0 = vpop.eup %3031  ;;  %3051 = vrcp.f32 %v1860_v13  ;;  %v2233_v21 = vmul.f32 %v3030_v19, %v6991_v8  ;;  %2359 = vst.msk [vmem:[%s5782_s29 + $0x1c0] sm:$0xff] %vm326_vm0, %v2231_v31  ;;  %v1877_v8 = vadd.f32 1.0, %v5651_v58  ;;  %v7006_v58 = vld [vmem:[#allocation83_spill] sm:$0xff] }
 0x37a   : > { %v3034_v53 = vpop.eup %3033  ;;  %3053 = vrcp.f32 %v1861_v16  ;;  %v2234_v41 = vmul.f32 %v3032_v0, %v6992_v5  ;;  %2360 = vst.msk [vmem:[%s5782_s29 + $0x1c8] sm:$0xff] %vm326_vm0, %v2232_v26  ;;  %v1872_v16 = vadd.f32 1.0, %v5636_v29  ;;  %v7001_v29 = vld [vmem:[#allocation71_spill] sm:$0xff]  ;;  %v1876_v26 = vadd.f32 1.0, %v5648_v55  ;;  %v7005_v55 = vld [vmem:[#allocation82_spill] sm:$0xff] }
 0x37b   : > { %v3036_v44 = vpop.eup %3035  ;;  %3055 = vrcp.f32 %v1862_v60  ;;  %v2235_v18 = vmul.f32 %v3034_v53, %v6993_v25  ;;  %2361 = vst.msk [vmem:[%s5782_s29 + $0x1d0] sm:$0xff] %vm326_vm0, %v2233_v21 }
 0x37c   : > { %v3038_v59 = vpop.eup %3037  ;;  %3057 = vrcp.f32 %v1863_v56  ;;  %v2236_v34 = vmul.f32 %v3036_v44, %v6994_v35  ;;  %2362 = vst.msk [vmem:[%s5782_s29 + $0x1d8] sm:$0xff] %vm326_vm0, %v2234_v41  ;;  %v1879_v44 = vadd.f32 1.0, %v5657_v24  ;;  %v1881_v35 = vadd.f32 1.0, %v5663_v37  ;;  %v7008_v24 = vld [vmem:[#allocation85_spill] sm:$0xff]  ;;  %v7010_v37 = vld [vmem:[#allocation87_spill] sm:$0xff] }
 0x37d   : > { %v3040_v9 = vpop.eup %3039  ;;  %3059 = vrcp.f32 %v1864_v6  ;;  %v2237_v12 = vmul.f32 %v3038_v59, %v6995_v50  ;;  %2363 = vst.msk [vmem:[%s5782_s29 + $0x1e0] sm:$0xff] %vm326_vm0, %v2235_v18  ;;  %v1880_v18 = vadd.f32 1.0, %v5660_v38  ;;  %v7009_v38 = vld [vmem:[#allocation86_spill] sm:$0xff] }
 0x37e   : > { %v3042_v10 = vpop.eup %3041  ;;  %3061 = vrcp.f32 %v1865_v11  ;;  %v2238_v42 = vmul.f32 %v3040_v9, %v6996_v51  ;;  %2364 = vst.msk [vmem:[%s5782_s29 + $0x1e8] sm:$0xff] %vm326_vm0, %v2236_v34  ;;  %v1878_v11 = vadd.f32 1.0, %v5654_v33  ;;  %v7007_v33 = vld [vmem:[#allocation84_spill] sm:$0xff] }
 0x37f   : > { %v3044_v23 = vpop.eup %3043  ;;  %3063 = vrcp.f32 %v1866_v15  ;;  %v2239_v13 = vmul.f32 %v3042_v10, %v6997_v2  ;;  %2365 = vst.msk [vmem:[%s5782_s29 + $0x1f0] sm:$0xff] %vm326_vm0, %v2237_v12  ;;  %v1883_v10 = vadd.f32 1.0, %v5669_v43  ;;  %v7012_v2 = vld [vmem:[#allocation183_spill] sm:$0xff]  ;;  %v7013_v43 = vld [vmem:[#allocation89_spill] sm:$0xff] }
 0x380   : > { %v3046_v47 = vpop.eup %3045  ;;  %3065 = vrcp.f32 %v1867_v28  ;;  %v2240_v36 = vmul.f32 %v3044_v23, %v6998_v20  ;;  %2366 = vst.msk [vmem:[%s5782_s29 + $0x1f8] sm:$0xff] %vm326_vm0, %v2238_v42  ;;  %v1884_v42 = vadd.f32 1.0, %v5672_v30  ;;  %v7014_v20 = vld [vmem:[#allocation184_spill] sm:$0xff]  ;;  %v7015_v30 = vld [vmem:[#allocation90_spill] sm:$0xff] }
 0x381   : > { %v3048_v45 = vpop.eup %3047  ;;  %3067 = vrcp.f32 %v1868_v39  ;;  %v2241_v54 = vmul.f32 %v3046_v47, %v6999_v32  ;;  %2367 = vst.msk [vmem:[%s5782_s29 + $0x200] sm:$0xff] %vm326_vm0, %v2239_v13  ;;  %v1882_v39 = vadd.f32 1.0, %v5666_v40  ;;  %v7011_v40 = vld [vmem:[#allocation88_spill] sm:$0xff]  ;;  %v1885_v13 = vadd.f32 1.0, %v7012_v2 }
 0x382   : > { %v3050_v14 = vpop.eup %3049  ;;  %3069 = vrcp.f32 %v1869_v7  ;;  %v2242_v62 = vmul.f32 %v3048_v45, %v7000_v3  ;;  %2368 = vst.msk [vmem:[%s5782_s29 + $0x208] sm:$0xff] %vm326_vm0, %v2240_v36  ;;  %v1886_v36 = vadd.f32 1.0, %v7014_v20  ;;  %v1887_v32 = vadd.f32 1.0, %v5681_v48  ;;  %v7018_v48 = vld [vmem:[#allocation93_spill] sm:$0xff]  ;;  %v7036_v2 = vld [vmem:[#allocation76_spill] sm:$0xff] }
 0x383   : > { %v3052_v60 = vpop.eup %3051  ;;  %3071 = vrcp.f32 %v1870_v4  ;;  %v2243_v31 = vmul.f32 %v3050_v14, %v7001_v29  ;;  %2369 = vst.msk [vmem:[%s5782_s29 + $0x210] sm:$0xff] %vm326_vm0, %v2241_v54  ;;  %v7016_v54 = vld [vmem:[#allocation91_spill] sm:$0xff]  ;;  %v1888_v3 = vadd.f32 1.0, %v5684_v57  ;;  %v1889_v29 = vadd.f32 1.0, %v5687_v61  ;;  %v7020_v57 = vld [vmem:[#allocation94_spill] sm:$0xff]  ;;  %v7038_v20 = vld [vmem:[#allocation77_spill] sm:$0xff] }
 0x384   : > { %v3054_v19 = vpop.eup %3053  ;;  %3073 = vrcp.f32 %v1871_v22  ;;  %v2244_v56 = vmul.f32 %v3052_v60, %v7002_v46  ;;  %2370 = vst.msk [vmem:[%s5782_s29 + $0x218] sm:$0xff] %vm326_vm0, %v2242_v62  ;;  %v7017_v62 = vld [vmem:[#allocation92_spill] sm:$0xff]  ;;  %v7022_v61 = vld [vmem:[#allocation95_spill] sm:$0xff] }
 0x385   : > { %v3056_v17 = vpop.eup %3055  ;;  %3075 = vrcp.f32 %v1872_v16  ;;  %v2245_v0 = vmul.f32 %v3054_v19, %v7003_v49  ;;  %2371 = vst.msk [vmem:[%s5782_s29 + $0x220] sm:$0xff] %vm326_vm0, %v2243_v31 }
 0x386   : > { %v3058_v6 = vpop.eup %3057  ;;  %3077 = vrcp.f32 %v1873_v27  ;;  %v2246_v21 = vmul.f32 %v3056_v17, %v7004_v52  ;;  %2372 = vst.msk [vmem:[%s5782_s29 + $0x228] sm:$0xff] %vm326_vm0, %v2244_v56 }
 0x387   : > { %v3060_v53 = vpop.eup %3059  ;;  %3079 = vrcp.f32 %v1874_v1  ;;  %v2247_v5 = vmul.f32 %v3058_v6, %v7005_v55  ;;  %2373 = vst.msk [vmem:[%s5782_s29 + $0x230] sm:$0xff] %vm326_vm0, %v2245_v0  ;;  %v7025_v55 = vld [vmem:[#allocation188_spill] sm:$0xff] }
 0x388   : > { %v3062_v41 = vpop.eup %3061  ;;  %3081 = vrcp.f32 %v1875_v63  ;;  %v2248_v15 = vmul.f32 %v3060_v53, %v7006_v58  ;;  %2374 = vst.msk [vmem:[%s5782_s29 + $0x238] sm:$0xff] %vm326_vm0, %v2246_v21  ;;  %v7019_v63 = vld [vmem:[#allocation185_spill] sm:$0xff]  ;;  %v7024_v21 = vld [vmem:[#allocation96_spill] sm:$0xff] }
 0x389   : > { %v3064_v25 = vpop.eup %3063  ;;  %3083 = vrcp.f32 %v1876_v26  ;;  %v2249_v59 = vmul.f32 %v3062_v41, %v7007_v33  ;;  %2375 = vst.msk [vmem:[%s5782_s29 + $0x240] sm:$0xff] %vm326_vm0, %v2247_v5  ;;  %v1890_v46 = vadd.f32 1.0, %v7019_v63  ;;  %v7021_v26 = vld [vmem:[#allocation186_spill] sm:$0xff]  ;;  %v1893_v5 = vadd.f32 1.0, %v7025_v55  ;;  %v7026_v41 = vld [vmem:[#allocation97_spill] sm:$0xff] }
 0x38a   : > { %v3066_v28 = vpop.eup %3065  ;;  %3085 = vrcp.f32 %v1877_v8  ;;  %v2250_v34 = vmul.f32 %v3064_v25, %v7008_v24  ;;  %2376 = vst.msk [vmem:[%s5782_s29 + $0x248] sm:$0xff] %vm326_vm0, %v2248_v15  ;;  %v1891_v49 = vadd.f32 1.0, %v7021_v26  ;;  %v7023_v8 = vld [vmem:[#allocation187_spill] sm:$0xff]  ;;  %v7027_v15 = vld [vmem:[#allocation189_spill] sm:$0xff] }
 0x38b   : > { %v3068_v9 = vpop.eup %3067  ;;  %3087 = vrcp.f32 %v1878_v11  ;;  %v2251_v50 = vmul.f32 %v3066_v28, %v7009_v38  ;;  %2377 = vst.msk [vmem:[%s5782_s29 + $0x250] sm:$0xff] %vm326_vm0, %v2249_v59  ;;  %v1892_v52 = vadd.f32 1.0, %v7023_v8  ;;  %v1894_v25 = vadd.f32 1.0, %v7027_v15  ;;  %v7029_v28 = vld [vmem:[#allocation190_spill] sm:$0xff]  ;;  %v7030_v24 = vld [vmem:[#allocation99_spill] sm:$0xff] }
 0x38c   : > { %v3070_v12 = vpop.eup %3069  ;;  %3089 = vrcp.f32 %v1879_v44  ;;  %v2252_v7 = vmul.f32 %v3068_v9, %v7010_v37  ;;  %2378 = vst.msk [vmem:[%s5782_s29 + $0x258] sm:$0xff] %vm326_vm0, %v2250_v34  ;;  %v7033_v37 = vld [vmem:[#allocation192_spill] sm:$0xff] }
 0x38d   : > { %v3072_v51 = vpop.eup %3071  ;;  %3091 = vrcp.f32 %v1880_v18  ;;  %v2253_v23 = vmul.f32 %v3070_v12, %v7011_v40  ;;  %2379 = vst.msk [vmem:[%s5782_s29 + $0x260] sm:$0xff] %vm326_vm0, %v2251_v50  ;;  %v7028_v18 = vld [vmem:[#allocation98_spill] sm:$0xff]  ;;  %v7032_v50 = vld [vmem:[#allocation100_spill] sm:$0xff] }
 0x38e   : > { %v3074_v4 = vpop.eup %3073  ;;  %3093 = vrcp.f32 %v1881_v35  ;;  %v2254_v47 = vmul.f32 %v3072_v51, %v7013_v43  ;;  %2380 = vst.msk [vmem:[%s5782_s29 + $0x268] sm:$0xff] %vm326_vm0, %v2252_v7  ;;  %v1895_v35 = vadd.f32 1.0, %v7029_v28  ;;  %v1897_v7 = vadd.f32 1.0, %v7033_v37  ;;  %v7034_v51 = vld [vmem:[#allocation75_spill] sm:$0xff] }
 0x38f   : > { %v3076_v22 = vpop.eup %3075  ;;  %3095 = vrcp.f32 %v1882_v39  ;;  %v2255_v45 = vmul.f32 %v3074_v4, %v7015_v30  ;;  %2381 = vst.msk [vmem:[%s5782_s29 + $0x270] sm:$0xff] %vm326_vm0, %v2253_v23  ;;  %v7031_v39 = vld [vmem:[#allocation191_spill] sm:$0xff]  ;;  %v7035_v23 = vld [vmem:[#allocation193_spill] sm:$0xff] }
 0x390   : > { %v3078_v16 = vpop.eup %3077  ;;  %3097 = vrcp.f32 %v1883_v10  ;;  %v2256_v14 = vmul.f32 %v3076_v22, %v7016_v54  ;;  %2382 = vst.msk [vmem:[%s5782_s29 + $0x278] sm:$0xff] %vm326_vm0, %v2254_v47  ;;  %v1896_v38 = vadd.f32 1.0, %v7031_v39  ;;  %v1898_v4 = vadd.f32 1.0, %v7035_v23  ;;  %v7037_v47 = vld [vmem:[#allocation194_spill] sm:$0xff] }
 0x391   : > { %v3080_v27 = vpop.eup %3079  ;;  %3099 = vrcp.f32 %v1884_v42  ;;  %v2257_v60 = vmul.f32 %v3078_v16, %v7017_v62  ;;  %2383 = vst.msk [vmem:[%s5782_s29 + $0x280] sm:$0xff] %vm326_vm0, %v2255_v45  ;;  %v1899_v22 = vadd.f32 1.0, %v7037_v47  ;;  %v7039_v45 = vld [vmem:[#allocation195_spill] sm:$0xff] }
 0x392   : > { %v3082_v1 = vpop.eup %3081  ;;  %3101 = vrcp.f32 %v1885_v13  ;;  %v2258_v31 = vmul.f32 %v3080_v27, %v7018_v48  ;;  %2384 = vst.msk [vmem:[%s5782_s29 + $0x288] sm:$0xff] %vm326_vm0, %v2256_v14  ;;  %v1900_v16 = vadd.f32 1.0, %v7039_v45  ;;  %v7041_v27 = vld [vmem:[#allocation196_spill] sm:$0xff]  ;;  %v7042_v62 = vld [vmem:[#allocation79_spill] sm:$0xff] }
 0x393   : > { %v3084_v19 = vpop.eup %3083  ;;  %3103 = vrcp.f32 %v1886_v36  ;;  %v2259_v56 = vmul.f32 %v3082_v1, %v7020_v57  ;;  %2385 = vst.msk [vmem:[%s5782_s29 + $0x290] sm:$0xff] %vm326_vm0, %v2257_v60 }
 0x394   : > { %v3086_v17 = vpop.eup %3085  ;;  %3105 = vrcp.f32 %v1887_v32  ;;  %v2260_v0 = vmul.f32 %v3084_v19, %v7022_v61  ;;  %2386 = vst.msk [vmem:[%s5782_s29 + $0x298] sm:$0xff] %vm326_vm0, %v2258_v31  ;;  %v7040_v32 = vld [vmem:[#allocation78_spill] sm:$0xff]  ;;  %v7044_v31 = vld [vmem:[#allocation80_spill] sm:$0xff] }
 0x395   : > { %v3088_v6 = vpop.eup %3087  ;;  %3107 = vrcp.f32 %v1888_v3  ;;  %v2261_v53 = vmul.f32 %v3086_v17, %v7024_v21  ;;  %2387 = vst.msk [vmem:[%s5782_s29 + $0x2a0] sm:$0xff] %vm326_vm0, %v2259_v56  ;;  %v1901_v3 = vadd.f32 1.0, %v7041_v27  ;;  %v7046_v56 = vld [vmem:[#allocation101_spill] sm:$0xff] }
 0x396   : > { %v3090_v11 = vpop.eup %3089  ;;  %3109 = vrcp.f32 %v1889_v29  ;;  %v2262_v44 = vmul.f32 %v3088_v6, %v7026_v41  ;;  %2388 = vst.msk [vmem:[%s5782_s29 + $0x2a8] sm:$0xff] %vm326_vm0, %v2260_v0  ;;  %v7043_v29 = vld [vmem:[#allocation197_spill] sm:$0xff]  ;;  %v7048_v0 = vld [vmem:[#allocation102_spill] sm:$0xff] }
 0x397   : > { %v3092_v58 = vpop.eup %3091  ;;  %3111 = vrcp.f32 %v1890_v46  ;;  %v2263_v33 = vmul.f32 %v3090_v11, %v7028_v18  ;;  %2389 = vst.msk [vmem:[%s5782_s29 + $0x2b0] sm:$0xff] %vm326_vm0, %v2261_v53  ;;  %v1902_v48 = vadd.f32 1.0, %v7043_v29  ;;  %v7045_v46 = vld [vmem:[#allocation198_spill] sm:$0xff]  ;;  %v7050_v53 = vld [vmem:[#allocation103_spill] sm:$0xff] }
 0x398   : > { %v3094_v59 = vpop.eup %3093  ;;  %3113 = vrcp.f32 %v1891_v49  ;;  %v2264_v34 = vmul.f32 %v3092_v58, %v7030_v24  ;;  %2390 = vst.msk [vmem:[%s5782_s29 + $0x2b8] sm:$0xff] %vm326_vm0, %v2262_v44  ;;  %v1903_v57 = vadd.f32 1.0, %v7045_v46  ;;  %v7047_v49 = vld [vmem:[#allocation199_spill] sm:$0xff]  ;;  %v7052_v44 = vld [vmem:[#allocation104_spill] sm:$0xff] }
 0x399   : > { %v3096_v9 = vpop.eup %3095  ;;  %3115 = vrcp.f32 %v1892_v52  ;;  %v2265_v12 = vmul.f32 %v3094_v59, %v7032_v50  ;;  %2391 = vst.msk [vmem:[%s5782_s29 + $0x2c0] sm:$0xff] %vm326_vm0, %v2263_v33  ;;  %v1904_v61 = vadd.f32 1.0, %v7047_v49  ;;  %v7049_v52 = vld [vmem:[#allocation200_spill] sm:$0xff]  ;;  %v7054_v33 = vld [vmem:[#allocation105_spill] sm:$0xff] }
 0x39a   : > { %v3098_v10 = vpop.eup %3097  ;;  %3117 = vrcp.f32 %v1893_v5  ;;  %v2266_v42 = vmul.f32 %v3096_v9, %v7034_v51  ;;  %2392 = vst.msk [vmem:[%s5782_s29 + $0x2c8] sm:$0xff] %vm326_vm0, %v2264_v34  ;;  %v1905_v21 = vadd.f32 1.0, %v7049_v52  ;;  %v7051_v5 = vld [vmem:[#allocation201_spill] sm:$0xff]  ;;  %v7056_v34 = vld [vmem:[#allocation106_spill] sm:$0xff] }
 0x39b   : > { %v3100_v40 = vpop.eup %3099  ;;  %3119 = vrcp.f32 %v1894_v25  ;;  %v2267_v13 = vmul.f32 %v3098_v10, %v7036_v2  ;;  %2393 = vst.msk [vmem:[%s5782_s29 + $0x2d0] sm:$0xff] %vm326_vm0, %v2265_v12  ;;  %v1906_v41 = vadd.f32 1.0, %v7051_v5  ;;  %v7053_v25 = vld [vmem:[#allocation130_spill] sm:$0xff]  ;;  %v7058_v12 = vld [vmem:[#allocation107_spill] sm:$0xff] }
 0x39c   : > { %v3102_v43 = vpop.eup %3101  ;;  %3121 = vrcp.f32 %v1895_v35  ;;  %v2268_v36 = vmul.f32 %v3100_v40, %v7038_v20  ;;  %2394 = vst.msk [vmem:[%s5782_s29 + $0x2d8] sm:$0xff] %vm326_vm0, %v2266_v42  ;;  %v1907_v18 = vadd.f32 1.0, %v7053_v25  ;;  %v7055_v35 = vld [vmem:[#allocation131_spill] sm:$0xff]  ;;  %v7060_v42 = vld [vmem:[#allocation108_spill] sm:$0xff] }
 0x39d   : > { %v3104_v30 = vpop.eup %3103  ;;  %3123 = vrcp.f32 %v1896_v38  ;;  %v2269_v54 = vmul.f32 %v3102_v43, %v7040_v32  ;;  %2395 = vst.msk [vmem:[%s5782_s29 + $0x2e0] sm:$0xff] %vm326_vm0, %v2267_v13  ;;  %v1908_v24 = vadd.f32 1.0, %v7055_v35  ;;  %v7057_v38 = vld [vmem:[#allocation132_spill] sm:$0xff]  ;;  %v7062_v13 = vld [vmem:[#allocation109_spill] sm:$0xff] }
 0x39e   : > { %v3106_v14 = vpop.eup %3105  ;;  %3125 = vrcp.f32 %v1897_v7  ;;  %v2270_v60 = vmul.f32 %v3104_v30, %v7042_v62  ;;  %2396 = vst.msk [vmem:[%s5782_s29 + $0x2e8] sm:$0xff] %vm326_vm0, %v2268_v36  ;;  %v1909_v50 = vadd.f32 1.0, %v7057_v38  ;;  %v7059_v7 = vld [vmem:[#allocation133_spill] sm:$0xff]  ;;  %v7064_v36 = vld [vmem:[#allocation110_spill] sm:$0xff]  ;;  %v7080_v35 = vld [vmem:[#allocation120_spill] sm:$0xff] }
 0x39f   : > { %v3108_v1 = vpop.eup %3107  ;;  %3127 = vrcp.f32 %v1898_v4  ;;  %v2271_v19 = vmul.f32 %v3106_v14, %v7044_v31  ;;  %2397 = vst.msk [vmem:[%s5782_s29 + $0x2f0] sm:$0xff] %vm326_vm0, %v2269_v54  ;;  %v1910_v51 = vadd.f32 1.0, %v7059_v7  ;;  %v7061_v4 = vld [vmem:[#allocation134_spill] sm:$0xff]  ;;  %v7066_v54 = vld [vmem:[#allocation111_spill] sm:$0xff] }
 0x3a0   : > { %v3110_v63 = vpop.eup %3109  ;;  %3129 = vrcp.f32 %v1899_v22  ;;  %v2272_v17 = vmul.f32 %v3108_v1, %v7046_v56  ;;  %2398 = vst.msk [vmem:[%s5782_s29 + $0x2f8] sm:$0xff] %vm326_vm0, %v2270_v60  ;;  %v1911_v2 = vadd.f32 1.0, %v7061_v4  ;;  %v7063_v22 = vld [vmem:[#allocation135_spill] sm:$0xff]  ;;  %v7068_v60 = vld [vmem:[#allocation112_spill] sm:$0xff] }
 0x3a1   : > { %v3112_v26 = vpop.eup %3111  ;;  %3131 = vrcp.f32 %v1900_v16  ;;  %v2273_v6 = vmul.f32 %v3110_v63, %v7048_v0  ;;  %2399 = vst.msk [vmem:[%s5782_s29 + $0x300] sm:$0xff] %vm326_vm0, %v2271_v19  ;;  %v1912_v20 = vadd.f32 1.0, %v7063_v22  ;;  %v7065_v16 = vld [vmem:[#allocation136_spill] sm:$0xff]  ;;  %v7070_v19 = vld [vmem:[#allocation113_spill] sm:$0xff]  ;;  %v7085_v4 = vld [vmem:[#allocation123_spill] sm:$0xff] }
 0x3a2   : > { %v3114_v8 = vpop.eup %3113  ;;  %3133 = vrcp.f32 %v1901_v3  ;;  %v2274_v11 = vmul.f32 %v3112_v26, %v7050_v53  ;;  %2400 = vst.msk [vmem:[%s5782_s29 + $0x308] sm:$0xff] %vm326_vm0, %v2272_v17  ;;  %v1913_v32 = vadd.f32 1.0, %v7065_v16  ;;  %v7067_v3 = vld [vmem:[#allocation137_spill] sm:$0xff]  ;;  %v7072_v17 = vld [vmem:[#allocation114_spill] sm:$0xff] }
 0x3a3   : > { %v3116_v55 = vpop.eup %3115  ;;  %3135 = vrcp.f32 %v1902_v48  ;;  %v2275_v58 = vmul.f32 %v3114_v8, %v7052_v44  ;;  %2401 = vst.msk [vmem:[%s5782_s29 + $0x310] sm:$0xff] %vm326_vm0, %v2273_v6  ;;  %v1914_v62 = vadd.f32 1.0, %v7067_v3  ;;  %v7069_v48 = vld [vmem:[#allocation138_spill] sm:$0xff]  ;;  %v7074_v6 = vld [vmem:[#allocation115_spill] sm:$0xff]  ;;  %v7090_v3 = vld [vmem:[#allocation128_spill] sm:$0xff] }
 0x3a4   : > { %v3118_v15 = vpop.eup %3117  ;;  %3137 = vrcp.f32 %v1903_v57  ;;  %v2276_v59 = vmul.f32 %v3116_v55, %v7054_v33  ;;  %2402 = vst.msk [vmem:[%s5782_s29 + $0x318] sm:$0xff] %vm326_vm0, %v2274_v11  ;;  %v1915_v31 = vadd.f32 1.0, %v7069_v48  ;;  %v7071_v57 = vld [vmem:[#allocation139_spill] sm:$0xff]  ;;  %v7076_v11 = vld [vmem:[#allocation116_spill] sm:$0xff] }
 0x3a5   : > { %v3120_v28 = vpop.eup %3119  ;;  %3139 = vrcp.f32 %v1904_v61  ;;  %v2277_v9 = vmul.f32 %v3118_v15, %v7056_v34  ;;  %2403 = vst.msk [vmem:[%s5782_s29 + $0x320] sm:$0xff] %vm326_vm0, %v2275_v58  ;;  %v1916_v56 = vadd.f32 1.0, %v7071_v57  ;;  %v7073_v61 = vld [vmem:[#allocation140_spill] sm:$0xff]  ;;  %v7078_v15 = vld [vmem:[#allocation118_spill] sm:$0xff]  ;;  %v7079_v33 = vld [vmem:[#allocation119_spill] sm:$0xff] }
 0x3a6   : > { %v3122_v39 = vpop.eup %3121  ;;  %3141 = vrcp.f32 %v1905_v21  ;;  %v2278_v10 = vmul.f32 %v3120_v28, %v7058_v12  ;;  %2404 = vst.msk [vmem:[%s5782_s29 + $0x328] sm:$0xff] %vm326_vm0, %v2276_v59  ;;  %v1917_v0 = vadd.f32 1.0, %v7073_v61  ;;  %v7075_v21 = vld [vmem:[#allocation141_spill] sm:$0xff] }
 0x3a7   : > { %v3124_v37 = vpop.eup %3123  ;;  %3143 = vrcp.f32 %v1906_v41  ;;  %v2279_v40 = vmul.f32 %v3122_v39, %v7060_v42  ;;  %2405 = vst.msk [vmem:[%s5782_s29 + $0x330] sm:$0xff] %vm326_vm0, %v2277_v9  ;;  %v1918_v53 = vadd.f32 1.0, %v7075_v21  ;;  %v7077_v41 = vld [vmem:[#allocation117_spill] sm:$0xff]  ;;  %v7084_v42 = vld [vmem:[#allocation122_spill] sm:$0xff] }
 0x3a8   : > { %v3126_v23 = vpop.eup %3125  ;;  %3145 = vrcp.f32 %v1907_v18  ;;  %v2280_v43 = vmul.f32 %v3124_v37, %v7062_v13  ;;  %2406 = vst.msk [vmem:[%s5782_s29 + $0x338] sm:$0xff] %vm326_vm0, %v2278_v10  ;;  %v7081_v9 = vld [vmem:[#allocation121_spill] sm:$0xff]  ;;  %v7083_v37 = vld [vmem:[#allocation3_spill] sm:$0xff] }
 0x3a9   : > { %v3128_v47 = vpop.eup %3127  ;;  %3147 = vrcp.f32 %v1908_v24  ;;  %v2281_v30 = vmul.f32 %v3126_v23, %v7064_v36  ;;  %2407 = vst.msk [vmem:[%s5782_s29 + $0x340] sm:$0xff] %vm326_vm0, %v2279_v40 }
 0x3aa   : > { %v3130_v45 = vpop.eup %3129  ;;  %3149 = vrcp.f32 %v1909_v50  ;;  %v2282_v14 = vmul.f32 %v3128_v47, %v7066_v54  ;;  %2408 = vst.msk [vmem:[%s5782_s29 + $0x348] sm:$0xff] %vm326_vm0, %v2280_v43  ;;  %v7082_v50 = vld [vmem:[#allocation2_spill] sm:$0xff]  ;;  %v7086_v43 = vld [vmem:[#allocation124_spill] sm:$0xff]  ;;  %v7089_v54 = vld [vmem:[#allocation127_spill] sm:$0xff] }
 0x3ab   : > { %v3132_v27 = vpop.eup %3131  ;;  %3151 = vrcp.f32 %v1910_v51  ;;  %v2283_v1 = vmul.f32 %v3130_v45, %v7068_v60  ;;  %2409 = vst.msk [vmem:[%s5782_s29 + $0x350] sm:$0xff] %vm326_vm0, %v2281_v30  ;;  %v7088_v45 = vld [vmem:[#allocation126_spill] sm:$0xff]  ;;  %v7091_v60 = vld [vmem:[#allocation129_spill] sm:$0xff] }
 0x3ac   : > { %v3134_v29 = vpop.eup %3133  ;;  %3153 = vrcp.f32 %v1911_v2  ;;  %v2284_v63 = vmul.f32 %v3132_v27, %v7070_v19  ;;  %2410 = vst.msk [vmem:[%s5782_s29 + $0x358] sm:$0xff] %vm326_vm0, %v2282_v14 }
 0x3ad   : > { %v3136_v46 = vpop.eup %3135  ;;  %3155 = vrcp.f32 %v1912_v20  ;;  %v2285_v26 = vmul.f32 %v3134_v29, %v7072_v17  ;;  %2411 = vst.msk [vmem:[%s5782_s29 + $0x360] sm:$0xff] %vm326_vm0, %v2283_v1  ;;  %v7087_v20 = vld [vmem:[#allocation125_spill] sm:$0xff] }
 0x3ae   : > { %v3138_v49 = vpop.eup %3137  ;;  %3157 = vrcp.f32 %v1913_v32  ;;  %v2286_v8 = vmul.f32 %v3136_v46, %v7074_v6  ;;  %2412 = vst.msk [vmem:[%s5782_s29 + $0x368] sm:$0xff] %vm326_vm0, %v2284_v63 }
 0x3af   : > { %v3140_v52 = vpop.eup %3139  ;;  %3159 = vrcp.f32 %v1914_v62  ;;  %v2287_v55 = vmul.f32 %v3138_v49, %v7076_v11  ;;  %2413 = vst.msk [vmem:[%s5782_s29 + $0x370] sm:$0xff] %vm326_vm0, %v2285_v26 }
 0x3b0   : > { %v3142_v5 = vpop.eup %3141  ;;  %3161 = vrcp.f32 %v1915_v31  ;;  %v2288_v44 = vmul.f32 %v3140_v52, %v7077_v41  ;;  %2414 = vst.msk [vmem:[%s5782_s29 + $0x378] sm:$0xff] %vm326_vm0, %v2286_v8 }
 0x3b1   : > { %v3144_v58 = vpop.eup %3143  ;;  %3163 = vrcp.f32 %v1916_v56  ;;  %v2289_v25 = vmul.f32 %v3142_v5, %v7078_v15  ;;  %2415 = vst.msk [vmem:[%s5782_s29 + $0x380] sm:$0xff] %vm326_vm0, %v2287_v55 }
 0x3b2   : > { %v3146_v18 = vpop.eup %3145  ;;  %3165 = vrcp.f32 %v1917_v0  ;;  %v2290_v59 = vmul.f32 %v3144_v58, %v7079_v33  ;;  %2416 = vst.msk [vmem:[%s5782_s29 + $0x388] sm:$0xff] %vm326_vm0, %v2288_v44 }
 0x3b3   : > { %v3148_v28 = vpop.eup %3147  ;;  %3167 = vrcp.f32 %v1918_v53  ;;  %v2291_v24 = vmul.f32 %v3146_v18, %v7080_v35  ;;  %2417 = vst.msk [vmem:[%s5782_s29 + $0x390] sm:$0xff] %vm326_vm0, %v2289_v25 }
 0x3b4   : > { %v3150_v34 = vpop.eup %3149  ;;  %v2292_v39 = vmul.f32 %v3148_v28, %v7081_v9  ;;  %2418 = vst.msk [vmem:[%s5782_s29 + $0x398] sm:$0xff] %vm326_vm0, %v2290_v59 }
 0x3b5   : > { %v3152_v38 = vpop.eup %3151  ;;  %v2293_v12 = vmul.f32 %v3150_v34, %v7082_v50  ;;  %2419 = vst.msk [vmem:[%s5782_s29 + $0x3a0] sm:$0xff] %vm326_vm0, %v2291_v24 }
 0x3b6   : > { %v3154_v10 = vpop.eup %3153  ;;  %v2294_v7 = vmul.f32 %v3152_v38, %v7083_v37  ;;  %2420 = vst.msk [vmem:[%s5782_s29 + $0x3a8] sm:$0xff] %vm326_vm0, %v2292_v39 }
 0x3b7   : > { %v3156_v51 = vpop.eup %3155  ;;  %v2295_v40 = vmul.f32 %v3154_v10, %v7084_v42  ;;  %2421 = vst.msk [vmem:[%s5782_s29 + $0x3b0] sm:$0xff] %vm326_vm0, %v2293_v12 }
 0x3b8   : > { %v3158_v23 = vpop.eup %3157  ;;  %v2296_v2 = vmul.f32 %v3156_v51, %v7085_v4  ;;  %2422 = vst.msk [vmem:[%s5782_s29 + $0x3b8] sm:$0xff] %vm326_vm0, %v2294_v7 }
 0x3b9   : > { %v3160_v13 = vpop.eup %3159  ;;  %v2297_v47 = vmul.f32 %v3158_v23, %v7086_v43  ;;  %2423 = vst.msk [vmem:[%s5782_s29 + $0x3c0] sm:$0xff] %vm326_vm0, %v2295_v40 }
 0x3ba   : > { %v3162_v22 = vpop.eup %3161  ;;  %v2298_v36 = vmul.f32 %v3160_v13, %v7087_v20  ;;  %2424 = vst.msk [vmem:[%s5782_s29 + $0x3c8] sm:$0xff] %vm326_vm0, %v2296_v2 }
 0x3bb   : > { %v3164_v30 = vpop.eup %3163  ;;  %v2299_v16 = vmul.f32 %v3162_v22, %v7088_v45  ;;  %2425 = vst.msk [vmem:[%s5782_s29 + $0x3d0] sm:$0xff] %vm326_vm0, %v2297_v47 }
 0x3bc   : > { %v3166_v32 = vpop.eup %3165  ;;  %v2300_v14 = vmul.f32 %v3164_v30, %v7089_v54  ;;  %2426 = vst.msk [vmem:[%s5782_s29 + $0x3d8] sm:$0xff] %vm326_vm0, %v2298_v36 }
 0x3bd   : > { %v3168_v27 = vpop.eup %3167  ;;  %v2301_v62 = vmul.f32 %v3166_v32, %v7090_v3  ;;  %2427 = vst.msk [vmem:[%s5782_s29 + $0x3e0] sm:$0xff] %vm326_vm0, %v2299_v16 }
 0x3be   : > { %v2302_v1 = vmul.f32 %v3168_v27, %v7091_v60  ;;  %2428 = vst.msk [vmem:[%s5782_s29 + $0x3e8] sm:$0xff] %vm326_vm0, %v2300_v14 }
 0x3bf   : > { %2429 = vst.msk [vmem:[%s5782_s29 + $0x3f0] sm:$0xff] %vm326_vm0, %v2301_v62 }
 0x3c0   : > { %2430 = vst.msk [vmem:[%s5782_s29 + $0x3f8] sm:$0xff] %vm326_vm0, %v2302_v1 }
 0x3c1 PF: > { %s14_s15 = sadd.s32 1, %s3253_s15  }
 0x3c2   : > { %p11_p4 = scmp.ge.s32.totalorder %s14_s15, 4  }
 0x3c4   :  { %13 = sbr.rel (!%p11_p4) target bundleno = 1 (0x1), region = 66 }

// kernel: upsample_forward.13
= control target key start
LH: loop header
LB: loop body
LE: loop exit
PB: predicated region body
PF: predicated region fallthrough
CT: control target
= control target key end

     0   :  { %s836_s12 = smov 0   ;;  %s838_s13 = smov 0   ;;  %s959_s0 = inlined_call_operand.vmem [shape: bf16[2,34,34,4], index: 0, kind: input, shape index: {}]   ;;  %s960_s1 = inlined_call_operand.vmem [shape: bf16[3,3,4,8], index: 1, kind: input, shape index: {}]   ;;  %s961_s2 = inlined_call_operand.vmem [shape: f32[1,8], index: 2, kind: input, shape index: {}]   ;;  %s962_s3 = inlined_call_operand.vmem [shape: f32[2,32,32,8], index: 3, kind: output, shape index: {}]  }
   0x1   :  { %s840_s14 = smov 0   ;;  %s842_s15 = smov 0  }
   0x2   :  { %s844_s16 = smov 0   ;;  %s846_s17 = smov 0  }
   0x3   :  { %s848_s18 = smov 0  }
   0x4 LB: > { %s25_s19 = sadd.s32 1, %s801_s15  ;;  %s28_s20 = sadd.s32 1, %s805_s16  ;;  %s813_s18 = sphi %s848_s18, %s13_s18   ;;  %s809_s17 = sphi %s846_s17, %s968_s17   ;;  %s805_s16 = sphi %s844_s16, %s967_s16   ;;  %s801_s15 = sphi %s842_s15, %s966_s15   ;;  %s797_s14 = sphi %s840_s14, %s965_s14   ;;  %s793_s13 = sphi %s838_s13, %s964_s13   ;;  %s789_s12 = sphi %s836_s12, %s963_s12  }
   0x5   : > { %p26_p0 = scmp.ge.s32.totalorder %s25_s19, 3  ;;  %p634_p1 = scmp.ge.s32.totalorder %s813_s18, 1 }
   0x6   : > { %p178_p2 = scmp.lt.s32.totalorder %s813_s18, 193  ;;  %s32_s21 = sadd.s32 1, %s809_s17 }
   0x7   : > { %s970_s19 = smov (%p26_p0, %s25_s19), 0  ;;  %s972_s20 = smov (!%p26_p0, %s28_s20), %s805_s16 }
   0x8   : > { %p179_p3 = pnand %p634_p1, %p178_p2  ;;  %p30_p4 = scmp.ge.s32.totalorder %s972_s20, 32 }
   0x9   : > { %s216_s22 = sadd.s32 (!%p179_p3), %s789_s12, %s793_s13  ;;  %p217_p6 = scmp.lt.s32.totalorder (!%p179_p3), %s797_s14, 1 }
   0xa   : > { %s974_s20 = smov (%p30_p4, %s972_s20), 0  ;;  %s976_s21 = smov (!%p30_p4, %s32_s21), %s809_s17 }
   0xb   : > { %p34_p5 = scmp.ge.s32.totalorder %s976_s21, 2  ;;  %182 = sbr.rel (%p179_p3) target bundleno = 283 (0x11b), region = 32 }
   0xc   : > { %p219_p7 = scmp.lt.s32.totalorder (!%p179_p3), %s216_s22, 33  ;;  %p227_p8 = scmp.lt.s32.totalorder (!%p179_p3), %s789_s12, 2 }
   0xd   : > { %s978_s21 = smov (%p34_p5, %s976_s21), 0  ;;  %p234_p9 = scmp.lt.s32.totalorder (!%p179_p3), %s793_s13, 31 }
   0xe   : > { %p640_p10 = scmp.ne.s32.totalorder (!%p179_p3), %s789_s12, 0 }
  0x12   : > { %s980_s14 = smov (!%p217_p6, %s797_s14), 1  ;;  %s982_s22 = smov (!%p219_p7, %s216_s22), 33 }
  0x13   : > { %s697_s23 = smul.u32 170, %s980_s14  ;;  %s638_s8 = sshll.u32 %s980_s14, 7  ;;  %vm246_vm0 = vcmask (!%p640_p10), 64512   ;;  %v815_v0 = vmov (!%p640_p10), 0.0  }
  0x14   : > { %s696_s24 = smul.u32 5, %s982_s22  ;;  %s984_s13 = smov (!%p234_p9, %s793_s13), 31  ;;  %247 = vst.msk [vmem:[#allocation2] sm:$0xff] (!%p640_p10), %vm246_vm0, %v815_v0  ;;  %248 = vst.msk [vmem:[#allocation2 + $0x8] sm:$0xff] (!%p640_p10), %vm246_vm0, %v815_v0 }
  0x15   : > { %s228_s25 = scalar_select %p227_p8, %s789_s12, 2 }
  0x16   : > { %s223_s26 = sadd.s32 %s697_s23, %s696_s24  ;;  %s637_s9 = sshll.u32 %s984_s13, 2  ;;  %249 = vst.msk [vmem:[#allocation2 + $0x10] sm:$0xff] (!%p640_p10), %vm246_vm0, %v815_v0  ;;  %250 = vst.msk [vmem:[#allocation2 + $0x18] sm:$0xff] (!%p640_p10), %vm246_vm0, %v815_v0 }
  0x17   : > { %s635_s27 = sshll.u32 %s223_s26, 2  ;;  %s698_s28 = smul.u32 6, %s228_s25 }
  0x18   : > { %s890_s4 = scalar_lea.vmem %s959_s0, %s635_s27  ;;  %s238_s10 = sadd.s32 %s638_s8, %s637_s9 }
  0x19   : > { %s895_s7 = scalar_lea.vmem %s960_s1, %s698_s28  ;;  %s639_s11 = sshll.u32 %s238_s10, 3 }
  0x1a   : > { %s901_s24 = scalar_lea.vmem %s962_s3, %s639_s11  ;;  %245 = sbr.rel (%p640_p10) target bundleno = 33 (0x21), region = 36 }
  0x21 PF: > { %v257_v1 = vld [vmem:[%s895_s7 + $0x2] sm:$0x3]  ;;  %vm280_vm1 = vcmask 1041408   ;;  %v757_v4 = vld [vmem:[%s890_s4 + $0x8] sm:$0xff]   ;;  %vm273_vm2 = vcmask 31744   ;;  %vm421_vm4 = vcmask 1046528  }
  0x22   : > { %v756_v2 = vld [vmem:[%s890_s4] sm:$0xff]   ;;  %694 = vmatprep.subr.msk.bf16.mxu0 %vm280_vm1, %v257_v1  ;;  %v366_v3 = vsel %vm280_vm1, %v257_v1, 0  ;;  %v347_v7 = vshll.u32 %v757_v4, 16  ;;  %v351_v8 = vshrl.u32 %v757_v4, 16  ;;  %v423_v15 = vrot.slane %v757_v4, 1  ;;  %v261_v31 = vld [vmem:[#allocation2 + $0x10] sm:$0xff] }
  0x23   : > { %670 = vmatpush3.bf16.msra.mxu0 %v366_v3  ;;  %v341_v5 = vshrl.u32 %v756_v2, 16  ;;  %v343_v6 = vshll.u32 %v756_v2, 16  ;;  %v258_v9 = vld [vmem:[%s895_s7 + $0x4] sm:$0x3]  ;;  %665 = vmatprep.mubr.msk.bf16.mxu1 %vm273_vm2, %v756_v2  ;;  %v256_v13 = vld [vmem:[%s895_s7] sm:$0x3] }
  0x24   : > { %695 = vmatprep.subr.msk.bf16.mxu0 %vm280_vm1, %v258_v9  ;;  %v758_v10 = vld [vmem:[%s890_s4 + $0x10] ss:$0 sps:$4 sm:$0x11]   ;;  %v349_v12 = vrot.slane %v347_v7, 1  ;;  %v422_v14 = vrot.slane %v756_v2, 1  ;;  %693 = vmatprep.subr.msk.bf16.mxu1 %vm280_vm1, %v256_v13  ;;  %v282_v17 = vsel %vm280_vm1, %v256_v13, 0 }
  0x25   : > { %v345_v11 = vrot.slane %v343_v6, 1  ;;  %vm340_vm3 = vsmask.f32 7424  ;;  %v355_v16 = vshll.u32 %v758_v10, 16  ;;  %664 = vmatpush3.bf16.msra.mxu1 %v282_v17  ;;  %v434_v22 = vsel %vm280_vm1, %v258_v9, 0  ;;  %v259_v32 = vld [vmem:[#allocation2] sm:$0xff] }
  0x26   : > { %v353_v19 = vor.u32 %v351_v8, %v349_v12  ;;  %v424_v23 = vsel %vm421_vm4, %v422_v14, %v423_v15  ;;  %v425_v25 = vrot.slane %v758_v10, 1  ;;  %v262_v35 = vld [vmem:[#allocation2 + $0x18] sm:$0xff]  ;;  %v260_v36 = vld [vmem:[#allocation2 + $0x8] sm:$0xff]  ;;  %vm489_vm5 = vcmask 64512   ;;  %p650_p11 = scmp.ne.s32.totalorder %s789_s12, 2 }
  0x27   : > { %v346_v18 = vor.u32 %v345_v11, %v341_v5  ;;  %v357_v20 = vrot.slane %v355_v16, 1  ;;  %v651_v48 = vld [vmem:[%s961_s2] ss:$0 sm:$0xff] (!%p650_p11) }
  0x28   : > { %666 = vmatmul.mubr.msk.bf16.vlgmr.msra.gmra.mrb[0].mxu1 %vm273_vm2, %v757_v4  ;;  %v426_v26 = vsel %vm421_vm4, %v423_v15, %v425_v25 }
  0x29   : > { %v350_v21 = vsel %vm340_vm3, %v346_v18, %v349_v12  ;;  %v358_v24 = vsel %vm340_vm3, %v353_v19, %v357_v20 }
  0x2a   : > { %671 = vmatprep.mubr.msk.bf16.mxu0 %vm273_vm2, %v350_v21 }
  0x2b   : > { %672 = vmatmul.mubr.msk.bf16.vlgmr.msra.gmra.mrb[0].mxu0 %vm273_vm2, %v358_v24 }
  0x2c   : > { %676 = vmatpush3.bf16.msra.mxu0 %v434_v22  ;;  %677 = vmatprep.mubr.msk.bf16.mxu0 %vm273_vm2, %v424_v23 }
  0x37   : > { %678 = vmatmul.mubr.msk.bf16.vlgmr.msra.gmra.mrb[0].mxu0 %vm273_vm2, %v426_v26 }
  0xfb   : > { %v667_v27 = vpop.f32.mrb[0].mxu1 }
  0xfc   : > { %v318_v28 = vpop.f32.mrb[1].mxu1  ;;  %v335_v33 = vadd.f32 %v667_v27, %v261_v31 }
  0xfd   : > { %v668_v29 = vpop.f32.mrb[2].mxu1  ;;  %v333_v34 = vadd.f32 %v318_v28, %v259_v32 }
  0xfe   : > { %v321_v30 = vpop.f32.mrb[3].mxu1  ;;  %v336_v38 = vadd.f32 %v668_v29, %v262_v35 }
  0xff   : > { %v334_v41 = vadd.f32 %v321_v30, %v260_v36 }
 0x10a   : > { %v679_v37 = vpop.f32.mrb[0].mxu0  ;;  %497 = sbr.rel (%p650_p11) target bundleno = 283 (0x11b), region = 40 }
 0x10b   : > { %v682_v39 = vadd.f32 %v679_v37, %v335_v33  ;;  %v470_v40 = vpop.f32.mrb[1].mxu0 }
 0x10c   : > { %v684_v42 = vadd.f32 %v470_v40, %v333_v34  ;;  %v680_v43 = vpop.f32.mrb[2].mxu0 }
 0x10d   : > { %492 = vst.msk [vmem:[#allocation2 + $0x10] sm:$0xff] %vm489_vm5, %v682_v39  ;;  %v686_v44 = vadd.f32 %v680_v43, %v336_v38  ;;  %v473_v45 = vpop.f32.mrb[3].mxu0 }
 0x10e   : > { %490 = vst.msk [vmem:[#allocation2] sm:$0xff] %vm489_vm5, %v684_v42  ;;  %v688_v46 = vadd.f32 %v473_v45, %v334_v41 }
 0x10f   : > { %493 = vst.msk [vmem:[#allocation2 + $0x18] sm:$0xff] %vm489_vm5, %v686_v44 }
 0x110   : > { %491 = vst.msk [vmem:[#allocation2 + $0x8] sm:$0xff] %vm489_vm5, %v688_v46 }
 0x114   : > { %v500_v52 = vld [vmem:[#allocation2 + $0x10] sm:$0xff] }
 0x115   : > { %v498_v47 = vld [vmem:[#allocation2] sm:$0xff]  ;;  %v511_v54 = vadd.f32 %v651_v48, %v500_v52 }
 0x116   : > { %v509_v50 = vadd.f32 %v651_v48, %v498_v47  ;;  %v501_v53 = vld [vmem:[#allocation2 + $0x18] sm:$0xff] }
 0x117   : > { %v499_v49 = vld [vmem:[#allocation2 + $0x8] sm:$0xff]  ;;  %v512_v55 = vadd.f32 %v651_v48, %v501_v53  ;;  %515 = vst.msk [vmem:[%s901_s24 + $0x10] sm:$0xff] %vm489_vm5, %v511_v54 }
 0x118   : > { %v510_v51 = vadd.f32 %v651_v48, %v499_v49  ;;  %513 = vst.msk [vmem:[%s901_s24] sm:$0xff] %vm489_vm5, %v509_v50 }
 0x119   : > { %516 = vst.msk [vmem:[%s901_s24 + $0x18] sm:$0xff] %vm489_vm5, %v512_v55 }
 0x11a   : > { %514 = vst.msk [vmem:[%s901_s24 + $0x8] sm:$0xff] %vm489_vm5, %v510_v51 }
 0x11b PF: > { %s13_s18 = sadd.s32 1, %s813_s18   ;;  %s963_s12 = smov %s801_s15 }
 0x11c   : > { %p10_p12 = scmp.ge.s32.totalorder %s13_s18, 194   ;;  %s964_s13 = smov %s805_s16 }
 0x11d   : > { %s965_s14 = smov %s809_s17  ;;  %s966_s15 = smov %s970_s19 }
 0x11e   : > { %s967_s16 = smov %s974_s20  ;;  %s968_s17 = smov %s978_s21 }
 0x11f   :  { %12 = sbr.rel (!%p10_p12) target bundleno = 4 (0x4), region = 73 }

// kernel: upsample_forward.14
= control target key start
LH: loop header
LB: loop body
LE: loop exit
PB: predicated region body
PF: predicated region fallthrough
CT: control target
= control target key end

     0   :  { %s3276_s15 = smov 0   ;;  %s6279_s0 = inlined_call_operand.vmem [shape: f32[2,1024,8], index: 0, kind: input, shape index: {}]   ;;  %s6280_s1 = inlined_call_operand.vmem [shape: f32[1,8], index: 1, kind: input, shape index: {}]   ;;  %s6281_s2 = inlined_call_operand.vmem [shape: f32[1,8], index: 2, kind: input, shape index: {}]   ;;  %s6282_s3 = inlined_call_operand.vmem [shape: f32[8,8], index: 3, kind: input, shape index: {}]   ;;  %s6283_s4 = inlined_call_operand.vmem [shape: f32[2,1024,8], index: 4, kind: output, shape index: {}]  }
   0x1 LB: > { %s2482_s16 = sadd.s32 4294967295, %s3247_s15   ;;  %p2486_p0 = scmp.ge.s32.totalorder %s3247_s15, 1  ;;  %s3247_s15 = sphi %s3276_s15, %s14_s15  }
   0x2   : > { %p162_p1 = scmp.lt.s32.totalorder %s3247_s15, 3 }
   0x4   : > { %p163_p2 = pnand %p2486_p0, %p162_p1 }
   0x6   : > { %166 = sbr.rel (%p163_p2) target bundleno = 961 (0x3c1), region = 36 }
   0xd   : > { %p188_p3 = scmp.lt.s32.totalorder %s2482_s16, 1  ;;  %vm326_vm0 = vcmask 64512   ;;  %vm3250_vm1 = vmmov 0  }
   0xf   : > { %s7087_s16 = smov (!%p188_p3, %s2482_s16), 1 }
  0x10   : > { %s2623_s17 = sshll.u32 %s7087_s16, 10 }
  0x11   : > { %s3292_s20 = scalar_lea.vmem %s6279_s0, %s2623_s17  ;;  %s5776_s29 = scalar_lea.vmem %s6283_s4, %s2623_s17 }
  0x12   : > { %v3295_v0 = vld [vmem:[%s3292_s20] sm:$0xff]  ;;  %v3298_v1 = vld [vmem:[%s3292_s20 + $0x8] sm:$0xff]  ;;  %v3301_v2 = vld [vmem:[%s3292_s20 + $0x10] sm:$0xff] }
  0x13   : > { %v3304_v3 = vld [vmem:[%s3292_s20 + $0x18] sm:$0xff]  ;;  %v327_v4 = vsel %vm326_vm0, %v3295_v0, 0.0  ;;  %v328_v5 = vsel %vm326_vm0, %v3298_v1, 0.0  ;;  %v330_v6 = vsel %vm326_vm0, %v3301_v2, 0.0  ;;  %v3313_v7 = vld [vmem:[%s3292_s20 + $0x20] sm:$0xff]  ;;  %v3318_v10 = vld [vmem:[%s3292_s20 + $0x28] sm:$0xff] }
  0x14   : > { %v329_v8 = vadd.f32 %v328_v5, %v327_v4  ;;  %v332_v9 = vsel %vm326_vm0, %v3304_v3, 0.0  ;;  %v334_v12 = vsel %vm326_vm0, %v3313_v7, 0.0  ;;  %v3323_v13 = vld [vmem:[%s3292_s20 + $0x30] sm:$0xff]  ;;  %v336_v15 = vsel %vm326_vm0, %v3318_v10, 0.0  ;;  %v3328_v16 = vld [vmem:[%s3292_s20 + $0x38] sm:$0xff]  ;;  %v3333_v19 = vld [vmem:[%s3292_s20 + $0x40] sm:$0xff] }
  0x15   : > { %v338_v18 = vsel %vm326_vm0, %v3323_v13, 0.0  ;;  %v340_v21 = vsel %vm326_vm0, %v3328_v16, 0.0  ;;  %v3338_v22 = vld [vmem:[%s3292_s20 + $0x48] sm:$0xff]  ;;  %v342_v24 = vsel %vm326_vm0, %v3333_v19, 0.0  ;;  %v3343_v25 = vld [vmem:[%s3292_s20 + $0x50] sm:$0xff]  ;;  %v3348_v28 = vld [vmem:[%s3292_s20 + $0x58] sm:$0xff] }
  0x16   : > { %v331_v11 = vadd.f32 %v330_v6, %v329_v8  ;;  %v344_v27 = vsel %vm326_vm0, %v3338_v22, 0.0  ;;  %v346_v30 = vsel %vm326_vm0, %v3343_v25, 0.0  ;;  %v3353_v31 = vld [vmem:[%s3292_s20 + $0x60] sm:$0xff]  ;;  %v348_v33 = vsel %vm326_vm0, %v3348_v28, 0.0  ;;  %v3358_v34 = vld [vmem:[%s3292_s20 + $0x68] sm:$0xff]  ;;  %v3363_v37 = vld [vmem:[%s3292_s20 + $0x70] sm:$0xff] }
  0x17   : > { %v350_v36 = vsel %vm326_vm0, %v3353_v31, 0.0  ;;  %v352_v39 = vsel %vm326_vm0, %v3358_v34, 0.0  ;;  %v3368_v40 = vld [vmem:[%s3292_s20 + $0x78] sm:$0xff]  ;;  %v354_v42 = vsel %vm326_vm0, %v3363_v37, 0.0  ;;  %v3373_v43 = vld [vmem:[%s3292_s20 + $0x80] sm:$0xff]  ;;  %v3378_v46 = vld [vmem:[%s3292_s20 + $0x88] sm:$0xff] }
  0x18   : > { %v333_v14 = vadd.f32 %v332_v9, %v331_v11  ;;  %v356_v45 = vsel %vm326_vm0, %v3368_v40, 0.0  ;;  %v358_v48 = vsel %vm326_vm0, %v3373_v43, 0.0  ;;  %v3383_v49 = vld [vmem:[%s3292_s20 + $0x90] sm:$0xff]  ;;  %v360_v51 = vsel %vm326_vm0, %v3378_v46, 0.0  ;;  %v3388_v52 = vld [vmem:[%s3292_s20 + $0x98] sm:$0xff]  ;;  %v3393_v55 = vld [vmem:[%s3292_s20 + $0xa0] sm:$0xff] }
  0x19   : > { %v362_v54 = vsel %vm326_vm0, %v3383_v49, 0.0  ;;  %v364_v57 = vsel %vm326_vm0, %v3388_v52, 0.0  ;;  %v3398_v58 = vld [vmem:[%s3292_s20 + $0xa8] sm:$0xff]  ;;  %v366_v60 = vsel %vm326_vm0, %v3393_v55, 0.0  ;;  %v3403_v61 = vld [vmem:[%s3292_s20 + $0xb0] sm:$0xff]  ;;  %v3408_v4 = vld [vmem:[%s3292_s20 + $0xb8] sm:$0xff] }
  0x1a   : > { %v335_v17 = vadd.f32 %v334_v12, %v333_v14  ;;  %v368_v63 = vsel %vm326_vm0, %v3398_v58, 0.0  ;;  %v370_v6 = vsel %vm326_vm0, %v3403_v61, 0.0  ;;  %v3413_v8 = vld [vmem:[%s3292_s20 + $0xc0] sm:$0xff]  ;;  %v372_v11 = vsel %vm326_vm0, %v3408_v4, 0.0  ;;  %v3418_v12 = vld [vmem:[%s3292_s20 + $0xc8] sm:$0xff] }
  0x1c   : > { %v337_v20 = vadd.f32 %v336_v15, %v335_v17  ;;  %v374_v15 = vsel %vm326_vm0, %v3413_v8, 0.0  ;;  %v3423_v17 = vld [vmem:[%s3292_s20 + $0xd0] sm:$0xff] }
  0x1e   : > { %v339_v23 = vadd.f32 %v338_v18, %v337_v20  ;;  %v376_v20 = vsel %vm326_vm0, %v3418_v12, 0.0 }
  0x20   : > { %v341_v26 = vadd.f32 %v340_v21, %v339_v23  ;;  %v3428_v21 = vld [vmem:[%s3292_s20 + $0xd8] sm:$0xff] }
  0x22   : > { %v343_v29 = vadd.f32 %v342_v24, %v341_v26  ;;  %v378_v24 = vsel %vm326_vm0, %v3423_v17, 0.0  ;;  %v588_v26 = vmul.f32 %v3295_v0, %v3295_v0  ;;  %v592_v0 = vmul.f32 %v3313_v7, %v3313_v7 }
  0x23   : > { %v593_v7 = vmul.f32 %v3318_v10, %v3318_v10 }
  0x24   : > { %v345_v32 = vadd.f32 %v344_v27, %v343_v29  ;;  %v589_v27 = vmul.f32 %v3298_v1, %v3298_v1  ;;  %v590_v29 = vmul.f32 %v3301_v2, %v3301_v2  ;;  %v716_v2 = vsel %vm326_vm0, %v588_v26, 0.0  ;;  %v3496_v26 = vld [vmem:[%s3292_s20 + $0x118] sm:$0xff] }
  0x26   : > { %v347_v35 = vadd.f32 %v346_v30, %v345_v32  ;;  %v3439_v30 = vld [vmem:[%s3292_s20 + $0xe0] sm:$0xff] }
  0x27   : > { %v382_v1 = vsel %vm326_vm0, %v3439_v30, 0.0 }
  0x28   : > { %v349_v38 = vadd.f32 %v348_v33, %v347_v35  ;;  %v380_v33 = vsel %vm326_vm0, %v3428_v21, 0.0  ;;  %v591_v35 = vmul.f32 %v3304_v3, %v3304_v3 }
  0x2a   : > { %v351_v41 = vadd.f32 %v350_v36, %v349_v38  ;;  %v3446_v36 = vld [vmem:[%s3292_s20 + $0xe8] sm:$0xff] }
  0x2c   : > { %v353_v44 = vadd.f32 %v352_v39, %v351_v41  ;;  %v717_v39 = vsel %vm326_vm0, %v589_v27, 0.0  ;;  %v719_v41 = vsel %vm326_vm0, %v590_v29, 0.0 }
  0x2d   : > { %v718_v3 = vadd.f32 %v717_v39, %v716_v2  ;;  %v3512_v39 = vld [vmem:[%s3292_s20 + $0x128] sm:$0xff] }
  0x2e   : > { %v355_v47 = vadd.f32 %v354_v42, %v353_v44  ;;  %v3456_v42 = vld [vmem:[%s3292_s20 + $0xf0] sm:$0xff] }
  0x30   : > { %v357_v50 = vadd.f32 %v356_v45, %v355_v47  ;;  %v384_v45 = vsel %vm326_vm0, %v3446_v36, 0.0  ;;  %v721_v47 = vsel %vm326_vm0, %v591_v35, 0.0  ;;  %v3504_v35 = vld [vmem:[%s3292_s20 + $0x120] sm:$0xff] }
  0x32   : > { %v359_v53 = vadd.f32 %v358_v48, %v357_v50  ;;  %v3464_v48 = vld [vmem:[%s3292_s20 + $0xf8] sm:$0xff] }
  0x33   : > { %v388_v10 = vsel %vm326_vm0, %v3464_v48, 0.0 }
  0x34   : > { %v361_v56 = vadd.f32 %v360_v51, %v359_v53  ;;  %v720_v51 = vadd.f32 %v719_v41, %v718_v3  ;;  %v386_v53 = vsel %vm326_vm0, %v3456_v42, 0.0  ;;  %v600_v3 = vmul.f32 %v3353_v31, %v3353_v31 }
  0x36   : > { %v363_v59 = vadd.f32 %v362_v54, %v361_v56  ;;  %v594_v54 = vmul.f32 %v3323_v13, %v3323_v13  ;;  %v723_v56 = vsel %vm326_vm0, %v592_v0, 0.0 }
  0x38   : > { %v365_v62 = vadd.f32 %v364_v57, %v363_v59  ;;  %v3472_v57 = vld [vmem:[%s3292_s20 + $0x100] sm:$0xff] }
  0x39   : > { %v390_v13 = vsel %vm326_vm0, %v3472_v57, 0.0 }
  0x3a   : > { %v367_v5 = vadd.f32 %v366_v60, %v365_v62  ;;  %v722_v60 = vadd.f32 %v721_v47, %v720_v51  ;;  %v595_v62 = vmul.f32 %v3328_v16, %v3328_v16  ;;  %v601_v51 = vmul.f32 %v3358_v34, %v3358_v34 }
  0x3c   : > { %v369_v9 = vadd.f32 %v368_v63, %v367_v5  ;;  %v725_v63 = vsel %vm326_vm0, %v593_v7, 0.0  ;;  %v3480_v5 = vld [vmem:[%s3292_s20 + $0x108] sm:$0xff]  ;;  %v3520_v7 = vld [vmem:[%s3292_s20 + $0x130] sm:$0xff] }
  0x3d   : > { %v392_v16 = vsel %vm326_vm0, %v3480_v5, 0.0  ;;  %v402_v31 = vsel %vm326_vm0, %v3520_v7, 0.0 }
  0x3e   : > { %v371_v14 = vadd.f32 %v370_v6, %v369_v9  ;;  %v724_v9 = vadd.f32 %v723_v56, %v722_v60  ;;  %v602_v60 = vmul.f32 %v3363_v37, %v3363_v37 }
  0x40   : > { %v373_v18 = vadd.f32 %v372_v11, %v371_v14  ;;  %v596_v11 = vmul.f32 %v3333_v19, %v3333_v19  ;;  %v727_v14 = vsel %vm326_vm0, %v594_v54, 0.0  ;;  %v3528_v54 = vld [vmem:[%s3292_s20 + $0x138] sm:$0xff] }
  0x41   : > { %v404_v34 = vsel %vm326_vm0, %v3528_v54, 0.0 }
  0x42   : > { %v375_v23 = vadd.f32 %v374_v15, %v373_v18  ;;  %v3488_v15 = vld [vmem:[%s3292_s20 + $0x110] sm:$0xff] }
  0x43   : > { %v394_v19 = vsel %vm326_vm0, %v3488_v15, 0.0 }
  0x44   : > { %v377_v32 = vadd.f32 %v376_v20, %v375_v23  ;;  %v726_v20 = vadd.f32 %v725_v63, %v724_v9  ;;  %v597_v23 = vmul.f32 %v3338_v22, %v3338_v22  ;;  %v396_v22 = vsel %vm326_vm0, %v3496_v26, 0.0 }
  0x45   : > { %v603_v9 = vmul.f32 %v3368_v40, %v3368_v40 }
  0x46   : > { %v379_v38 = vadd.f32 %v378_v24, %v377_v32  ;;  %v729_v24 = vsel %vm326_vm0, %v595_v62, 0.0  ;;  %v728_v29 = vadd.f32 %v727_v14, %v726_v20  ;;  %v598_v32 = vmul.f32 %v3343_v25, %v3343_v25  ;;  %v3536_v62 = vld [vmem:[%s3292_s20 + $0x140] sm:$0xff] }
  0x47   : > { %v733_v2 = vsel %vm326_vm0, %v597_v23, 0.0  ;;  %v398_v25 = vsel %vm326_vm0, %v3504_v35, 0.0  ;;  %v406_v37 = vsel %vm326_vm0, %v3536_v62, 0.0  ;;  %v604_v20 = vmul.f32 %v3373_v43, %v3373_v43  ;;  %v3552_v23 = vld [vmem:[%s3292_s20 + $0x150] sm:$0xff] }
  0x48   : > { %v381_v44 = vadd.f32 %v380_v33, %v379_v38  ;;  %v731_v33 = vsel %vm326_vm0, %v596_v11, 0.0  ;;  %v730_v0 = vadd.f32 %v729_v24, %v728_v29  ;;  %v3544_v11 = vld [vmem:[%s3292_s20 + $0x148] sm:$0xff]  ;;  %v605_v29 = vmul.f32 %v3378_v46, %v3378_v46 }
  0x49   : > { %v408_v40 = vsel %vm326_vm0, %v3544_v11, 0.0  ;;  %v410_v43 = vsel %vm326_vm0, %v3552_v23, 0.0 }
  0x4a   : > { %v383_v50 = vadd.f32 %v382_v1, %v381_v44  ;;  %v599_v1 = vmul.f32 %v3348_v28, %v3348_v28  ;;  %v732_v44 = vadd.f32 %v731_v33, %v730_v0  ;;  %v400_v28 = vsel %vm326_vm0, %v3512_v39, 0.0 }
  0x4b   : > { %v606_v0 = vmul.f32 %v3383_v49, %v3383_v49 }
  0x4c   : > { %v385_v59 = vadd.f32 %v384_v45, %v383_v50  ;;  %v735_v45 = vsel %vm326_vm0, %v598_v32, 0.0  ;;  %v734_v50 = vadd.f32 %v733_v2, %v732_v44  ;;  %v3560_v32 = vld [vmem:[%s3292_s20 + $0x158] sm:$0xff]  ;;  %v607_v44 = vmul.f32 %v3388_v52, %v3388_v52 }
  0x4d   : > { %v412_v46 = vsel %vm326_vm0, %v3560_v32, 0.0 }
  0x4e   : > { %v387_v6 = vadd.f32 %v386_v53, %v385_v59  ;;  %v737_v53 = vsel %vm326_vm0, %v599_v1, 0.0  ;;  %v736_v59 = vadd.f32 %v735_v45, %v734_v50  ;;  %v3568_v1 = vld [vmem:[%s3292_s20 + $0x160] sm:$0xff]  ;;  %v608_v50 = vmul.f32 %v3393_v55, %v3393_v55 }
  0x4f   : > { %v414_v49 = vsel %vm326_vm0, %v3568_v1, 0.0 }
  0x50   : > { %v389_v18 = vadd.f32 %v388_v10, %v387_v6  ;;  %v739_v10 = vsel %vm326_vm0, %v600_v3, 0.0  ;;  %v738_v6 = vadd.f32 %v737_v53, %v736_v59  ;;  %v3576_v3 = vld [vmem:[%s3292_s20 + $0x168] sm:$0xff]  ;;  %v609_v59 = vmul.f32 %v3398_v58, %v3398_v58 }
  0x51   : > { %v416_v52 = vsel %vm326_vm0, %v3576_v3, 0.0 }
  0x52   : > { %v391_v27 = vadd.f32 %v390_v13, %v389_v18  ;;  %v741_v13 = vsel %vm326_vm0, %v601_v51, 0.0  ;;  %v740_v18 = vadd.f32 %v739_v10, %v738_v6  ;;  %v3584_v51 = vld [vmem:[%s3292_s20 + $0x170] sm:$0xff]  ;;  %v610_v6 = vmul.f32 %v3403_v61, %v3403_v61 }
  0x53   : > { %v418_v55 = vsel %vm326_vm0, %v3584_v51, 0.0 }
  0x54   : > { %v393_v38 = vadd.f32 %v392_v16, %v391_v27  ;;  %v743_v16 = vsel %vm326_vm0, %v602_v60, 0.0  ;;  %v742_v27 = vadd.f32 %v741_v13, %v740_v18  ;;  %v3592_v60 = vld [vmem:[%s3292_s20 + $0x178] sm:$0xff]  ;;  %v611_v18 = vmul.f32 %v3408_v4, %v3408_v4 }
  0x55   : > { %v420_v58 = vsel %vm326_vm0, %v3592_v60, 0.0 }
  0x56   : > { %v395_v41 = vadd.f32 %v394_v19, %v393_v38  ;;  %v745_v19 = vsel %vm326_vm0, %v603_v9, 0.0  ;;  %v744_v38 = vadd.f32 %v743_v16, %v742_v27  ;;  %v3600_v9 = vld [vmem:[%s3292_s20 + $0x180] sm:$0xff]  ;;  %v612_v27 = vmul.f32 %v3413_v8, %v3413_v8 }
  0x57   : > { %v422_v61 = vsel %vm326_vm0, %v3600_v9, 0.0 }
  0x58   : > { %v397_v47 = vadd.f32 %v396_v22, %v395_v41  ;;  %v747_v22 = vsel %vm326_vm0, %v604_v20, 0.0  ;;  %v746_v41 = vadd.f32 %v745_v19, %v744_v38  ;;  %v3608_v20 = vld [vmem:[%s3292_s20 + $0x188] sm:$0xff]  ;;  %v613_v38 = vmul.f32 %v3418_v12, %v3418_v12 }
  0x59   : > { %v424_v4 = vsel %vm326_vm0, %v3608_v20, 0.0 }
  0x5a   : > { %v399_v56 = vadd.f32 %v398_v25, %v397_v47  ;;  %v749_v25 = vsel %vm326_vm0, %v605_v29, 0.0  ;;  %v748_v47 = vadd.f32 %v747_v22, %v746_v41  ;;  %v3616_v29 = vld [vmem:[%s3292_s20 + $0x190] sm:$0xff]  ;;  %v614_v41 = vmul.f32 %v3423_v17, %v3423_v17 }
  0x5b   : > { %v426_v8 = vsel %vm326_vm0, %v3616_v29, 0.0 }
  0x5c   : > { %v401_v63 = vadd.f32 %v400_v28, %v399_v56  ;;  %v751_v28 = vsel %vm326_vm0, %v606_v0, 0.0  ;;  %v750_v56 = vadd.f32 %v749_v25, %v748_v47  ;;  %v3624_v0 = vld [vmem:[%s3292_s20 + $0x198] sm:$0xff]  ;;  %v615_v47 = vmul.f32 %v3428_v21, %v3428_v21 }
  0x5d   : > { %v428_v12 = vsel %vm326_vm0, %v3624_v0, 0.0 }
  0x5e   : > { %v403_v14 = vadd.f32 %v402_v31, %v401_v63  ;;  %v753_v31 = vsel %vm326_vm0, %v607_v44, 0.0  ;;  %v752_v63 = vadd.f32 %v751_v28, %v750_v56  ;;  %v3632_v44 = vld [vmem:[%s3292_s20 + $0x1a0] sm:$0xff]  ;;  %v616_v56 = vmul.f32 %v3439_v30, %v3439_v30 }
  0x5f   : > { %v430_v17 = vsel %vm326_vm0, %v3632_v44, 0.0 }
  0x60   : > { %v405_v24 = vadd.f32 %v404_v34, %v403_v14  ;;  %v755_v34 = vsel %vm326_vm0, %v608_v50, 0.0  ;;  %v754_v14 = vadd.f32 %v753_v31, %v752_v63  ;;  %v3640_v50 = vld [vmem:[%s3292_s20 + $0x1a8] sm:$0xff]  ;;  %v617_v63 = vmul.f32 %v3446_v36, %v3446_v36 }
  0x61   : > { %v432_v21 = vsel %vm326_vm0, %v3640_v50, 0.0 }
  0x62   : > { %v407_v33 = vadd.f32 %v406_v37, %v405_v24  ;;  %v757_v37 = vsel %vm326_vm0, %v609_v59, 0.0  ;;  %v756_v24 = vadd.f32 %v755_v34, %v754_v14  ;;  %v3648_v59 = vld [vmem:[%s3292_s20 + $0x1b0] sm:$0xff]  ;;  %v618_v14 = vmul.f32 %v3456_v42, %v3456_v42 }
  0x63   : > { %v434_v30 = vsel %vm326_vm0, %v3648_v59, 0.0 }
  0x64   : > { %v409_v2 = vadd.f32 %v408_v40, %v407_v33  ;;  %v759_v40 = vsel %vm326_vm0, %v610_v6, 0.0  ;;  %v758_v33 = vadd.f32 %v757_v37, %v756_v24  ;;  %v3656_v6 = vld [vmem:[%s3292_s20 + $0x1b8] sm:$0xff]  ;;  %v619_v24 = vmul.f32 %v3464_v48, %v3464_v48 }
  0x65   : > { %v436_v36 = vsel %vm326_vm0, %v3656_v6, 0.0 }
  0x66   : > { %v411_v45 = vadd.f32 %v410_v43, %v409_v2  ;;  %v761_v43 = vsel %vm326_vm0, %v611_v18, 0.0  ;;  %v760_v2 = vadd.f32 %v759_v40, %v758_v33  ;;  %v3664_v18 = vld [vmem:[%s3292_s20 + $0x1c0] sm:$0xff]  ;;  %v620_v33 = vmul.f32 %v3472_v57, %v3472_v57 }
  0x67   : > { %v438_v42 = vsel %vm326_vm0, %v3664_v18, 0.0 }
  0x68   : > { %v413_v53 = vadd.f32 %v412_v46, %v411_v45  ;;  %v763_v46 = vsel %vm326_vm0, %v612_v27, 0.0  ;;  %v762_v45 = vadd.f32 %v761_v43, %v760_v2  ;;  %v3672_v27 = vld [vmem:[%s3292_s20 + $0x1c8] sm:$0xff]  ;;  %v621_v2 = vmul.f32 %v3480_v5, %v3480_v5 }
  0x69   : > { %v440_v48 = vsel %vm326_vm0, %v3672_v27, 0.0 }
  0x6a   : > { %v415_v10 = vadd.f32 %v414_v49, %v413_v53  ;;  %v765_v49 = vsel %vm326_vm0, %v613_v38, 0.0  ;;  %v764_v53 = vadd.f32 %v763_v46, %v762_v45  ;;  %v3680_v38 = vld [vmem:[%s3292_s20 + $0x1d0] sm:$0xff]  ;;  %v622_v45 = vmul.f32 %v3488_v15, %v3488_v15 }
  0x6b   : > { %v442_v57 = vsel %vm326_vm0, %v3680_v38, 0.0 }
  0x6c   : > { %v417_v13 = vadd.f32 %v416_v52, %v415_v10  ;;  %v767_v52 = vsel %vm326_vm0, %v614_v41, 0.0  ;;  %v766_v10 = vadd.f32 %v765_v49, %v764_v53  ;;  %v3688_v41 = vld [vmem:[%s3292_s20 + $0x1d8] sm:$0xff]  ;;  %v623_v53 = vmul.f32 %v3496_v26, %v3496_v26 }
  0x6d   : > { %v444_v5 = vsel %vm326_vm0, %v3688_v41, 0.0 }
  0x6e   : > { %v419_v16 = vadd.f32 %v418_v55, %v417_v13  ;;  %v769_v55 = vsel %vm326_vm0, %v615_v47, 0.0  ;;  %v768_v13 = vadd.f32 %v767_v52, %v766_v10  ;;  %v3696_v47 = vld [vmem:[%s3292_s20 + $0x1e0] sm:$0xff]  ;;  %v624_v10 = vmul.f32 %v3504_v35, %v3504_v35 }
  0x6f   : > { %v446_v15 = vsel %vm326_vm0, %v3696_v47, 0.0 }
  0x70   : > { %v421_v19 = vadd.f32 %v420_v58, %v419_v16  ;;  %v771_v58 = vsel %vm326_vm0, %v616_v56, 0.0  ;;  %v770_v16 = vadd.f32 %v769_v55, %v768_v13  ;;  %v3704_v56 = vld [vmem:[%s3292_s20 + $0x1e8] sm:$0xff]  ;;  %v625_v13 = vmul.f32 %v3512_v39, %v3512_v39 }
  0x71   : > { %v448_v26 = vsel %vm326_vm0, %v3704_v56, 0.0 }
  0x72   : > { %v423_v22 = vadd.f32 %v422_v61, %v421_v19  ;;  %v773_v61 = vsel %vm326_vm0, %v617_v63, 0.0  ;;  %v772_v19 = vadd.f32 %v771_v58, %v770_v16  ;;  %v3712_v63 = vld [vmem:[%s3292_s20 + $0x1f0] sm:$0xff]  ;;  %v626_v16 = vmul.f32 %v3520_v7, %v3520_v7 }
  0x73   : > { %v450_v35 = vsel %vm326_vm0, %v3712_v63, 0.0 }
  0x74   : > { %v425_v25 = vadd.f32 %v424_v4, %v423_v22  ;;  %v775_v4 = vsel %vm326_vm0, %v618_v14, 0.0  ;;  %v774_v22 = vadd.f32 %v773_v61, %v772_v19  ;;  %v3720_v14 = vld [vmem:[%s3292_s20 + $0x1f8] sm:$0xff]  ;;  %v627_v19 = vmul.f32 %v3528_v54, %v3528_v54 }
  0x75   : > { %v452_v39 = vsel %vm326_vm0, %v3720_v14, 0.0 }
  0x76   : > { %v427_v28 = vadd.f32 %v426_v8, %v425_v25  ;;  %v777_v8 = vsel %vm326_vm0, %v619_v24, 0.0  ;;  %v776_v25 = vadd.f32 %v775_v4, %v774_v22  ;;  %v3728_v24 = vld [vmem:[%s3292_s20 + $0x200] sm:$0xff]  ;;  %v628_v22 = vmul.f32 %v3536_v62, %v3536_v62 }
  0x77   : > { %v454_v7 = vsel %vm326_vm0, %v3728_v24, 0.0 }
  0x78   : > { %v429_v31 = vadd.f32 %v428_v12, %v427_v28  ;;  %v779_v12 = vsel %vm326_vm0, %v620_v33, 0.0  ;;  %v778_v28 = vadd.f32 %v777_v8, %v776_v25  ;;  %v3736_v33 = vld [vmem:[%s3292_s20 + $0x208] sm:$0xff]  ;;  %v629_v25 = vmul.f32 %v3544_v11, %v3544_v11 }
  0x79   : > { %v456_v54 = vsel %vm326_vm0, %v3736_v33, 0.0 }
  0x7a   : > { %v431_v34 = vadd.f32 %v430_v17, %v429_v31  ;;  %v781_v17 = vsel %vm326_vm0, %v621_v2, 0.0  ;;  %v780_v31 = vadd.f32 %v779_v12, %v778_v28  ;;  %v3744_v2 = vld [vmem:[%s3292_s20 + $0x210] sm:$0xff]  ;;  %v630_v28 = vmul.f32 %v3552_v23, %v3552_v23 }
  0x7b   : > { %v458_v62 = vsel %vm326_vm0, %v3744_v2, 0.0 }
  0x7c   : > { %v433_v37 = vadd.f32 %v432_v21, %v431_v34  ;;  %v783_v21 = vsel %vm326_vm0, %v622_v45, 0.0  ;;  %v782_v34 = vadd.f32 %v781_v17, %v780_v31  ;;  %v3752_v45 = vld [vmem:[%s3292_s20 + $0x218] sm:$0xff]  ;;  %v631_v31 = vmul.f32 %v3560_v32, %v3560_v32 }
  0x7d   : > { %v460_v11 = vsel %vm326_vm0, %v3752_v45, 0.0 }
  0x7e   : > { %v435_v40 = vadd.f32 %v434_v30, %v433_v37  ;;  %v785_v30 = vsel %vm326_vm0, %v623_v53, 0.0  ;;  %v784_v37 = vadd.f32 %v783_v21, %v782_v34  ;;  %v3760_v53 = vld [vmem:[%s3292_s20 + $0x220] sm:$0xff]  ;;  %v632_v34 = vmul.f32 %v3568_v1, %v3568_v1 }
  0x7f   : > { %v462_v23 = vsel %vm326_vm0, %v3760_v53, 0.0 }
  0x80   : > { %v437_v43 = vadd.f32 %v436_v36, %v435_v40  ;;  %v787_v36 = vsel %vm326_vm0, %v624_v10, 0.0  ;;  %v786_v40 = vadd.f32 %v785_v30, %v784_v37  ;;  %v3768_v10 = vld [vmem:[%s3292_s20 + $0x228] sm:$0xff]  ;;  %v633_v37 = vmul.f32 %v3576_v3, %v3576_v3 }
  0x81   : > { %v464_v32 = vsel %vm326_vm0, %v3768_v10, 0.0 }
  0x82   : > { %v439_v46 = vadd.f32 %v438_v42, %v437_v43  ;;  %v789_v42 = vsel %vm326_vm0, %v625_v13, 0.0  ;;  %v788_v43 = vadd.f32 %v787_v36, %v786_v40  ;;  %v3776_v13 = vld [vmem:[%s3292_s20 + $0x230] sm:$0xff]  ;;  %v634_v40 = vmul.f32 %v3584_v51, %v3584_v51 }
  0x83   : > { %v466_v1 = vsel %vm326_vm0, %v3776_v13, 0.0 }
  0x84   : > { %v441_v49 = vadd.f32 %v440_v48, %v439_v46  ;;  %v791_v48 = vsel %vm326_vm0, %v626_v16, 0.0  ;;  %v790_v46 = vadd.f32 %v789_v42, %v788_v43  ;;  %v3784_v16 = vld [vmem:[%s3292_s20 + $0x238] sm:$0xff]  ;;  %v635_v43 = vmul.f32 %v3592_v60, %v3592_v60 }
  0x85   : > { %v468_v3 = vsel %vm326_vm0, %v3784_v16, 0.0 }
  0x86   : > { %v443_v52 = vadd.f32 %v442_v57, %v441_v49  ;;  %v793_v57 = vsel %vm326_vm0, %v627_v19, 0.0  ;;  %v792_v49 = vadd.f32 %v791_v48, %v790_v46  ;;  %v3792_v19 = vld [vmem:[%s3292_s20 + $0x240] sm:$0xff]  ;;  %v636_v46 = vmul.f32 %v3600_v9, %v3600_v9 }
  0x87   : > { %v470_v51 = vsel %vm326_vm0, %v3792_v19, 0.0 }
  0x88   : > { %v445_v55 = vadd.f32 %v444_v5, %v443_v52  ;;  %v795_v5 = vsel %vm326_vm0, %v628_v22, 0.0  ;;  %v794_v52 = vadd.f32 %v793_v57, %v792_v49  ;;  %v3800_v22 = vld [vmem:[%s3292_s20 + $0x248] sm:$0xff]  ;;  %v637_v49 = vmul.f32 %v3608_v20, %v3608_v20 }
  0x89   : > { %v472_v60 = vsel %vm326_vm0, %v3800_v22, 0.0 }
  0x8a   : > { %v447_v58 = vadd.f32 %v446_v15, %v445_v55  ;;  %v797_v15 = vsel %vm326_vm0, %v629_v25, 0.0  ;;  %v796_v55 = vadd.f32 %v795_v5, %v794_v52  ;;  %v3808_v25 = vld [vmem:[%s3292_s20 + $0x250] sm:$0xff]  ;;  %v638_v52 = vmul.f32 %v3616_v29, %v3616_v29 }
  0x8b   : > { %v474_v9 = vsel %vm326_vm0, %v3808_v25, 0.0 }
  0x8c   : > { %v449_v61 = vadd.f32 %v448_v26, %v447_v58  ;;  %v799_v26 = vsel %vm326_vm0, %v630_v28, 0.0  ;;  %v798_v58 = vadd.f32 %v797_v15, %v796_v55  ;;  %v3816_v28 = vld [vmem:[%s3292_s20 + $0x258] sm:$0xff]  ;;  %v639_v55 = vmul.f32 %v3624_v0, %v3624_v0 }
  0x8d   : > { %v476_v20 = vsel %vm326_vm0, %v3816_v28, 0.0 }
  0x8e   : > { %v451_v4 = vadd.f32 %v450_v35, %v449_v61  ;;  %v801_v35 = vsel %vm326_vm0, %v631_v31, 0.0  ;;  %v800_v61 = vadd.f32 %v799_v26, %v798_v58  ;;  %v3824_v31 = vld [vmem:[%s3292_s20 + $0x260] sm:$0xff]  ;;  %v640_v58 = vmul.f32 %v3632_v44, %v3632_v44 }
  0x8f   : > { %v478_v29 = vsel %vm326_vm0, %v3824_v31, 0.0 }
  0x90   : > { %v453_v8 = vadd.f32 %v452_v39, %v451_v4  ;;  %v803_v39 = vsel %vm326_vm0, %v632_v34, 0.0  ;;  %v802_v4 = vadd.f32 %v801_v35, %v800_v61  ;;  %v3832_v34 = vld [vmem:[%s3292_s20 + $0x268] sm:$0xff]  ;;  %v641_v61 = vmul.f32 %v3640_v50, %v3640_v50 }
  0x91   : > { %v480_v0 = vsel %vm326_vm0, %v3832_v34, 0.0 }
  0x92   : > { %v455_v12 = vadd.f32 %v454_v7, %v453_v8  ;;  %v805_v7 = vsel %vm326_vm0, %v633_v37, 0.0  ;;  %v804_v8 = vadd.f32 %v803_v39, %v802_v4  ;;  %v3840_v37 = vld [vmem:[%s3292_s20 + $0x270] sm:$0xff]  ;;  %v642_v4 = vmul.f32 %v3648_v59, %v3648_v59 }
  0x93   : > { %v482_v44 = vsel %vm326_vm0, %v3840_v37, 0.0 }
  0x94   : > { %v457_v17 = vadd.f32 %v456_v54, %v455_v12  ;;  %v807_v54 = vsel %vm326_vm0, %v634_v40, 0.0  ;;  %v806_v12 = vadd.f32 %v805_v7, %v804_v8  ;;  %v3848_v40 = vld [vmem:[%s3292_s20 + $0x278] sm:$0xff]  ;;  %v643_v8 = vmul.f32 %v3656_v6, %v3656_v6 }
  0x95   : > { %v484_v50 = vsel %vm326_vm0, %v3848_v40, 0.0 }
  0x96   : > { %v459_v21 = vadd.f32 %v458_v62, %v457_v17  ;;  %v809_v62 = vsel %vm326_vm0, %v635_v43, 0.0  ;;  %v808_v17 = vadd.f32 %v807_v54, %v806_v12  ;;  %v3856_v43 = vld [vmem:[%s3292_s20 + $0x280] sm:$0xff]  ;;  %v644_v12 = vmul.f32 %v3664_v18, %v3664_v18 }
  0x97   : > { %v486_v59 = vsel %vm326_vm0, %v3856_v43, 0.0 }
  0x98   : > { %v461_v30 = vadd.f32 %v460_v11, %v459_v21  ;;  %v811_v11 = vsel %vm326_vm0, %v636_v46, 0.0  ;;  %v810_v21 = vadd.f32 %v809_v62, %v808_v17  ;;  %v3864_v46 = vld [vmem:[%s3292_s20 + $0x288] sm:$0xff]  ;;  %v645_v17 = vmul.f32 %v3672_v27, %v3672_v27 }
  0x99   : > { %v488_v6 = vsel %vm326_vm0, %v3864_v46, 0.0 }
  0x9a   : > { %v463_v36 = vadd.f32 %v462_v23, %v461_v30  ;;  %v813_v23 = vsel %vm326_vm0, %v637_v49, 0.0  ;;  %v812_v30 = vadd.f32 %v811_v11, %v810_v21  ;;  %v3872_v49 = vld [vmem:[%s3292_s20 + $0x290] sm:$0xff]  ;;  %v646_v21 = vmul.f32 %v3680_v38, %v3680_v38 }
  0x9b   : > { %v490_v18 = vsel %vm326_vm0, %v3872_v49, 0.0 }
  0x9c   : > { %v465_v42 = vadd.f32 %v464_v32, %v463_v36  ;;  %v815_v32 = vsel %vm326_vm0, %v638_v52, 0.0  ;;  %v814_v36 = vadd.f32 %v813_v23, %v812_v30  ;;  %v3880_v52 = vld [vmem:[%s3292_s20 + $0x298] sm:$0xff]  ;;  %v647_v30 = vmul.f32 %v3688_v41, %v3688_v41 }
  0x9d   : > { %v492_v27 = vsel %vm326_vm0, %v3880_v52, 0.0 }
  0x9e   : > { %v467_v48 = vadd.f32 %v466_v1, %v465_v42  ;;  %v817_v1 = vsel %vm326_vm0, %v639_v55, 0.0  ;;  %v816_v42 = vadd.f32 %v815_v32, %v814_v36  ;;  %v3888_v55 = vld [vmem:[%s3292_s20 + $0x2a0] sm:$0xff]  ;;  %v648_v36 = vmul.f32 %v3696_v47, %v3696_v47 }
  0x9f   : > { %v494_v38 = vsel %vm326_vm0, %v3888_v55, 0.0 }
  0xa0   : > { %v469_v57 = vadd.f32 %v468_v3, %v467_v48  ;;  %v819_v3 = vsel %vm326_vm0, %v640_v58, 0.0  ;;  %v818_v48 = vadd.f32 %v817_v1, %v816_v42  ;;  %v3896_v58 = vld [vmem:[%s3292_s20 + $0x2a8] sm:$0xff]  ;;  %v649_v42 = vmul.f32 %v3704_v56, %v3704_v56 }
  0xa1   : > { %v496_v41 = vsel %vm326_vm0, %v3896_v58, 0.0 }
  0xa2   : > { %v471_v5 = vadd.f32 %v470_v51, %v469_v57  ;;  %v821_v51 = vsel %vm326_vm0, %v641_v61, 0.0  ;;  %v820_v57 = vadd.f32 %v819_v3, %v818_v48  ;;  %v3904_v61 = vld [vmem:[%s3292_s20 + $0x2b0] sm:$0xff]  ;;  %v650_v48 = vmul.f32 %v3712_v63, %v3712_v63 }
  0xa3   : > { %v498_v47 = vsel %vm326_vm0, %v3904_v61, 0.0 }
  0xa4   : > { %v473_v15 = vadd.f32 %v472_v60, %v471_v5  ;;  %v823_v60 = vsel %vm326_vm0, %v642_v4, 0.0  ;;  %v822_v5 = vadd.f32 %v821_v51, %v820_v57  ;;  %v3912_v4 = vld [vmem:[%s3292_s20 + $0x2b8] sm:$0xff]  ;;  %v651_v57 = vmul.f32 %v3720_v14, %v3720_v14 }
  0xa5   : > { %v500_v56 = vsel %vm326_vm0, %v3912_v4, 0.0 }
  0xa6   : > { %v475_v26 = vadd.f32 %v474_v9, %v473_v15  ;;  %v825_v9 = vsel %vm326_vm0, %v643_v8, 0.0  ;;  %v824_v15 = vadd.f32 %v823_v60, %v822_v5  ;;  %v3920_v8 = vld [vmem:[%s3292_s20 + $0x2c0] sm:$0xff]  ;;  %v652_v5 = vmul.f32 %v3728_v24, %v3728_v24 }
  0xa7   : > { %v502_v63 = vsel %vm326_vm0, %v3920_v8, 0.0 }
  0xa8   : > { %v477_v35 = vadd.f32 %v476_v20, %v475_v26  ;;  %v827_v20 = vsel %vm326_vm0, %v644_v12, 0.0  ;;  %v826_v26 = vadd.f32 %v825_v9, %v824_v15  ;;  %v3928_v12 = vld [vmem:[%s3292_s20 + $0x2c8] sm:$0xff]  ;;  %v653_v15 = vmul.f32 %v3736_v33, %v3736_v33 }
  0xa9   : > { %v504_v14 = vsel %vm326_vm0, %v3928_v12, 0.0 }
  0xaa   : > { %v479_v39 = vadd.f32 %v478_v29, %v477_v35  ;;  %v829_v29 = vsel %vm326_vm0, %v645_v17, 0.0  ;;  %v828_v35 = vadd.f32 %v827_v20, %v826_v26  ;;  %v3936_v17 = vld [vmem:[%s3292_s20 + $0x2d0] sm:$0xff]  ;;  %v654_v26 = vmul.f32 %v3744_v2, %v3744_v2 }
  0xab   : > { %v506_v24 = vsel %vm326_vm0, %v3936_v17, 0.0 }
  0xac   : > { %v481_v7 = vadd.f32 %v480_v0, %v479_v39  ;;  %v831_v0 = vsel %vm326_vm0, %v646_v21, 0.0  ;;  %v830_v39 = vadd.f32 %v829_v29, %v828_v35  ;;  %v3944_v21 = vld [vmem:[%s3292_s20 + $0x2d8] sm:$0xff]  ;;  %v655_v35 = vmul.f32 %v3752_v45, %v3752_v45 }
  0xad   : > { %v508_v33 = vsel %vm326_vm0, %v3944_v21, 0.0 }
  0xae   : > { %v483_v54 = vadd.f32 %v482_v44, %v481_v7  ;;  %v833_v44 = vsel %vm326_vm0, %v647_v30, 0.0  ;;  %v832_v7 = vadd.f32 %v831_v0, %v830_v39  ;;  %v3952_v30 = vld [vmem:[%s3292_s20 + $0x2e0] sm:$0xff]  ;;  %v656_v39 = vmul.f32 %v3760_v53, %v3760_v53 }
  0xaf   : > { %v510_v2 = vsel %vm326_vm0, %v3952_v30, 0.0 }
  0xb0   : > { %v485_v62 = vadd.f32 %v484_v50, %v483_v54  ;;  %v835_v50 = vsel %vm326_vm0, %v648_v36, 0.0  ;;  %v834_v54 = vadd.f32 %v833_v44, %v832_v7  ;;  %v3960_v36 = vld [vmem:[%s3292_s20 + $0x2e8] sm:$0xff]  ;;  %v657_v7 = vmul.f32 %v3768_v10, %v3768_v10 }
  0xb1   : > { %v512_v45 = vsel %vm326_vm0, %v3960_v36, 0.0 }
  0xb2   : > { %v487_v11 = vadd.f32 %v486_v59, %v485_v62  ;;  %v837_v59 = vsel %vm326_vm0, %v649_v42, 0.0  ;;  %v836_v62 = vadd.f32 %v835_v50, %v834_v54  ;;  %v3968_v42 = vld [vmem:[%s3292_s20 + $0x2f0] sm:$0xff]  ;;  %v658_v54 = vmul.f32 %v3776_v13, %v3776_v13  ;;  %v977_v13 = vld [vmem:[%s6282_s3] sm:$0xff] }
  0xb3   : > { %v514_v53 = vsel %vm326_vm0, %v3968_v42, 0.0 }
  0xb4   : > { %v489_v23 = vadd.f32 %v488_v6, %v487_v11  ;;  %v839_v6 = vsel %vm326_vm0, %v650_v48, 0.0  ;;  %v838_v11 = vadd.f32 %v837_v59, %v836_v62  ;;  %v3976_v48 = vld [vmem:[%s3292_s20 + $0x2f8] sm:$0xff]  ;;  %v659_v62 = vmul.f32 %v3784_v16, %v3784_v16 }
  0xb5   : > { %v516_v10 = vsel %vm326_vm0, %v3976_v48, 0.0  ;;  %v660_v16 = vmul.f32 %v3792_v19, %v3792_v19 }
  0xb6   : > { %v491_v32 = vadd.f32 %v490_v18, %v489_v23  ;;  %v841_v18 = vsel %vm326_vm0, %v651_v57, 0.0  ;;  %v840_v23 = vadd.f32 %v839_v6, %v838_v11  ;;  %v3984_v57 = vld [vmem:[%s3292_s20 + $0x300] sm:$0xff]  ;;  %v3249_v11 = vmov 0.0  }
  0xb7   : > { %2629 = vmatprep.subr.mxu0 %v3249_v11  ;;  %2634 = vmatprep.subr.mxu1 %v3249_v11  ;;  %v857_v19 = vsel %vm326_vm0, %v659_v62, 0.0  ;;  %v666_v62 = vmul.f32 %v3840_v37, %v3840_v37 }
  0xb8   : > { %v493_v1 = vadd.f32 %v492_v27, %v491_v32  ;;  %v843_v27 = vsel %vm326_vm0, %v652_v5, 0.0  ;;  %v842_v32 = vadd.f32 %v841_v18, %v840_v23  ;;  %v3992_v5 = vld [vmem:[%s3292_s20 + $0x308] sm:$0xff]  ;;  %2630 = vmatpush3.msra.mxu0 %v977_v13  ;;  %2631 = vmatprep.mubr.msk.f32.mxu0 %vm3250_vm1, %v3249_v11  ;;  %v4003_v18 = vld [vmem:[%s3292_s20 + $0x310] sm:$0xff] }
  0xb9   : > { %6420 = vst [vmem:[#allocation2_spill] sm:$0xff] %v3992_v5  ;;  %6421 = vst [vmem:[#allocation3_spill] sm:$0xff] %v4003_v18  ;;  %2635 = vmatpush3.msra.mxu1 %v977_v13  ;;  %2636 = vmatprep.mubr.msk.f32.mxu1 %vm3250_vm1, %v3249_v11  ;;  %v667_v11 = vmul.f32 %v3848_v40, %v3848_v40 }
  0xba   : > { %v495_v3 = vadd.f32 %v494_v38, %v493_v1  ;;  %v845_v38 = vsel %vm326_vm0, %v653_v15, 0.0  ;;  %v844_v1 = vadd.f32 %v843_v27, %v842_v32  ;;  %v855_v15 = vsel %vm326_vm0, %v658_v54, 0.0  ;;  %v4011_v27 = vld [vmem:[%s3292_s20 + $0x318] sm:$0xff] }
  0xbb   : > { %6422 = vst [vmem:[#allocation4_spill] sm:$0xff] %v4011_v27  ;;  %v665_v54 = vmul.f32 %v3832_v34, %v3832_v34 }
  0xbc   : > { %v497_v51 = vadd.f32 %v496_v41, %v495_v3  ;;  %v847_v41 = vsel %vm326_vm0, %v654_v26, 0.0  ;;  %v846_v3 = vadd.f32 %v845_v38, %v844_v1  ;;  %v661_v26 = vmul.f32 %v3800_v22, %v3800_v22 }
  0xbd   : > { %v859_v38 = vsel %vm326_vm0, %v660_v16, 0.0  ;;  %v524_v22 = vsel %vm326_vm0, %v4011_v27, 0.0  ;;  %v4059_v16 = vld [vmem:[%s3292_s20 + $0x348] sm:$0xff] }
  0xbe   : > { %v499_v60 = vadd.f32 %v498_v47, %v497_v51  ;;  %v849_v47 = vsel %vm326_vm0, %v655_v35, 0.0  ;;  %v848_v51 = vadd.f32 %v847_v41, %v846_v3  ;;  %v662_v35 = vmul.f32 %v3808_v25, %v3808_v25 }
  0xbf   : > { %v861_v41 = vsel %vm326_vm0, %v661_v26, 0.0  ;;  %v871_v26 = vsel %vm326_vm0, %v666_v62, 0.0  ;;  %v4099_v62 = vld [vmem:[%s3292_s20 + $0x370] sm:$0xff] }
  0xc0   : > { %v501_v9 = vadd.f32 %v500_v56, %v499_v60  ;;  %v851_v56 = vsel %vm326_vm0, %v656_v39, 0.0  ;;  %v850_v60 = vadd.f32 %v849_v47, %v848_v51  ;;  %v663_v39 = vmul.f32 %v3816_v28, %v3816_v28 }
  0xc1   : > { %v863_v47 = vsel %vm326_vm0, %v662_v35, 0.0  ;;  %v669_v35 = vmul.f32 %v3864_v46, %v3864_v46 }
  0xc2   : > { %v503_v20 = vadd.f32 %v502_v63, %v501_v9  ;;  %v853_v63 = vsel %vm326_vm0, %v657_v7, 0.0  ;;  %v852_v9 = vadd.f32 %v851_v56, %v850_v60  ;;  %v664_v7 = vmul.f32 %v3824_v31, %v3824_v31 }
  0xc3   : > { %v865_v56 = vsel %vm326_vm0, %v663_v39, 0.0 }
  0xc4   : > { %v505_v29 = vadd.f32 %v504_v14, %v503_v20  ;;  %v518_v14 = vsel %vm326_vm0, %v3984_v57, 0.0  ;;  %v854_v23 = vadd.f32 %v853_v63, %v852_v9  ;;  %v867_v63 = vsel %vm326_vm0, %v664_v7, 0.0 }
  0xc6   : > { %v507_v0 = vadd.f32 %v506_v24, %v505_v29  ;;  %v520_v24 = vsel %vm326_vm0, %v3992_v5, 0.0  ;;  %v856_v32 = vadd.f32 %v855_v15, %v854_v23 }
  0xc8   : > { %v509_v44 = vadd.f32 %v508_v33, %v507_v0  ;;  %v522_v33 = vsel %vm326_vm0, %v4003_v18, 0.0  ;;  %v4019_v0 = vld [vmem:[%s3292_s20 + $0x320] sm:$0xff] }
  0xc9   : > { %6423 = vst [vmem:[#allocation5_spill] sm:$0xff] %v4019_v0  ;;  %v526_v25 = vsel %vm326_vm0, %v4019_v0, 0.0 }
  0xca   : > { %v511_v50 = vadd.f32 %v510_v2, %v509_v44  ;;  %v858_v2 = vadd.f32 %v857_v19, %v856_v32  ;;  %v4027_v44 = vld [vmem:[%s3292_s20 + $0x328] sm:$0xff]  ;;  %v4067_v19 = vld [vmem:[%s3292_s20 + $0x350] sm:$0xff] }
  0xcb   : > { %6424 = vst [vmem:[#allocation6_spill] sm:$0xff] %v4027_v44  ;;  %v528_v28 = vsel %vm326_vm0, %v4027_v44, 0.0  ;;  %v538_v39 = vsel %vm326_vm0, %v4067_v19, 0.0 }
  0xcc   : > { %v513_v59 = vadd.f32 %v512_v45, %v511_v50  ;;  %v860_v45 = vadd.f32 %v859_v38, %v858_v2  ;;  %v4035_v50 = vld [vmem:[%s3292_s20 + $0x330] sm:$0xff]  ;;  %v873_v38 = vsel %vm326_vm0, %v667_v11, 0.0 }
  0xcd   : > { %6425 = vst [vmem:[#allocation7_spill] sm:$0xff] %v4035_v50  ;;  %v530_v31 = vsel %vm326_vm0, %v4035_v50, 0.0 }
  0xce   : > { %v515_v6 = vadd.f32 %v514_v53, %v513_v59  ;;  %v862_v53 = vadd.f32 %v861_v41, %v860_v45  ;;  %v4043_v59 = vld [vmem:[%s3292_s20 + $0x338] sm:$0xff]  ;;  %v670_v41 = vmul.f32 %v3872_v49, %v3872_v49  ;;  %v4083_v45 = vld [vmem:[%s3292_s20 + $0x360] sm:$0xff] }
  0xcf   : > { %v532_v34 = vsel %vm326_vm0, %v4043_v59, 0.0 }
  0xd0   : > { %v517_v20 = vadd.f32 %v516_v10, %v515_v6  ;;  %v864_v10 = vadd.f32 %v863_v47, %v862_v53  ;;  %v4051_v6 = vld [vmem:[%s3292_s20 + $0x340] sm:$0xff]  ;;  %v877_v53 = vsel %vm326_vm0, %v669_v35, 0.0 }
  0xd1   : > { %v534_v23 = vsel %vm326_vm0, %v4051_v6, 0.0 }
  0xd2   : > { %v519_v29 = vadd.f32 %v518_v14, %v517_v20  ;;  %v866_v13 = vadd.f32 %v865_v56, %v864_v10  ;;  %v869_v14 = vsel %vm326_vm0, %v665_v54, 0.0  ;;  %v672_v10 = vmul.f32 %v3888_v55, %v3888_v55 }
  0xd4   : > { %v521_v1 = vadd.f32 %v520_v24, %v519_v29  ;;  %v868_v20 = vadd.f32 %v867_v63, %v866_v13  ;;  %v668_v24 = vmul.f32 %v3856_v43, %v3856_v43 }
  0xd6   : > { %v523_v3 = vadd.f32 %v522_v33, %v521_v1  ;;  %v870_v32 = vadd.f32 %v869_v14, %v868_v20  ;;  %v536_v33 = vsel %vm326_vm0, %v4059_v16, 0.0  ;;  %v4075_v1 = vld [vmem:[%s3292_s20 + $0x358] sm:$0xff] }
  0xd7   : > { %v540_v47 = vsel %vm326_vm0, %v4075_v1, 0.0  ;;  %v4107_v14 = vld [vmem:[%s3292_s20 + $0x378] sm:$0xff] }
  0xd8   : > { %v525_v51 = vadd.f32 %v524_v22, %v523_v3  ;;  %v872_v22 = vadd.f32 %v871_v26, %v870_v32  ;;  %v875_v3 = vsel %vm326_vm0, %v668_v24, 0.0  ;;  %v674_v24 = vmul.f32 %v3904_v61, %v3904_v61 }
  0xd9   : > { %v883_v26 = vsel %vm326_vm0, %v672_v10, 0.0  ;;  %v548_v35 = vsel %vm326_vm0, %v4107_v14, 0.0  ;;  %v4139_v10 = vld [vmem:[%s3292_s20 + $0x398] sm:$0xff] }
  0xda   : > { %v527_v60 = vadd.f32 %v526_v25, %v525_v51  ;;  %v874_v7 = vadd.f32 %v873_v38, %v872_v22  ;;  %v671_v51 = vmul.f32 %v3880_v52, %v3880_v52  ;;  %v675_v38 = vmul.f32 %v3912_v4, %v3912_v4  ;;  %v4123_v22 = vld [vmem:[%s3292_s20 + $0x388] sm:$0xff] }
  0xdc   : > { %v529_v9 = vadd.f32 %v528_v28, %v527_v60  ;;  %v4091_v28 = vld [vmem:[%s3292_s20 + $0x368] sm:$0xff]  ;;  %v876_v56 = vadd.f32 %v875_v3, %v874_v7  ;;  %v542_v60 = vsel %vm326_vm0, %v4083_v45, 0.0  ;;  %v881_v11 = vsel %vm326_vm0, %v671_v51, 0.0 }
  0xdd   : > { %v544_v13 = vsel %vm326_vm0, %v4091_v28, 0.0  ;;  %v887_v7 = vsel %vm326_vm0, %v674_v24, 0.0  ;;  %v679_v24 = vmul.f32 %v3944_v21, %v3944_v21 }
  0xde   : > { %v531_v15 = vadd.f32 %v530_v31, %v529_v9  ;;  %v879_v31 = vsel %vm326_vm0, %v670_v41, 0.0  ;;  %v878_v9 = vadd.f32 %v877_v53, %v876_v56  ;;  %v677_v56 = vmul.f32 %v3928_v12, %v3928_v12 }
  0xe0   : > { %v533_v29 = vadd.f32 %v532_v34, %v531_v15  ;;  %v673_v34 = vmul.f32 %v3896_v58, %v3896_v58  ;;  %v880_v20 = vadd.f32 %v879_v31, %v878_v9 }
  0xe2   : > { %v535_v2 = vadd.f32 %v534_v23, %v533_v29  ;;  %v546_v23 = vsel %vm326_vm0, %v4099_v62, 0.0  ;;  %v4115_v29 = vld [vmem:[%s3292_s20 + $0x380] sm:$0xff] }
  0xe3   : > { %v550_v3 = vsel %vm326_vm0, %v4115_v29, 0.0 }
  0xe4   : > { %v537_v25 = vadd.f32 %v536_v33, %v535_v2  ;;  %v882_v33 = vadd.f32 %v881_v11, %v880_v20  ;;  %v885_v2 = vsel %vm326_vm0, %v673_v34, 0.0  ;;  %v4147_v11 = vld [vmem:[%s3292_s20 + $0x3a0] sm:$0xff] }
  0xe6   : > { %v539_v54 = vadd.f32 %v538_v39, %v537_v25  ;;  %v884_v41 = vadd.f32 %v883_v26, %v882_v33  ;;  %v676_v25 = vmul.f32 %v3920_v8, %v3920_v8  ;;  %v893_v26 = vsel %vm326_vm0, %v677_v56, 0.0 }
  0xe8   : > { %v541_v63 = vadd.f32 %v540_v47, %v539_v54  ;;  %v4131_v47 = vld [vmem:[%s3292_s20 + $0x390] sm:$0xff]  ;;  %v886_v53 = vadd.f32 %v885_v2, %v884_v41  ;;  %v552_v54 = vsel %vm326_vm0, %v4123_v22, 0.0  ;;  %v891_v34 = vsel %vm326_vm0, %v676_v25, 0.0 }
  0xe9   : > { %v554_v9 = vsel %vm326_vm0, %v4131_v47, 0.0  ;;  %v680_v2 = vmul.f32 %v3952_v30, %v3952_v30  ;;  %v4163_v41 = vld [vmem:[%s3292_s20 + $0x3b0] sm:$0xff] }
  0xea   : > { %v543_v15 = vadd.f32 %v542_v60, %v541_v63  ;;  %v889_v60 = vsel %vm326_vm0, %v675_v38, 0.0  ;;  %v888_v63 = vadd.f32 %v887_v7, %v886_v53  ;;  %v558_v38 = vsel %vm326_vm0, %v4147_v11, 0.0 }
  0xeb   : > { %v897_v53 = vsel %vm326_vm0, %v679_v24, 0.0 }
  0xec   : > { %v545_v32 = vadd.f32 %v544_v13, %v543_v15  ;;  %v678_v13 = vmul.f32 %v3936_v17, %v3936_v17  ;;  %v890_v20 = vadd.f32 %v889_v60, %v888_v63  ;;  %v682_v63 = vmul.f32 %v3968_v42, %v3968_v42 }
  0xee   : > { %v547_v39 = vadd.f32 %v546_v23, %v545_v32  ;;  %v556_v23 = vsel %vm326_vm0, %v4139_v10, 0.0  ;;  %v4155_v32 = vld [vmem:[%s3292_s20 + $0x3a8] sm:$0xff] }
  0xef   : > { %v560_v7 = vsel %vm326_vm0, %v4155_v32, 0.0 }
  0xf0   : > { %v549_v51 = vadd.f32 %v548_v35, %v547_v39  ;;  %v892_v35 = vadd.f32 %v891_v34, %v890_v20  ;;  %v895_v39 = vsel %vm326_vm0, %v678_v13, 0.0  ;;  %v4179_v13 = vld [vmem:[%s3292_s20 + $0x3c0] sm:$0xff] }
  0xf2   : > { %v551_v31 = vadd.f32 %v550_v3, %v549_v51  ;;  %v894_v25 = vadd.f32 %v893_v26, %v892_v35  ;;  %v681_v51 = vmul.f32 %v3960_v36, %v3960_v36  ;;  %v4187_v26 = vld [vmem:[%s3292_s20 + $0x3c8] sm:$0xff] }
  0xf4   : > { %v553_v15 = vadd.f32 %v552_v54, %v551_v31  ;;  %v4171_v54 = vld [vmem:[%s3292_s20 + $0x3b8] sm:$0xff]  ;;  %v896_v60 = vadd.f32 %v895_v39, %v894_v25  ;;  %v562_v31 = vsel %vm326_vm0, %v4163_v41, 0.0  ;;  %v901_v24 = vsel %vm326_vm0, %v681_v51, 0.0 }
  0xf5   : > { %v564_v20 = vsel %vm326_vm0, %v4171_v54, 0.0  ;;  %v903_v39 = vsel %vm326_vm0, %v682_v63, 0.0  ;;  %v568_v51 = vsel %vm326_vm0, %v4187_v26, 0.0 }
  0xf6   : > { %v555_v33 = vadd.f32 %v554_v9, %v553_v15  ;;  %v899_v9 = vsel %vm326_vm0, %v680_v2, 0.0  ;;  %v898_v15 = vadd.f32 %v897_v53, %v896_v60  ;;  %v684_v2 = vmul.f32 %v3984_v57, %v3984_v57  ;;  %v4203_v60 = vld [vmem:[%s3292_s20 + $0x3d8] sm:$0xff] }
  0xf7   : > { %v685_v53 = vmul.f32 %v3992_v5, %v3992_v5 }
  0xf8   : > { %v557_v3 = vadd.f32 %v556_v23, %v555_v33  ;;  %v683_v23 = vmul.f32 %v3976_v48, %v3976_v48  ;;  %v900_v35 = vadd.f32 %v899_v9, %v898_v15  ;;  %v907_v15 = vsel %vm326_vm0, %v684_v2, 0.0 }
  0xfa   : > { %v559_v56 = vadd.f32 %v558_v38, %v557_v3  ;;  %v566_v38 = vsel %vm326_vm0, %v4179_v13, 0.0  ;;  %v4195_v3 = vld [vmem:[%s3292_s20 + $0x3d0] sm:$0xff] }
  0xfb   : > { %v570_v63 = vsel %vm326_vm0, %v4195_v3, 0.0 }
  0xfc   : > { %v561_v34 = vadd.f32 %v560_v7, %v559_v56  ;;  %v902_v7 = vadd.f32 %v901_v24, %v900_v35  ;;  %v905_v56 = vsel %vm326_vm0, %v683_v23, 0.0  ;;  %v572_v23 = vsel %vm326_vm0, %v4203_v60, 0.0 }
  0xfd   : > { %v687_v35 = vmul.f32 %v4011_v27, %v4011_v27 }
  0xfe   : > { %v563_v33 = vadd.f32 %v562_v31, %v561_v34  ;;  %v904_v9 = vadd.f32 %v903_v39, %v902_v7  ;;  %v686_v34 = vmul.f32 %v4003_v18, %v4003_v18  ;;  %v4219_v39 = vld [vmem:[%s3292_s20 + $0x3e8] sm:$0xff] }
  0xff   : > { %v576_v27 = vsel %vm326_vm0, %v4219_v39, 0.0 }
 0x100   : > { %v565_v25 = vadd.f32 %v564_v20, %v563_v33  ;;  %v4211_v20 = vld [vmem:[%s3292_s20 + $0x3e0] sm:$0xff]  ;;  %v906_v33 = vadd.f32 %v905_v56, %v904_v9  ;;  %v911_v56 = vsel %vm326_vm0, %v686_v34, 0.0  ;;  %v690_v34 = vmul.f32 %v4035_v50, %v4035_v50 }
 0x101   : > { %v574_v2 = vsel %vm326_vm0, %v4211_v20, 0.0 }
 0x102   : > { %v567_v31 = vadd.f32 %v566_v38, %v565_v25  ;;  %v909_v38 = vsel %vm326_vm0, %v685_v53, 0.0  ;;  %v908_v7 = vadd.f32 %v907_v15, %v906_v33  ;;  %v689_v53 = vmul.f32 %v4027_v44, %v4027_v44  ;;  %v4235_v15 = vld [vmem:[%s3292_s20 + $0x3f8] sm:$0xff] }
 0x103   : > { %6426 = vst [vmem:[#allocation8_spill] sm:$0xff] %v4235_v15 }
 0x104   : > { %v569_v24 = vadd.f32 %v568_v51, %v567_v31  ;;  %v688_v51 = vmul.f32 %v4019_v0, %v4019_v0  ;;  %v4227_v31 = vld [vmem:[%s3292_s20 + $0x3f0] sm:$0xff]  ;;  %v910_v18 = vadd.f32 %v909_v38, %v908_v7  ;;  %v580_v7 = vsel %vm326_vm0, %v4235_v15, 0.0 }
 0x105   : > { %v578_v0 = vsel %vm326_vm0, %v4227_v31, 0.0  ;;  %v917_v44 = vsel %vm326_vm0, %v689_v53, 0.0 }
 0x106   : > { %v571_v25 = vadd.f32 %v570_v63, %v569_v24  ;;  %v913_v63 = vsel %vm326_vm0, %v687_v35, 0.0  ;;  %v912_v33 = vadd.f32 %v911_v56, %v910_v18  ;;  %v691_v35 = vmul.f32 %v4043_v59, %v4043_v59 }
 0x107   : > { %v692_v56 = vmul.f32 %v4051_v6, %v4051_v6 }
 0x108   : > { %v573_v9 = vadd.f32 %v572_v23, %v571_v25  ;;  %v915_v23 = vsel %vm326_vm0, %v688_v51, 0.0  ;;  %v914_v25 = vadd.f32 %v913_v63, %v912_v33  ;;  %v921_v51 = vsel %vm326_vm0, %v691_v35, 0.0 }
 0x109   : > { %v694_v33 = vmul.f32 %v4067_v19, %v4067_v19 }
 0x10a   : > { %v575_v24 = vadd.f32 %v574_v2, %v573_v9  ;;  %v916_v18 = vadd.f32 %v915_v23, %v914_v25  ;;  %v919_v9 = vsel %vm326_vm0, %v690_v34, 0.0 }
 0x10b   : > { %v927_v35 = vsel %vm326_vm0, %v694_v33, 0.0 }
 0x10c   : > { %v577_v38 = vadd.f32 %v576_v27, %v575_v24  ;;  %v918_v5 = vadd.f32 %v917_v44, %v916_v18  ;;  %v693_v27 = vmul.f32 %v4059_v16, %v4059_v16  ;;  %v697_v18 = vmul.f32 %v4091_v28, %v4091_v28 }
 0x10e   : > { %v579_v2 = vadd.f32 %v578_v0, %v577_v38  ;;  %v920_v24 = vadd.f32 %v919_v9, %v918_v5  ;;  %v923_v0 = vsel %vm326_vm0, %v692_v56, 0.0  ;;  %v695_v38 = vmul.f32 %v4075_v1, %v4075_v1 }
 0x10f   : > { %v925_v34 = vsel %vm326_vm0, %v693_v27, 0.0  ;;  %v933_v33 = vsel %vm326_vm0, %v697_v18, 0.0  ;;  %v703_v18 = vmul.f32 %v4139_v10, %v4139_v10 }
 0x110   : > { %v581_v50 = vadd.f32 %v580_v7, %v579_v2  ;;  %v922_v23 = vadd.f32 %v921_v51, %v920_v24  ;;  %v696_v7 = vmul.f32 %v4083_v45, %v4083_v45  ;;  %v698_v51 = vmul.f32 %v4099_v62, %v4099_v62 }
 0x112   : > { %v582_v63 = vrot.slane %v581_v50, 4  ;;  %v924_v25 = vadd.f32 %v923_v0, %v922_v23  ;;  %v931_v27 = vsel %vm326_vm0, %v696_v7, 0.0  ;;  %v699_v0 = vmul.f32 %v4107_v14, %v4107_v14 }
 0x113   : > { %v700_v23 = vmul.f32 %v4115_v29, %v4115_v29 }
 0x114   : > { %v583_v53 = vadd.f32 %v582_v63, %v581_v50  ;;  %v926_v2 = vadd.f32 %v925_v34, %v924_v25  ;;  %v929_v50 = vsel %vm326_vm0, %v695_v38, 0.0  ;;  %v935_v38 = vsel %vm326_vm0, %v698_v51, 0.0 }
 0x115   : > { %v937_v25 = vsel %vm326_vm0, %v699_v0, 0.0 }
 0x116   : > { %v584_v44 = vrot.slane %v583_v53, 2  ;;  %v928_v9 = vadd.f32 %v927_v35, %v926_v2  ;;  %v702_v35 = vmul.f32 %v4131_v47, %v4131_v47 }
 0x118   : > { %v585_v5 = vadd.f32 %v584_v44, %v583_v53  ;;  %v930_v24 = vadd.f32 %v929_v50, %v928_v9  ;;  %v701_v44 = vmul.f32 %v4123_v22, %v4123_v22  ;;  %v704_v9 = vmul.f32 %v4147_v11, %v4147_v11 }
 0x119   : > { %v943_v51 = vsel %vm326_vm0, %v702_v35, 0.0 }
 0x11a   : > { %v586_v56 = vrot.slane %v585_v5, 1  ;;  %v932_v53 = vadd.f32 %v931_v27, %v930_v24  ;;  %v941_v50 = vsel %vm326_vm0, %v701_v44, 0.0  ;;  %v945_v24 = vsel %vm326_vm0, %v703_v18, 0.0 }
 0x11c   : > { %v587_v63 = vadd.f32 %v586_v56, %v585_v5  ;;  %v934_v34 = vadd.f32 %v933_v33, %v932_v53  ;;  %v939_v5 = vsel %vm326_vm0, %v700_v23, 0.0  ;;  %v706_v33 = vmul.f32 %v4163_v41, %v4163_v41 }
 0x11d   : > { %v947_v53 = vsel %vm326_vm0, %v704_v9, 0.0 }
 0x11e   : > { %2632 = vmatmul.mubr.msk.f32.vlgmr.msra.gmra.mrb[0].mxu0 %vm326_vm0, %v587_v63  ;;  %v936_v7 = vadd.f32 %v935_v38, %v934_v34  ;;  %v705_v63 = vmul.f32 %v4155_v32, %v4155_v32  ;;  %v707_v38 = vmul.f32 %v4171_v54, %v4171_v54 }
 0x120   : > { %v938_v2 = vadd.f32 %v937_v25, %v936_v7  ;;  %v949_v34 = vsel %vm326_vm0, %v705_v63, 0.0  ;;  %v708_v25 = vmul.f32 %v4179_v13, %v4179_v13  ;;  %v951_v7 = vsel %vm326_vm0, %v706_v33, 0.0 }
 0x122   : > { %v940_v56 = vadd.f32 %v939_v5, %v938_v2  ;;  %v709_v5 = vmul.f32 %v4187_v26, %v4187_v26  ;;  %v953_v2 = vsel %vm326_vm0, %v707_v38, 0.0 }
 0x124   : > { %v942_v27 = vadd.f32 %v941_v50, %v940_v56  ;;  %v710_v50 = vmul.f32 %v4195_v3, %v4195_v3  ;;  %v955_v56 = vsel %vm326_vm0, %v708_v25, 0.0 }
 0x126   : > { %v944_v0 = vadd.f32 %v943_v51, %v942_v27  ;;  %v711_v51 = vmul.f32 %v4203_v60, %v4203_v60  ;;  %v957_v27 = vsel %vm326_vm0, %v709_v5, 0.0 }
 0x128   : > { %v946_v23 = vadd.f32 %v945_v24, %v944_v0  ;;  %v712_v24 = vmul.f32 %v4211_v20, %v4211_v20  ;;  %v959_v0 = vsel %vm326_vm0, %v710_v50, 0.0 }
 0x12a   : > { %v948_v44 = vadd.f32 %v947_v53, %v946_v23  ;;  %v713_v53 = vmul.f32 %v4219_v39, %v4219_v39  ;;  %v961_v23 = vsel %vm326_vm0, %v711_v51, 0.0 }
 0x12c   : > { %v950_v35 = vadd.f32 %v949_v34, %v948_v44  ;;  %v714_v34 = vmul.f32 %v4227_v31, %v4227_v31  ;;  %v963_v44 = vsel %vm326_vm0, %v712_v24, 0.0 }
 0x12e   : > { %v952_v18 = vadd.f32 %v951_v7, %v950_v35  ;;  %v715_v7 = vmul.f32 %v4235_v15, %v4235_v15  ;;  %v965_v35 = vsel %vm326_vm0, %v713_v53, 0.0 }
 0x130   : > { %v954_v9 = vadd.f32 %v953_v2, %v952_v18  ;;  %v967_v2 = vsel %vm326_vm0, %v714_v34, 0.0  ;;  %v969_v50 = vsel %vm326_vm0, %v715_v7, 0.0 }
 0x132   : > { %v956_v63 = vadd.f32 %v955_v56, %v954_v9 }
 0x134   : > { %v958_v33 = vadd.f32 %v957_v27, %v956_v63 }
 0x136   : > { %v960_v38 = vadd.f32 %v959_v0, %v958_v33 }
 0x138   : > { %v962_v25 = vadd.f32 %v961_v23, %v960_v38 }
 0x13a   : > { %v964_v5 = vadd.f32 %v963_v44, %v962_v25 }
 0x13c   : > { %v966_v18 = vadd.f32 %v965_v35, %v964_v5 }
 0x13e   : > { %v968_v56 = vadd.f32 %v967_v2, %v966_v18  ;;  %v1137_v2 = vlaneseq }
 0x140   : > { %v970_v9 = vadd.f32 %v969_v50, %v968_v56  ;;  %v4323_v18 = vshrl.u32 %v1137_v2, 7  ;;  %v1132_v50 = vld [vmem:[%s6280_s1] sm:$0x1] }
 0x142   : > { %v971_v51 = vrot.slane %v970_v9, 4  ;;  %v6291_v56 = vsub.s32 0, %v4323_v18 }
 0x144   : > { %v972_v27 = vadd.f32 %v971_v51, %v970_v9 }
 0x146   : > { %v973_v63 = vrot.slane %v972_v27, 2 }
 0x148   : > { %v974_v0 = vadd.f32 %v973_v63, %v972_v27  ;;  %v4332_v27 = vld [vmem:[%s6281_s2] sm:$0x1] }
 0x14a   : > { %v975_v33 = vrot.slane %v974_v0, 1 }
 0x14c   : > { %v976_v24 = vadd.f32 %v975_v33, %v974_v0  ;;  %v3174_v33 = vld [vmem:[%s3292_s20 + $0x58] sm:$0xff] }
 0x14e   : > { %2637 = vmatmul.mubr.msk.f32.vlgmr.msra.gmra.mrb[0].mxu1 %vm326_vm0, %v976_v24  ;;  %v3163_v24 = vld [vmem:[%s3292_s20] sm:$0xff] }
 0x1f1   : > { %v1047_v23 = vpop.f32.mrb[0].mxu0 }
 0x1f2   : > { %v2633_v38 = vpop.f32.mrb[1].mxu0  ;;  %v1052_v15 = vmul.f32 0.00024414063, %v1047_v23 }
 0x1f3   : > { %v3164_v38 = vld [vmem:[%s3292_s20 + $0x8] sm:$0xff] }
 0x1f4   : > { %v1127_v53 = vmul.f32 %v1052_v15, %v1052_v15 }
 0x221   : > { %v1122_v44 = vpop.f32.mrb[0].mxu1 }
 0x222   : > { %v2638_v25 = vpop.f32.mrb[1].mxu1  ;;  %v1126_v34 = vmul.f32 0.00024414063, %v1122_v44 }
 0x223   : > { %v3166_v25 = vld [vmem:[%s3292_s20 + $0x18] sm:$0xff] }
 0x224   : > { %v1128_v35 = vsub.f32 %v1126_v34, %v1127_v53 }
 0x226   : > { %v1129_v7 = vmax.f32 %v1128_v35, 0.0  ;;  %v3167_v35 = vld [vmem:[%s3292_s20 + $0x20] sm:$0xff] }
 0x228   : > { %v1130_v5 = vadd.f32 1e-05, %v1129_v7 }
 0x22a   : > { %2649 = vrsqrt.f32 %v1130_v5  ;;  %v3168_v5 = vld [vmem:[%s3292_s20 + $0x28] sm:$0xff] }
 0x234   : > { %v2650_v9 = vpop.eup %2649 }
 0x235   : > { %v1133_v51 = vmul.f32 %v2650_v9, %v1132_v50  ;;  %v3169_v50 = vld [vmem:[%s3292_s20 + $0x30] sm:$0xff] }
 0x237   : > { %v4334_v63 = vmul.f32 %v1133_v51, %v1052_v15  ;;  %v4338_v0 = vrot.slane %v1133_v51, %v6291_v56  ;;  %v3165_v15 = vld [vmem:[%s3292_s20 + $0x10] sm:$0xff]  ;;  %v3170_v51 = vld [vmem:[%s3292_s20 + $0x38] sm:$0xff]  ;;  %v3175_v56 = vld [vmem:[%s3292_s20 + $0x60] sm:$0xff] }
 0x239   : > { %v4344_v23 = vmul.f32 %v3163_v24, %v4338_v0  ;;  %v4348_v53 = vmul.f32 %v3164_v38, %v4338_v0  ;;  %v4352_v44 = vmul.f32 %v3165_v15, %v4338_v0  ;;  %v4356_v34 = vmul.f32 %v3166_v25, %v4338_v0  ;;  %v3171_v38 = vld [vmem:[%s3292_s20 + $0x40] sm:$0xff]  ;;  %v3172_v25 = vld [vmem:[%s3292_s20 + $0x48] sm:$0xff] }
 0x23a   : > { %v4360_v7 = vmul.f32 %v3167_v35, %v4338_v0  ;;  %v4364_v2 = vmul.f32 %v3168_v5, %v4338_v0  ;;  %v4368_v9 = vmul.f32 %v3169_v50, %v4338_v0  ;;  %v4372_v24 = vmul.f32 %v3170_v51, %v4338_v0  ;;  %v3173_v5 = vld [vmem:[%s3292_s20 + $0x50] sm:$0xff] }
 0x23b   : > { %v4376_v15 = vmul.f32 %v3171_v38, %v4338_v0  ;;  %v4380_v35 = vmul.f32 %v3172_v25, %v4338_v0  ;;  %v4384_v50 = vmul.f32 %v3173_v5, %v4338_v0  ;;  %v4388_v51 = vmul.f32 %v3174_v33, %v4338_v0 }
 0x23c   : > { %6427 = vst [vmem:[#allocation9_spill] sm:$0xff] %v4368_v9  ;;  %6428 = vst [vmem:[#allocation10_spill] sm:$0xff] %v4372_v24  ;;  %v4392_v38 = vmul.f32 %v3175_v56, %v4338_v0  ;;  %v3236_v9 = vld [vmem:[%s3292_s20 + $0x248] sm:$0xff] }
 0x23d   : > { %6429 = vst [vmem:[#allocation11_spill] sm:$0xff] %v4376_v15  ;;  %6430 = vst [vmem:[#allocation12_spill] sm:$0xff] %v4380_v35  ;;  %v3176_v15 = vld [vmem:[%s3292_s20 + $0x68] sm:$0xff]  ;;  %v3177_v35 = vld [vmem:[%s3292_s20 + $0x70] sm:$0xff] }
 0x23e   : > { %6431 = vst [vmem:[#allocation13_spill] sm:$0xff] %v4384_v50  ;;  %6432 = vst [vmem:[#allocation14_spill] sm:$0xff] %v4388_v51  ;;  %v4396_v25 = vmul.f32 %v3176_v15, %v4338_v0  ;;  %v4400_v5 = vmul.f32 %v3177_v35, %v4338_v0  ;;  %v3178_v50 = vld [vmem:[%s3292_s20 + $0x78] sm:$0xff]  ;;  %v3179_v51 = vld [vmem:[%s3292_s20 + $0x80] sm:$0xff] }
 0x23f   : > { %6433 = vst [vmem:[#allocation15_spill] sm:$0xff] %v4392_v38  ;;  %v4404_v33 = vmul.f32 %v3178_v50, %v4338_v0  ;;  %v4408_v56 = vmul.f32 %v3179_v51, %v4338_v0  ;;  %v3180_v38 = vld [vmem:[%s3292_s20 + $0x88] sm:$0xff] }
 0x240   : > { %6434 = vst [vmem:[#allocation16_spill] sm:$0xff] %v4396_v25  ;;  %6435 = vst [vmem:[#allocation17_spill] sm:$0xff] %v4400_v5  ;;  %v4412_v15 = vmul.f32 %v3180_v38, %v4338_v0  ;;  %v3181_v25 = vld [vmem:[%s3292_s20 + $0x90] sm:$0xff]  ;;  %v3182_v5 = vld [vmem:[%s3292_s20 + $0x98] sm:$0xff] }
 0x241   : > { %6436 = vst [vmem:[#allocation18_spill] sm:$0xff] %v4404_v33  ;;  %6437 = vst [vmem:[#allocation19_spill] sm:$0xff] %v4408_v56  ;;  %v4416_v35 = vmul.f32 %v3181_v25, %v4338_v0  ;;  %v4420_v50 = vmul.f32 %v3182_v5, %v4338_v0  ;;  %v3183_v33 = vld [vmem:[%s3292_s20 + $0xa0] sm:$0xff]  ;;  %v3184_v56 = vld [vmem:[%s3292_s20 + $0xa8] sm:$0xff] }
 0x242   : > { %6438 = vst [vmem:[#allocation20_spill] sm:$0xff] %v4412_v15  ;;  %v4424_v51 = vmul.f32 %v3183_v33, %v4338_v0  ;;  %v4428_v38 = vmul.f32 %v3184_v56, %v4338_v0  ;;  %v3185_v15 = vld [vmem:[%s3292_s20 + $0xb0] sm:$0xff] }
 0x243   : > { %6439 = vst [vmem:[#allocation21_spill] sm:$0xff] %v4416_v35  ;;  %6440 = vst [vmem:[#allocation22_spill] sm:$0xff] %v4420_v50  ;;  %v4432_v25 = vmul.f32 %v3185_v15, %v4338_v0  ;;  %v3186_v35 = vld [vmem:[%s3292_s20 + $0xb8] sm:$0xff]  ;;  %v3187_v50 = vld [vmem:[%s3292_s20 + $0xc0] sm:$0xff] }
 0x244   : > { %6441 = vst [vmem:[#allocation23_spill] sm:$0xff] %v4424_v51  ;;  %6442 = vst [vmem:[#allocation24_spill] sm:$0xff] %v4428_v38  ;;  %v4436_v5 = vmul.f32 %v3186_v35, %v4338_v0  ;;  %v4440_v33 = vmul.f32 %v3187_v50, %v4338_v0  ;;  %v3188_v51 = vld [vmem:[%s3292_s20 + $0xc8] sm:$0xff]  ;;  %v3189_v38 = vld [vmem:[%s3292_s20 + $0xd0] sm:$0xff] }
 0x245   : > { %6443 = vst [vmem:[#allocation25_spill] sm:$0xff] %v4432_v25  ;;  %v4444_v56 = vmul.f32 %v3188_v51, %v4338_v0  ;;  %v4448_v15 = vmul.f32 %v3189_v38, %v4338_v0  ;;  %v3190_v25 = vld [vmem:[%s3292_s20 + $0xd8] sm:$0xff] }
 0x246   : > { %6444 = vst [vmem:[#allocation26_spill] sm:$0xff] %v4436_v5  ;;  %6445 = vst [vmem:[#allocation27_spill] sm:$0xff] %v4440_v33  ;;  %v4452_v35 = vmul.f32 %v3190_v25, %v4338_v0  ;;  %v3191_v5 = vld [vmem:[%s3292_s20 + $0xe0] sm:$0xff]  ;;  %v3192_v33 = vld [vmem:[%s3292_s20 + $0xe8] sm:$0xff] }
 0x247   : > { %6446 = vst [vmem:[#allocation28_spill] sm:$0xff] %v4444_v56  ;;  %6447 = vst [vmem:[#allocation29_spill] sm:$0xff] %v4448_v15  ;;  %v4456_v50 = vmul.f32 %v3191_v5, %v4338_v0  ;;  %v4460_v51 = vmul.f32 %v3192_v33, %v4338_v0  ;;  %v3193_v56 = vld [vmem:[%s3292_s20 + $0xf0] sm:$0xff]  ;;  %v3194_v15 = vld [vmem:[%s3292_s20 + $0xf8] sm:$0xff] }
 0x248   : > { %6448 = vst [vmem:[#allocation30_spill] sm:$0xff] %v4452_v35  ;;  %v4464_v38 = vmul.f32 %v3193_v56, %v4338_v0  ;;  %v4468_v25 = vmul.f32 %v3194_v15, %v4338_v0  ;;  %v3195_v35 = vld [vmem:[%s3292_s20 + $0x100] sm:$0xff] }
 0x249   : > { %6449 = vst [vmem:[#allocation31_spill] sm:$0xff] %v4456_v50  ;;  %6450 = vst [vmem:[#allocation32_spill] sm:$0xff] %v4460_v51  ;;  %v4472_v5 = vmul.f32 %v3195_v35, %v4338_v0  ;;  %v3196_v50 = vld [vmem:[%s3292_s20 + $0x108] sm:$0xff]  ;;  %v3197_v51 = vld [vmem:[%s3292_s20 + $0x110] sm:$0xff] }
 0x24a   : > { %6451 = vst [vmem:[#allocation33_spill] sm:$0xff] %v4464_v38  ;;  %6452 = vst [vmem:[#allocation34_spill] sm:$0xff] %v4468_v25  ;;  %v4476_v33 = vmul.f32 %v3196_v50, %v4338_v0  ;;  %v4480_v56 = vmul.f32 %v3197_v51, %v4338_v0  ;;  %v3198_v38 = vld [vmem:[%s3292_s20 + $0x118] sm:$0xff]  ;;  %v3199_v25 = vld [vmem:[%s3292_s20 + $0x120] sm:$0xff] }
 0x24b   : > { %6453 = vst [vmem:[#allocation35_spill] sm:$0xff] %v4472_v5  ;;  %v4484_v15 = vmul.f32 %v3198_v38, %v4338_v0  ;;  %v4488_v35 = vmul.f32 %v3199_v25, %v4338_v0  ;;  %v3200_v5 = vld [vmem:[%s3292_s20 + $0x128] sm:$0xff] }
 0x24c   : > { %6454 = vst [vmem:[#allocation36_spill] sm:$0xff] %v4476_v33  ;;  %6455 = vst [vmem:[#allocation37_spill] sm:$0xff] %v4480_v56  ;;  %v4492_v50 = vmul.f32 %v3200_v5, %v4338_v0  ;;  %v3201_v33 = vld [vmem:[%s3292_s20 + $0x130] sm:$0xff]  ;;  %v3202_v56 = vld [vmem:[%s3292_s20 + $0x138] sm:$0xff] }
 0x24d   : > { %6456 = vst [vmem:[#allocation38_spill] sm:$0xff] %v4484_v15  ;;  %6457 = vst [vmem:[#allocation39_spill] sm:$0xff] %v4488_v35  ;;  %v4496_v51 = vmul.f32 %v3201_v33, %v4338_v0  ;;  %v4500_v38 = vmul.f32 %v3202_v56, %v4338_v0  ;;  %v3203_v15 = vld [vmem:[%s3292_s20 + $0x140] sm:$0xff]  ;;  %v3204_v35 = vld [vmem:[%s3292_s20 + $0x148] sm:$0xff] }
 0x24e   : > { %6458 = vst [vmem:[#allocation40_spill] sm:$0xff] %v4492_v50  ;;  %v4504_v25 = vmul.f32 %v3203_v15, %v4338_v0  ;;  %v4508_v5 = vmul.f32 %v3204_v35, %v4338_v0  ;;  %v3205_v50 = vld [vmem:[%s3292_s20 + $0x150] sm:$0xff] }
 0x24f   : > { %6459 = vst [vmem:[#allocation41_spill] sm:$0xff] %v4496_v51  ;;  %6460 = vst [vmem:[#allocation42_spill] sm:$0xff] %v4500_v38  ;;  %v4512_v33 = vmul.f32 %v3205_v50, %v4338_v0  ;;  %v3206_v51 = vld [vmem:[%s3292_s20 + $0x158] sm:$0xff]  ;;  %v3207_v38 = vld [vmem:[%s3292_s20 + $0x160] sm:$0xff] }
 0x250   : > { %6461 = vst [vmem:[#allocation43_spill] sm:$0xff] %v4504_v25  ;;  %6462 = vst [vmem:[#allocation44_spill] sm:$0xff] %v4508_v5  ;;  %v4516_v56 = vmul.f32 %v3206_v51, %v4338_v0  ;;  %v4520_v15 = vmul.f32 %v3207_v38, %v4338_v0  ;;  %v3208_v25 = vld [vmem:[%s3292_s20 + $0x168] sm:$0xff]  ;;  %v3209_v5 = vld [vmem:[%s3292_s20 + $0x170] sm:$0xff] }
 0x251   : > { %6463 = vst [vmem:[#allocation45_spill] sm:$0xff] %v4512_v33  ;;  %v4524_v35 = vmul.f32 %v3208_v25, %v4338_v0  ;;  %v4528_v50 = vmul.f32 %v3209_v5, %v4338_v0  ;;  %v3210_v33 = vld [vmem:[%s3292_s20 + $0x178] sm:$0xff] }
 0x252   : > { %6464 = vst [vmem:[#allocation46_spill] sm:$0xff] %v4516_v56  ;;  %6465 = vst [vmem:[#allocation47_spill] sm:$0xff] %v4520_v15  ;;  %v4532_v51 = vmul.f32 %v3210_v33, %v4338_v0  ;;  %v3211_v56 = vld [vmem:[%s3292_s20 + $0x180] sm:$0xff]  ;;  %v3212_v15 = vld [vmem:[%s3292_s20 + $0x188] sm:$0xff] }
 0x253   : > { %6466 = vst [vmem:[#allocation48_spill] sm:$0xff] %v4524_v35  ;;  %6467 = vst [vmem:[#allocation49_spill] sm:$0xff] %v4528_v50  ;;  %v4536_v38 = vmul.f32 %v3211_v56, %v4338_v0  ;;  %v4540_v25 = vmul.f32 %v3212_v15, %v4338_v0  ;;  %v3213_v35 = vld [vmem:[%s3292_s20 + $0x190] sm:$0xff]  ;;  %v3214_v50 = vld [vmem:[%s3292_s20 + $0x198] sm:$0xff] }
 0x254   : > { %6468 = vst [vmem:[#allocation50_spill] sm:$0xff] %v4532_v51  ;;  %v4544_v5 = vmul.f32 %v3213_v35, %v4338_v0  ;;  %v4548_v33 = vmul.f32 %v3214_v50, %v4338_v0  ;;  %v3215_v51 = vld [vmem:[%s3292_s20 + $0x1a0] sm:$0xff] }
 0x255   : > { %6469 = vst [vmem:[#allocation51_spill] sm:$0xff] %v4536_v38  ;;  %6470 = vst [vmem:[#allocation52_spill] sm:$0xff] %v4540_v25  ;;  %v4552_v56 = vmul.f32 %v3215_v51, %v4338_v0  ;;  %v3216_v38 = vld [vmem:[%s3292_s20 + $0x1a8] sm:$0xff]  ;;  %v3217_v25 = vld [vmem:[%s3292_s20 + $0x1b0] sm:$0xff] }
 0x256   : > { %6471 = vst [vmem:[#allocation53_spill] sm:$0xff] %v4544_v5  ;;  %6472 = vst [vmem:[#allocation54_spill] sm:$0xff] %v4548_v33  ;;  %v4556_v15 = vmul.f32 %v3216_v38, %v4338_v0  ;;  %v4560_v35 = vmul.f32 %v3217_v25, %v4338_v0  ;;  %v3218_v5 = vld [vmem:[%s3292_s20 + $0x1b8] sm:$0xff]  ;;  %v3219_v33 = vld [vmem:[%s3292_s20 + $0x1c0] sm:$0xff] }
 0x257   : > { %6473 = vst [vmem:[#allocation55_spill] sm:$0xff] %v4552_v56  ;;  %v4564_v50 = vmul.f32 %v3218_v5, %v4338_v0  ;;  %v4568_v51 = vmul.f32 %v3219_v33, %v4338_v0  ;;  %v3220_v56 = vld [vmem:[%s3292_s20 + $0x1c8] sm:$0xff] }
 0x258   : > { %6474 = vst [vmem:[#allocation56_spill] sm:$0xff] %v4556_v15  ;;  %6475 = vst [vmem:[#allocation57_spill] sm:$0xff] %v4560_v35  ;;  %v4572_v38 = vmul.f32 %v3220_v56, %v4338_v0  ;;  %v3221_v15 = vld [vmem:[%s3292_s20 + $0x1d0] sm:$0xff]  ;;  %v3222_v35 = vld [vmem:[%s3292_s20 + $0x1d8] sm:$0xff] }
 0x259   : > { %6476 = vst [vmem:[#allocation58_spill] sm:$0xff] %v4564_v50  ;;  %6477 = vst [vmem:[#allocation59_spill] sm:$0xff] %v4568_v51  ;;  %v4576_v25 = vmul.f32 %v3221_v15, %v4338_v0  ;;  %v4580_v5 = vmul.f32 %v3222_v35, %v4338_v0  ;;  %v3223_v50 = vld [vmem:[%s3292_s20 + $0x1e0] sm:$0xff]  ;;  %v3224_v51 = vld [vmem:[%s3292_s20 + $0x1e8] sm:$0xff] }
 0x25a   : > { %6478 = vst [vmem:[#allocation60_spill] sm:$0xff] %v4572_v38  ;;  %v4584_v33 = vmul.f32 %v3223_v50, %v4338_v0  ;;  %v4588_v56 = vmul.f32 %v3224_v51, %v4338_v0  ;;  %v3225_v38 = vld [vmem:[%s3292_s20 + $0x1f0] sm:$0xff] }
 0x25b   : > { %6479 = vst [vmem:[#allocation61_spill] sm:$0xff] %v4576_v25  ;;  %6480 = vst [vmem:[#allocation62_spill] sm:$0xff] %v4580_v5  ;;  %v4592_v15 = vmul.f32 %v3225_v38, %v4338_v0  ;;  %v3226_v25 = vld [vmem:[%s3292_s20 + $0x1f8] sm:$0xff]  ;;  %v3227_v5 = vld [vmem:[%s3292_s20 + $0x200] sm:$0xff] }
 0x25c   : > { %6481 = vst [vmem:[#allocation63_spill] sm:$0xff] %v4584_v33  ;;  %6482 = vst [vmem:[#allocation64_spill] sm:$0xff] %v4588_v56  ;;  %v4596_v35 = vmul.f32 %v3226_v25, %v4338_v0  ;;  %v4600_v50 = vmul.f32 %v3227_v5, %v4338_v0  ;;  %v3228_v33 = vld [vmem:[%s3292_s20 + $0x208] sm:$0xff]  ;;  %v3229_v56 = vld [vmem:[%s3292_s20 + $0x210] sm:$0xff] }
 0x25d   : > { %6483 = vst [vmem:[#allocation65_spill] sm:$0xff] %v4592_v15  ;;  %v4604_v51 = vmul.f32 %v3228_v33, %v4338_v0  ;;  %v4608_v38 = vmul.f32 %v3229_v56, %v4338_v0  ;;  %v3230_v15 = vld [vmem:[%s3292_s20 + $0x218] sm:$0xff] }
 0x25e   : > { %6484 = vst [vmem:[#allocation66_spill] sm:$0xff] %v4596_v35  ;;  %6485 = vst [vmem:[#allocation67_spill] sm:$0xff] %v4600_v50  ;;  %v4612_v25 = vmul.f32 %v3230_v15, %v4338_v0  ;;  %v3231_v35 = vld [vmem:[%s3292_s20 + $0x220] sm:$0xff]  ;;  %v3232_v50 = vld [vmem:[%s3292_s20 + $0x228] sm:$0xff] }
 0x25f   : > { %6486 = vst [vmem:[#allocation68_spill] sm:$0xff] %v4604_v51  ;;  %6487 = vst [vmem:[#allocation69_spill] sm:$0xff] %v4608_v38  ;;  %v4616_v5 = vmul.f32 %v3231_v35, %v4338_v0  ;;  %v4620_v33 = vmul.f32 %v3232_v50, %v4338_v0  ;;  %v3233_v51 = vld [vmem:[%s3292_s20 + $0x230] sm:$0xff]  ;;  %v3234_v56 = vld [vmem:[%s3292_s20 + $0x238] sm:$0xff]  ;;  %v4636_v35 = vmul.f32 %v3236_v9, %v4338_v0 }
 0x260   : > { %6488 = vst [vmem:[#allocation70_spill] sm:$0xff] %v4612_v25  ;;  %v4624_v24 = vmul.f32 %v3233_v51, %v4338_v0  ;;  %v4628_v38 = vmul.f32 %v3234_v56, %v4338_v0  ;;  %v3235_v15 = vld [vmem:[%s3292_s20 + $0x240] sm:$0xff]  ;;  %v4656_v9 = vmul.f32 %v4338_v0, %v3840_v37  ;;  %v4676_v37 = vmul.f32 %v4338_v0, %v3880_v52 }
 0x261   : > { %6489 = vst [vmem:[#allocation71_spill] sm:$0xff] %v4616_v5  ;;  %6490 = vst [vmem:[#allocation72_spill] sm:$0xff] %v4620_v33  ;;  %v4632_v25 = vmul.f32 %v3235_v15, %v4338_v0  ;;  %v3237_v5 = vld [vmem:[%s3292_s20 + $0x250] sm:$0xff]  ;;  %v3238_v33 = vld [vmem:[%s3292_s20 + $0x258] sm:$0xff]  ;;  %v4696_v52 = vmul.f32 %v4338_v0, %v3920_v8  ;;  %v4716_v8 = vmul.f32 %v4338_v0, %v3960_v36 }
 0x262   : > { %6491 = vst [vmem:[#allocation73_spill] sm:$0xff] %v4624_v24  ;;  %6492 = vst [vmem:[#allocation74_spill] sm:$0xff] %v4628_v38  ;;  %v4640_v50 = vmul.f32 %v3237_v5, %v4338_v0  ;;  %v4644_v51 = vmul.f32 %v3238_v33, %v4338_v0  ;;  %v3239_v24 = vld [vmem:[%s3292_s20 + $0x260] sm:$0xff]  ;;  %v3240_v38 = vld [vmem:[%s3292_s20 + $0x268] sm:$0xff]  ;;  %v4660_v5 = vmul.f32 %v4338_v0, %v3848_v40 }
 0x263   : > { %v4648_v56 = vmul.f32 %v3239_v24, %v4338_v0  ;;  %v4652_v15 = vmul.f32 %v3240_v38, %v4338_v0  ;;  %v4664_v33 = vmul.f32 %v4338_v0, %v3856_v43  ;;  %v4668_v24 = vmul.f32 %v4338_v0, %v3864_v46  ;;  %6495 = vst [vmem:[#allocation77_spill] sm:$0xff] %v4716_v8  ;;  %v6501_v8 = vld [vmem:[#allocation4_spill] sm:$0xff] }
 0x264   : > { %v4672_v38 = vmul.f32 %v4338_v0, %v3872_v49  ;;  %v4680_v40 = vmul.f32 %v4338_v0, %v3888_v55  ;;  %v4684_v43 = vmul.f32 %v4338_v0, %v3896_v58  ;;  %v4688_v46 = vmul.f32 %v4338_v0, %v3904_v61 }
 0x265   : > { %v4692_v49 = vmul.f32 %v4338_v0, %v3912_v4  ;;  %v4700_v55 = vmul.f32 %v4338_v0, %v3928_v12  ;;  %v4704_v58 = vmul.f32 %v4338_v0, %v3936_v17  ;;  %v4708_v61 = vmul.f32 %v4338_v0, %v3944_v21 }
 0x266   : > { %v4712_v4 = vmul.f32 %v4338_v0, %v3952_v30  ;;  %v4720_v12 = vmul.f32 %v4338_v0, %v3968_v42  ;;  %v4724_v17 = vmul.f32 %v4338_v0, %v3976_v48  ;;  %v4728_v21 = vmul.f32 %v4338_v0, %v3984_v57 }
 0x267   : > { %6493 = vst [vmem:[#allocation75_spill] sm:$0xff] %v4708_v61  ;;  %v6499_v61 = vld [vmem:[#allocation2_spill] sm:$0xff]  ;;  %v4740_v42 = vmul.f32 %v4338_v0, %v6501_v8  ;;  %v4760_v8 = vmul.f32 %v4338_v0, %v4051_v6  ;;  %v4780_v6 = vmul.f32 %v4338_v0, %v4091_v28  ;;  %v4800_v28 = vmul.f32 %v4338_v0, %v4131_v47 }
 0x268   : > { %6494 = vst [vmem:[#allocation76_spill] sm:$0xff] %v4712_v4  ;;  %6496 = vst [vmem:[#allocation78_spill] sm:$0xff] %v4720_v12  ;;  %v4732_v30 = vmul.f32 %v4338_v0, %v6499_v61  ;;  %v6500_v4 = vld [vmem:[#allocation3_spill] sm:$0xff]  ;;  %v6502_v12 = vld [vmem:[#allocation5_spill] sm:$0xff]  ;;  %v4820_v47 = vmul.f32 %v4338_v0, %v4171_v54  ;;  %v6508_v54 = vsub.f32 %v4332_v27, %v4334_v63 }
 0x269   : > { %6497 = vst [vmem:[#allocation79_spill] sm:$0xff] %v4724_v17  ;;  %6498 = vst [vmem:[#allocation80_spill] sm:$0xff] %v4728_v21  ;;  %v4736_v36 = vmul.f32 %v4338_v0, %v6500_v4  ;;  %v4744_v48 = vmul.f32 %v4338_v0, %v6502_v12  ;;  %v6503_v17 = vld [vmem:[#allocation6_spill] sm:$0xff]  ;;  %v6504_v21 = vld [vmem:[#allocation7_spill] sm:$0xff]  ;;  %v4756_v4 = vmul.f32 %v4338_v0, %v4043_v59 }
 0x26a   : > { %v4748_v57 = vmul.f32 %v4338_v0, %v6503_v17  ;;  %v4752_v61 = vmul.f32 %v4338_v0, %v6504_v21  ;;  %v4764_v12 = vmul.f32 %v4338_v0, %v4059_v16  ;;  %v4768_v17 = vmul.f32 %v4338_v0, %v4067_v19  ;;  %6506 = vst [vmem:[#allocation3_spill] sm:$0xff] %v4820_v47 }
 0x26b   : > { %v4772_v21 = vmul.f32 %v4338_v0, %v4075_v1  ;;  %v4776_v59 = vmul.f32 %v4338_v0, %v4083_v45  ;;  %v4784_v16 = vmul.f32 %v4338_v0, %v4099_v62  ;;  %v4788_v19 = vmul.f32 %v4338_v0, %v4107_v14 }
 0x26c   : > { %v4792_v1 = vmul.f32 %v4338_v0, %v4115_v29  ;;  %v4796_v45 = vmul.f32 %v4338_v0, %v4123_v22  ;;  %v4804_v62 = vmul.f32 %v4338_v0, %v4139_v10  ;;  %v4808_v14 = vmul.f32 %v4338_v0, %v4147_v11 }
 0x26d   : > { %v4812_v29 = vmul.f32 %v4338_v0, %v4155_v32  ;;  %v4816_v22 = vmul.f32 %v4338_v0, %v4163_v41  ;;  %v4824_v10 = vmul.f32 %v4338_v0, %v4179_v13  ;;  %v4828_v11 = vmul.f32 %v4338_v0, %v4187_v26 }
 0x26e   : > { %v4832_v32 = vmul.f32 %v4338_v0, %v4195_v3  ;;  %v4836_v41 = vmul.f32 %v4338_v0, %v4203_v60  ;;  %v4847_v13 = vmul.f32 %v4338_v0, %v4211_v20  ;;  %v4851_v26 = vmul.f32 %v4338_v0, %v4219_v39  ;;  %v6509_v60 = vld [vmem:[#allocation8_spill] sm:$0xff] }
 0x26f   : > { %6505 = vst [vmem:[#allocation2_spill] sm:$0xff] %v4816_v22  ;;  %v6507_v22 = vsub.s32 0, %v4323_v18  ;;  %v4855_v3 = vmul.f32 %v4338_v0, %v4227_v31  ;;  %v4859_v18 = vmul.f32 %v4338_v0, %v6509_v60  ;;  %v6522_v60 = vld [vmem:[#allocation12_spill] sm:$0xff] }
 0x271   : > { %v4843_v47 = vrot.slane %v6508_v54, %v6507_v22  ;;  %v6518_v22 = vld [vmem:[#allocation10_spill] sm:$0xff]  ;;  %v6520_v54 = vld [vmem:[#allocation11_spill] sm:$0xff] }
 0x273   : > { %v4863_v27 = vadd.f32 %v4843_v47, %v4344_v23  ;;  %v4867_v20 = vadd.f32 %v4843_v47, %v4348_v53  ;;  %v4871_v39 = vadd.f32 %v4843_v47, %v4352_v44  ;;  %v4875_v31 = vadd.f32 %v4843_v47, %v4356_v34  ;;  %v6516_v23 = vld [vmem:[#allocation9_spill] sm:$0xff] }
 0x274   : > { %v4879_v63 = vadd.f32 %v4843_v47, %v4360_v7  ;;  %v4883_v0 = vadd.f32 %v4843_v47, %v4364_v2  ;;  %v4887_v53 = vadd.f32 %v4843_v47, %v6516_v23  ;;  %v4891_v44 = vadd.f32 %v4843_v47, %v6518_v22 }
 0x275   : > { %6510 = vst [vmem:[#allocation4_spill] sm:$0xff] %v4863_v27  ;;  %6511 = vst [vmem:[#allocation5_spill] sm:$0xff] %v4867_v20  ;;  %v4895_v34 = vadd.f32 %v4843_v47, %v6520_v54  ;;  %v4899_v7 = vadd.f32 %v4843_v47, %v6522_v60 }
 0x276   : > { %6512 = vst [vmem:[#allocation6_spill] sm:$0xff] %v4871_v39  ;;  %6513 = vst [vmem:[#allocation7_spill] sm:$0xff] %v4875_v31 }
 0x277   : > { %6514 = vst [vmem:[#allocation8_spill] sm:$0xff] %v4879_v63  ;;  %6515 = vst [vmem:[#allocation81_spill] sm:$0xff] %v4883_v0  ;;  %v6524_v63 = vld [vmem:[#allocation13_spill] sm:$0xff]  ;;  %v6526_v0 = vld [vmem:[#allocation14_spill] sm:$0xff] }
 0x278   : > { %6517 = vst [vmem:[#allocation9_spill] sm:$0xff] %v4887_v53  ;;  %6519 = vst [vmem:[#allocation10_spill] sm:$0xff] %v4891_v44  ;;  %v4903_v2 = vadd.f32 %v4843_v47, %v6524_v63  ;;  %v4907_v23 = vadd.f32 %v4843_v47, %v6526_v0  ;;  %v6528_v53 = vld [vmem:[#allocation15_spill] sm:$0xff]  ;;  %v6530_v44 = vld [vmem:[#allocation16_spill] sm:$0xff] }
 0x279   : > { %6521 = vst [vmem:[#allocation11_spill] sm:$0xff] %v4895_v34  ;;  %6523 = vst [vmem:[#allocation12_spill] sm:$0xff] %v4899_v7  ;;  %v4911_v22 = vadd.f32 %v4843_v47, %v6528_v53  ;;  %v4915_v54 = vadd.f32 %v4843_v47, %v6530_v44  ;;  %v6532_v34 = vld [vmem:[#allocation17_spill] sm:$0xff]  ;;  %v6534_v7 = vld [vmem:[#allocation18_spill] sm:$0xff] }
 0x27a   : > { %6525 = vst [vmem:[#allocation13_spill] sm:$0xff] %v4903_v2  ;;  %6527 = vst [vmem:[#allocation14_spill] sm:$0xff] %v4907_v23  ;;  %v4919_v60 = vadd.f32 %v4843_v47, %v6532_v34  ;;  %v4923_v63 = vadd.f32 %v4843_v47, %v6534_v7  ;;  %v6536_v2 = vld [vmem:[#allocation19_spill] sm:$0xff]  ;;  %v6538_v23 = vld [vmem:[#allocation20_spill] sm:$0xff] }
 0x27b   : > { %6529 = vst [vmem:[#allocation15_spill] sm:$0xff] %v4911_v22  ;;  %6531 = vst [vmem:[#allocation16_spill] sm:$0xff] %v4915_v54  ;;  %v4927_v0 = vadd.f32 %v4843_v47, %v6536_v2  ;;  %v4931_v53 = vadd.f32 %v4843_v47, %v6538_v23  ;;  %v6540_v22 = vld [vmem:[#allocation21_spill] sm:$0xff]  ;;  %v6542_v54 = vld [vmem:[#allocation22_spill] sm:$0xff] }
 0x27c   : > { %6533 = vst [vmem:[#allocation17_spill] sm:$0xff] %v4919_v60  ;;  %6535 = vst [vmem:[#allocation18_spill] sm:$0xff] %v4923_v63  ;;  %v4935_v44 = vadd.f32 %v4843_v47, %v6540_v22  ;;  %v4939_v34 = vadd.f32 %v4843_v47, %v6542_v54  ;;  %v6544_v60 = vld [vmem:[#allocation23_spill] sm:$0xff]  ;;  %v6546_v63 = vld [vmem:[#allocation24_spill] sm:$0xff] }
 0x27d   : > { %6537 = vst [vmem:[#allocation19_spill] sm:$0xff] %v4927_v0  ;;  %6539 = vst [vmem:[#allocation20_spill] sm:$0xff] %v4931_v53  ;;  %v4943_v7 = vadd.f32 %v4843_v47, %v6544_v60  ;;  %v4947_v2 = vadd.f32 %v4843_v47, %v6546_v63  ;;  %v6548_v0 = vld [vmem:[#allocation25_spill] sm:$0xff]  ;;  %v6550_v53 = vld [vmem:[#allocation26_spill] sm:$0xff] }
 0x27e   : > { %6541 = vst [vmem:[#allocation21_spill] sm:$0xff] %v4935_v44  ;;  %6543 = vst [vmem:[#allocation22_spill] sm:$0xff] %v4939_v34  ;;  %v4951_v23 = vadd.f32 %v4843_v47, %v6548_v0  ;;  %v4955_v22 = vadd.f32 %v4843_v47, %v6550_v53  ;;  %v6552_v44 = vld [vmem:[#allocation27_spill] sm:$0xff]  ;;  %v6554_v34 = vld [vmem:[#allocation28_spill] sm:$0xff] }
 0x27f   : > { %6545 = vst [vmem:[#allocation23_spill] sm:$0xff] %v4943_v7  ;;  %6547 = vst [vmem:[#allocation24_spill] sm:$0xff] %v4947_v2  ;;  %v4959_v54 = vadd.f32 %v4843_v47, %v6552_v44  ;;  %v4963_v60 = vadd.f32 %v4843_v47, %v6554_v34  ;;  %v6556_v7 = vld [vmem:[#allocation29_spill] sm:$0xff]  ;;  %v6558_v2 = vld [vmem:[#allocation30_spill] sm:$0xff] }
 0x280   : > { %6549 = vst [vmem:[#allocation25_spill] sm:$0xff] %v4951_v23  ;;  %6551 = vst [vmem:[#allocation26_spill] sm:$0xff] %v4955_v22  ;;  %v4967_v63 = vadd.f32 %v4843_v47, %v6556_v7  ;;  %v4971_v0 = vadd.f32 %v4843_v47, %v6558_v2  ;;  %v6560_v23 = vld [vmem:[#allocation31_spill] sm:$0xff]  ;;  %v6562_v22 = vld [vmem:[#allocation32_spill] sm:$0xff] }
 0x281   : > { %6553 = vst [vmem:[#allocation27_spill] sm:$0xff] %v4959_v54  ;;  %6555 = vst [vmem:[#allocation28_spill] sm:$0xff] %v4963_v60  ;;  %v4975_v53 = vadd.f32 %v4843_v47, %v6560_v23  ;;  %v4979_v44 = vadd.f32 %v4843_v47, %v6562_v22  ;;  %v6564_v54 = vld [vmem:[#allocation33_spill] sm:$0xff]  ;;  %v6566_v60 = vld [vmem:[#allocation34_spill] sm:$0xff] }
 0x282   : > { %6557 = vst [vmem:[#allocation29_spill] sm:$0xff] %v4967_v63  ;;  %6559 = vst [vmem:[#allocation30_spill] sm:$0xff] %v4971_v0  ;;  %v4983_v34 = vadd.f32 %v4843_v47, %v6564_v54  ;;  %v4987_v7 = vadd.f32 %v4843_v47, %v6566_v60  ;;  %v6568_v63 = vld [vmem:[#allocation35_spill] sm:$0xff]  ;;  %v6570_v0 = vld [vmem:[#allocation36_spill] sm:$0xff] }
 0x283   : > { %6561 = vst [vmem:[#allocation31_spill] sm:$0xff] %v4975_v53  ;;  %6563 = vst [vmem:[#allocation32_spill] sm:$0xff] %v4979_v44  ;;  %v4991_v2 = vadd.f32 %v4843_v47, %v6568_v63  ;;  %v4995_v23 = vadd.f32 %v4843_v47, %v6570_v0  ;;  %v6572_v53 = vld [vmem:[#allocation37_spill] sm:$0xff]  ;;  %v6574_v44 = vld [vmem:[#allocation38_spill] sm:$0xff] }
 0x284   : > { %6565 = vst [vmem:[#allocation33_spill] sm:$0xff] %v4983_v34  ;;  %6567 = vst [vmem:[#allocation34_spill] sm:$0xff] %v4987_v7  ;;  %v4999_v22 = vadd.f32 %v4843_v47, %v6572_v53  ;;  %v5003_v54 = vadd.f32 %v4843_v47, %v6574_v44  ;;  %v6576_v34 = vld [vmem:[#allocation39_spill] sm:$0xff]  ;;  %v6578_v7 = vld [vmem:[#allocation40_spill] sm:$0xff] }
 0x285   : > { %6569 = vst [vmem:[#allocation35_spill] sm:$0xff] %v4991_v2  ;;  %6571 = vst [vmem:[#allocation36_spill] sm:$0xff] %v4995_v23  ;;  %v5007_v60 = vadd.f32 %v4843_v47, %v6576_v34  ;;  %v5011_v63 = vadd.f32 %v4843_v47, %v6578_v7  ;;  %v6580_v2 = vld [vmem:[#allocation41_spill] sm:$0xff]  ;;  %v6582_v23 = vld [vmem:[#allocation42_spill] sm:$0xff] }
 0x286   : > { %6573 = vst [vmem:[#allocation37_spill] sm:$0xff] %v4999_v22  ;;  %6575 = vst [vmem:[#allocation38_spill] sm:$0xff] %v5003_v54  ;;  %v5015_v0 = vadd.f32 %v4843_v47, %v6580_v2  ;;  %v5019_v53 = vadd.f32 %v4843_v47, %v6582_v23  ;;  %v6584_v22 = vld [vmem:[#allocation43_spill] sm:$0xff]  ;;  %v6586_v54 = vld [vmem:[#allocation44_spill] sm:$0xff] }
 0x287   : > { %6577 = vst [vmem:[#allocation39_spill] sm:$0xff] %v5007_v60  ;;  %6579 = vst [vmem:[#allocation40_spill] sm:$0xff] %v5011_v63  ;;  %v5023_v44 = vadd.f32 %v4843_v47, %v6584_v22  ;;  %v5027_v34 = vadd.f32 %v4843_v47, %v6586_v54  ;;  %v6588_v60 = vld [vmem:[#allocation45_spill] sm:$0xff]  ;;  %v6590_v63 = vld [vmem:[#allocation46_spill] sm:$0xff] }
 0x288   : > { %6581 = vst [vmem:[#allocation41_spill] sm:$0xff] %v5015_v0  ;;  %6583 = vst [vmem:[#allocation42_spill] sm:$0xff] %v5019_v53  ;;  %v5031_v7 = vadd.f32 %v4843_v47, %v6588_v60  ;;  %v5035_v2 = vadd.f32 %v4843_v47, %v6590_v63  ;;  %v6592_v0 = vld [vmem:[#allocation47_spill] sm:$0xff]  ;;  %v6594_v53 = vld [vmem:[#allocation48_spill] sm:$0xff] }
 0x289   : > { %6585 = vst [vmem:[#allocation43_spill] sm:$0xff] %v5023_v44  ;;  %6587 = vst [vmem:[#allocation44_spill] sm:$0xff] %v5027_v34  ;;  %v5039_v23 = vadd.f32 %v4843_v47, %v6592_v0  ;;  %v5043_v22 = vadd.f32 %v4843_v47, %v6594_v53  ;;  %v6596_v44 = vld [vmem:[#allocation49_spill] sm:$0xff]  ;;  %v6598_v34 = vld [vmem:[#allocation50_spill] sm:$0xff] }
 0x28a   : > { %6589 = vst [vmem:[#allocation45_spill] sm:$0xff] %v5031_v7  ;;  %6591 = vst [vmem:[#allocation46_spill] sm:$0xff] %v5035_v2  ;;  %v5047_v54 = vadd.f32 %v4843_v47, %v6596_v44  ;;  %v5051_v60 = vadd.f32 %v4843_v47, %v6598_v34  ;;  %v6600_v7 = vld [vmem:[#allocation51_spill] sm:$0xff]  ;;  %v6602_v2 = vld [vmem:[#allocation52_spill] sm:$0xff] }
 0x28b   : > { %6593 = vst [vmem:[#allocation47_spill] sm:$0xff] %v5039_v23  ;;  %6595 = vst [vmem:[#allocation48_spill] sm:$0xff] %v5043_v22  ;;  %v5055_v63 = vadd.f32 %v4843_v47, %v6600_v7  ;;  %v5059_v0 = vadd.f32 %v4843_v47, %v6602_v2  ;;  %v6604_v23 = vld [vmem:[#allocation53_spill] sm:$0xff]  ;;  %v6606_v22 = vld [vmem:[#allocation54_spill] sm:$0xff] }
 0x28c   : > { %6597 = vst [vmem:[#allocation49_spill] sm:$0xff] %v5047_v54  ;;  %6599 = vst [vmem:[#allocation50_spill] sm:$0xff] %v5051_v60  ;;  %v5063_v53 = vadd.f32 %v4843_v47, %v6604_v23  ;;  %v5067_v44 = vadd.f32 %v4843_v47, %v6606_v22  ;;  %v6608_v54 = vld [vmem:[#allocation55_spill] sm:$0xff]  ;;  %v6610_v60 = vld [vmem:[#allocation56_spill] sm:$0xff] }
 0x28d   : > { %6601 = vst [vmem:[#allocation51_spill] sm:$0xff] %v5055_v63  ;;  %6603 = vst [vmem:[#allocation52_spill] sm:$0xff] %v5059_v0  ;;  %v5071_v34 = vadd.f32 %v4843_v47, %v6608_v54  ;;  %v5075_v7 = vadd.f32 %v4843_v47, %v6610_v60  ;;  %v6612_v63 = vld [vmem:[#allocation57_spill] sm:$0xff]  ;;  %v6614_v0 = vld [vmem:[#allocation58_spill] sm:$0xff] }
 0x28e   : > { %6605 = vst [vmem:[#allocation53_spill] sm:$0xff] %v5063_v53  ;;  %6607 = vst [vmem:[#allocation54_spill] sm:$0xff] %v5067_v44  ;;  %v5079_v2 = vadd.f32 %v4843_v47, %v6612_v63  ;;  %v5083_v23 = vadd.f32 %v4843_v47, %v6614_v0  ;;  %v6616_v53 = vld [vmem:[#allocation59_spill] sm:$0xff]  ;;  %v6618_v44 = vld [vmem:[#allocation60_spill] sm:$0xff] }
 0x28f   : > { %6609 = vst [vmem:[#allocation55_spill] sm:$0xff] %v5071_v34  ;;  %6611 = vst [vmem:[#allocation56_spill] sm:$0xff] %v5075_v7  ;;  %v5087_v22 = vadd.f32 %v4843_v47, %v6616_v53  ;;  %v5091_v54 = vadd.f32 %v4843_v47, %v6618_v44  ;;  %v6620_v34 = vld [vmem:[#allocation61_spill] sm:$0xff]  ;;  %v6622_v7 = vld [vmem:[#allocation62_spill] sm:$0xff] }
 0x290   : > { %6613 = vst [vmem:[#allocation57_spill] sm:$0xff] %v5079_v2  ;;  %6615 = vst [vmem:[#allocation58_spill] sm:$0xff] %v5083_v23  ;;  %v5095_v60 = vadd.f32 %v4843_v47, %v6620_v34  ;;  %v5099_v63 = vadd.f32 %v4843_v47, %v6622_v7  ;;  %v6624_v2 = vld [vmem:[#allocation63_spill] sm:$0xff]  ;;  %v6626_v23 = vld [vmem:[#allocation64_spill] sm:$0xff] }
 0x291   : > { %6617 = vst [vmem:[#allocation59_spill] sm:$0xff] %v5087_v22  ;;  %6619 = vst [vmem:[#allocation60_spill] sm:$0xff] %v5091_v54  ;;  %v5103_v0 = vadd.f32 %v4843_v47, %v6624_v2  ;;  %v5107_v53 = vadd.f32 %v4843_v47, %v6626_v23  ;;  %v6628_v22 = vld [vmem:[#allocation65_spill] sm:$0xff]  ;;  %v6630_v54 = vld [vmem:[#allocation66_spill] sm:$0xff] }
 0x292   : > { %6621 = vst [vmem:[#allocation61_spill] sm:$0xff] %v5095_v60  ;;  %6623 = vst [vmem:[#allocation62_spill] sm:$0xff] %v5099_v63  ;;  %v5111_v44 = vadd.f32 %v4843_v47, %v6628_v22  ;;  %v5115_v34 = vadd.f32 %v4843_v47, %v6630_v54  ;;  %v6632_v60 = vld [vmem:[#allocation67_spill] sm:$0xff]  ;;  %v6634_v63 = vld [vmem:[#allocation68_spill] sm:$0xff] }
 0x293   : > { %6625 = vst [vmem:[#allocation63_spill] sm:$0xff] %v5103_v0  ;;  %6627 = vst [vmem:[#allocation64_spill] sm:$0xff] %v5107_v53  ;;  %v5119_v7 = vadd.f32 %v4843_v47, %v6632_v60  ;;  %v5123_v2 = vadd.f32 %v4843_v47, %v6634_v63  ;;  %v6636_v0 = vld [vmem:[#allocation69_spill] sm:$0xff]  ;;  %v6638_v53 = vld [vmem:[#allocation70_spill] sm:$0xff] }
 0x294   : > { %6629 = vst [vmem:[#allocation65_spill] sm:$0xff] %v5111_v44  ;;  %6631 = vst [vmem:[#allocation66_spill] sm:$0xff] %v5115_v34  ;;  %v5127_v23 = vadd.f32 %v4843_v47, %v6636_v0  ;;  %v5131_v22 = vadd.f32 %v4843_v47, %v6638_v53  ;;  %v6640_v44 = vld [vmem:[#allocation71_spill] sm:$0xff]  ;;  %v6642_v34 = vld [vmem:[#allocation72_spill] sm:$0xff]  ;;  %v5151_v53 = vadd.f32 %v4843_v47, %v4632_v25 }
 0x295   : > { %6633 = vst [vmem:[#allocation67_spill] sm:$0xff] %v5119_v7  ;;  %6635 = vst [vmem:[#allocation68_spill] sm:$0xff] %v5123_v2  ;;  %v5135_v54 = vadd.f32 %v4843_v47, %v6640_v44  ;;  %v5139_v60 = vadd.f32 %v4843_v47, %v6642_v34  ;;  %v6644_v7 = vld [vmem:[#allocation73_spill] sm:$0xff]  ;;  %v6646_v2 = vld [vmem:[#allocation74_spill] sm:$0xff]  ;;  %v5155_v44 = vadd.f32 %v4843_v47, %v4636_v35 }
 0x296   : > { %6637 = vst [vmem:[#allocation69_spill] sm:$0xff] %v5127_v23  ;;  %6639 = vst [vmem:[#allocation70_spill] sm:$0xff] %v5131_v22  ;;  %v5143_v63 = vadd.f32 %v4843_v47, %v6644_v7  ;;  %v5147_v0 = vadd.f32 %v4843_v47, %v6646_v2  ;;  %v5159_v34 = vadd.f32 %v4843_v47, %v4640_v50 }
 0x297   : > { %6641 = vst [vmem:[#allocation71_spill] sm:$0xff] %v5135_v54  ;;  %6643 = vst [vmem:[#allocation72_spill] sm:$0xff] %v5139_v60  ;;  %v5163_v7 = vadd.f32 %v4843_v47, %v4644_v51  ;;  %v5167_v2 = vadd.f32 %v4843_v47, %v4648_v56  ;;  %v5171_v25 = vadd.f32 %v4843_v47, %v4652_v15 }
 0x298   : > { %6645 = vst [vmem:[#allocation73_spill] sm:$0xff] %v5143_v63  ;;  %6647 = vst [vmem:[#allocation74_spill] sm:$0xff] %v5147_v0  ;;  %v5175_v35 = vadd.f32 %v4843_v47, %v4656_v9  ;;  %v5179_v50 = vadd.f32 %v4843_v47, %v4660_v5  ;;  %v5183_v51 = vadd.f32 %v4843_v47, %v4664_v33 }
 0x299   : > { %6648 = vst [vmem:[#allocation82_spill] sm:$0xff] %v5151_v53  ;;  %6649 = vst [vmem:[#allocation83_spill] sm:$0xff] %v5155_v44  ;;  %v5187_v56 = vadd.f32 %v4843_v47, %v4668_v24  ;;  %v5191_v15 = vadd.f32 %v4843_v47, %v4672_v38  ;;  %v5195_v9 = vadd.f32 %v4843_v47, %v4676_v37 }
 0x29a   : > { %6650 = vst [vmem:[#allocation84_spill] sm:$0xff] %v5159_v34  ;;  %6651 = vst [vmem:[#allocation85_spill] sm:$0xff] %v5163_v7  ;;  %v5199_v5 = vadd.f32 %v4843_v47, %v4680_v40  ;;  %v5203_v33 = vadd.f32 %v4843_v47, %v4684_v43  ;;  %v5207_v24 = vadd.f32 %v4843_v47, %v4688_v46 }
 0x29b   : > { %6652 = vst [vmem:[#allocation86_spill] sm:$0xff] %v5167_v2  ;;  %6653 = vst [vmem:[#allocation87_spill] sm:$0xff] %v5171_v25  ;;  %v5211_v38 = vadd.f32 %v4843_v47, %v4692_v49  ;;  %v5215_v37 = vadd.f32 %v4843_v47, %v4696_v52  ;;  %v5219_v40 = vadd.f32 %v4843_v47, %v4700_v55 }
 0x29c   : > { %6654 = vst [vmem:[#allocation88_spill] sm:$0xff] %v5175_v35  ;;  %6655 = vst [vmem:[#allocation89_spill] sm:$0xff] %v5179_v50  ;;  %v5223_v43 = vadd.f32 %v4843_v47, %v4704_v58 }
 0x29d   : > { %6656 = vst [vmem:[#allocation90_spill] sm:$0xff] %v5183_v51  ;;  %6657 = vst [vmem:[#allocation91_spill] sm:$0xff] %v5187_v56 }
 0x29e   : > { %6658 = vst [vmem:[#allocation92_spill] sm:$0xff] %v5191_v15  ;;  %6659 = vst [vmem:[#allocation93_spill] sm:$0xff] %v5195_v9 }
 0x29f   : > { %6660 = vst [vmem:[#allocation94_spill] sm:$0xff] %v5199_v5  ;;  %6661 = vst [vmem:[#allocation95_spill] sm:$0xff] %v5203_v33  ;;  %v6667_v33 = vld [vmem:[#allocation75_spill] sm:$0xff] }
 0x2a0   : > { %6662 = vst [vmem:[#allocation96_spill] sm:$0xff] %v5207_v24  ;;  %6663 = vst [vmem:[#allocation97_spill] sm:$0xff] %v5211_v38  ;;  %v5227_v46 = vadd.f32 %v4843_v47, %v6667_v33  ;;  %v6669_v24 = vld [vmem:[#allocation76_spill] sm:$0xff]  ;;  %v6671_v38 = vld [vmem:[#allocation77_spill] sm:$0xff] }
 0x2a1   : > { %6664 = vst [vmem:[#allocation98_spill] sm:$0xff] %v5215_v37  ;;  %6665 = vst [vmem:[#allocation99_spill] sm:$0xff] %v5219_v40  ;;  %v5231_v49 = vadd.f32 %v4843_v47, %v6669_v24  ;;  %v5235_v52 = vadd.f32 %v4843_v47, %v6671_v38  ;;  %v6673_v37 = vld [vmem:[#allocation78_spill] sm:$0xff]  ;;  %v6675_v40 = vld [vmem:[#allocation79_spill] sm:$0xff]  ;;  %v5251_v24 = vadd.f32 %v4843_v47, %v4732_v30 }
 0x2a2   : > { %6666 = vst [vmem:[#allocation100_spill] sm:$0xff] %v5223_v43  ;;  %6668 = vst [vmem:[#allocation75_spill] sm:$0xff] %v5227_v46  ;;  %v5239_v55 = vadd.f32 %v4843_v47, %v6673_v37  ;;  %v5243_v58 = vadd.f32 %v4843_v47, %v6675_v40  ;;  %v6677_v43 = vld [vmem:[#allocation80_spill] sm:$0xff]  ;;  %v5255_v38 = vadd.f32 %v4843_v47, %v4736_v36 }
 0x2a3   : > { %6670 = vst [vmem:[#allocation76_spill] sm:$0xff] %v5231_v49  ;;  %6672 = vst [vmem:[#allocation77_spill] sm:$0xff] %v5235_v52  ;;  %v5247_v33 = vadd.f32 %v4843_v47, %v6677_v43  ;;  %v5259_v37 = vadd.f32 %v4843_v47, %v4740_v42  ;;  %v5263_v40 = vadd.f32 %v4843_v47, %v4744_v48 }
 0x2a4   : > { %6674 = vst [vmem:[#allocation78_spill] sm:$0xff] %v5239_v55  ;;  %6676 = vst [vmem:[#allocation79_spill] sm:$0xff] %v5243_v58  ;;  %v5267_v43 = vadd.f32 %v4843_v47, %v4748_v57  ;;  %v5271_v30 = vadd.f32 %v4843_v47, %v4752_v61  ;;  %v5275_v36 = vadd.f32 %v4843_v47, %v4756_v4 }
 0x2a5   : > { %6678 = vst [vmem:[#allocation80_spill] sm:$0xff] %v5247_v33  ;;  %6679 = vst [vmem:[#allocation101_spill] sm:$0xff] %v5251_v24  ;;  %v5279_v42 = vadd.f32 %v4843_v47, %v4760_v8  ;;  %v5283_v48 = vadd.f32 %v4843_v47, %v4764_v12  ;;  %v5287_v57 = vadd.f32 %v4843_v47, %v4768_v17 }
 0x2a6   : > { %6680 = vst [vmem:[#allocation102_spill] sm:$0xff] %v5255_v38  ;;  %6681 = vst [vmem:[#allocation103_spill] sm:$0xff] %v5259_v37  ;;  %v5291_v61 = vadd.f32 %v4843_v47, %v4772_v21  ;;  %v5295_v4 = vadd.f32 %v4843_v47, %v4776_v59  ;;  %v5299_v8 = vadd.f32 %v4843_v47, %v4780_v6 }
 0x2a7   : > { %6682 = vst [vmem:[#allocation104_spill] sm:$0xff] %v5263_v40  ;;  %6683 = vst [vmem:[#allocation105_spill] sm:$0xff] %v5267_v43  ;;  %v5303_v12 = vadd.f32 %v4843_v47, %v4784_v16  ;;  %v5307_v17 = vadd.f32 %v4843_v47, %v4788_v19  ;;  %v5311_v21 = vadd.f32 %v4843_v47, %v4792_v1 }
 0x2a8   : > { %6684 = vst [vmem:[#allocation106_spill] sm:$0xff] %v5271_v30  ;;  %6685 = vst [vmem:[#allocation107_spill] sm:$0xff] %v5275_v36  ;;  %v5315_v59 = vadd.f32 %v4843_v47, %v4796_v45  ;;  %v5319_v6 = vadd.f32 %v4843_v47, %v4800_v28  ;;  %v5323_v16 = vadd.f32 %v4843_v47, %v4804_v62 }
 0x2a9   : > { %6686 = vst [vmem:[#allocation108_spill] sm:$0xff] %v5279_v42  ;;  %6687 = vst [vmem:[#allocation109_spill] sm:$0xff] %v5283_v48  ;;  %v5327_v19 = vadd.f32 %v4843_v47, %v4808_v14  ;;  %v5331_v1 = vadd.f32 %v4843_v47, %v4812_v29  ;;  %v5343_v62 = vadd.f32 %v4843_v47, %v4824_v10 }
 0x2aa   : > { %6688 = vst [vmem:[#allocation110_spill] sm:$0xff] %v5287_v57  ;;  %6689 = vst [vmem:[#allocation111_spill] sm:$0xff] %v5291_v61  ;;  %v5347_v14 = vadd.f32 %v4843_v47, %v4828_v11  ;;  %v5351_v29 = vadd.f32 %v4843_v47, %v4832_v32  ;;  %v5363_v10 = vadd.f32 %v4843_v47, %v4851_v26 }
 0x2ab   : > { %6690 = vst [vmem:[#allocation112_spill] sm:$0xff] %v5295_v4  ;;  %6691 = vst [vmem:[#allocation113_spill] sm:$0xff] %v5299_v8  ;;  %v5367_v11 = vadd.f32 %v4843_v47, %v4855_v3  ;;  %v5371_v32 = vadd.f32 %v4843_v47, %v4859_v18  ;;  %v6714_v3 = vld [vmem:[#allocation9_spill] sm:$0xff] }
 0x2ac   : > { %6692 = vst [vmem:[#allocation114_spill] sm:$0xff] %v5303_v12  ;;  %6693 = vst [vmem:[#allocation115_spill] sm:$0xff] %v5307_v17 }
 0x2ad   : > { %6694 = vst [vmem:[#allocation116_spill] sm:$0xff] %v5311_v21  ;;  %6695 = vst [vmem:[#allocation117_spill] sm:$0xff] %v5315_v59  ;;  %v6700_v21 = vld [vmem:[#allocation2_spill] sm:$0xff]  ;;  %v6702_v59 = vld [vmem:[#allocation3_spill] sm:$0xff] }
 0x2ae   : > { %6696 = vst [vmem:[#allocation118_spill] sm:$0xff] %v5319_v6  ;;  %6697 = vst [vmem:[#allocation119_spill] sm:$0xff] %v5323_v16  ;;  %v5335_v45 = vadd.f32 %v4843_v47, %v6700_v21  ;;  %v5339_v28 = vadd.f32 %v4843_v47, %v6702_v59  ;;  %v5355_v21 = vadd.f32 %v4843_v47, %v4836_v41  ;;  %v2494_v41 = vmul.f32 -1.442695, %v4867_v20  ;;  %v6717_v20 = vld [vmem:[#allocation12_spill] sm:$0xff] }
 0x2af   : > { %6698 = vst [vmem:[#allocation120_spill] sm:$0xff] %v5327_v19  ;;  %6699 = vst [vmem:[#allocation121_spill] sm:$0xff] %v5331_v1  ;;  %v5359_v59 = vadd.f32 %v4843_v47, %v4847_v13  ;;  %v2496_v13 = vmul.f32 -1.442695, %v4875_v31  ;;  %v6715_v47 = vld [vmem:[#allocation10_spill] sm:$0xff]  ;;  %v6718_v31 = vld [vmem:[#allocation13_spill] sm:$0xff] }
 0x2b0   : > { %6701 = vst [vmem:[#allocation2_spill] sm:$0xff] %v5335_v45  ;;  %6703 = vst [vmem:[#allocation3_spill] sm:$0xff] %v5339_v28  ;;  %v2500_v18 = vmul.f32 -1.442695, %v6715_v47 }
 0x2b1   : > { %6704 = vst [vmem:[#allocation122_spill] sm:$0xff] %v5343_v62  ;;  %6705 = vst [vmem:[#allocation123_spill] sm:$0xff] %v5347_v14 }
 0x2b2   : > { %6706 = vst [vmem:[#allocation124_spill] sm:$0xff] %v5351_v29  ;;  %6707 = vst [vmem:[#allocation125_spill] sm:$0xff] %v5355_v21  ;;  %v2493_v29 = vmul.f32 -1.442695, %v4863_v27  ;;  %v2495_v21 = vmul.f32 -1.442695, %v4871_v39 }
 0x2b3   : > { %6708 = vst [vmem:[#allocation126_spill] sm:$0xff] %v5359_v59  ;;  %6709 = vst [vmem:[#allocation127_spill] sm:$0xff] %v5363_v10  ;;  %v6712_v59 = vld [vmem:[#allocation8_spill] sm:$0xff]  ;;  %v6713_v10 = vld [vmem:[#allocation81_spill] sm:$0xff]  ;;  %v2502_v39 = vmul.f32 -1.442695, %v6717_v20 }
 0x2b4   : > { %6710 = vst [vmem:[#allocation128_spill] sm:$0xff] %v5367_v11  ;;  %6711 = vst [vmem:[#allocation129_spill] sm:$0xff] %v5371_v32  ;;  %2651 = vpow2.f32 %v2493_v29  ;;  %v2497_v26 = vmul.f32 -1.442695, %v6712_v59  ;;  %v2498_v14 = vmul.f32 -1.442695, %v6713_v10 }
 0x2b5   : > { %2653 = vpow2.f32 %v2494_v41  ;;  %v2499_v11 = vmul.f32 -1.442695, %v6714_v3  ;;  %v6716_v27 = vld [vmem:[#allocation11_spill] sm:$0xff]  ;;  %v2503_v29 = vmul.f32 -1.442695, %v6718_v31  ;;  %v6719_v59 = vld [vmem:[#allocation14_spill] sm:$0xff] }
 0x2b6   : > { %2655 = vpow2.f32 %v2495_v21  ;;  %v2501_v32 = vmul.f32 -1.442695, %v6716_v27  ;;  %v2504_v41 = vmul.f32 -1.442695, %v6719_v59  ;;  %v6720_v10 = vld [vmem:[#allocation15_spill] sm:$0xff]  ;;  %v6721_v3 = vld [vmem:[#allocation16_spill] sm:$0xff] }
 0x2b7   : > { %2657 = vpow2.f32 %v2496_v13  ;;  %v2505_v21 = vmul.f32 -1.442695, %v6720_v10  ;;  %v2506_v13 = vmul.f32 -1.442695, %v6721_v3 }
 0x2b8   : > { %2659 = vpow2.f32 %v2497_v26  ;;  %v6722_v26 = vld [vmem:[#allocation17_spill] sm:$0xff] }
 0x2b9   : > { %2661 = vpow2.f32 %v2498_v14  ;;  %v2507_v27 = vmul.f32 -1.442695, %v6722_v26 }
 0x2ba   : > { %2663 = vpow2.f32 %v2499_v11  ;;  %v6724_v11 = vld [vmem:[#allocation18_spill] sm:$0xff] }
 0x2bb   : > { %2665 = vpow2.f32 %v2500_v18  ;;  %v2508_v20 = vmul.f32 -1.442695, %v6724_v11  ;;  %v6726_v18 = vld [vmem:[#allocation19_spill] sm:$0xff] }
 0x2bc   : > { %2667 = vpow2.f32 %v2501_v32  ;;  %v2509_v32 = vmul.f32 -1.442695, %v6726_v18 }
 0x2bd   : > { %2669 = vpow2.f32 %v2502_v39  ;;  %v6728_v39 = vld [vmem:[#allocation20_spill] sm:$0xff] }
 0x2be   : > { %v5387_v62 = vpop.eup %2651  ;;  %2671 = vpow2.f32 %v2503_v29  ;;  %v2510_v3 = vmul.f32 -1.442695, %v6728_v39  ;;  %v6730_v29 = vld [vmem:[#allocation21_spill] sm:$0xff] }
 0x2bf   : > { %v5390_v14 = vpop.eup %2653  ;;  %2673 = vpow2.f32 %v2504_v41  ;;  %v2511_v26 = vmul.f32 -1.442695, %v6730_v29  ;;  %v6732_v41 = vld [vmem:[#allocation22_spill] sm:$0xff] }
 0x2c0   : > { %6723 = vst [vmem:[#allocation130_spill] sm:$0xff] %v5390_v14  ;;  %v5393_v31 = vpop.eup %2655  ;;  %2675 = vpow2.f32 %v2505_v21  ;;  %v2512_v11 = vmul.f32 -1.442695, %v6732_v41  ;;  %v6734_v21 = vld [vmem:[#allocation23_spill] sm:$0xff] }
 0x2c1   : > { %6725 = vst [vmem:[#allocation131_spill] sm:$0xff] %v5393_v31  ;;  %v5396_v59 = vpop.eup %2657  ;;  %2677 = vpow2.f32 %v2506_v13  ;;  %v2513_v18 = vmul.f32 -1.442695, %v6734_v21  ;;  %v6736_v13 = vld [vmem:[#allocation24_spill] sm:$0xff] }
 0x2c2   : > { %6727 = vst [vmem:[#allocation132_spill] sm:$0xff] %v5396_v59  ;;  %v5399_v10 = vpop.eup %2659  ;;  %2679 = vpow2.f32 %v2507_v27  ;;  %v2514_v39 = vmul.f32 -1.442695, %v6736_v13  ;;  %v6738_v27 = vld [vmem:[#allocation25_spill] sm:$0xff] }
 0x2c3   : > { %6729 = vst [vmem:[#allocation133_spill] sm:$0xff] %v5399_v10  ;;  %v5402_v47 = vpop.eup %2661  ;;  %2681 = vpow2.f32 %v2508_v20  ;;  %v2515_v29 = vmul.f32 -1.442695, %v6738_v27  ;;  %v6740_v20 = vld [vmem:[#allocation26_spill] sm:$0xff] }
 0x2c4   : > { %6731 = vst [vmem:[#allocation134_spill] sm:$0xff] %v5402_v47  ;;  %v5405_v14 = vpop.eup %2663  ;;  %2683 = vpow2.f32 %v2509_v32  ;;  %v2516_v41 = vmul.f32 -1.442695, %v6740_v20  ;;  %v6742_v32 = vld [vmem:[#allocation27_spill] sm:$0xff] }
 0x2c5   : > { %6733 = vst [vmem:[#allocation135_spill] sm:$0xff] %v5405_v14  ;;  %v5408_v31 = vpop.eup %2665  ;;  %2685 = vpow2.f32 %v2510_v3  ;;  %v2517_v21 = vmul.f32 -1.442695, %v6742_v32  ;;  %v6744_v3 = vld [vmem:[#allocation28_spill] sm:$0xff] }
 0x2c6   : > { %6735 = vst [vmem:[#allocation136_spill] sm:$0xff] %v5408_v31  ;;  %v5411_v59 = vpop.eup %2667  ;;  %2687 = vpow2.f32 %v2511_v26  ;;  %v2518_v13 = vmul.f32 -1.442695, %v6744_v3  ;;  %v6746_v26 = vld [vmem:[#allocation29_spill] sm:$0xff] }
 0x2c7   : > { %6737 = vst [vmem:[#allocation137_spill] sm:$0xff] %v5411_v59  ;;  %v5414_v10 = vpop.eup %2669  ;;  %2689 = vpow2.f32 %v2512_v11  ;;  %v2519_v27 = vmul.f32 -1.442695, %v6746_v26  ;;  %v6748_v11 = vld [vmem:[#allocation30_spill] sm:$0xff] }
 0x2c8   : > { %6739 = vst [vmem:[#allocation138_spill] sm:$0xff] %v5414_v10  ;;  %v5417_v47 = vpop.eup %2671  ;;  %2691 = vpow2.f32 %v2513_v18  ;;  %v2520_v20 = vmul.f32 -1.442695, %v6748_v11  ;;  %v6750_v18 = vld [vmem:[#allocation31_spill] sm:$0xff] }
 0x2c9   : > { %6741 = vst [vmem:[#allocation139_spill] sm:$0xff] %v5417_v47  ;;  %v5420_v14 = vpop.eup %2673  ;;  %2693 = vpow2.f32 %v2514_v39  ;;  %v2521_v32 = vmul.f32 -1.442695, %v6750_v18  ;;  %v6752_v39 = vld [vmem:[#allocation32_spill] sm:$0xff] }
 0x2ca   : > { %6743 = vst [vmem:[#allocation140_spill] sm:$0xff] %v5420_v14  ;;  %v5423_v31 = vpop.eup %2675  ;;  %2695 = vpow2.f32 %v2515_v29  ;;  %v2522_v3 = vmul.f32 -1.442695, %v6752_v39  ;;  %v6754_v29 = vld [vmem:[#allocation33_spill] sm:$0xff] }
 0x2cb   : > { %6745 = vst [vmem:[#allocation141_spill] sm:$0xff] %v5423_v31  ;;  %v5426_v59 = vpop.eup %2677  ;;  %2697 = vpow2.f32 %v2516_v41  ;;  %v2523_v26 = vmul.f32 -1.442695, %v6754_v29  ;;  %v6756_v41 = vld [vmem:[#allocation34_spill] sm:$0xff] }
 0x2cc   : > { %6747 = vst [vmem:[#allocation142_spill] sm:$0xff] %v5426_v59  ;;  %v5429_v10 = vpop.eup %2679  ;;  %2699 = vpow2.f32 %v2517_v21  ;;  %v2524_v11 = vmul.f32 -1.442695, %v6756_v41  ;;  %v6758_v21 = vld [vmem:[#allocation35_spill] sm:$0xff] }
 0x2cd   : > { %6749 = vst [vmem:[#allocation143_spill] sm:$0xff] %v5429_v10  ;;  %v5432_v47 = vpop.eup %2681  ;;  %2701 = vpow2.f32 %v2518_v13  ;;  %v2525_v18 = vmul.f32 -1.442695, %v6758_v21  ;;  %v6760_v13 = vld [vmem:[#allocation36_spill] sm:$0xff] }
 0x2ce   : > { %6751 = vst [vmem:[#allocation144_spill] sm:$0xff] %v5432_v47  ;;  %v5435_v14 = vpop.eup %2683  ;;  %2703 = vpow2.f32 %v2519_v27  ;;  %v2526_v39 = vmul.f32 -1.442695, %v6760_v13  ;;  %v6762_v27 = vld [vmem:[#allocation37_spill] sm:$0xff] }
 0x2cf   : > { %6753 = vst [vmem:[#allocation145_spill] sm:$0xff] %v5435_v14  ;;  %v5438_v31 = vpop.eup %2685  ;;  %2705 = vpow2.f32 %v2520_v20  ;;  %v2527_v29 = vmul.f32 -1.442695, %v6762_v27  ;;  %v6764_v20 = vld [vmem:[#allocation38_spill] sm:$0xff] }
 0x2d0   : > { %6755 = vst [vmem:[#allocation146_spill] sm:$0xff] %v5438_v31  ;;  %v5441_v59 = vpop.eup %2687  ;;  %2707 = vpow2.f32 %v2521_v32  ;;  %v2528_v41 = vmul.f32 -1.442695, %v6764_v20  ;;  %v6766_v32 = vld [vmem:[#allocation39_spill] sm:$0xff] }
 0x2d1   : > { %6757 = vst [vmem:[#allocation147_spill] sm:$0xff] %v5441_v59  ;;  %v5444_v10 = vpop.eup %2689  ;;  %2709 = vpow2.f32 %v2522_v3  ;;  %v2529_v21 = vmul.f32 -1.442695, %v6766_v32  ;;  %v6768_v3 = vld [vmem:[#allocation40_spill] sm:$0xff] }
 0x2d2   : > { %6759 = vst [vmem:[#allocation148_spill] sm:$0xff] %v5444_v10  ;;  %v5447_v47 = vpop.eup %2691  ;;  %2711 = vpow2.f32 %v2523_v26  ;;  %v2530_v13 = vmul.f32 -1.442695, %v6768_v3  ;;  %v6770_v26 = vld [vmem:[#allocation41_spill] sm:$0xff] }
 0x2d3   : > { %6761 = vst [vmem:[#allocation149_spill] sm:$0xff] %v5447_v47  ;;  %v5450_v14 = vpop.eup %2693  ;;  %2713 = vpow2.f32 %v2524_v11  ;;  %v2531_v27 = vmul.f32 -1.442695, %v6770_v26  ;;  %v6772_v11 = vld [vmem:[#allocation42_spill] sm:$0xff] }
 0x2d4   : > { %6763 = vst [vmem:[#allocation150_spill] sm:$0xff] %v5450_v14  ;;  %v5453_v31 = vpop.eup %2695  ;;  %2715 = vpow2.f32 %v2525_v18  ;;  %v2532_v20 = vmul.f32 -1.442695, %v6772_v11  ;;  %v6774_v18 = vld [vmem:[#allocation43_spill] sm:$0xff] }
 0x2d5   : > { %6765 = vst [vmem:[#allocation151_spill] sm:$0xff] %v5453_v31  ;;  %v5456_v59 = vpop.eup %2697  ;;  %2717 = vpow2.f32 %v2526_v39  ;;  %v2533_v32 = vmul.f32 -1.442695, %v6774_v18  ;;  %v6776_v39 = vld [vmem:[#allocation44_spill] sm:$0xff] }
 0x2d6   : > { %6767 = vst [vmem:[#allocation152_spill] sm:$0xff] %v5456_v59  ;;  %v5459_v10 = vpop.eup %2699  ;;  %2719 = vpow2.f32 %v2527_v29  ;;  %v2534_v3 = vmul.f32 -1.442695, %v6776_v39  ;;  %v6778_v29 = vld [vmem:[#allocation45_spill] sm:$0xff] }
 0x2d7   : > { %6769 = vst [vmem:[#allocation153_spill] sm:$0xff] %v5459_v10  ;;  %v5462_v47 = vpop.eup %2701  ;;  %2721 = vpow2.f32 %v2528_v41  ;;  %v2535_v26 = vmul.f32 -1.442695, %v6778_v29  ;;  %v6780_v41 = vld [vmem:[#allocation46_spill] sm:$0xff] }
 0x2d8   : > { %6771 = vst [vmem:[#allocation154_spill] sm:$0xff] %v5462_v47  ;;  %v5465_v14 = vpop.eup %2703  ;;  %2723 = vpow2.f32 %v2529_v21  ;;  %v2536_v11 = vmul.f32 -1.442695, %v6780_v41  ;;  %v6782_v21 = vld [vmem:[#allocation47_spill] sm:$0xff] }
 0x2d9   : > { %6773 = vst [vmem:[#allocation155_spill] sm:$0xff] %v5465_v14  ;;  %v5468_v31 = vpop.eup %2705  ;;  %2725 = vpow2.f32 %v2530_v13  ;;  %v2537_v18 = vmul.f32 -1.442695, %v6782_v21  ;;  %v6784_v13 = vld [vmem:[#allocation48_spill] sm:$0xff] }
 0x2da   : > { %6775 = vst [vmem:[#allocation156_spill] sm:$0xff] %v5468_v31  ;;  %v5471_v59 = vpop.eup %2707  ;;  %2727 = vpow2.f32 %v2531_v27  ;;  %v2538_v39 = vmul.f32 -1.442695, %v6784_v13  ;;  %v6786_v27 = vld [vmem:[#allocation49_spill] sm:$0xff] }
 0x2db   : > { %6777 = vst [vmem:[#allocation157_spill] sm:$0xff] %v5471_v59  ;;  %v5474_v10 = vpop.eup %2709  ;;  %2729 = vpow2.f32 %v2532_v20  ;;  %v2539_v29 = vmul.f32 -1.442695, %v6786_v27  ;;  %v6788_v20 = vld [vmem:[#allocation50_spill] sm:$0xff] }
 0x2dc   : > { %6779 = vst [vmem:[#allocation158_spill] sm:$0xff] %v5474_v10  ;;  %v5477_v47 = vpop.eup %2711  ;;  %2731 = vpow2.f32 %v2533_v32  ;;  %v2540_v41 = vmul.f32 -1.442695, %v6788_v20  ;;  %v6790_v32 = vld [vmem:[#allocation51_spill] sm:$0xff] }
 0x2dd   : > { %6781 = vst [vmem:[#allocation159_spill] sm:$0xff] %v5477_v47  ;;  %v5480_v14 = vpop.eup %2713  ;;  %2733 = vpow2.f32 %v2534_v3  ;;  %v2541_v21 = vmul.f32 -1.442695, %v6790_v32  ;;  %v6792_v3 = vld [vmem:[#allocation52_spill] sm:$0xff] }
 0x2de   : > { %6783 = vst [vmem:[#allocation160_spill] sm:$0xff] %v5480_v14  ;;  %v5483_v31 = vpop.eup %2715  ;;  %2735 = vpow2.f32 %v2535_v26  ;;  %v2542_v13 = vmul.f32 -1.442695, %v6792_v3  ;;  %v6794_v26 = vld [vmem:[#allocation53_spill] sm:$0xff] }
 0x2df   : > { %6785 = vst [vmem:[#allocation161_spill] sm:$0xff] %v5483_v31  ;;  %v5486_v59 = vpop.eup %2717  ;;  %2737 = vpow2.f32 %v2536_v11  ;;  %v2543_v27 = vmul.f32 -1.442695, %v6794_v26  ;;  %v6796_v11 = vld [vmem:[#allocation54_spill] sm:$0xff] }
 0x2e0   : > { %6787 = vst [vmem:[#allocation162_spill] sm:$0xff] %v5486_v59  ;;  %v5489_v10 = vpop.eup %2719  ;;  %2739 = vpow2.f32 %v2537_v18  ;;  %v2544_v20 = vmul.f32 -1.442695, %v6796_v11  ;;  %v6798_v18 = vld [vmem:[#allocation55_spill] sm:$0xff] }
 0x2e1   : > { %6789 = vst [vmem:[#allocation163_spill] sm:$0xff] %v5489_v10  ;;  %v5492_v47 = vpop.eup %2721  ;;  %2741 = vpow2.f32 %v2538_v39  ;;  %v2545_v32 = vmul.f32 -1.442695, %v6798_v18  ;;  %v6800_v39 = vld [vmem:[#allocation56_spill] sm:$0xff] }
 0x2e2   : > { %6791 = vst [vmem:[#allocation164_spill] sm:$0xff] %v5492_v47  ;;  %v5495_v14 = vpop.eup %2723  ;;  %2743 = vpow2.f32 %v2539_v29  ;;  %v2546_v3 = vmul.f32 -1.442695, %v6800_v39  ;;  %v6802_v29 = vld [vmem:[#allocation57_spill] sm:$0xff] }
 0x2e3   : > { %6793 = vst [vmem:[#allocation165_spill] sm:$0xff] %v5495_v14  ;;  %v5498_v31 = vpop.eup %2725  ;;  %2745 = vpow2.f32 %v2540_v41  ;;  %v2547_v26 = vmul.f32 -1.442695, %v6802_v29  ;;  %v6804_v41 = vld [vmem:[#allocation58_spill] sm:$0xff] }
 0x2e4   : > { %6795 = vst [vmem:[#allocation166_spill] sm:$0xff] %v5498_v31  ;;  %v5501_v59 = vpop.eup %2727  ;;  %2747 = vpow2.f32 %v2541_v21  ;;  %v2548_v11 = vmul.f32 -1.442695, %v6804_v41  ;;  %v6806_v21 = vld [vmem:[#allocation59_spill] sm:$0xff] }
 0x2e5   : > { %6797 = vst [vmem:[#allocation167_spill] sm:$0xff] %v5501_v59  ;;  %v5504_v10 = vpop.eup %2729  ;;  %2749 = vpow2.f32 %v2542_v13  ;;  %v2549_v18 = vmul.f32 -1.442695, %v6806_v21  ;;  %v6808_v13 = vld [vmem:[#allocation60_spill] sm:$0xff] }
 0x2e6   : > { %6799 = vst [vmem:[#allocation168_spill] sm:$0xff] %v5504_v10  ;;  %v5507_v47 = vpop.eup %2731  ;;  %2751 = vpow2.f32 %v2543_v27  ;;  %v2550_v39 = vmul.f32 -1.442695, %v6808_v13  ;;  %v6810_v27 = vld [vmem:[#allocation61_spill] sm:$0xff] }
 0x2e7   : > { %6801 = vst [vmem:[#allocation169_spill] sm:$0xff] %v5507_v47  ;;  %v5510_v14 = vpop.eup %2733  ;;  %2753 = vpow2.f32 %v2544_v20  ;;  %v2551_v29 = vmul.f32 -1.442695, %v6810_v27  ;;  %v6812_v20 = vld [vmem:[#allocation62_spill] sm:$0xff] }
 0x2e8   : > { %6803 = vst [vmem:[#allocation170_spill] sm:$0xff] %v5510_v14  ;;  %v5513_v31 = vpop.eup %2735  ;;  %2755 = vpow2.f32 %v2545_v32  ;;  %v2552_v41 = vmul.f32 -1.442695, %v6812_v20  ;;  %v6814_v32 = vld [vmem:[#allocation63_spill] sm:$0xff] }
 0x2e9   : > { %6805 = vst [vmem:[#allocation171_spill] sm:$0xff] %v5513_v31  ;;  %v5516_v59 = vpop.eup %2737  ;;  %2757 = vpow2.f32 %v2546_v3  ;;  %v2553_v21 = vmul.f32 -1.442695, %v6814_v32  ;;  %v6816_v3 = vld [vmem:[#allocation64_spill] sm:$0xff] }
 0x2ea   : > { %6807 = vst [vmem:[#allocation172_spill] sm:$0xff] %v5516_v59  ;;  %v5519_v10 = vpop.eup %2739  ;;  %2759 = vpow2.f32 %v2547_v26  ;;  %v2554_v13 = vmul.f32 -1.442695, %v6816_v3  ;;  %v6817_v26 = vld [vmem:[#allocation65_spill] sm:$0xff] }
 0x2eb   : > { %6809 = vst [vmem:[#allocation173_spill] sm:$0xff] %v5519_v10  ;;  %v5522_v47 = vpop.eup %2741  ;;  %2761 = vpow2.f32 %v2548_v11  ;;  %v2555_v27 = vmul.f32 -1.442695, %v6817_v26  ;;  %v6818_v11 = vld [vmem:[#allocation66_spill] sm:$0xff] }
 0x2ec   : > { %6811 = vst [vmem:[#allocation174_spill] sm:$0xff] %v5522_v47  ;;  %v5525_v14 = vpop.eup %2743  ;;  %2763 = vpow2.f32 %v2549_v18  ;;  %v2556_v20 = vmul.f32 -1.442695, %v6818_v11  ;;  %v6819_v18 = vld [vmem:[#allocation67_spill] sm:$0xff] }
 0x2ed   : > { %6813 = vst [vmem:[#allocation175_spill] sm:$0xff] %v5525_v14  ;;  %v5528_v31 = vpop.eup %2745  ;;  %2765 = vpow2.f32 %v2550_v39  ;;  %v2557_v32 = vmul.f32 -1.442695, %v6819_v18  ;;  %v6820_v39 = vld [vmem:[#allocation68_spill] sm:$0xff] }
 0x2ee   : > { %6815 = vst [vmem:[#allocation176_spill] sm:$0xff] %v5528_v31  ;;  %v5531_v59 = vpop.eup %2747  ;;  %2767 = vpow2.f32 %v2551_v29  ;;  %v2558_v3 = vmul.f32 -1.442695, %v6820_v39  ;;  %v2559_v29 = vmul.f32 -1.442695, %v5127_v23 }
 0x2ef   : > { %v5534_v10 = vpop.eup %2749  ;;  %2769 = vpow2.f32 %v2552_v41  ;;  %v2560_v41 = vmul.f32 -1.442695, %v5131_v22 }
 0x2f0   : > { %v5537_v47 = vpop.eup %2751  ;;  %2771 = vpow2.f32 %v2553_v21  ;;  %v2561_v21 = vmul.f32 -1.442695, %v5135_v54 }
 0x2f1   : > { %v5540_v14 = vpop.eup %2753  ;;  %2773 = vpow2.f32 %v2554_v13  ;;  %v2562_v13 = vmul.f32 -1.442695, %v5139_v60 }
 0x2f2   : > { %v5543_v31 = vpop.eup %2755  ;;  %2775 = vpow2.f32 %v2555_v27  ;;  %v2563_v27 = vmul.f32 -1.442695, %v5143_v63 }
 0x2f3   : > { %v5546_v26 = vpop.eup %2757  ;;  %2777 = vpow2.f32 %v2556_v20  ;;  %v2564_v20 = vmul.f32 -1.442695, %v5147_v0 }
 0x2f4   : > { %v5549_v11 = vpop.eup %2759  ;;  %2779 = vpow2.f32 %v2557_v32  ;;  %v2565_v32 = vmul.f32 -1.442695, %v5151_v53 }
 0x2f5   : > { %v5552_v18 = vpop.eup %2761  ;;  %2781 = vpow2.f32 %v2558_v3  ;;  %v2566_v3 = vmul.f32 -1.442695, %v5155_v44 }
 0x2f6   : > { %v5555_v39 = vpop.eup %2763  ;;  %2783 = vpow2.f32 %v2559_v29  ;;  %v2567_v29 = vmul.f32 -1.442695, %v5159_v34 }
 0x2f7   : > { %v5558_v23 = vpop.eup %2765  ;;  %2785 = vpow2.f32 %v2560_v41  ;;  %v2568_v41 = vmul.f32 -1.442695, %v5163_v7 }
 0x2f8   : > { %v5561_v22 = vpop.eup %2767  ;;  %2787 = vpow2.f32 %v2561_v21  ;;  %v2569_v21 = vmul.f32 -1.442695, %v5167_v2 }
 0x2f9   : > { %v5564_v54 = vpop.eup %2769  ;;  %2789 = vpow2.f32 %v2562_v13  ;;  %v2570_v13 = vmul.f32 -1.442695, %v5171_v25 }
 0x2fa   : > { %v5567_v60 = vpop.eup %2771  ;;  %2791 = vpow2.f32 %v2563_v27  ;;  %v2571_v27 = vmul.f32 -1.442695, %v5175_v35 }
 0x2fb   : > { %v5570_v63 = vpop.eup %2773  ;;  %2793 = vpow2.f32 %v2564_v20  ;;  %v2572_v20 = vmul.f32 -1.442695, %v5179_v50 }
 0x2fc   : > { %v5573_v0 = vpop.eup %2775  ;;  %2795 = vpow2.f32 %v2565_v32  ;;  %v2573_v32 = vmul.f32 -1.442695, %v5183_v51 }
 0x2fd   : > { %v5576_v53 = vpop.eup %2777  ;;  %2797 = vpow2.f32 %v2566_v3  ;;  %v2574_v3 = vmul.f32 -1.442695, %v5187_v56 }
 0x2fe   : > { %v5579_v44 = vpop.eup %2779  ;;  %2799 = vpow2.f32 %v2567_v29  ;;  %v2575_v29 = vmul.f32 -1.442695, %v5191_v15 }
 0x2ff   : > { %v5582_v34 = vpop.eup %2781  ;;  %2801 = vpow2.f32 %v2568_v41  ;;  %v2576_v41 = vmul.f32 -1.442695, %v5195_v9 }
 0x300   : > { %v5585_v7 = vpop.eup %2783  ;;  %2803 = vpow2.f32 %v2569_v21  ;;  %v2577_v21 = vmul.f32 -1.442695, %v5199_v5 }
 0x301   : > { %v5588_v2 = vpop.eup %2785  ;;  %2805 = vpow2.f32 %v2570_v13  ;;  %v6826_v13 = vld [vmem:[#allocation95_spill] sm:$0xff] }
 0x302   : > { %6821 = vst [vmem:[#allocation177_spill] sm:$0xff] %v5588_v2  ;;  %v5591_v25 = vpop.eup %2787  ;;  %2807 = vpow2.f32 %v2571_v27  ;;  %v2578_v56 = vmul.f32 -1.442695, %v6826_v13  ;;  %v6828_v27 = vld [vmem:[#allocation96_spill] sm:$0xff] }
 0x303   : > { %6822 = vst [vmem:[#allocation178_spill] sm:$0xff] %v5591_v25  ;;  %v5594_v35 = vpop.eup %2789  ;;  %2809 = vpow2.f32 %v2572_v20  ;;  %v2579_v15 = vmul.f32 -1.442695, %v6828_v27  ;;  %v6829_v20 = vld [vmem:[#allocation97_spill] sm:$0xff] }
 0x304   : > { %6823 = vst [vmem:[#allocation179_spill] sm:$0xff] %v5594_v35  ;;  %v5597_v50 = vpop.eup %2791  ;;  %2811 = vpow2.f32 %v2573_v32  ;;  %v2580_v9 = vmul.f32 -1.442695, %v6829_v20  ;;  %v6830_v32 = vld [vmem:[#allocation98_spill] sm:$0xff] }
 0x305   : > { %6824 = vst [vmem:[#allocation180_spill] sm:$0xff] %v5597_v50  ;;  %v5600_v51 = vpop.eup %2793  ;;  %2813 = vpow2.f32 %v2574_v3  ;;  %v2581_v5 = vmul.f32 -1.442695, %v6830_v32  ;;  %v6831_v3 = vld [vmem:[#allocation99_spill] sm:$0xff] }
 0x306   : > { %6825 = vst [vmem:[#allocation181_spill] sm:$0xff] %v5600_v51  ;;  %v5603_v2 = vpop.eup %2795  ;;  %2815 = vpow2.f32 %v2575_v29  ;;  %v2582_v13 = vmul.f32 -1.442695, %v6831_v3  ;;  %v6832_v29 = vld [vmem:[#allocation100_spill] sm:$0xff] }
 0x307   : > { %6827 = vst [vmem:[#allocation182_spill] sm:$0xff] %v5603_v2  ;;  %v5606_v25 = vpop.eup %2797  ;;  %2817 = vpow2.f32 %v2576_v41  ;;  %v2583_v27 = vmul.f32 -1.442695, %v6832_v29  ;;  %v2584_v41 = vmul.f32 -1.442695, %v5227_v46 }
 0x308   : > { %v5609_v35 = vpop.eup %2799  ;;  %2819 = vpow2.f32 %v2577_v21  ;;  %v2585_v21 = vmul.f32 -1.442695, %v5231_v49 }
 0x309   : > { %v5612_v50 = vpop.eup %2801  ;;  %2821 = vpow2.f32 %v2578_v56  ;;  %v2586_v56 = vmul.f32 -1.442695, %v5235_v52 }
 0x30a   : > { %v5615_v51 = vpop.eup %2803  ;;  %2823 = vpow2.f32 %v2579_v15  ;;  %v2587_v15 = vmul.f32 -1.442695, %v5239_v55 }
 0x30b   : > { %v5618_v2 = vpop.eup %2805  ;;  %2825 = vpow2.f32 %v2580_v9  ;;  %v2588_v9 = vmul.f32 -1.442695, %v5243_v58 }
 0x30c   : > { %v5621_v20 = vpop.eup %2807  ;;  %2827 = vpow2.f32 %v2581_v5  ;;  %v2589_v5 = vmul.f32 -1.442695, %v5247_v33 }
 0x30d   : > { %v5624_v32 = vpop.eup %2809  ;;  %2829 = vpow2.f32 %v2582_v13  ;;  %v2590_v13 = vmul.f32 -1.442695, %v5251_v24 }
 0x30e   : > { %v5627_v3 = vpop.eup %2811  ;;  %2831 = vpow2.f32 %v2583_v27  ;;  %v2591_v27 = vmul.f32 -1.442695, %v5255_v38 }
 0x30f   : > { %v5630_v29 = vpop.eup %2813  ;;  %2833 = vpow2.f32 %v2584_v41  ;;  %v2592_v41 = vmul.f32 -1.442695, %v5259_v37 }
 0x310   : > { %v5633_v46 = vpop.eup %2815  ;;  %2835 = vpow2.f32 %v2585_v21  ;;  %v2593_v21 = vmul.f32 -1.442695, %v5263_v40 }
 0x311   : > { %v5636_v49 = vpop.eup %2817  ;;  %2837 = vpow2.f32 %v2586_v56  ;;  %v2594_v56 = vmul.f32 -1.442695, %v5267_v43 }
 0x312   : > { %v5639_v52 = vpop.eup %2819  ;;  %2839 = vpow2.f32 %v2587_v15  ;;  %v2595_v15 = vmul.f32 -1.442695, %v5271_v30 }
 0x313   : > { %v5642_v55 = vpop.eup %2821  ;;  %2841 = vpow2.f32 %v2588_v9  ;;  %v2596_v9 = vmul.f32 -1.442695, %v5275_v36 }
 0x314   : > { %v5645_v58 = vpop.eup %2823  ;;  %2843 = vpow2.f32 %v2589_v5  ;;  %v2597_v5 = vmul.f32 -1.442695, %v5279_v42 }
 0x315   : > { %v5648_v33 = vpop.eup %2825  ;;  %2845 = vpow2.f32 %v2590_v13  ;;  %v2598_v13 = vmul.f32 -1.442695, %v5283_v48 }
 0x316   : > { %v5651_v24 = vpop.eup %2827  ;;  %2847 = vpow2.f32 %v2591_v27  ;;  %v2599_v27 = vmul.f32 -1.442695, %v5287_v57 }
 0x317   : > { %v5654_v38 = vpop.eup %2829  ;;  %2849 = vpow2.f32 %v2592_v41  ;;  %v2600_v41 = vmul.f32 -1.442695, %v5291_v61 }
 0x318   : > { %v5657_v37 = vpop.eup %2831  ;;  %2851 = vpow2.f32 %v2593_v21  ;;  %v2601_v21 = vmul.f32 -1.442695, %v5295_v4 }
 0x319   : > { %v5660_v40 = vpop.eup %2833  ;;  %2853 = vpow2.f32 %v2594_v56  ;;  %v2602_v56 = vmul.f32 -1.442695, %v5299_v8 }
 0x31a   : > { %v5663_v43 = vpop.eup %2835  ;;  %2855 = vpow2.f32 %v2595_v15  ;;  %v2603_v15 = vmul.f32 -1.442695, %v5303_v12 }
 0x31b   : > { %v5666_v30 = vpop.eup %2837  ;;  %2857 = vpow2.f32 %v2596_v9  ;;  %v2604_v9 = vmul.f32 -1.442695, %v5307_v17 }
 0x31c   : > { %v5669_v36 = vpop.eup %2839  ;;  %2859 = vpow2.f32 %v2597_v5  ;;  %v6835_v5 = vld [vmem:[#allocation116_spill] sm:$0xff] }
 0x31d   : > { %6833 = vst [vmem:[#allocation183_spill] sm:$0xff] %v5669_v36  ;;  %v5672_v42 = vpop.eup %2841  ;;  %2861 = vpow2.f32 %v2598_v13  ;;  %v2605_v4 = vmul.f32 -1.442695, %v6835_v5  ;;  %v6837_v13 = vld [vmem:[#allocation117_spill] sm:$0xff] }
 0x31e   : > { %6834 = vst [vmem:[#allocation184_spill] sm:$0xff] %v5672_v42  ;;  %v5675_v48 = vpop.eup %2843  ;;  %2863 = vpow2.f32 %v2599_v27  ;;  %v2606_v8 = vmul.f32 -1.442695, %v6837_v13  ;;  %v2607_v27 = vmul.f32 -1.442695, %v5319_v6 }
 0x31f   : > { %v5678_v57 = vpop.eup %2845  ;;  %2865 = vpow2.f32 %v2600_v41  ;;  %v2608_v41 = vmul.f32 -1.442695, %v5323_v16 }
 0x320   : > { %v5681_v61 = vpop.eup %2847  ;;  %2867 = vpow2.f32 %v2601_v21  ;;  %v2609_v21 = vmul.f32 -1.442695, %v5327_v19 }
 0x321   : > { %v5684_v36 = vpop.eup %2849  ;;  %2869 = vpow2.f32 %v2602_v56  ;;  %v2610_v56 = vmul.f32 -1.442695, %v5331_v1 }
 0x322   : > { %6836 = vst [vmem:[#allocation185_spill] sm:$0xff] %v5684_v36  ;;  %v5687_v42 = vpop.eup %2851  ;;  %2871 = vpow2.f32 %v2603_v15  ;;  %v2611_v15 = vmul.f32 -1.442695, %v5335_v45 }
 0x323   : > { %6838 = vst [vmem:[#allocation186_spill] sm:$0xff] %v5687_v42  ;;  %v5690_v12 = vpop.eup %2853  ;;  %2873 = vpow2.f32 %v2604_v9  ;;  %v2612_v9 = vmul.f32 -1.442695, %v5339_v28 }
 0x324   : > { %6839 = vst [vmem:[#allocation187_spill] sm:$0xff] %v5690_v12  ;;  %v5693_v17 = vpop.eup %2855  ;;  %2875 = vpow2.f32 %v2605_v4  ;;  %v6845_v4 = vld [vmem:[#allocation122_spill] sm:$0xff] }
 0x325   : > { %6840 = vst [vmem:[#allocation188_spill] sm:$0xff] %v5693_v17  ;;  %v5696_v5 = vpop.eup %2857  ;;  %2877 = vpow2.f32 %v2606_v8  ;;  %v2613_v19 = vmul.f32 -1.442695, %v6845_v4  ;;  %v6847_v8 = vld [vmem:[#allocation123_spill] sm:$0xff]  ;;  %v6892_v12 = vld [vmem:[#allocation146_spill] sm:$0xff] }
 0x326   : > { %6841 = vst [vmem:[#allocation189_spill] sm:$0xff] %v5696_v5  ;;  %v5699_v13 = vpop.eup %2859  ;;  %2879 = vpow2.f32 %v2607_v27  ;;  %v2614_v1 = vmul.f32 -1.442695, %v6847_v8  ;;  %v6849_v27 = vld [vmem:[#allocation124_spill] sm:$0xff]  ;;  %v1804_v42 = vadd.f32 1.0, %v6892_v12 }
 0x327   : > { %6842 = vst [vmem:[#allocation190_spill] sm:$0xff] %v5699_v13  ;;  %v5702_v6 = vpop.eup %2861  ;;  %2881 = vpow2.f32 %v2608_v41  ;;  %v2615_v45 = vmul.f32 -1.442695, %v6849_v27  ;;  %v6851_v41 = vld [vmem:[#allocation125_spill] sm:$0xff]  ;;  %v6897_v12 = vld [vmem:[#allocation8_spill] sm:$0xff] }
 0x328   : > { %6843 = vst [vmem:[#allocation191_spill] sm:$0xff] %v5702_v6  ;;  %v5705_v16 = vpop.eup %2863  ;;  %2883 = vpow2.f32 %v2609_v21  ;;  %v2616_v28 = vmul.f32 -1.442695, %v6851_v41  ;;  %v6853_v21 = vld [vmem:[#allocation126_spill] sm:$0xff] }
 0x329   : > { %6844 = vst [vmem:[#allocation192_spill] sm:$0xff] %v5705_v16  ;;  %v5708_v17 = vpop.eup %2865  ;;  %2885 = vpow2.f32 %v2610_v56  ;;  %v2617_v4 = vmul.f32 -1.442695, %v6853_v21  ;;  %v6855_v56 = vld [vmem:[#allocation127_spill] sm:$0xff] }
 0x32a   : > { %6846 = vst [vmem:[#allocation193_spill] sm:$0xff] %v5708_v17  ;;  %v5711_v5 = vpop.eup %2867  ;;  %2887 = vpow2.f32 %v2611_v15  ;;  %v2618_v8 = vmul.f32 -1.442695, %v6855_v56  ;;  %v6857_v15 = vld [vmem:[#allocation128_spill] sm:$0xff] }
 0x32b   : > { %6848 = vst [vmem:[#allocation194_spill] sm:$0xff] %v5711_v5  ;;  %v5714_v13 = vpop.eup %2869  ;;  %2889 = vpow2.f32 %v2612_v9  ;;  %v2619_v27 = vmul.f32 -1.442695, %v6857_v15  ;;  %v6859_v9 = vld [vmem:[#allocation129_spill] sm:$0xff] }
 0x32c   : > { %6850 = vst [vmem:[#allocation195_spill] sm:$0xff] %v5714_v13  ;;  %v5717_v6 = vpop.eup %2871  ;;  %2891 = vpow2.f32 %v2613_v19  ;;  %v2620_v41 = vmul.f32 -1.442695, %v6859_v9  ;;  %v1787_v19 = vadd.f32 1.0, %v5387_v62 }
 0x32d   : > { %6852 = vst [vmem:[#allocation196_spill] sm:$0xff] %v5717_v6  ;;  %v5720_v16 = vpop.eup %2873  ;;  %2893 = vpow2.f32 %v2614_v1  ;;  %v6862_v1 = vld [vmem:[#allocation130_spill] sm:$0xff] }
 0x32e   : > { %6854 = vst [vmem:[#allocation197_spill] sm:$0xff] %v5720_v16  ;;  %v5723_v17 = vpop.eup %2875  ;;  %2895 = vpow2.f32 %v2615_v45  ;;  %v1788_v56 = vadd.f32 1.0, %v6862_v1  ;;  %v6864_v45 = vld [vmem:[#allocation131_spill] sm:$0xff] }
 0x32f   : > { %6856 = vst [vmem:[#allocation198_spill] sm:$0xff] %v5723_v17  ;;  %v5726_v5 = vpop.eup %2877  ;;  %2897 = vpow2.f32 %v2616_v28  ;;  %v1789_v15 = vadd.f32 1.0, %v6864_v45  ;;  %v6866_v28 = vld [vmem:[#allocation132_spill] sm:$0xff] }
 0x330   : > { %6858 = vst [vmem:[#allocation199_spill] sm:$0xff] %v5726_v5  ;;  %v5729_v13 = vpop.eup %2879  ;;  %2899 = vpow2.f32 %v2617_v4  ;;  %v1790_v9 = vadd.f32 1.0, %v6866_v28  ;;  %v6868_v4 = vld [vmem:[#allocation133_spill] sm:$0xff] }
 0x331   : > { %6860 = vst [vmem:[#allocation200_spill] sm:$0xff] %v5729_v13  ;;  %v5732_v21 = vpop.eup %2881  ;;  %2901 = vpow2.f32 %v2618_v8  ;;  %v1791_v13 = vadd.f32 1.0, %v6868_v4  ;;  %v6870_v8 = vld [vmem:[#allocation134_spill] sm:$0xff] }
 0x332   : > { %6861 = vst [vmem:[#allocation201_spill] sm:$0xff] %v5732_v21  ;;  %v5735_v16 = vpop.eup %2883  ;;  %2903 = vpow2.f32 %v2619_v27  ;;  %v1792_v21 = vadd.f32 1.0, %v6870_v8  ;;  %v6872_v27 = vld [vmem:[#allocation135_spill] sm:$0xff] }
 0x333   : > { %6863 = vst [vmem:[#allocation130_spill] sm:$0xff] %v5735_v16  ;;  %v5738_v17 = vpop.eup %2885  ;;  %2905 = vpow2.f32 %v2620_v41  ;;  %v1793_v16 = vadd.f32 1.0, %v6872_v27  ;;  %v6874_v41 = vld [vmem:[#allocation136_spill] sm:$0xff]  ;;  %v6880_v27 = vld [vmem:[#allocation139_spill] sm:$0xff] }
 0x334   : > { %6865 = vst [vmem:[#allocation131_spill] sm:$0xff] %v5738_v17  ;;  %v5741_v5 = vpop.eup %2887  ;;  %2907 = vrcp.f32 %v1787_v19  ;;  %v1794_v17 = vadd.f32 1.0, %v6874_v41  ;;  %v6882_v41 = vld [vmem:[#allocation140_spill] sm:$0xff] }
 0x335   : > { %6867 = vst [vmem:[#allocation132_spill] sm:$0xff] %v5741_v5  ;;  %v5744_v62 = vpop.eup %2889  ;;  %2909 = vrcp.f32 %v1788_v56  ;;  %v6876_v5 = vld [vmem:[#allocation137_spill] sm:$0xff] }
 0x336   : > { %6869 = vst [vmem:[#allocation133_spill] sm:$0xff] %v5744_v62  ;;  %v5747_v1 = vpop.eup %2891  ;;  %2911 = vrcp.f32 %v1789_v15  ;;  %v1795_v4 = vadd.f32 1.0, %v6876_v5  ;;  %v6878_v62 = vld [vmem:[#allocation138_spill] sm:$0xff]  ;;  %v1797_v15 = vadd.f32 1.0, %v6880_v27  ;;  %v6884_v5 = vld [vmem:[#allocation141_spill] sm:$0xff] }
 0x337   : > { %6871 = vst [vmem:[#allocation134_spill] sm:$0xff] %v5747_v1  ;;  %v5750_v45 = vpop.eup %2893  ;;  %2913 = vrcp.f32 %v1790_v9  ;;  %v1796_v56 = vadd.f32 1.0, %v6878_v62  ;;  %v1798_v9 = vadd.f32 1.0, %v6882_v41  ;;  %v6886_v1 = vld [vmem:[#allocation142_spill] sm:$0xff]  ;;  %v6888_v41 = vld [vmem:[#allocation144_spill] sm:$0xff] }
 0x338   : > { %6873 = vst [vmem:[#allocation135_spill] sm:$0xff] %v5750_v45  ;;  %v5753_v28 = vpop.eup %2895  ;;  %2915 = vrcp.f32 %v1791_v13  ;;  %v1799_v13 = vadd.f32 1.0, %v6884_v5  ;;  %v1800_v62 = vadd.f32 1.0, %v6886_v1  ;;  %v1802_v5 = vadd.f32 1.0, %v6888_v41 }
 0x339   : > { %6875 = vst [vmem:[#allocation136_spill] sm:$0xff] %v5753_v28  ;;  %v5756_v19 = vpop.eup %2897  ;;  %2917 = vrcp.f32 %v1792_v21 }
 0x33a   : > { %6877 = vst [vmem:[#allocation137_spill] sm:$0xff] %v5756_v19  ;;  %v5759_v8 = vpop.eup %2899  ;;  %2919 = vrcp.f32 %v1793_v16  ;;  %v6887_v16 = vld [vmem:[#allocation143_spill] sm:$0xff] }
 0x33b   : > { %6879 = vst [vmem:[#allocation138_spill] sm:$0xff] %v5759_v8  ;;  %v5762_v45 = vpop.eup %2901  ;;  %2921 = vrcp.f32 %v1794_v17  ;;  %v1801_v17 = vadd.f32 1.0, %v6887_v16  ;;  %v6893_v16 = vld [vmem:[#allocation6_spill] sm:$0xff] }
 0x33c   : > { %6881 = vst [vmem:[#allocation139_spill] sm:$0xff] %v5762_v45  ;;  %v5765_v28 = vpop.eup %2903  ;;  %2923 = vrcp.f32 %v1795_v4  ;;  %v6889_v4 = vld [vmem:[#allocation4_spill] sm:$0xff]  ;;  %v6891_v45 = vld [vmem:[#allocation5_spill] sm:$0xff] }
 0x33d   : > { %6883 = vst [vmem:[#allocation140_spill] sm:$0xff] %v5765_v28  ;;  %v5768_v19 = vpop.eup %2905  ;;  %2925 = vrcp.f32 %v1796_v56  ;;  %v6890_v56 = vld [vmem:[#allocation145_spill] sm:$0xff] }
 0x33e   : > { %6885 = vst [vmem:[#allocation141_spill] sm:$0xff] %v5768_v19  ;;  %v2908_v21 = vpop.eup %2907  ;;  %2927 = vrcp.f32 %v1797_v15  ;;  %v1803_v28 = vadd.f32 1.0, %v6890_v56 }
 0x33f   : > { %v2910_v27 = vpop.eup %2909  ;;  %2929 = vrcp.f32 %v1798_v9  ;;  %v2171_v19 = vmul.f32 %v2908_v21, %v6889_v4  ;;  %v6894_v9 = vld [vmem:[#allocation147_spill] sm:$0xff] }
 0x340   : > { %v2912_v1 = vpop.eup %2911  ;;  %2931 = vrcp.f32 %v1799_v13  ;;  %v2172_v8 = vmul.f32 %v2910_v27, %v6891_v45  ;;  %v1805_v36 = vadd.f32 1.0, %v6894_v9  ;;  %v6895_v21 = vld [vmem:[#allocation7_spill] sm:$0xff]  ;;  %v6896_v45 = vld [vmem:[#allocation148_spill] sm:$0xff] }
 0x341   : > { %v2914_v6 = vpop.eup %2913  ;;  %2933 = vrcp.f32 %v1800_v62  ;;  %v2173_v15 = vmul.f32 %v2912_v1, %v6893_v16  ;;  %2299 = vst.msk [vmem:[%s5776_s29] sm:$0xff] %vm326_vm0, %v2171_v19  ;;  %v1806_v27 = vadd.f32 1.0, %v6896_v45  ;;  %v6898_v19 = vld [vmem:[#allocation149_spill] sm:$0xff] }
 0x342   : > { %v2916_v41 = vpop.eup %2915  ;;  %2935 = vrcp.f32 %v1801_v17  ;;  %v2174_v4 = vmul.f32 %v2914_v6, %v6895_v21  ;;  %2300 = vst.msk [vmem:[%s5776_s29 + $0x8] sm:$0xff] %vm326_vm0, %v2172_v8  ;;  %v1807_v56 = vadd.f32 1.0, %v6898_v19  ;;  %v6899_v16 = vld [vmem:[#allocation81_spill] sm:$0xff]  ;;  %v6900_v8 = vld [vmem:[#allocation150_spill] sm:$0xff] }
 0x343   : > { %v2918_v13 = vpop.eup %2917  ;;  %2937 = vrcp.f32 %v1802_v5  ;;  %v2175_v62 = vmul.f32 %v2916_v41, %v6897_v12  ;;  %2301 = vst.msk [vmem:[%s5776_s29 + $0x10] sm:$0xff] %vm326_vm0, %v2173_v15  ;;  %v1808_v9 = vadd.f32 1.0, %v6900_v8  ;;  %v6901_v21 = vld [vmem:[#allocation9_spill] sm:$0xff]  ;;  %v6902_v15 = vld [vmem:[#allocation151_spill] sm:$0xff]  ;;  %v6903_v12 = vld [vmem:[#allocation10_spill] sm:$0xff] }
 0x344   : > { %v2920_v1 = vpop.eup %2919  ;;  %2939 = vrcp.f32 %v1803_v28  ;;  %v2176_v17 = vmul.f32 %v2918_v13, %v6899_v16  ;;  %2302 = vst.msk [vmem:[%s5776_s29 + $0x18] sm:$0xff] %vm326_vm0, %v2174_v4  ;;  %v1809_v45 = vadd.f32 1.0, %v6902_v15  ;;  %v6904_v4 = vld [vmem:[#allocation152_spill] sm:$0xff]  ;;  %v6905_v16 = vld [vmem:[#allocation11_spill] sm:$0xff] }
 0x345   : > { %v2922_v6 = vpop.eup %2921  ;;  %2941 = vrcp.f32 %v1804_v42  ;;  %v2177_v5 = vmul.f32 %v2920_v1, %v6901_v21  ;;  %2303 = vst.msk [vmem:[%s5776_s29 + $0x20] sm:$0xff] %vm326_vm0, %v2175_v62  ;;  %v1810_v19 = vadd.f32 1.0, %v6904_v4  ;;  %v6906_v62 = vld [vmem:[#allocation153_spill] sm:$0xff]  ;;  %v6907_v21 = vld [vmem:[#allocation12_spill] sm:$0xff] }
 0x346   : > { %v2924_v41 = vpop.eup %2923  ;;  %2943 = vrcp.f32 %v1805_v36  ;;  %v2178_v28 = vmul.f32 %v2922_v6, %v6903_v12  ;;  %2304 = vst.msk [vmem:[%s5776_s29 + $0x28] sm:$0xff] %vm326_vm0, %v2176_v17  ;;  %v1811_v8 = vadd.f32 1.0, %v6906_v62  ;;  %v6908_v17 = vld [vmem:[#allocation154_spill] sm:$0xff]  ;;  %v6909_v12 = vld [vmem:[#allocation13_spill] sm:$0xff] }
 0x347   : > { %v2926_v13 = vpop.eup %2925  ;;  %2945 = vrcp.f32 %v1806_v27  ;;  %v2179_v42 = vmul.f32 %v2924_v41, %v6905_v16  ;;  %2305 = vst.msk [vmem:[%s5776_s29 + $0x30] sm:$0xff] %vm326_vm0, %v2177_v5  ;;  %v1812_v15 = vadd.f32 1.0, %v6908_v17  ;;  %v6910_v5 = vld [vmem:[#allocation155_spill] sm:$0xff]  ;;  %v6911_v16 = vld [vmem:[#allocation14_spill] sm:$0xff] }
 0x348   : > { %v2928_v1 = vpop.eup %2927  ;;  %2947 = vrcp.f32 %v1807_v56  ;;  %v2180_v36 = vmul.f32 %v2926_v13, %v6907_v21  ;;  %2306 = vst.msk [vmem:[%s5776_s29 + $0x38] sm:$0xff] %vm326_vm0, %v2178_v28  ;;  %v1813_v4 = vadd.f32 1.0, %v6910_v5  ;;  %v6912_v28 = vld [vmem:[#allocation156_spill] sm:$0xff]  ;;  %v6913_v21 = vld [vmem:[#allocation15_spill] sm:$0xff] }
 0x349   : > { %v2930_v6 = vpop.eup %2929  ;;  %2949 = vrcp.f32 %v1808_v9  ;;  %v2181_v27 = vmul.f32 %v2928_v1, %v6909_v12  ;;  %2307 = vst.msk [vmem:[%s5776_s29 + $0x40] sm:$0xff] %vm326_vm0, %v2179_v42  ;;  %v1814_v62 = vadd.f32 1.0, %v6912_v28  ;;  %v6914_v42 = vld [vmem:[#allocation157_spill] sm:$0xff]  ;;  %v6915_v12 = vld [vmem:[#allocation16_spill] sm:$0xff] }
 0x34a   : > { %v2932_v41 = vpop.eup %2931  ;;  %2951 = vrcp.f32 %v1809_v45  ;;  %v2182_v56 = vmul.f32 %v2930_v6, %v6911_v16  ;;  %2308 = vst.msk [vmem:[%s5776_s29 + $0x48] sm:$0xff] %vm326_vm0, %v2180_v36  ;;  %v1815_v17 = vadd.f32 1.0, %v6914_v42  ;;  %v6916_v36 = vld [vmem:[#allocation158_spill] sm:$0xff]  ;;  %v6917_v16 = vld [vmem:[#allocation17_spill] sm:$0xff] }
 0x34b   : > { %v2934_v13 = vpop.eup %2933  ;;  %2953 = vrcp.f32 %v1810_v19  ;;  %v2183_v9 = vmul.f32 %v2932_v41, %v6913_v21  ;;  %2309 = vst.msk [vmem:[%s5776_s29 + $0x50] sm:$0xff] %vm326_vm0, %v2181_v27  ;;  %v1816_v5 = vadd.f32 1.0, %v6916_v36  ;;  %v6918_v27 = vld [vmem:[#allocation159_spill] sm:$0xff]  ;;  %v6919_v21 = vld [vmem:[#allocation18_spill] sm:$0xff] }
 0x34c   : > { %v2936_v1 = vpop.eup %2935  ;;  %2955 = vrcp.f32 %v1811_v8  ;;  %v2184_v45 = vmul.f32 %v2934_v13, %v6915_v12  ;;  %2310 = vst.msk [vmem:[%s5776_s29 + $0x58] sm:$0xff] %vm326_vm0, %v2182_v56  ;;  %v1817_v28 = vadd.f32 1.0, %v6918_v27  ;;  %v6920_v56 = vld [vmem:[#allocation160_spill] sm:$0xff]  ;;  %v6921_v12 = vld [vmem:[#allocation19_spill] sm:$0xff] }
 0x34d   : > { %v2938_v6 = vpop.eup %2937  ;;  %2957 = vrcp.f32 %v1812_v15  ;;  %v2185_v19 = vmul.f32 %v2936_v1, %v6917_v16  ;;  %2311 = vst.msk [vmem:[%s5776_s29 + $0x60] sm:$0xff] %vm326_vm0, %v2183_v9  ;;  %v1818_v42 = vadd.f32 1.0, %v6920_v56  ;;  %v6922_v9 = vld [vmem:[#allocation161_spill] sm:$0xff]  ;;  %v6923_v16 = vld [vmem:[#allocation20_spill] sm:$0xff] }
 0x34e   : > { %v2940_v41 = vpop.eup %2939  ;;  %2959 = vrcp.f32 %v1813_v4  ;;  %v2186_v8 = vmul.f32 %v2938_v6, %v6919_v21  ;;  %2312 = vst.msk [vmem:[%s5776_s29 + $0x68] sm:$0xff] %vm326_vm0, %v2184_v45  ;;  %v1819_v36 = vadd.f32 1.0, %v6922_v9  ;;  %v6924_v45 = vld [vmem:[#allocation162_spill] sm:$0xff]  ;;  %v6925_v21 = vld [vmem:[#allocation21_spill] sm:$0xff] }
 0x34f   : > { %v2942_v13 = vpop.eup %2941  ;;  %2961 = vrcp.f32 %v1814_v62  ;;  %v2187_v15 = vmul.f32 %v2940_v41, %v6921_v12  ;;  %2313 = vst.msk [vmem:[%s5776_s29 + $0x70] sm:$0xff] %vm326_vm0, %v2185_v19  ;;  %v1820_v27 = vadd.f32 1.0, %v6924_v45  ;;  %v6926_v19 = vld [vmem:[#allocation163_spill] sm:$0xff]  ;;  %v6927_v12 = vld [vmem:[#allocation22_spill] sm:$0xff] }
 0x350   : > { %v2944_v1 = vpop.eup %2943  ;;  %2963 = vrcp.f32 %v1815_v17  ;;  %v2188_v4 = vmul.f32 %v2942_v13, %v6923_v16  ;;  %2314 = vst.msk [vmem:[%s5776_s29 + $0x78] sm:$0xff] %vm326_vm0, %v2186_v8  ;;  %v1821_v56 = vadd.f32 1.0, %v6926_v19  ;;  %v6928_v8 = vld [vmem:[#allocation164_spill] sm:$0xff]  ;;  %v6929_v16 = vld [vmem:[#allocation23_spill] sm:$0xff] }
 0x351   : > { %v2946_v6 = vpop.eup %2945  ;;  %2965 = vrcp.f32 %v1816_v5  ;;  %v2189_v62 = vmul.f32 %v2944_v1, %v6925_v21  ;;  %2315 = vst.msk [vmem:[%s5776_s29 + $0x80] sm:$0xff] %vm326_vm0, %v2187_v15  ;;  %v1822_v9 = vadd.f32 1.0, %v6928_v8  ;;  %v6930_v15 = vld [vmem:[#allocation165_spill] sm:$0xff]  ;;  %v6931_v21 = vld [vmem:[#allocation24_spill] sm:$0xff] }
 0x352   : > { %v2948_v41 = vpop.eup %2947  ;;  %2967 = vrcp.f32 %v1817_v28  ;;  %v2190_v17 = vmul.f32 %v2946_v6, %v6927_v12  ;;  %2316 = vst.msk [vmem:[%s5776_s29 + $0x88] sm:$0xff] %vm326_vm0, %v2188_v4  ;;  %v1823_v45 = vadd.f32 1.0, %v6930_v15  ;;  %v6932_v4 = vld [vmem:[#allocation166_spill] sm:$0xff]  ;;  %v6933_v12 = vld [vmem:[#allocation25_spill] sm:$0xff] }
 0x353   : > { %v2950_v13 = vpop.eup %2949  ;;  %2969 = vrcp.f32 %v1818_v42  ;;  %v2191_v5 = vmul.f32 %v2948_v41, %v6929_v16  ;;  %2317 = vst.msk [vmem:[%s5776_s29 + $0x90] sm:$0xff] %vm326_vm0, %v2189_v62  ;;  %v1824_v19 = vadd.f32 1.0, %v6932_v4  ;;  %v6934_v62 = vld [vmem:[#allocation167_spill] sm:$0xff]  ;;  %v6935_v16 = vld [vmem:[#allocation26_spill] sm:$0xff] }
 0x354   : > { %v2952_v1 = vpop.eup %2951  ;;  %2971 = vrcp.f32 %v1819_v36  ;;  %v2192_v28 = vmul.f32 %v2950_v13, %v6931_v21  ;;  %2318 = vst.msk [vmem:[%s5776_s29 + $0x98] sm:$0xff] %vm326_vm0, %v2190_v17  ;;  %v1825_v8 = vadd.f32 1.0, %v6934_v62  ;;  %v6936_v17 = vld [vmem:[#allocation168_spill] sm:$0xff]  ;;  %v6937_v21 = vld [vmem:[#allocation27_spill] sm:$0xff] }
 0x355   : > { %v2954_v6 = vpop.eup %2953  ;;  %2973 = vrcp.f32 %v1820_v27  ;;  %v2193_v42 = vmul.f32 %v2952_v1, %v6933_v12  ;;  %2319 = vst.msk [vmem:[%s5776_s29 + $0xa0] sm:$0xff] %vm326_vm0, %v2191_v5  ;;  %v1826_v15 = vadd.f32 1.0, %v6936_v17  ;;  %v6938_v5 = vld [vmem:[#allocation169_spill] sm:$0xff]  ;;  %v6939_v12 = vld [vmem:[#allocation28_spill] sm:$0xff] }
 0x356   : > { %v2956_v41 = vpop.eup %2955  ;;  %2975 = vrcp.f32 %v1821_v56  ;;  %v2194_v36 = vmul.f32 %v2954_v6, %v6935_v16  ;;  %2320 = vst.msk [vmem:[%s5776_s29 + $0xa8] sm:$0xff] %vm326_vm0, %v2192_v28  ;;  %v1827_v4 = vadd.f32 1.0, %v6938_v5  ;;  %v6940_v28 = vld [vmem:[#allocation170_spill] sm:$0xff]  ;;  %v6941_v16 = vld [vmem:[#allocation29_spill] sm:$0xff] }
 0x357   : > { %v2958_v13 = vpop.eup %2957  ;;  %2977 = vrcp.f32 %v1822_v9  ;;  %v2195_v27 = vmul.f32 %v2956_v41, %v6937_v21  ;;  %2321 = vst.msk [vmem:[%s5776_s29 + $0xb0] sm:$0xff] %vm326_vm0, %v2193_v42  ;;  %v1828_v62 = vadd.f32 1.0, %v6940_v28  ;;  %v6942_v42 = vld [vmem:[#allocation171_spill] sm:$0xff]  ;;  %v6943_v21 = vld [vmem:[#allocation30_spill] sm:$0xff] }
 0x358   : > { %v2960_v1 = vpop.eup %2959  ;;  %2979 = vrcp.f32 %v1823_v45  ;;  %v2196_v56 = vmul.f32 %v2958_v13, %v6939_v12  ;;  %2322 = vst.msk [vmem:[%s5776_s29 + $0xb8] sm:$0xff] %vm326_vm0, %v2194_v36  ;;  %v1829_v17 = vadd.f32 1.0, %v6942_v42  ;;  %v6944_v36 = vld [vmem:[#allocation172_spill] sm:$0xff]  ;;  %v6945_v12 = vld [vmem:[#allocation31_spill] sm:$0xff] }
 0x359   : > { %v2962_v6 = vpop.eup %2961  ;;  %2981 = vrcp.f32 %v1824_v19  ;;  %v2197_v9 = vmul.f32 %v2960_v1, %v6941_v16  ;;  %2323 = vst.msk [vmem:[%s5776_s29 + $0xc0] sm:$0xff] %vm326_vm0, %v2195_v27  ;;  %v1830_v5 = vadd.f32 1.0, %v6944_v36  ;;  %v6946_v27 = vld [vmem:[#allocation173_spill] sm:$0xff]  ;;  %v6947_v16 = vld [vmem:[#allocation32_spill] sm:$0xff] }
 0x35a   : > { %v2964_v41 = vpop.eup %2963  ;;  %2983 = vrcp.f32 %v1825_v8  ;;  %v2198_v45 = vmul.f32 %v2962_v6, %v6943_v21  ;;  %2324 = vst.msk [vmem:[%s5776_s29 + $0xc8] sm:$0xff] %vm326_vm0, %v2196_v56  ;;  %v1831_v28 = vadd.f32 1.0, %v6946_v27  ;;  %v6948_v56 = vld [vmem:[#allocation174_spill] sm:$0xff]  ;;  %v6949_v21 = vld [vmem:[#allocation33_spill] sm:$0xff] }
 0x35b   : > { %v2966_v13 = vpop.eup %2965  ;;  %2985 = vrcp.f32 %v1826_v15  ;;  %v2199_v19 = vmul.f32 %v2964_v41, %v6945_v12  ;;  %2325 = vst.msk [vmem:[%s5776_s29 + $0xd0] sm:$0xff] %vm326_vm0, %v2197_v9  ;;  %v1832_v42 = vadd.f32 1.0, %v6948_v56  ;;  %v6950_v9 = vld [vmem:[#allocation175_spill] sm:$0xff]  ;;  %v6951_v12 = vld [vmem:[#allocation34_spill] sm:$0xff]  ;;  %v6954_v56 = vld [vmem:[#allocation36_spill] sm:$0xff] }
 0x35c   : > { %v2968_v1 = vpop.eup %2967  ;;  %2987 = vrcp.f32 %v1827_v4  ;;  %v2200_v8 = vmul.f32 %v2966_v13, %v6947_v16  ;;  %2326 = vst.msk [vmem:[%s5776_s29 + $0xd8] sm:$0xff] %vm326_vm0, %v2198_v45  ;;  %v1833_v36 = vadd.f32 1.0, %v6950_v9  ;;  %v6952_v45 = vld [vmem:[#allocation176_spill] sm:$0xff]  ;;  %v6953_v16 = vld [vmem:[#allocation35_spill] sm:$0xff] }
 0x35d   : > { %v2970_v6 = vpop.eup %2969  ;;  %2989 = vrcp.f32 %v1828_v62  ;;  %v2201_v15 = vmul.f32 %v2968_v1, %v6949_v21  ;;  %2327 = vst.msk [vmem:[%s5776_s29 + $0xe0] sm:$0xff] %vm326_vm0, %v2199_v19  ;;  %v1834_v27 = vadd.f32 1.0, %v6952_v45  ;;  %v1835_v19 = vadd.f32 1.0, %v5531_v59  ;;  %v6955_v21 = vld [vmem:[#allocation37_spill] sm:$0xff]  ;;  %v6956_v59 = vld [vmem:[#allocation38_spill] sm:$0xff] }
 0x35e   : > { %v2972_v41 = vpop.eup %2971  ;;  %2991 = vrcp.f32 %v1829_v17  ;;  %v2202_v4 = vmul.f32 %v2970_v6, %v6951_v12  ;;  %2328 = vst.msk [vmem:[%s5776_s29 + $0xe8] sm:$0xff] %vm326_vm0, %v2200_v8  ;;  %v1836_v8 = vadd.f32 1.0, %v5534_v10  ;;  %v1838_v12 = vadd.f32 1.0, %v5540_v14  ;;  %v6957_v10 = vld [vmem:[#allocation39_spill] sm:$0xff]  ;;  %v6959_v14 = vld [vmem:[#allocation41_spill] sm:$0xff] }
 0x35f   : > { %v2974_v13 = vpop.eup %2973  ;;  %2993 = vrcp.f32 %v1830_v5  ;;  %v2203_v62 = vmul.f32 %v2972_v41, %v6953_v16  ;;  %2329 = vst.msk [vmem:[%s5776_s29 + $0xf0] sm:$0xff] %vm326_vm0, %v2201_v15  ;;  %v1837_v15 = vadd.f32 1.0, %v5537_v47  ;;  %v6958_v47 = vld [vmem:[#allocation40_spill] sm:$0xff]  ;;  %v1840_v16 = vadd.f32 1.0, %v5546_v26  ;;  %v6961_v26 = vld [vmem:[#allocation43_spill] sm:$0xff] }
 0x360   : > { %v2976_v1 = vpop.eup %2975  ;;  %2995 = vrcp.f32 %v1831_v28  ;;  %v2204_v17 = vmul.f32 %v2974_v13, %v6954_v56  ;;  %2330 = vst.msk [vmem:[%s5776_s29 + $0xf8] sm:$0xff] %vm326_vm0, %v2202_v4  ;;  %v1839_v13 = vadd.f32 1.0, %v5543_v31  ;;  %v6960_v31 = vld [vmem:[#allocation42_spill] sm:$0xff] }
 0x361   : > { %v2978_v6 = vpop.eup %2977  ;;  %2997 = vrcp.f32 %v1832_v42  ;;  %v2205_v5 = vmul.f32 %v2976_v1, %v6955_v21  ;;  %2331 = vst.msk [vmem:[%s5776_s29 + $0x100] sm:$0xff] %vm326_vm0, %v2203_v62  ;;  %v1841_v1 = vadd.f32 1.0, %v5549_v11  ;;  %v1843_v21 = vadd.f32 1.0, %v5555_v39  ;;  %v6962_v11 = vld [vmem:[#allocation44_spill] sm:$0xff]  ;;  %v6964_v39 = vld [vmem:[#allocation46_spill] sm:$0xff] }
 0x362   : > { %v2980_v41 = vpop.eup %2979  ;;  %2999 = vrcp.f32 %v1833_v36  ;;  %v2206_v28 = vmul.f32 %v2978_v6, %v6956_v59  ;;  %2332 = vst.msk [vmem:[%s5776_s29 + $0x108] sm:$0xff] %vm326_vm0, %v2204_v17  ;;  %v1842_v17 = vadd.f32 1.0, %v5552_v18  ;;  %v6963_v18 = vld [vmem:[#allocation45_spill] sm:$0xff] }
 0x363   : > { %v2982_v9 = vpop.eup %2981  ;;  %3001 = vrcp.f32 %v1834_v27  ;;  %v2207_v42 = vmul.f32 %v2980_v41, %v6957_v10  ;;  %2333 = vst.msk [vmem:[%s5776_s29 + $0x110] sm:$0xff] %vm326_vm0, %v2205_v5 }
 0x364   : > { %v2984_v4 = vpop.eup %2983  ;;  %3003 = vrcp.f32 %v1835_v19  ;;  %v2208_v36 = vmul.f32 %v2982_v9, %v6958_v47  ;;  %2334 = vst.msk [vmem:[%s5776_s29 + $0x118] sm:$0xff] %vm326_vm0, %v2206_v28  ;;  %v1845_v9 = vadd.f32 1.0, %v5561_v22  ;;  %v1847_v47 = vadd.f32 1.0, %v5567_v60  ;;  %v6966_v22 = vld [vmem:[#allocation48_spill] sm:$0xff]  ;;  %v6968_v60 = vld [vmem:[#allocation50_spill] sm:$0xff] }
 0x365   : > { %v2986_v45 = vpop.eup %2985  ;;  %3005 = vrcp.f32 %v1836_v8  ;;  %v2209_v27 = vmul.f32 %v2984_v4, %v6959_v14  ;;  %2335 = vst.msk [vmem:[%s5776_s29 + $0x120] sm:$0xff] %vm326_vm0, %v2207_v42  ;;  %v1846_v42 = vadd.f32 1.0, %v5564_v54  ;;  %v6967_v54 = vld [vmem:[#allocation49_spill] sm:$0xff] }
 0x366   : > { %v2988_v62 = vpop.eup %2987  ;;  %3007 = vrcp.f32 %v1837_v15  ;;  %v2210_v19 = vmul.f32 %v2986_v45, %v6960_v31  ;;  %2336 = vst.msk [vmem:[%s5776_s29 + $0x128] sm:$0xff] %vm326_vm0, %v2208_v36  ;;  %v1844_v15 = vadd.f32 1.0, %v5558_v23  ;;  %v6965_v23 = vld [vmem:[#allocation47_spill] sm:$0xff] }
 0x367   : > { %v2990_v56 = vpop.eup %2989  ;;  %3009 = vrcp.f32 %v1838_v12  ;;  %v2211_v6 = vmul.f32 %v2988_v62, %v6961_v26  ;;  %2337 = vst.msk [vmem:[%s5776_s29 + $0x130] sm:$0xff] %vm326_vm0, %v2209_v27  ;;  %v1849_v62 = vadd.f32 1.0, %v5573_v0  ;;  %v1851_v26 = vadd.f32 1.0, %v5579_v44  ;;  %v6970_v0 = vld [vmem:[#allocation52_spill] sm:$0xff]  ;;  %v6972_v44 = vld [vmem:[#allocation54_spill] sm:$0xff] }
 0x368   : > { %v2992_v8 = vpop.eup %2991  ;;  %3011 = vrcp.f32 %v1839_v13  ;;  %v2212_v5 = vmul.f32 %v2990_v56, %v6962_v11  ;;  %2338 = vst.msk [vmem:[%s5776_s29 + $0x138] sm:$0xff] %vm326_vm0, %v2210_v19  ;;  %v1850_v19 = vadd.f32 1.0, %v5576_v53  ;;  %v6971_v53 = vld [vmem:[#allocation53_spill] sm:$0xff] }
 0x369   : > { %v2994_v41 = vpop.eup %2993  ;;  %3013 = vrcp.f32 %v1840_v16  ;;  %v2213_v59 = vmul.f32 %v2992_v8, %v6963_v18  ;;  %2339 = vst.msk [vmem:[%s5776_s29 + $0x140] sm:$0xff] %vm326_vm0, %v2211_v6  ;;  %v1848_v16 = vadd.f32 1.0, %v5570_v63  ;;  %v6969_v63 = vld [vmem:[#allocation51_spill] sm:$0xff] }
 0x36a   : > { %v2996_v28 = vpop.eup %2995  ;;  %3015 = vrcp.f32 %v1841_v1  ;;  %v2214_v12 = vmul.f32 %v2994_v41, %v6964_v39  ;;  %2340 = vst.msk [vmem:[%s5776_s29 + $0x148] sm:$0xff] %vm326_vm0, %v2212_v5  ;;  %v1853_v41 = vadd.f32 1.0, %v5585_v7  ;;  %v6976_v7 = vld [vmem:[#allocation56_spill] sm:$0xff] }
 0x36b   : > { %v2998_v10 = vpop.eup %2997  ;;  %3017 = vrcp.f32 %v1842_v17  ;;  %v2215_v4 = vmul.f32 %v2996_v28, %v6965_v23  ;;  %2341 = vst.msk [vmem:[%s5776_s29 + $0x150] sm:$0xff] %vm326_vm0, %v2213_v59  ;;  %v6973_v59 = vld [vmem:[#allocation177_spill] sm:$0xff] }
 0x36c   : > { %v3000_v13 = vpop.eup %2999  ;;  %3019 = vrcp.f32 %v1843_v21  ;;  %v2216_v36 = vmul.f32 %v2998_v10, %v6966_v22  ;;  %2342 = vst.msk [vmem:[%s5776_s29 + $0x158] sm:$0xff] %vm326_vm0, %v2214_v12  ;;  %v1852_v21 = vadd.f32 1.0, %v5582_v34  ;;  %v1854_v28 = vadd.f32 1.0, %v6973_v59  ;;  %v6974_v34 = vld [vmem:[#allocation55_spill] sm:$0xff]  ;;  %v6975_v12 = vld [vmem:[#allocation178_spill] sm:$0xff] }
 0x36d   : > { %v3002_v45 = vpop.eup %3001  ;;  %3021 = vrcp.f32 %v1844_v15  ;;  %v2217_v14 = vmul.f32 %v3000_v13, %v6967_v54  ;;  %2343 = vst.msk [vmem:[%s5776_s29 + $0x160] sm:$0xff] %vm326_vm0, %v2215_v4  ;;  %v1855_v10 = vadd.f32 1.0, %v6975_v12  ;;  %v6977_v4 = vld [vmem:[#allocation179_spill] sm:$0xff]  ;;  %v6980_v54 = vld [vmem:[#allocation58_spill] sm:$0xff] }
 0x36e   : > { %v3004_v27 = vpop.eup %3003  ;;  %3023 = vrcp.f32 %v1845_v9  ;;  %v2218_v1 = vmul.f32 %v3002_v45, %v6968_v60  ;;  %2344 = vst.msk [vmem:[%s5776_s29 + $0x168] sm:$0xff] %vm326_vm0, %v2216_v36  ;;  %v1856_v13 = vadd.f32 1.0, %v6977_v4  ;;  %v6979_v45 = vld [vmem:[#allocation180_spill] sm:$0xff]  ;;  %v1866_v4 = vadd.f32 1.0, %v5624_v32  ;;  %v6993_v32 = vld [vmem:[#allocation69_spill] sm:$0xff] }
 0x36f   : > { %v3006_v31 = vpop.eup %3005  ;;  %3025 = vrcp.f32 %v1846_v42  ;;  %v2219_v56 = vmul.f32 %v3004_v27, %v6969_v63  ;;  %2345 = vst.msk [vmem:[%s5776_s29 + $0x170] sm:$0xff] %vm326_vm0, %v2217_v14  ;;  %v6983_v63 = vld [vmem:[#allocation182_spill] sm:$0xff] }
 0x370   : > { %v3008_v17 = vpop.eup %3007  ;;  %3027 = vrcp.f32 %v1847_v47  ;;  %v2220_v6 = vmul.f32 %v3006_v31, %v6970_v0  ;;  %2346 = vst.msk [vmem:[%s5776_s29 + $0x178] sm:$0xff] %vm326_vm0, %v2218_v1  ;;  %v6978_v47 = vld [vmem:[#allocation57_spill] sm:$0xff]  ;;  %v6982_v1 = vld [vmem:[#allocation59_spill] sm:$0xff] }
 0x371   : > { %v3010_v8 = vpop.eup %3009  ;;  %3029 = vrcp.f32 %v1848_v16  ;;  %v2221_v11 = vmul.f32 %v3008_v17, %v6971_v53  ;;  %2347 = vst.msk [vmem:[%s5776_s29 + $0x180] sm:$0xff] %vm326_vm0, %v2219_v56  ;;  %v1857_v16 = vadd.f32 1.0, %v6979_v45  ;;  %v1859_v56 = vadd.f32 1.0, %v6983_v63  ;;  %v6984_v17 = vld [vmem:[#allocation60_spill] sm:$0xff] }
 0x372   : > { %v3012_v5 = vpop.eup %3011  ;;  %3031 = vrcp.f32 %v1849_v62  ;;  %v2222_v15 = vmul.f32 %v3010_v8, %v6972_v44  ;;  %2348 = vst.msk [vmem:[%s5776_s29 + $0x188] sm:$0xff] %vm326_vm0, %v2220_v6  ;;  %v6981_v62 = vld [vmem:[#allocation181_spill] sm:$0xff]  ;;  %v1860_v6 = vadd.f32 1.0, %v5606_v25  ;;  %v6987_v25 = vld [vmem:[#allocation63_spill] sm:$0xff]  ;;  %v1871_v63 = vadd.f32 1.0, %v5639_v52  ;;  %v6998_v52 = vld [vmem:[#allocation74_spill] sm:$0xff] }
 0x373   : > { %v3014_v18 = vpop.eup %3013  ;;  %3033 = vrcp.f32 %v1850_v19  ;;  %v2223_v9 = vmul.f32 %v3012_v5, %v6974_v34  ;;  %2349 = vst.msk [vmem:[%s5776_s29 + $0x190] sm:$0xff] %vm326_vm0, %v2221_v11  ;;  %v1858_v60 = vadd.f32 1.0, %v6981_v62  ;;  %v6985_v8 = vld [vmem:[#allocation61_spill] sm:$0xff]  ;;  %v1861_v11 = vadd.f32 1.0, %v5609_v35  ;;  %v6986_v5 = vld [vmem:[#allocation62_spill] sm:$0xff]  ;;  %v6988_v35 = vld [vmem:[#allocation64_spill] sm:$0xff] }
 0x374   : > { %v3016_v39 = vpop.eup %3015  ;;  %3035 = vrcp.f32 %v1851_v26  ;;  %v2224_v42 = vmul.f32 %v3014_v18, %v6976_v7  ;;  %2350 = vst.msk [vmem:[%s5776_s29 + $0x198] sm:$0xff] %vm326_vm0, %v2222_v15  ;;  %v1862_v15 = vadd.f32 1.0, %v5612_v50  ;;  %v6989_v50 = vld [vmem:[#allocation65_spill] sm:$0xff]  ;;  %v1865_v7 = vadd.f32 1.0, %v5621_v20  ;;  %v6992_v20 = vld [vmem:[#allocation68_spill] sm:$0xff] }
 0x375   : > { %v3018_v23 = vpop.eup %3017  ;;  %3037 = vrcp.f32 %v1852_v21  ;;  %v2225_v22 = vmul.f32 %v3016_v39, %v6978_v47  ;;  %2351 = vst.msk [vmem:[%s5776_s29 + $0x1a0] sm:$0xff] %vm326_vm0, %v2223_v9  ;;  %v1864_v39 = vadd.f32 1.0, %v5618_v2  ;;  %v6991_v2 = vld [vmem:[#allocation67_spill] sm:$0xff] }
 0x376   : > { %v3020_v36 = vpop.eup %3019  ;;  %3039 = vrcp.f32 %v1853_v41  ;;  %v2226_v14 = vmul.f32 %v3018_v23, %v6980_v54  ;;  %2352 = vst.msk [vmem:[%s5776_s29 + $0x1a8] sm:$0xff] %vm326_vm0, %v2224_v42 }
 0x377   : > { %v3022_v27 = vpop.eup %3021  ;;  %3041 = vrcp.f32 %v1854_v28  ;;  %v2227_v31 = vmul.f32 %v3020_v36, %v6982_v1  ;;  %2353 = vst.msk [vmem:[%s5776_s29 + $0x1b0] sm:$0xff] %vm326_vm0, %v2225_v22  ;;  %v1863_v28 = vadd.f32 1.0, %v5615_v51  ;;  %v6990_v51 = vld [vmem:[#allocation66_spill] sm:$0xff]  ;;  %v1867_v22 = vadd.f32 1.0, %v5627_v3 }
 0x378   : > { %v3024_v19 = vpop.eup %3023  ;;  %3043 = vrcp.f32 %v1855_v10  ;;  %v2228_v26 = vmul.f32 %v3022_v27, %v6984_v17  ;;  %2354 = vst.msk [vmem:[%s5776_s29 + $0x1b8] sm:$0xff] %vm326_vm0, %v2226_v14  ;;  %v1869_v27 = vadd.f32 1.0, %v5633_v46  ;;  %v6994_v3 = vld [vmem:[#allocation70_spill] sm:$0xff]  ;;  %v1870_v1 = vadd.f32 1.0, %v5636_v49  ;;  %v6996_v46 = vld [vmem:[#allocation72_spill] sm:$0xff]  ;;  %v6997_v49 = vld [vmem:[#allocation73_spill] sm:$0xff] }
 0x379   : > { %v3026_v0 = vpop.eup %3025  ;;  %3045 = vrcp.f32 %v1856_v13  ;;  %v2229_v21 = vmul.f32 %v3024_v19, %v6985_v8  ;;  %2355 = vst.msk [vmem:[%s5776_s29 + $0x1c0] sm:$0xff] %vm326_vm0, %v2227_v31  ;;  %v1873_v8 = vadd.f32 1.0, %v5645_v58  ;;  %v7000_v58 = vld [vmem:[#allocation83_spill] sm:$0xff] }
 0x37a   : > { %v3028_v53 = vpop.eup %3027  ;;  %3047 = vrcp.f32 %v1857_v16  ;;  %v2230_v41 = vmul.f32 %v3026_v0, %v6986_v5  ;;  %2356 = vst.msk [vmem:[%s5776_s29 + $0x1c8] sm:$0xff] %vm326_vm0, %v2228_v26  ;;  %v1868_v16 = vadd.f32 1.0, %v5630_v29  ;;  %v6995_v29 = vld [vmem:[#allocation71_spill] sm:$0xff]  ;;  %v1872_v26 = vadd.f32 1.0, %v5642_v55  ;;  %v6999_v55 = vld [vmem:[#allocation82_spill] sm:$0xff] }
 0x37b   : > { %v3030_v44 = vpop.eup %3029  ;;  %3049 = vrcp.f32 %v1858_v60  ;;  %v2231_v18 = vmul.f32 %v3028_v53, %v6987_v25  ;;  %2357 = vst.msk [vmem:[%s5776_s29 + $0x1d0] sm:$0xff] %vm326_vm0, %v2229_v21 }
 0x37c   : > { %v3032_v59 = vpop.eup %3031  ;;  %3051 = vrcp.f32 %v1859_v56  ;;  %v2232_v34 = vmul.f32 %v3030_v44, %v6988_v35  ;;  %2358 = vst.msk [vmem:[%s5776_s29 + $0x1d8] sm:$0xff] %vm326_vm0, %v2230_v41  ;;  %v1875_v44 = vadd.f32 1.0, %v5651_v24  ;;  %v1877_v35 = vadd.f32 1.0, %v5657_v37  ;;  %v7002_v24 = vld [vmem:[#allocation85_spill] sm:$0xff]  ;;  %v7004_v37 = vld [vmem:[#allocation87_spill] sm:$0xff] }
 0x37d   : > { %v3034_v9 = vpop.eup %3033  ;;  %3053 = vrcp.f32 %v1860_v6  ;;  %v2233_v12 = vmul.f32 %v3032_v59, %v6989_v50  ;;  %2359 = vst.msk [vmem:[%s5776_s29 + $0x1e0] sm:$0xff] %vm326_vm0, %v2231_v18  ;;  %v1876_v18 = vadd.f32 1.0, %v5654_v38  ;;  %v7003_v38 = vld [vmem:[#allocation86_spill] sm:$0xff] }
 0x37e   : > { %v3036_v10 = vpop.eup %3035  ;;  %3055 = vrcp.f32 %v1861_v11  ;;  %v2234_v42 = vmul.f32 %v3034_v9, %v6990_v51  ;;  %2360 = vst.msk [vmem:[%s5776_s29 + $0x1e8] sm:$0xff] %vm326_vm0, %v2232_v34  ;;  %v1874_v11 = vadd.f32 1.0, %v5648_v33  ;;  %v7001_v33 = vld [vmem:[#allocation84_spill] sm:$0xff] }
 0x37f   : > { %v3038_v23 = vpop.eup %3037  ;;  %3057 = vrcp.f32 %v1862_v15  ;;  %v2235_v13 = vmul.f32 %v3036_v10, %v6991_v2  ;;  %2361 = vst.msk [vmem:[%s5776_s29 + $0x1f0] sm:$0xff] %vm326_vm0, %v2233_v12  ;;  %v1879_v10 = vadd.f32 1.0, %v5663_v43  ;;  %v7006_v2 = vld [vmem:[#allocation183_spill] sm:$0xff]  ;;  %v7007_v43 = vld [vmem:[#allocation89_spill] sm:$0xff] }
 0x380   : > { %v3040_v47 = vpop.eup %3039  ;;  %3059 = vrcp.f32 %v1863_v28  ;;  %v2236_v36 = vmul.f32 %v3038_v23, %v6992_v20  ;;  %2362 = vst.msk [vmem:[%s5776_s29 + $0x1f8] sm:$0xff] %vm326_vm0, %v2234_v42  ;;  %v1880_v42 = vadd.f32 1.0, %v5666_v30  ;;  %v7008_v20 = vld [vmem:[#allocation184_spill] sm:$0xff]  ;;  %v7009_v30 = vld [vmem:[#allocation90_spill] sm:$0xff] }
 0x381   : > { %v3042_v45 = vpop.eup %3041  ;;  %3061 = vrcp.f32 %v1864_v39  ;;  %v2237_v54 = vmul.f32 %v3040_v47, %v6993_v32  ;;  %2363 = vst.msk [vmem:[%s5776_s29 + $0x200] sm:$0xff] %vm326_vm0, %v2235_v13  ;;  %v1878_v39 = vadd.f32 1.0, %v5660_v40  ;;  %v7005_v40 = vld [vmem:[#allocation88_spill] sm:$0xff]  ;;  %v1881_v13 = vadd.f32 1.0, %v7006_v2 }
 0x382   : > { %v3044_v14 = vpop.eup %3043  ;;  %3063 = vrcp.f32 %v1865_v7  ;;  %v2238_v62 = vmul.f32 %v3042_v45, %v6994_v3  ;;  %2364 = vst.msk [vmem:[%s5776_s29 + $0x208] sm:$0xff] %vm326_vm0, %v2236_v36  ;;  %v1882_v36 = vadd.f32 1.0, %v7008_v20  ;;  %v1883_v32 = vadd.f32 1.0, %v5675_v48  ;;  %v7012_v48 = vld [vmem:[#allocation93_spill] sm:$0xff]  ;;  %v7030_v2 = vld [vmem:[#allocation76_spill] sm:$0xff] }
 0x383   : > { %v3046_v60 = vpop.eup %3045  ;;  %3065 = vrcp.f32 %v1866_v4  ;;  %v2239_v31 = vmul.f32 %v3044_v14, %v6995_v29  ;;  %2365 = vst.msk [vmem:[%s5776_s29 + $0x210] sm:$0xff] %vm326_vm0, %v2237_v54  ;;  %v7010_v54 = vld [vmem:[#allocation91_spill] sm:$0xff]  ;;  %v1884_v3 = vadd.f32 1.0, %v5678_v57  ;;  %v1885_v29 = vadd.f32 1.0, %v5681_v61  ;;  %v7014_v57 = vld [vmem:[#allocation94_spill] sm:$0xff]  ;;  %v7032_v20 = vld [vmem:[#allocation77_spill] sm:$0xff] }
 0x384   : > { %v3048_v19 = vpop.eup %3047  ;;  %3067 = vrcp.f32 %v1867_v22  ;;  %v2240_v56 = vmul.f32 %v3046_v60, %v6996_v46  ;;  %2366 = vst.msk [vmem:[%s5776_s29 + $0x218] sm:$0xff] %vm326_vm0, %v2238_v62  ;;  %v7011_v62 = vld [vmem:[#allocation92_spill] sm:$0xff]  ;;  %v7016_v61 = vld [vmem:[#allocation95_spill] sm:$0xff] }
 0x385   : > { %v3050_v17 = vpop.eup %3049  ;;  %3069 = vrcp.f32 %v1868_v16  ;;  %v2241_v0 = vmul.f32 %v3048_v19, %v6997_v49  ;;  %2367 = vst.msk [vmem:[%s5776_s29 + $0x220] sm:$0xff] %vm326_vm0, %v2239_v31 }
 0x386   : > { %v3052_v6 = vpop.eup %3051  ;;  %3071 = vrcp.f32 %v1869_v27  ;;  %v2242_v21 = vmul.f32 %v3050_v17, %v6998_v52  ;;  %2368 = vst.msk [vmem:[%s5776_s29 + $0x228] sm:$0xff] %vm326_vm0, %v2240_v56 }
 0x387   : > { %v3054_v53 = vpop.eup %3053  ;;  %3073 = vrcp.f32 %v1870_v1  ;;  %v2243_v5 = vmul.f32 %v3052_v6, %v6999_v55  ;;  %2369 = vst.msk [vmem:[%s5776_s29 + $0x230] sm:$0xff] %vm326_vm0, %v2241_v0  ;;  %v7019_v55 = vld [vmem:[#allocation188_spill] sm:$0xff] }
 0x388   : > { %v3056_v41 = vpop.eup %3055  ;;  %3075 = vrcp.f32 %v1871_v63  ;;  %v2244_v15 = vmul.f32 %v3054_v53, %v7000_v58  ;;  %2370 = vst.msk [vmem:[%s5776_s29 + $0x238] sm:$0xff] %vm326_vm0, %v2242_v21  ;;  %v7013_v63 = vld [vmem:[#allocation185_spill] sm:$0xff]  ;;  %v7018_v21 = vld [vmem:[#allocation96_spill] sm:$0xff] }
 0x389   : > { %v3058_v25 = vpop.eup %3057  ;;  %3077 = vrcp.f32 %v1872_v26  ;;  %v2245_v59 = vmul.f32 %v3056_v41, %v7001_v33  ;;  %2371 = vst.msk [vmem:[%s5776_s29 + $0x240] sm:$0xff] %vm326_vm0, %v2243_v5  ;;  %v1886_v46 = vadd.f32 1.0, %v7013_v63  ;;  %v7015_v26 = vld [vmem:[#allocation186_spill] sm:$0xff]  ;;  %v1889_v5 = vadd.f32 1.0, %v7019_v55  ;;  %v7020_v41 = vld [vmem:[#allocation97_spill] sm:$0xff] }
 0x38a   : > { %v3060_v28 = vpop.eup %3059  ;;  %3079 = vrcp.f32 %v1873_v8  ;;  %v2246_v34 = vmul.f32 %v3058_v25, %v7002_v24  ;;  %2372 = vst.msk [vmem:[%s5776_s29 + $0x248] sm:$0xff] %vm326_vm0, %v2244_v15  ;;  %v1887_v49 = vadd.f32 1.0, %v7015_v26  ;;  %v7017_v8 = vld [vmem:[#allocation187_spill] sm:$0xff]  ;;  %v7021_v15 = vld [vmem:[#allocation189_spill] sm:$0xff] }
 0x38b   : > { %v3062_v9 = vpop.eup %3061  ;;  %3081 = vrcp.f32 %v1874_v11  ;;  %v2247_v50 = vmul.f32 %v3060_v28, %v7003_v38  ;;  %2373 = vst.msk [vmem:[%s5776_s29 + $0x250] sm:$0xff] %vm326_vm0, %v2245_v59  ;;  %v1888_v52 = vadd.f32 1.0, %v7017_v8  ;;  %v1890_v25 = vadd.f32 1.0, %v7021_v15  ;;  %v7023_v28 = vld [vmem:[#allocation190_spill] sm:$0xff]  ;;  %v7024_v24 = vld [vmem:[#allocation99_spill] sm:$0xff] }
 0x38c   : > { %v3064_v12 = vpop.eup %3063  ;;  %3083 = vrcp.f32 %v1875_v44  ;;  %v2248_v7 = vmul.f32 %v3062_v9, %v7004_v37  ;;  %2374 = vst.msk [vmem:[%s5776_s29 + $0x258] sm:$0xff] %vm326_vm0, %v2246_v34  ;;  %v7027_v37 = vld [vmem:[#allocation192_spill] sm:$0xff] }
 0x38d   : > { %v3066_v51 = vpop.eup %3065  ;;  %3085 = vrcp.f32 %v1876_v18  ;;  %v2249_v23 = vmul.f32 %v3064_v12, %v7005_v40  ;;  %2375 = vst.msk [vmem:[%s5776_s29 + $0x260] sm:$0xff] %vm326_vm0, %v2247_v50  ;;  %v7022_v18 = vld [vmem:[#allocation98_spill] sm:$0xff]  ;;  %v7026_v50 = vld [vmem:[#allocation100_spill] sm:$0xff] }
 0x38e   : > { %v3068_v4 = vpop.eup %3067  ;;  %3087 = vrcp.f32 %v1877_v35  ;;  %v2250_v47 = vmul.f32 %v3066_v51, %v7007_v43  ;;  %2376 = vst.msk [vmem:[%s5776_s29 + $0x268] sm:$0xff] %vm326_vm0, %v2248_v7  ;;  %v1891_v35 = vadd.f32 1.0, %v7023_v28  ;;  %v1893_v7 = vadd.f32 1.0, %v7027_v37  ;;  %v7028_v51 = vld [vmem:[#allocation75_spill] sm:$0xff] }
 0x38f   : > { %v3070_v22 = vpop.eup %3069  ;;  %3089 = vrcp.f32 %v1878_v39  ;;  %v2251_v45 = vmul.f32 %v3068_v4, %v7009_v30  ;;  %2377 = vst.msk [vmem:[%s5776_s29 + $0x270] sm:$0xff] %vm326_vm0, %v2249_v23  ;;  %v7025_v39 = vld [vmem:[#allocation191_spill] sm:$0xff]  ;;  %v7029_v23 = vld [vmem:[#allocation193_spill] sm:$0xff] }
 0x390   : > { %v3072_v16 = vpop.eup %3071  ;;  %3091 = vrcp.f32 %v1879_v10  ;;  %v2252_v14 = vmul.f32 %v3070_v22, %v7010_v54  ;;  %2378 = vst.msk [vmem:[%s5776_s29 + $0x278] sm:$0xff] %vm326_vm0, %v2250_v47  ;;  %v1892_v38 = vadd.f32 1.0, %v7025_v39  ;;  %v1894_v4 = vadd.f32 1.0, %v7029_v23  ;;  %v7031_v47 = vld [vmem:[#allocation194_spill] sm:$0xff] }
 0x391   : > { %v3074_v27 = vpop.eup %3073  ;;  %3093 = vrcp.f32 %v1880_v42  ;;  %v2253_v60 = vmul.f32 %v3072_v16, %v7011_v62  ;;  %2379 = vst.msk [vmem:[%s5776_s29 + $0x280] sm:$0xff] %vm326_vm0, %v2251_v45  ;;  %v1895_v22 = vadd.f32 1.0, %v7031_v47  ;;  %v7033_v45 = vld [vmem:[#allocation195_spill] sm:$0xff] }
 0x392   : > { %v3076_v1 = vpop.eup %3075  ;;  %3095 = vrcp.f32 %v1881_v13  ;;  %v2254_v31 = vmul.f32 %v3074_v27, %v7012_v48  ;;  %2380 = vst.msk [vmem:[%s5776_s29 + $0x288] sm:$0xff] %vm326_vm0, %v2252_v14  ;;  %v1896_v16 = vadd.f32 1.0, %v7033_v45  ;;  %v7035_v27 = vld [vmem:[#allocation196_spill] sm:$0xff]  ;;  %v7036_v62 = vld [vmem:[#allocation79_spill] sm:$0xff] }
 0x393   : > { %v3078_v19 = vpop.eup %3077  ;;  %3097 = vrcp.f32 %v1882_v36  ;;  %v2255_v56 = vmul.f32 %v3076_v1, %v7014_v57  ;;  %2381 = vst.msk [vmem:[%s5776_s29 + $0x290] sm:$0xff] %vm326_vm0, %v2253_v60 }
 0x394   : > { %v3080_v17 = vpop.eup %3079  ;;  %3099 = vrcp.f32 %v1883_v32  ;;  %v2256_v0 = vmul.f32 %v3078_v19, %v7016_v61  ;;  %2382 = vst.msk [vmem:[%s5776_s29 + $0x298] sm:$0xff] %vm326_vm0, %v2254_v31  ;;  %v7034_v32 = vld [vmem:[#allocation78_spill] sm:$0xff]  ;;  %v7038_v31 = vld [vmem:[#allocation80_spill] sm:$0xff] }
 0x395   : > { %v3082_v6 = vpop.eup %3081  ;;  %3101 = vrcp.f32 %v1884_v3  ;;  %v2257_v53 = vmul.f32 %v3080_v17, %v7018_v21  ;;  %2383 = vst.msk [vmem:[%s5776_s29 + $0x2a0] sm:$0xff] %vm326_vm0, %v2255_v56  ;;  %v1897_v3 = vadd.f32 1.0, %v7035_v27  ;;  %v7040_v56 = vld [vmem:[#allocation101_spill] sm:$0xff] }
 0x396   : > { %v3084_v11 = vpop.eup %3083  ;;  %3103 = vrcp.f32 %v1885_v29  ;;  %v2258_v44 = vmul.f32 %v3082_v6, %v7020_v41  ;;  %2384 = vst.msk [vmem:[%s5776_s29 + $0x2a8] sm:$0xff] %vm326_vm0, %v2256_v0  ;;  %v7037_v29 = vld [vmem:[#allocation197_spill] sm:$0xff]  ;;  %v7042_v0 = vld [vmem:[#allocation102_spill] sm:$0xff] }
 0x397   : > { %v3086_v58 = vpop.eup %3085  ;;  %3105 = vrcp.f32 %v1886_v46  ;;  %v2259_v33 = vmul.f32 %v3084_v11, %v7022_v18  ;;  %2385 = vst.msk [vmem:[%s5776_s29 + $0x2b0] sm:$0xff] %vm326_vm0, %v2257_v53  ;;  %v1898_v48 = vadd.f32 1.0, %v7037_v29  ;;  %v7039_v46 = vld [vmem:[#allocation198_spill] sm:$0xff]  ;;  %v7044_v53 = vld [vmem:[#allocation103_spill] sm:$0xff] }
 0x398   : > { %v3088_v59 = vpop.eup %3087  ;;  %3107 = vrcp.f32 %v1887_v49  ;;  %v2260_v34 = vmul.f32 %v3086_v58, %v7024_v24  ;;  %2386 = vst.msk [vmem:[%s5776_s29 + $0x2b8] sm:$0xff] %vm326_vm0, %v2258_v44  ;;  %v1899_v57 = vadd.f32 1.0, %v7039_v46  ;;  %v7041_v49 = vld [vmem:[#allocation199_spill] sm:$0xff]  ;;  %v7046_v44 = vld [vmem:[#allocation104_spill] sm:$0xff] }
 0x399   : > { %v3090_v9 = vpop.eup %3089  ;;  %3109 = vrcp.f32 %v1888_v52  ;;  %v2261_v12 = vmul.f32 %v3088_v59, %v7026_v50  ;;  %2387 = vst.msk [vmem:[%s5776_s29 + $0x2c0] sm:$0xff] %vm326_vm0, %v2259_v33  ;;  %v1900_v61 = vadd.f32 1.0, %v7041_v49  ;;  %v7043_v52 = vld [vmem:[#allocation200_spill] sm:$0xff]  ;;  %v7048_v33 = vld [vmem:[#allocation105_spill] sm:$0xff] }
 0x39a   : > { %v3092_v10 = vpop.eup %3091  ;;  %3111 = vrcp.f32 %v1889_v5  ;;  %v2262_v42 = vmul.f32 %v3090_v9, %v7028_v51  ;;  %2388 = vst.msk [vmem:[%s5776_s29 + $0x2c8] sm:$0xff] %vm326_vm0, %v2260_v34  ;;  %v1901_v21 = vadd.f32 1.0, %v7043_v52  ;;  %v7045_v5 = vld [vmem:[#allocation201_spill] sm:$0xff]  ;;  %v7050_v34 = vld [vmem:[#allocation106_spill] sm:$0xff] }
 0x39b   : > { %v3094_v40 = vpop.eup %3093  ;;  %3113 = vrcp.f32 %v1890_v25  ;;  %v2263_v13 = vmul.f32 %v3092_v10, %v7030_v2  ;;  %2389 = vst.msk [vmem:[%s5776_s29 + $0x2d0] sm:$0xff] %vm326_vm0, %v2261_v12  ;;  %v1902_v41 = vadd.f32 1.0, %v7045_v5  ;;  %v7047_v25 = vld [vmem:[#allocation130_spill] sm:$0xff]  ;;  %v7052_v12 = vld [vmem:[#allocation107_spill] sm:$0xff] }
 0x39c   : > { %v3096_v43 = vpop.eup %3095  ;;  %3115 = vrcp.f32 %v1891_v35  ;;  %v2264_v36 = vmul.f32 %v3094_v40, %v7032_v20  ;;  %2390 = vst.msk [vmem:[%s5776_s29 + $0x2d8] sm:$0xff] %vm326_vm0, %v2262_v42  ;;  %v1903_v18 = vadd.f32 1.0, %v7047_v25  ;;  %v7049_v35 = vld [vmem:[#allocation131_spill] sm:$0xff]  ;;  %v7054_v42 = vld [vmem:[#allocation108_spill] sm:$0xff] }
 0x39d   : > { %v3098_v30 = vpop.eup %3097  ;;  %3117 = vrcp.f32 %v1892_v38  ;;  %v2265_v54 = vmul.f32 %v3096_v43, %v7034_v32  ;;  %2391 = vst.msk [vmem:[%s5776_s29 + $0x2e0] sm:$0xff] %vm326_vm0, %v2263_v13  ;;  %v1904_v24 = vadd.f32 1.0, %v7049_v35  ;;  %v7051_v38 = vld [vmem:[#allocation132_spill] sm:$0xff]  ;;  %v7056_v13 = vld [vmem:[#allocation109_spill] sm:$0xff] }
 0x39e   : > { %v3100_v14 = vpop.eup %3099  ;;  %3119 = vrcp.f32 %v1893_v7  ;;  %v2266_v60 = vmul.f32 %v3098_v30, %v7036_v62  ;;  %2392 = vst.msk [vmem:[%s5776_s29 + $0x2e8] sm:$0xff] %vm326_vm0, %v2264_v36  ;;  %v1905_v50 = vadd.f32 1.0, %v7051_v38  ;;  %v7053_v7 = vld [vmem:[#allocation133_spill] sm:$0xff]  ;;  %v7058_v36 = vld [vmem:[#allocation110_spill] sm:$0xff]  ;;  %v7074_v35 = vld [vmem:[#allocation120_spill] sm:$0xff] }
 0x39f   : > { %v3102_v1 = vpop.eup %3101  ;;  %3121 = vrcp.f32 %v1894_v4  ;;  %v2267_v19 = vmul.f32 %v3100_v14, %v7038_v31  ;;  %2393 = vst.msk [vmem:[%s5776_s29 + $0x2f0] sm:$0xff] %vm326_vm0, %v2265_v54  ;;  %v1906_v51 = vadd.f32 1.0, %v7053_v7  ;;  %v7055_v4 = vld [vmem:[#allocation134_spill] sm:$0xff]  ;;  %v7060_v54 = vld [vmem:[#allocation111_spill] sm:$0xff] }
 0x3a0   : > { %v3104_v63 = vpop.eup %3103  ;;  %3123 = vrcp.f32 %v1895_v22  ;;  %v2268_v17 = vmul.f32 %v3102_v1, %v7040_v56  ;;  %2394 = vst.msk [vmem:[%s5776_s29 + $0x2f8] sm:$0xff] %vm326_vm0, %v2266_v60  ;;  %v1907_v2 = vadd.f32 1.0, %v7055_v4  ;;  %v7057_v22 = vld [vmem:[#allocation135_spill] sm:$0xff]  ;;  %v7062_v60 = vld [vmem:[#allocation112_spill] sm:$0xff] }
 0x3a1   : > { %v3106_v26 = vpop.eup %3105  ;;  %3125 = vrcp.f32 %v1896_v16  ;;  %v2269_v6 = vmul.f32 %v3104_v63, %v7042_v0  ;;  %2395 = vst.msk [vmem:[%s5776_s29 + $0x300] sm:$0xff] %vm326_vm0, %v2267_v19  ;;  %v1908_v20 = vadd.f32 1.0, %v7057_v22  ;;  %v7059_v16 = vld [vmem:[#allocation136_spill] sm:$0xff]  ;;  %v7064_v19 = vld [vmem:[#allocation113_spill] sm:$0xff]  ;;  %v7079_v4 = vld [vmem:[#allocation123_spill] sm:$0xff] }
 0x3a2   : > { %v3108_v8 = vpop.eup %3107  ;;  %3127 = vrcp.f32 %v1897_v3  ;;  %v2270_v11 = vmul.f32 %v3106_v26, %v7044_v53  ;;  %2396 = vst.msk [vmem:[%s5776_s29 + $0x308] sm:$0xff] %vm326_vm0, %v2268_v17  ;;  %v1909_v32 = vadd.f32 1.0, %v7059_v16  ;;  %v7061_v3 = vld [vmem:[#allocation137_spill] sm:$0xff]  ;;  %v7066_v17 = vld [vmem:[#allocation114_spill] sm:$0xff] }
 0x3a3   : > { %v3110_v55 = vpop.eup %3109  ;;  %3129 = vrcp.f32 %v1898_v48  ;;  %v2271_v58 = vmul.f32 %v3108_v8, %v7046_v44  ;;  %2397 = vst.msk [vmem:[%s5776_s29 + $0x310] sm:$0xff] %vm326_vm0, %v2269_v6  ;;  %v1910_v62 = vadd.f32 1.0, %v7061_v3  ;;  %v7063_v48 = vld [vmem:[#allocation138_spill] sm:$0xff]  ;;  %v7068_v6 = vld [vmem:[#allocation115_spill] sm:$0xff]  ;;  %v7084_v3 = vld [vmem:[#allocation128_spill] sm:$0xff] }
 0x3a4   : > { %v3112_v15 = vpop.eup %3111  ;;  %3131 = vrcp.f32 %v1899_v57  ;;  %v2272_v59 = vmul.f32 %v3110_v55, %v7048_v33  ;;  %2398 = vst.msk [vmem:[%s5776_s29 + $0x318] sm:$0xff] %vm326_vm0, %v2270_v11  ;;  %v1911_v31 = vadd.f32 1.0, %v7063_v48  ;;  %v7065_v57 = vld [vmem:[#allocation139_spill] sm:$0xff]  ;;  %v7070_v11 = vld [vmem:[#allocation116_spill] sm:$0xff] }
 0x3a5   : > { %v3114_v28 = vpop.eup %3113  ;;  %3133 = vrcp.f32 %v1900_v61  ;;  %v2273_v9 = vmul.f32 %v3112_v15, %v7050_v34  ;;  %2399 = vst.msk [vmem:[%s5776_s29 + $0x320] sm:$0xff] %vm326_vm0, %v2271_v58  ;;  %v1912_v56 = vadd.f32 1.0, %v7065_v57  ;;  %v7067_v61 = vld [vmem:[#allocation140_spill] sm:$0xff]  ;;  %v7072_v15 = vld [vmem:[#allocation118_spill] sm:$0xff]  ;;  %v7073_v33 = vld [vmem:[#allocation119_spill] sm:$0xff] }
 0x3a6   : > { %v3116_v39 = vpop.eup %3115  ;;  %3135 = vrcp.f32 %v1901_v21  ;;  %v2274_v10 = vmul.f32 %v3114_v28, %v7052_v12  ;;  %2400 = vst.msk [vmem:[%s5776_s29 + $0x328] sm:$0xff] %vm326_vm0, %v2272_v59  ;;  %v1913_v0 = vadd.f32 1.0, %v7067_v61  ;;  %v7069_v21 = vld [vmem:[#allocation141_spill] sm:$0xff] }
 0x3a7   : > { %v3118_v37 = vpop.eup %3117  ;;  %3137 = vrcp.f32 %v1902_v41  ;;  %v2275_v40 = vmul.f32 %v3116_v39, %v7054_v42  ;;  %2401 = vst.msk [vmem:[%s5776_s29 + $0x330] sm:$0xff] %vm326_vm0, %v2273_v9  ;;  %v1914_v53 = vadd.f32 1.0, %v7069_v21  ;;  %v7071_v41 = vld [vmem:[#allocation117_spill] sm:$0xff]  ;;  %v7078_v42 = vld [vmem:[#allocation122_spill] sm:$0xff] }
 0x3a8   : > { %v3120_v23 = vpop.eup %3119  ;;  %3139 = vrcp.f32 %v1903_v18  ;;  %v2276_v43 = vmul.f32 %v3118_v37, %v7056_v13  ;;  %2402 = vst.msk [vmem:[%s5776_s29 + $0x338] sm:$0xff] %vm326_vm0, %v2274_v10  ;;  %v7075_v9 = vld [vmem:[#allocation121_spill] sm:$0xff]  ;;  %v7077_v37 = vld [vmem:[#allocation3_spill] sm:$0xff] }
 0x3a9   : > { %v3122_v47 = vpop.eup %3121  ;;  %3141 = vrcp.f32 %v1904_v24  ;;  %v2277_v30 = vmul.f32 %v3120_v23, %v7058_v36  ;;  %2403 = vst.msk [vmem:[%s5776_s29 + $0x340] sm:$0xff] %vm326_vm0, %v2275_v40 }
 0x3aa   : > { %v3124_v45 = vpop.eup %3123  ;;  %3143 = vrcp.f32 %v1905_v50  ;;  %v2278_v14 = vmul.f32 %v3122_v47, %v7060_v54  ;;  %2404 = vst.msk [vmem:[%s5776_s29 + $0x348] sm:$0xff] %vm326_vm0, %v2276_v43  ;;  %v7076_v50 = vld [vmem:[#allocation2_spill] sm:$0xff]  ;;  %v7080_v43 = vld [vmem:[#allocation124_spill] sm:$0xff]  ;;  %v7083_v54 = vld [vmem:[#allocation127_spill] sm:$0xff] }
 0x3ab   : > { %v3126_v27 = vpop.eup %3125  ;;  %3145 = vrcp.f32 %v1906_v51  ;;  %v2279_v1 = vmul.f32 %v3124_v45, %v7062_v60  ;;  %2405 = vst.msk [vmem:[%s5776_s29 + $0x350] sm:$0xff] %vm326_vm0, %v2277_v30  ;;  %v7082_v45 = vld [vmem:[#allocation126_spill] sm:$0xff]  ;;  %v7085_v60 = vld [vmem:[#allocation129_spill] sm:$0xff] }
 0x3ac   : > { %v3128_v29 = vpop.eup %3127  ;;  %3147 = vrcp.f32 %v1907_v2  ;;  %v2280_v63 = vmul.f32 %v3126_v27, %v7064_v19  ;;  %2406 = vst.msk [vmem:[%s5776_s29 + $0x358] sm:$0xff] %vm326_vm0, %v2278_v14 }
 0x3ad   : > { %v3130_v46 = vpop.eup %3129  ;;  %3149 = vrcp.f32 %v1908_v20  ;;  %v2281_v26 = vmul.f32 %v3128_v29, %v7066_v17  ;;  %2407 = vst.msk [vmem:[%s5776_s29 + $0x360] sm:$0xff] %vm326_vm0, %v2279_v1  ;;  %v7081_v20 = vld [vmem:[#allocation125_spill] sm:$0xff] }
 0x3ae   : > { %v3132_v49 = vpop.eup %3131  ;;  %3151 = vrcp.f32 %v1909_v32  ;;  %v2282_v8 = vmul.f32 %v3130_v46, %v7068_v6  ;;  %2408 = vst.msk [vmem:[%s5776_s29 + $0x368] sm:$0xff] %vm326_vm0, %v2280_v63 }
 0x3af   : > { %v3134_v52 = vpop.eup %3133  ;;  %3153 = vrcp.f32 %v1910_v62  ;;  %v2283_v55 = vmul.f32 %v3132_v49, %v7070_v11  ;;  %2409 = vst.msk [vmem:[%s5776_s29 + $0x370] sm:$0xff] %vm326_vm0, %v2281_v26 }
 0x3b0   : > { %v3136_v5 = vpop.eup %3135  ;;  %3155 = vrcp.f32 %v1911_v31  ;;  %v2284_v44 = vmul.f32 %v3134_v52, %v7071_v41  ;;  %2410 = vst.msk [vmem:[%s5776_s29 + $0x378] sm:$0xff] %vm326_vm0, %v2282_v8 }
 0x3b1   : > { %v3138_v58 = vpop.eup %3137  ;;  %3157 = vrcp.f32 %v1912_v56  ;;  %v2285_v25 = vmul.f32 %v3136_v5, %v7072_v15  ;;  %2411 = vst.msk [vmem:[%s5776_s29 + $0x380] sm:$0xff] %vm326_vm0, %v2283_v55 }
 0x3b2   : > { %v3140_v18 = vpop.eup %3139  ;;  %3159 = vrcp.f32 %v1913_v0  ;;  %v2286_v59 = vmul.f32 %v3138_v58, %v7073_v33  ;;  %2412 = vst.msk [vmem:[%s5776_s29 + $0x388] sm:$0xff] %vm326_vm0, %v2284_v44 }
 0x3b3   : > { %v3142_v28 = vpop.eup %3141  ;;  %3161 = vrcp.f32 %v1914_v53  ;;  %v2287_v24 = vmul.f32 %v3140_v18, %v7074_v35  ;;  %2413 = vst.msk [vmem:[%s5776_s29 + $0x390] sm:$0xff] %vm326_vm0, %v2285_v25 }
 0x3b4   : > { %v3144_v34 = vpop.eup %3143  ;;  %v2288_v39 = vmul.f32 %v3142_v28, %v7075_v9  ;;  %2414 = vst.msk [vmem:[%s5776_s29 + $0x398] sm:$0xff] %vm326_vm0, %v2286_v59 }
 0x3b5   : > { %v3146_v38 = vpop.eup %3145  ;;  %v2289_v12 = vmul.f32 %v3144_v34, %v7076_v50  ;;  %2415 = vst.msk [vmem:[%s5776_s29 + $0x3a0] sm:$0xff] %vm326_vm0, %v2287_v24 }
 0x3b6   : > { %v3148_v10 = vpop.eup %3147  ;;  %v2290_v7 = vmul.f32 %v3146_v38, %v7077_v37  ;;  %2416 = vst.msk [vmem:[%s5776_s29 + $0x3a8] sm:$0xff] %vm326_vm0, %v2288_v39 }
 0x3b7   : > { %v3150_v51 = vpop.eup %3149  ;;  %v2291_v40 = vmul.f32 %v3148_v10, %v7078_v42  ;;  %2417 = vst.msk [vmem:[%s5776_s29 + $0x3b0] sm:$0xff] %vm326_vm0, %v2289_v12 }
 0x3b8   : > { %v3152_v23 = vpop.eup %3151  ;;  %v2292_v2 = vmul.f32 %v3150_v51, %v7079_v4  ;;  %2418 = vst.msk [vmem:[%s5776_s29 + $0x3b8] sm:$0xff] %vm326_vm0, %v2290_v7 }
 0x3b9   : > { %v3154_v13 = vpop.eup %3153  ;;  %v2293_v47 = vmul.f32 %v3152_v23, %v7080_v43  ;;  %2419 = vst.msk [vmem:[%s5776_s29 + $0x3c0] sm:$0xff] %vm326_vm0, %v2291_v40 }
 0x3ba   : > { %v3156_v22 = vpop.eup %3155  ;;  %v2294_v36 = vmul.f32 %v3154_v13, %v7081_v20  ;;  %2420 = vst.msk [vmem:[%s5776_s29 + $0x3c8] sm:$0xff] %vm326_vm0, %v2292_v2 }
 0x3bb   : > { %v3158_v30 = vpop.eup %3157  ;;  %v2295_v16 = vmul.f32 %v3156_v22, %v7082_v45  ;;  %2421 = vst.msk [vmem:[%s5776_s29 + $0x3d0] sm:$0xff] %vm326_vm0, %v2293_v47 }
 0x3bc   : > { %v3160_v32 = vpop.eup %3159  ;;  %v2296_v14 = vmul.f32 %v3158_v30, %v7083_v54  ;;  %2422 = vst.msk [vmem:[%s5776_s29 + $0x3d8] sm:$0xff] %vm326_vm0, %v2294_v36 }
 0x3bd   : > { %v3162_v27 = vpop.eup %3161  ;;  %v2297_v62 = vmul.f32 %v3160_v32, %v7084_v3  ;;  %2423 = vst.msk [vmem:[%s5776_s29 + $0x3e0] sm:$0xff] %vm326_vm0, %v2295_v16 }
 0x3be   : > { %v2298_v1 = vmul.f32 %v3162_v27, %v7085_v60  ;;  %2424 = vst.msk [vmem:[%s5776_s29 + $0x3e8] sm:$0xff] %vm326_vm0, %v2296_v14 }
 0x3bf   : > { %2425 = vst.msk [vmem:[%s5776_s29 + $0x3f0] sm:$0xff] %vm326_vm0, %v2297_v62 }
 0x3c0   : > { %2426 = vst.msk [vmem:[%s5776_s29 + $0x3f8] sm:$0xff] %vm326_vm0, %v2298_v1 }
 0x3c1 PF: > { %s14_s15 = sadd.s32 1, %s3247_s15  }
 0x3c2   : > { %p11_p4 = scmp.ge.s32.totalorder %s14_s15, 4  }
 0x3c4   :  { %13 = sbr.rel (!%p11_p4) target bundleno = 1 (0x1), region = 66 }

// kernel: upsample_forward.11
= control target key start
LH: loop header
LB: loop body
LE: loop exit
PB: predicated region body
PF: predicated region fallthrough
CT: control target
= control target key end

     0   :  { %s593_s12 = smov 0   ;;  %s595_s13 = smov 0   ;;  %s669_s0 = inlined_call_operand.vmem [shape: f32[2,32,32,4], index: 0, kind: input, shape index: {}]   ;;  %s670_s1 = inlined_call_operand.vmem [shape: bf16[1,1,4,8], index: 1, kind: input, shape index: {}]   ;;  %s671_s2 = inlined_call_operand.vmem [shape: f32[1,8], index: 2, kind: input, shape index: {}]   ;;  %s672_s3 = inlined_call_operand.vmem [shape: f32[2,32,32,8], index: 3, kind: output, shape index: {}]  }
   0x1   :  { %s597_s14 = smov 0   ;;  %s599_s15 = smov 0  }
   0x2   :  { %s601_s16 = smov 0  }
   0x3 LB: > { %s28_s17 = sadd.s32 1, %s562_s14  ;;  %s32_s18 = sadd.s32 1, %s566_s15  ;;  %s570_s16 = sphi %s601_s16, %s13_s16   ;;  %s566_s15 = sphi %s599_s15, %s676_s15   ;;  %s562_s14 = sphi %s597_s14, %s675_s14   ;;  %s558_s13 = sphi %s595_s13, %s674_s13   ;;  %s554_s12 = sphi %s593_s12, %s673_s12  }
   0x4   : > { %p30_p0 = scmp.ge.s32.totalorder %s28_s17, 32  ;;  %p469_p1 = scmp.ge.s32.totalorder %s570_s16, 1 }
   0x5   : > { %p177_p2 = scmp.lt.s32.totalorder %s570_s16, 65 }
   0x6   : > { %s678_s17 = smov (%p30_p0, %s28_s17), 0  ;;  %s680_s18 = smov (!%p30_p0, %s32_s18), %s566_s15 }
   0x7   : > { %p178_p3 = pnand %p469_p1, %p177_p2  ;;  %p34_p4 = scmp.ge.s32.totalorder %s680_s18, 2 }
   0x8   : > { %v254_v0 = vld [vmem:[%s670_s1] sm:$0x3] (!%p178_p3)  ;;  %vm266_vm0 = vcmask (!%p178_p3), 1041408   ;;  %p215_p5 = scmp.lt.s32.totalorder (!%p178_p3), %s558_s13, 1  ;;  %p217_p6 = scmp.lt.s32.totalorder (!%p178_p3), %s554_s12, 31  ;;  %vm243_vm1 = vcmask (!%p178_p3), 64512  }
   0x9   : > { %s682_s18 = smov (%p34_p4, %s680_s18), 0  ;;  %181 = sbr.rel (%p178_p3) target bundleno = 253 (0xfd), region = 32 }
   0xa   : > { %490 = vmatprep.subr.msk.bf16.mxu0 (!%p178_p3), %vm266_vm0, %v254_v0  ;;  %v268_v1 = vsel (!%p178_p3), %vm266_vm0, %v254_v0, 0  ;;  %v572_v2 = vmov (!%p178_p3), 0.0   ;;  %vm259_vm2 = vcmask (!%p178_p3), 31744   ;;  %v478_v21 = vld [vmem:[%s671_s2] ss:$0 sm:$0xff] (!%p178_p3) }
   0xb   : > { %485 = vmatpush3.bf16.msra.mxu0 (!%p178_p3), %v268_v1  ;;  %246 = vst.msk [vmem:[#allocation2 + $0x10] sm:$0xff] (!%p178_p3), %vm243_vm1, %v572_v2  ;;  %244 = vst.msk [vmem:[#allocation2] sm:$0xff] (!%p178_p3), %vm243_vm1, %v572_v2 }
   0xc   : > { %245 = vst.msk [vmem:[#allocation2 + $0x8] sm:$0xff] (!%p178_p3), %vm243_vm1, %v572_v2  ;;  %247 = vst.msk [vmem:[#allocation2 + $0x18] sm:$0xff] (!%p178_p3), %vm243_vm1, %v572_v2 }
  0x10   : > { %s684_s13 = smov (!%p215_p5, %s558_s13), 1  ;;  %s686_s12 = smov (!%p217_p6, %s554_s12), 31 }
  0x11   : > { %s471_s21 = sshll.u32 %s684_s13, 7  ;;  %s470_s22 = sshll.u32 %s686_s12, 2 }
  0x12   : > { %s634_s23 = sadd.s32 %s471_s21, %s470_s22  ;;  %v257_v9 = vld [vmem:[#allocation2 + $0x10] sm:$0xff]  ;;  %v255_v10 = vld [vmem:[#allocation2] sm:$0xff] }
  0x13   : > { %s472_s24 = sshll.u32 %s634_s23, 3  ;;  %v258_v12 = vld [vmem:[#allocation2 + $0x18] sm:$0xff]  ;;  %v256_v15 = vld [vmem:[#allocation2 + $0x8] sm:$0xff] }
  0x14   : > { %s223_s27 = scalar_lea.vmem %s669_s0, %s472_s24  ;;  %s237_s5 = scalar_lea.vmem %s672_s3, %s472_s24 }
  0x15   : > { %v248_v3 = vld [vmem:[%s223_s27] sm:$0xff]  ;;  %v249_v4 = vld [vmem:[%s223_s27 + $0x8] sm:$0xff]  ;;  %v250_v5 = vld [vmem:[%s223_s27 + $0x10] sm:$0xff] }
  0x16   : > { %v252_v6 = vpack.c.bf16 %v249_v4, %v248_v3  ;;  %v251_v7 = vld [vmem:[%s223_s27 + $0x18] sm:$0xff] }
  0x17   : > { %v253_v8 = vpack.c.bf16 %v251_v7, %v250_v5 }
  0x18   : > { %486 = vmatprep.mubr.msk.bf16.mxu0 %vm259_vm2, %v252_v6 }
  0x19   : > { %487 = vmatmul.mubr.msk.bf16.vlgmr.msra.gmra.mrb[0].mxu0 %vm259_vm2, %v253_v8 }
  0xec   : > { %v488_v11 = vpop.f32.mrb[0].mxu0 }
  0xed   : > { %v321_v13 = vadd.f32 %v488_v11, %v257_v9  ;;  %v304_v14 = vpop.f32.mrb[1].mxu0 }
  0xee   : > { %v319_v16 = vadd.f32 %v304_v14, %v255_v10  ;;  %v489_v17 = vpop.f32.mrb[2].mxu0 }
  0xef   : > { %326 = vst.msk [vmem:[#allocation2 + $0x10] sm:$0xff] %vm243_vm1, %v321_v13  ;;  %v322_v18 = vadd.f32 %v489_v17, %v258_v12  ;;  %v307_v19 = vpop.f32.mrb[3].mxu0 }
  0xf0   : > { %324 = vst.msk [vmem:[#allocation2] sm:$0xff] %vm243_vm1, %v319_v16  ;;  %v320_v20 = vadd.f32 %v307_v19, %v256_v15 }
  0xf1   : > { %327 = vst.msk [vmem:[#allocation2 + $0x18] sm:$0xff] %vm243_vm1, %v322_v18 }
  0xf2   : > { %325 = vst.msk [vmem:[#allocation2 + $0x8] sm:$0xff] %vm243_vm1, %v320_v20 }
  0xf6   : > { %v333_v22 = vld [vmem:[#allocation2 + $0x10] sm:$0xff] }
  0xf7   : > { %v344_v23 = vadd.f32 %v478_v21, %v333_v22  ;;  %v331_v24 = vld [vmem:[#allocation2] sm:$0xff] }
  0xf8   : > { %v342_v25 = vadd.f32 %v478_v21, %v331_v24  ;;  %v334_v26 = vld [vmem:[#allocation2 + $0x18] sm:$0xff] }
  0xf9   : > { %348 = vst.msk [vmem:[%s237_s5 + $0x10] sm:$0xff] %vm243_vm1, %v344_v23  ;;  %v345_v27 = vadd.f32 %v478_v21, %v334_v26  ;;  %v332_v28 = vld [vmem:[#allocation2 + $0x8] sm:$0xff] }
  0xfa   : > { %346 = vst.msk [vmem:[%s237_s5] sm:$0xff] %vm243_vm1, %v342_v25  ;;  %v343_v29 = vadd.f32 %v478_v21, %v332_v28 }
  0xfb   : > { %349 = vst.msk [vmem:[%s237_s5 + $0x18] sm:$0xff] %vm243_vm1, %v345_v27 }
  0xfc   : > { %347 = vst.msk [vmem:[%s237_s5 + $0x8] sm:$0xff] %vm243_vm1, %v343_v29 }
  0xfd PF: > { %s13_s16 = sadd.s32 1, %s570_s16   ;;  %s673_s12 = smov %s562_s14 }
  0xfe   : > { %p10_p7 = scmp.ge.s32.totalorder %s13_s16, 66   ;;  %s674_s13 = smov %s566_s15 }
  0xff   : > { %s675_s14 = smov %s678_s17  ;;  %s676_s15 = smov %s682_s18 }
 0x100   :  { %12 = sbr.rel (!%p10_p7) target bundleno = 3 (0x3), region = 73 }

// kernel: upsample_forward.15
= control target key start
LH: loop header
LB: loop body
LE: loop exit
PB: predicated region body
PF: predicated region fallthrough
CT: control target
= control target key end

     0   :  { %s933_s15 = smov 0   ;;  %s935_s16 = smov 0   ;;  %s1065_s0 = inlined_call_operand.vmem [shape: bf16[2,34,34,8], index: 0, kind: input, shape index: {}]   ;;  %s1066_s1 = inlined_call_operand.vmem [shape: bf16[3,3,8,8], index: 1, kind: input, shape index: {}]   ;;  %s1067_s2 = inlined_call_operand.vmem [shape: f32[1,8], index: 2, kind: input, shape index: {}]   ;;  %s1068_s3 = inlined_call_operand.vmem [shape: f32[2,32,32,8], index: 3, kind: input, shape index: {}]   ;;  %s1069_s4 = inlined_call_operand.vmem [shape: f32[2,32,32,8], index: 4, kind: output, shape index: {}]  }
   0x1   :  { %s937_s17 = smov 0   ;;  %s939_s18 = smov 0  }
   0x2   :  { %s941_s19 = smov 0   ;;  %s943_s20 = smov 0  }
   0x3   :  { %s945_s21 = smov 0  }
   0x4 LB: > { %s26_s22 = sadd.s32 1, %s893_s18  ;;  %s29_s23 = sadd.s32 1, %s897_s19  ;;  %s905_s21 = sphi %s945_s21, %s14_s21   ;;  %s901_s20 = sphi %s943_s20, %s1077_s20   ;;  %s897_s19 = sphi %s941_s19, %s1076_s19   ;;  %s893_s18 = sphi %s939_s18, %s1075_s18   ;;  %s889_s17 = sphi %s937_s17, %s1074_s17   ;;  %s885_s16 = sphi %s935_s16, %s1073_s16   ;;  %s881_s15 = sphi %s933_s15, %s1072_s15  }
   0x5   : > { %p27_p0 = scmp.ge.s32.totalorder %s26_s22, 3  ;;  %p723_p1 = scmp.ge.s32.totalorder %s905_s21, 1 }
   0x6   : > { %p219_p2 = scmp.lt.s32.totalorder %s905_s21, 193  ;;  %s33_s24 = sadd.s32 1, %s901_s20 }
   0x7   : > { %s1079_s22 = smov (%p27_p0, %s26_s22), 0  ;;  %s1081_s23 = smov (!%p27_p0, %s29_s23), %s897_s19 }
   0x8   : > { %p220_p3 = pnand %p723_p1, %p219_p2  ;;  %p31_p4 = scmp.ge.s32.totalorder %s1081_s23, 32 }
   0x9   : > { %s268_s25 = sadd.s32 (!%p220_p3), %s881_s15, %s885_s16  ;;  %p269_p6 = scmp.lt.s32.totalorder (!%p220_p3), %s889_s17, 1 }
   0xa   : > { %s1083_s23 = smov (%p31_p4, %s1081_s23), 0  ;;  %s1085_s24 = smov (!%p31_p4, %s33_s24), %s901_s20 }
   0xb   : > { %p35_p5 = scmp.ge.s32.totalorder %s1085_s24, 2  ;;  %223 = sbr.rel (%p220_p3) target bundleno = 286 (0x11e), region = 36 }
   0xc   : > { %p271_p7 = scmp.lt.s32.totalorder (!%p220_p3), %s268_s25, 33  ;;  %p279_p8 = scmp.lt.s32.totalorder (!%p220_p3), %s881_s15, 2 }
   0xd   : > { %s1087_s24 = smov (%p35_p5, %s1085_s24), 0  ;;  %p286_p9 = scmp.lt.s32.totalorder (!%p220_p3), %s885_s16, 31 }
   0xe   : > { %1070 = sst [smem:[#allocation3_spill]] %s1087_s24  ;;  %p732_p10 = scmp.ne.s32.totalorder (!%p220_p3), %s881_s15, 0 }
  0x12   : > { %s1089_s17 = smov (!%p269_p6, %s889_s17), 1  ;;  %s1091_s25 = smov (!%p271_p7, %s268_s25), 33 }
  0x13   : > { %s789_s26 = smul.u32 170, %s1089_s17  ;;  %s727_s12 = sshll.u32 %s1089_s17, 7  ;;  %vm307_vm0 = vcmask (!%p732_p10), 64512   ;;  %v907_v0 = vmov (!%p732_p10), 0.0  }
  0x14   : > { %s788_s27 = smul.u32 5, %s1091_s25  ;;  %s1093_s16 = smov (!%p286_p9, %s885_s16), 31  ;;  %308 = vst.msk [vmem:[#allocation2] sm:$0xff] (!%p732_p10), %vm307_vm0, %v907_v0  ;;  %309 = vst.msk [vmem:[#allocation2 + $0x8] sm:$0xff] (!%p732_p10), %vm307_vm0, %v907_v0 }
  0x15   : > { %s280_s28 = scalar_select %p279_p8, %s881_s15, 2 }
  0x16   : > { %s275_s29 = sadd.s32 %s789_s26, %s788_s27  ;;  %s726_s13 = sshll.u32 %s1093_s16, 2  ;;  %310 = vst.msk [vmem:[#allocation2 + $0x10] sm:$0xff] (!%p732_p10), %vm307_vm0, %v907_v0  ;;  %311 = vst.msk [vmem:[#allocation2 + $0x18] sm:$0xff] (!%p732_p10), %vm307_vm0, %v907_v0 }
  0x17   : > { %s724_s30 = sshll.u32 %s275_s29, 2  ;;  %s790_s5 = smul.u32 12, %s280_s28 }
  0x18   : > { %s987_s8 = scalar_lea.vmem %s1065_s0, %s724_s30  ;;  %s290_s14 = sadd.s32 %s727_s12, %s726_s13 }
  0x19   : > { %s992_s11 = scalar_lea.vmem %s1066_s1, %s790_s5  ;;  %s728_s25 = sshll.u32 %s290_s14, 3 }
  0x1a   : > { %s998_s27 = scalar_lea.vmem %s1068_s3, %s728_s25  ;;  %s1003_s30 = scalar_lea.vmem %s1069_s4, %s728_s25 }
  0x1b   : > { %306 = sbr.rel (%p732_p10) target bundleno = 34 (0x22), region = 40 }
  0x22 PF: > { %v318_v1 = vld [vmem:[%s992_s11 + $0x4] sm:$0xf]  ;;  %vm341_vm1 = vcmask 1043456   ;;  %v849_v4 = vld [vmem:[%s987_s8 + $0x8] sm:$0xff]   ;;  %vm334_vm2 = vcmask 64512   ;;  %vm482_vm4 = vcmask 1046528  }
  0x23   : > { %v848_v2 = vld [vmem:[%s987_s8] sm:$0xff]   ;;  %786 = vmatprep.subr.msk.bf16.mxu0 %vm341_vm1, %v318_v1  ;;  %v427_v3 = vsel %vm341_vm1, %v318_v1, 0  ;;  %v408_v7 = vshll.u32 %v849_v4, 16  ;;  %v412_v8 = vshrl.u32 %v849_v4, 16  ;;  %v319_v9 = vld [vmem:[%s992_s11 + $0x8] sm:$0xf] }
  0x24   : > { %762 = vmatpush3.bf16.msra.mxu0 %v427_v3  ;;  %v402_v5 = vshrl.u32 %v848_v2, 16  ;;  %v404_v6 = vshll.u32 %v848_v2, 16  ;;  %757 = vmatprep.mubr.msk.bf16.mxu1 %vm334_vm2, %v848_v2  ;;  %v850_v10 = vld [vmem:[%s987_s8 + $0x10] ss:$0 sps:$4 sm:$0x11]   ;;  %v483_v14 = vrot.slane %v848_v2, 1 }
  0x25   : > { %787 = vmatprep.subr.msk.bf16.mxu0 %vm341_vm1, %v319_v9  ;;  %v410_v12 = vrot.slane %v408_v7, 1  ;;  %v317_v13 = vld [vmem:[%s992_s11] sm:$0xf]  ;;  %v484_v15 = vrot.slane %v849_v4, 1  ;;  %vm401_vm3 = vsmask.f32 7424 }
  0x26   : > { %v406_v11 = vrot.slane %v404_v6, 1  ;;  %v416_v16 = vshll.u32 %v850_v10, 16  ;;  %785 = vmatprep.subr.msk.bf16.mxu1 %vm341_vm1, %v317_v13  ;;  %v343_v17 = vsel %vm341_vm1, %v317_v13, 0  ;;  %v495_v22 = vsel %vm341_vm1, %v319_v9, 0  ;;  %v322_v31 = vld [vmem:[#allocation2 + $0x10] sm:$0xff]  ;;  %v320_v32 = vld [vmem:[#allocation2] sm:$0xff] }
  0x27   : > { %v414_v19 = vor.u32 %v412_v8, %v410_v12  ;;  %756 = vmatpush3.bf16.msra.mxu1 %v343_v17  ;;  %v485_v23 = vsel %vm482_vm4, %v483_v14, %v484_v15  ;;  %v486_v25 = vrot.slane %v850_v10, 1  ;;  %v323_v35 = vld [vmem:[#allocation2 + $0x18] sm:$0xff]  ;;  %v321_v36 = vld [vmem:[#allocation2 + $0x8] sm:$0xff]  ;;  %p742_p11 = scmp.ne.s32.totalorder %s881_s15, 2 }
  0x28   : > { %v407_v18 = vor.u32 %v406_v11, %v402_v5  ;;  %v418_v20 = vrot.slane %v416_v16, 1  ;;  %v743_v48 = vld [vmem:[%s1067_s2] ss:$0 sm:$0xff] (!%p742_p11)  ;;  %v574_v52 = vld [vmem:[%s998_s27 + $0x8] sm:$0xff] (!%p742_p11)  ;;  %v575_v56 = vld [vmem:[%s998_s27 + $0x10] sm:$0xff] (!%p742_p11) }
  0x29   : > { %v487_v26 = vsel %vm482_vm4, %v484_v15, %v486_v25  ;;  %v573_v49 = vld [vmem:[%s998_s27] sm:$0xff] (!%p742_p11)  ;;  %v576_v58 = vld [vmem:[%s998_s27 + $0x18] sm:$0xff] (!%p742_p11) }
  0x2a   : > { %v411_v21 = vsel %vm401_vm3, %v407_v18, %v410_v12  ;;  %v419_v24 = vsel %vm401_vm3, %v414_v19, %v418_v20  ;;  %758 = vmatmul.mubr.msk.bf16.vlgmr.msra.gmra.mrb[0].mxu1 %vm334_vm2, %v849_v4 }
  0x2b   : > { %763 = vmatprep.mubr.msk.bf16.mxu0 %vm334_vm2, %v411_v21 }
  0x2c   : > { %764 = vmatmul.mubr.msk.bf16.vlgmr.msra.gmra.mrb[0].mxu0 %vm334_vm2, %v419_v24 }
  0x2d   : > { %768 = vmatpush3.bf16.msra.mxu0 %v495_v22  ;;  %769 = vmatprep.mubr.msk.bf16.mxu0 %vm334_vm2, %v485_v23 }
  0x38   : > { %770 = vmatmul.mubr.msk.bf16.vlgmr.msra.gmra.mrb[0].mxu0 %vm334_vm2, %v487_v26 }
  0xfd   : > { %v759_v27 = vpop.f32.mrb[0].mxu1 }
  0xfe   : > { %v379_v28 = vpop.f32.mrb[1].mxu1  ;;  %v396_v33 = vadd.f32 %v759_v27, %v322_v31 }
  0xff   : > { %v760_v29 = vpop.f32.mrb[2].mxu1  ;;  %v394_v34 = vadd.f32 %v379_v28, %v320_v32 }
 0x100   : > { %v382_v30 = vpop.f32.mrb[3].mxu1  ;;  %v397_v38 = vadd.f32 %v760_v29, %v323_v35 }
 0x101   : > { %v395_v41 = vadd.f32 %v382_v30, %v321_v36 }
 0x10b   : > { %v771_v37 = vpop.f32.mrb[0].mxu0  ;;  %557 = sbr.rel (%p742_p11) target bundleno = 286 (0x11e), region = 44 }
 0x10c   : > { %v774_v39 = vadd.f32 %v771_v37, %v396_v33  ;;  %v531_v40 = vpop.f32.mrb[1].mxu0 }
 0x10d   : > { %v776_v42 = vadd.f32 %v531_v40, %v394_v34  ;;  %v772_v43 = vpop.f32.mrb[2].mxu0 }
 0x10e   : > { %552 = vst.msk [vmem:[#allocation2 + $0x10] sm:$0xff] %vm334_vm2, %v774_v39  ;;  %v778_v44 = vadd.f32 %v772_v43, %v397_v38  ;;  %v534_v45 = vpop.f32.mrb[3].mxu0 }
 0x10f   : > { %550 = vst.msk [vmem:[#allocation2] sm:$0xff] %vm334_vm2, %v776_v42  ;;  %v780_v46 = vadd.f32 %v534_v45, %v395_v41 }
 0x110   : > { %553 = vst.msk [vmem:[#allocation2 + $0x18] sm:$0xff] %vm334_vm2, %v778_v44 }
 0x111   : > { %551 = vst.msk [vmem:[#allocation2 + $0x8] sm:$0xff] %vm334_vm2, %v780_v46 }
 0x115   : > { %v560_v53 = vld [vmem:[#allocation2 + $0x10] sm:$0xff] }
 0x116   : > { %v558_v47 = vld [vmem:[#allocation2] sm:$0xff]  ;;  %v571_v55 = vadd.f32 %v743_v48, %v560_v53 }
 0x117   : > { %v569_v50 = vadd.f32 %v743_v48, %v558_v47  ;;  %v561_v57 = vld [vmem:[#allocation2 + $0x18] sm:$0xff] }
 0x118   : > { %v559_v51 = vld [vmem:[#allocation2 + $0x8] sm:$0xff]  ;;  %v572_v60 = vadd.f32 %v743_v48, %v561_v57  ;;  %v579_v62 = vadd.f32 %v575_v56, %v571_v55 }
 0x119   : > { %v570_v54 = vadd.f32 %v743_v48, %v559_v51  ;;  %v577_v59 = vadd.f32 %v573_v49, %v569_v50 }
 0x11a   : > { %v580_v63 = vadd.f32 %v576_v58, %v572_v60  ;;  %583 = vst.msk [vmem:[%s1003_s30 + $0x10] sm:$0xff] %vm334_vm2, %v579_v62 }
 0x11b   : > { %v578_v61 = vadd.f32 %v574_v52, %v570_v54  ;;  %581 = vst.msk [vmem:[%s1003_s30] sm:$0xff] %vm334_vm2, %v577_v59 }
 0x11c   : > { %584 = vst.msk [vmem:[%s1003_s30 + $0x18] sm:$0xff] %vm334_vm2, %v580_v63 }
 0x11d   : > { %582 = vst.msk [vmem:[%s1003_s30 + $0x8] sm:$0xff] %vm334_vm2, %v578_v61 }
 0x11e PF: > { %s14_s21 = sadd.s32 1, %s905_s21   ;;  %s1071_s24 = sld [smem:[#allocation3_spill]] }
 0x11f   : > { %p11_p12 = scmp.ge.s32.totalorder %s14_s21, 194   ;;  %s1072_s15 = smov %s893_s18 }
 0x120   : > { %s1073_s16 = smov %s897_s19  ;;  %s1074_s17 = smov %s901_s20 }
 0x121   : > { %s1075_s18 = smov %s1079_s22  ;;  %s1076_s19 = smov %s1083_s23 }
 0x122   :  { %13 = sbr.rel (!%p11_p12) target bundleno = 4 (0x4), region = 80 }
 0x124   : > { %s1077_s20 = smov %s1071_s24 }

// kernel: upsample_forward.17
= control target key start
LH: loop header
LB: loop body
LE: loop exit
PB: predicated region body
PF: predicated region fallthrough
CT: control target
= control target key end

     0   :  { %s835_s12 = smov 0   ;;  %s837_s13 = smov 0   ;;  %s958_s0 = inlined_call_operand.vmem [shape: bf16[2,34,34,8], index: 0, kind: input, shape index: {}]   ;;  %s959_s1 = inlined_call_operand.vmem [shape: bf16[3,3,8,8], index: 1, kind: input, shape index: {}]   ;;  %s960_s2 = inlined_call_operand.vmem [shape: f32[1,8], index: 2, kind: input, shape index: {}]   ;;  %s961_s3 = inlined_call_operand.vmem [shape: f32[2,32,32,8], index: 3, kind: output, shape index: {}]  }
   0x1   :  { %s839_s14 = smov 0   ;;  %s841_s15 = smov 0  }
   0x2   :  { %s843_s16 = smov 0   ;;  %s845_s17 = smov 0  }
   0x3   :  { %s847_s18 = smov 0  }
   0x4 LB: > { %s25_s19 = sadd.s32 1, %s800_s15  ;;  %s28_s20 = sadd.s32 1, %s804_s16  ;;  %s812_s18 = sphi %s847_s18, %s13_s18   ;;  %s808_s17 = sphi %s845_s17, %s967_s17   ;;  %s804_s16 = sphi %s843_s16, %s966_s16   ;;  %s800_s15 = sphi %s841_s15, %s965_s15   ;;  %s796_s14 = sphi %s839_s14, %s964_s14   ;;  %s792_s13 = sphi %s837_s13, %s963_s13   ;;  %s788_s12 = sphi %s835_s12, %s962_s12  }
   0x5   : > { %p26_p0 = scmp.ge.s32.totalorder %s25_s19, 3  ;;  %p633_p1 = scmp.ge.s32.totalorder %s812_s18, 1 }
   0x6   : > { %p178_p2 = scmp.lt.s32.totalorder %s812_s18, 193  ;;  %s32_s21 = sadd.s32 1, %s808_s17 }
   0x7   : > { %s969_s19 = smov (%p26_p0, %s25_s19), 0  ;;  %s971_s20 = smov (!%p26_p0, %s28_s20), %s804_s16 }
   0x8   : > { %p179_p3 = pnand %p633_p1, %p178_p2  ;;  %p30_p4 = scmp.ge.s32.totalorder %s971_s20, 32 }
   0x9   : > { %s216_s22 = sadd.s32 (!%p179_p3), %s788_s12, %s792_s13  ;;  %p217_p6 = scmp.lt.s32.totalorder (!%p179_p3), %s796_s14, 1 }
   0xa   : > { %s973_s20 = smov (%p30_p4, %s971_s20), 0  ;;  %s975_s21 = smov (!%p30_p4, %s32_s21), %s808_s17 }
   0xb   : > { %p34_p5 = scmp.ge.s32.totalorder %s975_s21, 2  ;;  %182 = sbr.rel (%p179_p3) target bundleno = 283 (0x11b), region = 32 }
   0xc   : > { %p219_p7 = scmp.lt.s32.totalorder (!%p179_p3), %s216_s22, 33  ;;  %p227_p8 = scmp.lt.s32.totalorder (!%p179_p3), %s788_s12, 2 }
   0xd   : > { %s977_s21 = smov (%p34_p5, %s975_s21), 0  ;;  %p234_p9 = scmp.lt.s32.totalorder (!%p179_p3), %s792_s13, 31 }
   0xe   : > { %p639_p10 = scmp.ne.s32.totalorder (!%p179_p3), %s788_s12, 0 }
  0x12   : > { %s979_s14 = smov (!%p217_p6, %s796_s14), 1  ;;  %s981_s22 = smov (!%p219_p7, %s216_s22), 33 }
  0x13   : > { %s696_s23 = smul.u32 170, %s979_s14  ;;  %s637_s8 = sshll.u32 %s979_s14, 7  ;;  %vm246_vm0 = vcmask (!%p639_p10), 64512   ;;  %v814_v0 = vmov (!%p639_p10), 0.0  }
  0x14   : > { %s695_s24 = smul.u32 5, %s981_s22  ;;  %s983_s13 = smov (!%p234_p9, %s792_s13), 31  ;;  %247 = vst.msk [vmem:[#allocation2] sm:$0xff] (!%p639_p10), %vm246_vm0, %v814_v0  ;;  %248 = vst.msk [vmem:[#allocation2 + $0x8] sm:$0xff] (!%p639_p10), %vm246_vm0, %v814_v0 }
  0x15   : > { %s228_s25 = scalar_select %p227_p8, %s788_s12, 2 }
  0x16   : > { %s223_s26 = sadd.s32 %s696_s23, %s695_s24  ;;  %s636_s9 = sshll.u32 %s983_s13, 2  ;;  %249 = vst.msk [vmem:[#allocation2 + $0x10] sm:$0xff] (!%p639_p10), %vm246_vm0, %v814_v0  ;;  %250 = vst.msk [vmem:[#allocation2 + $0x18] sm:$0xff] (!%p639_p10), %vm246_vm0, %v814_v0 }
  0x17   : > { %s634_s27 = sshll.u32 %s223_s26, 2  ;;  %s697_s28 = smul.u32 12, %s228_s25 }
  0x18   : > { %s889_s4 = scalar_lea.vmem %s958_s0, %s634_s27  ;;  %s238_s10 = sadd.s32 %s637_s8, %s636_s9 }
  0x19   : > { %s894_s7 = scalar_lea.vmem %s959_s1, %s697_s28  ;;  %s638_s11 = sshll.u32 %s238_s10, 3 }
  0x1a   : > { %s900_s24 = scalar_lea.vmem %s961_s3, %s638_s11  ;;  %245 = sbr.rel (%p639_p10) target bundleno = 33 (0x21), region = 36 }
  0x21 PF: > { %v257_v1 = vld [vmem:[%s894_s7 + $0x4] sm:$0xf]  ;;  %vm280_vm1 = vcmask 1043456   ;;  %v756_v4 = vld [vmem:[%s889_s4 + $0x8] sm:$0xff]   ;;  %vm273_vm2 = vcmask 64512   ;;  %vm421_vm4 = vcmask 1046528  }
  0x22   : > { %v755_v2 = vld [vmem:[%s889_s4] sm:$0xff]   ;;  %693 = vmatprep.subr.msk.bf16.mxu0 %vm280_vm1, %v257_v1  ;;  %v366_v3 = vsel %vm280_vm1, %v257_v1, 0  ;;  %v347_v7 = vshll.u32 %v756_v4, 16  ;;  %v351_v8 = vshrl.u32 %v756_v4, 16  ;;  %v258_v9 = vld [vmem:[%s894_s7 + $0x8] sm:$0xf] }
  0x23   : > { %669 = vmatpush3.bf16.msra.mxu0 %v366_v3  ;;  %v341_v5 = vshrl.u32 %v755_v2, 16  ;;  %v343_v6 = vshll.u32 %v755_v2, 16  ;;  %664 = vmatprep.mubr.msk.bf16.mxu1 %vm273_vm2, %v755_v2  ;;  %v757_v10 = vld [vmem:[%s889_s4 + $0x10] ss:$0 sps:$4 sm:$0x11]   ;;  %v422_v14 = vrot.slane %v755_v2, 1 }
  0x24   : > { %694 = vmatprep.subr.msk.bf16.mxu0 %vm280_vm1, %v258_v9  ;;  %v349_v12 = vrot.slane %v347_v7, 1  ;;  %v256_v13 = vld [vmem:[%s894_s7] sm:$0xf]  ;;  %v423_v15 = vrot.slane %v756_v4, 1  ;;  %vm340_vm3 = vsmask.f32 7424 }
  0x25   : > { %v345_v11 = vrot.slane %v343_v6, 1  ;;  %v355_v16 = vshll.u32 %v757_v10, 16  ;;  %692 = vmatprep.subr.msk.bf16.mxu1 %vm280_vm1, %v256_v13  ;;  %v282_v17 = vsel %vm280_vm1, %v256_v13, 0  ;;  %v434_v22 = vsel %vm280_vm1, %v258_v9, 0  ;;  %v261_v31 = vld [vmem:[#allocation2 + $0x10] sm:$0xff]  ;;  %v259_v32 = vld [vmem:[#allocation2] sm:$0xff] }
  0x26   : > { %v353_v19 = vor.u32 %v351_v8, %v349_v12  ;;  %663 = vmatpush3.bf16.msra.mxu1 %v282_v17  ;;  %v424_v23 = vsel %vm421_vm4, %v422_v14, %v423_v15  ;;  %v425_v25 = vrot.slane %v757_v10, 1  ;;  %v262_v35 = vld [vmem:[#allocation2 + $0x18] sm:$0xff]  ;;  %v260_v36 = vld [vmem:[#allocation2 + $0x8] sm:$0xff]  ;;  %p649_p11 = scmp.ne.s32.totalorder %s788_s12, 2 }
  0x27   : > { %v346_v18 = vor.u32 %v345_v11, %v341_v5  ;;  %v357_v20 = vrot.slane %v355_v16, 1  ;;  %v650_v48 = vld [vmem:[%s960_s2] ss:$0 sm:$0xff] (!%p649_p11) }
  0x28   : > { %v426_v26 = vsel %vm421_vm4, %v423_v15, %v425_v25 }
  0x29   : > { %v350_v21 = vsel %vm340_vm3, %v346_v18, %v349_v12  ;;  %v358_v24 = vsel %vm340_vm3, %v353_v19, %v357_v20  ;;  %665 = vmatmul.mubr.msk.bf16.vlgmr.msra.gmra.mrb[0].mxu1 %vm273_vm2, %v756_v4 }
  0x2a   : > { %670 = vmatprep.mubr.msk.bf16.mxu0 %vm273_vm2, %v350_v21 }
  0x2b   : > { %671 = vmatmul.mubr.msk.bf16.vlgmr.msra.gmra.mrb[0].mxu0 %vm273_vm2, %v358_v24 }
  0x2c   : > { %675 = vmatpush3.bf16.msra.mxu0 %v434_v22  ;;  %676 = vmatprep.mubr.msk.bf16.mxu0 %vm273_vm2, %v424_v23 }
  0x37   : > { %677 = vmatmul.mubr.msk.bf16.vlgmr.msra.gmra.mrb[0].mxu0 %vm273_vm2, %v426_v26 }
  0xfc   : > { %v666_v27 = vpop.f32.mrb[0].mxu1 }
  0xfd   : > { %v318_v28 = vpop.f32.mrb[1].mxu1  ;;  %v335_v33 = vadd.f32 %v666_v27, %v261_v31 }
  0xfe   : > { %v667_v29 = vpop.f32.mrb[2].mxu1  ;;  %v333_v34 = vadd.f32 %v318_v28, %v259_v32 }
  0xff   : > { %v321_v30 = vpop.f32.mrb[3].mxu1  ;;  %v336_v38 = vadd.f32 %v667_v29, %v262_v35 }
 0x100   : > { %v334_v41 = vadd.f32 %v321_v30, %v260_v36 }
 0x10a   : > { %v678_v37 = vpop.f32.mrb[0].mxu0  ;;  %496 = sbr.rel (%p649_p11) target bundleno = 283 (0x11b), region = 40 }
 0x10b   : > { %v681_v39 = vadd.f32 %v678_v37, %v335_v33  ;;  %v470_v40 = vpop.f32.mrb[1].mxu0 }
 0x10c   : > { %v683_v42 = vadd.f32 %v470_v40, %v333_v34  ;;  %v679_v43 = vpop.f32.mrb[2].mxu0 }
 0x10d   : > { %491 = vst.msk [vmem:[#allocation2 + $0x10] sm:$0xff] %vm273_vm2, %v681_v39  ;;  %v685_v44 = vadd.f32 %v679_v43, %v336_v38  ;;  %v473_v45 = vpop.f32.mrb[3].mxu0 }
 0x10e   : > { %489 = vst.msk [vmem:[#allocation2] sm:$0xff] %vm273_vm2, %v683_v42  ;;  %v687_v46 = vadd.f32 %v473_v45, %v334_v41 }
 0x10f   : > { %492 = vst.msk [vmem:[#allocation2 + $0x18] sm:$0xff] %vm273_vm2, %v685_v44 }
 0x110   : > { %490 = vst.msk [vmem:[#allocation2 + $0x8] sm:$0xff] %vm273_vm2, %v687_v46 }
 0x114   : > { %v499_v52 = vld [vmem:[#allocation2 + $0x10] sm:$0xff] }
 0x115   : > { %v497_v47 = vld [vmem:[#allocation2] sm:$0xff]  ;;  %v510_v54 = vadd.f32 %v650_v48, %v499_v52 }
 0x116   : > { %v508_v50 = vadd.f32 %v650_v48, %v497_v47  ;;  %v500_v53 = vld [vmem:[#allocation2 + $0x18] sm:$0xff] }
 0x117   : > { %v498_v49 = vld [vmem:[#allocation2 + $0x8] sm:$0xff]  ;;  %v511_v55 = vadd.f32 %v650_v48, %v500_v53  ;;  %514 = vst.msk [vmem:[%s900_s24 + $0x10] sm:$0xff] %vm273_vm2, %v510_v54 }
 0x118   : > { %v509_v51 = vadd.f32 %v650_v48, %v498_v49  ;;  %512 = vst.msk [vmem:[%s900_s24] sm:$0xff] %vm273_vm2, %v508_v50 }
 0x119   : > { %515 = vst.msk [vmem:[%s900_s24 + $0x18] sm:$0xff] %vm273_vm2, %v511_v55 }
 0x11a   : > { %513 = vst.msk [vmem:[%s900_s24 + $0x8] sm:$0xff] %vm273_vm2, %v509_v51 }
 0x11b PF: > { %s13_s18 = sadd.s32 1, %s812_s18   ;;  %s962_s12 = smov %s800_s15 }
 0x11c   : > { %p10_p12 = scmp.ge.s32.totalorder %s13_s18, 194   ;;  %s963_s13 = smov %s804_s16 }
 0x11d   : > { %s964_s14 = smov %s808_s17  ;;  %s965_s15 = smov %s969_s19 }
 0x11e   : > { %s966_s16 = smov %s973_s20  ;;  %s967_s17 = smov %s977_s21 }
 0x11f   :  { %12 = sbr.rel (!%p10_p12) target bundleno = 4 (0x4), region = 73 }

</bundles_post_ra>
